<compile_context>
chip_gen: v7x
topology: tpu7x:2x2x1
jax: 0.10.0
libtpu: 0.0.40
codegen_flags: <defaults>
</compile_context>

<pallas_src>
import numpy as np
import jax
import jax.numpy as jnp
from jax.experimental import pallas as pl
from jax.experimental.pallas import tpu as pltpu

CH = 48          # channels[1..4]   (4 * CH == 192, as in Decoder)
C_DCT = 24       # DCT-branch input channels
D_ENH = 192      # EnhancedBlock output channels (fixed 192 in the source)
N_OUT = 4        # guide1, guide2, guide3, conv_out4(coarse_m4)
N_OUT_PAD = 8    # padded to a full sublane tile; rows 4..7 are zero, dropped
BF16 = jnp.bfloat16
F32 = jnp.float32


# ----------------------------------------------------------------------------
# helpers
# ----------------------------------------------------------------------------
def _full(arr):
    """Whole-array block, identical for every grid step."""
    return pl.BlockSpec(arr.shape, lambda *_: (0,) * arr.ndim)


def _interp_matrix(n_out, n_in):
    """1-D bilinear interpolation matrix, align_corners=True (numpy, f32)."""
    m = np.zeros((n_out, n_in), np.float32)
    if n_out == 1:
        m[0, 0] = 1.0
    elif n_in == 1:
        m[:, 0] = 1.0
    else:
        pos = np.arange(n_out) * (n_in - 1) / (n_out - 1)
        lo = np.clip(np.floor(pos).astype(np.int32), 0, n_in - 2)
        frac = (pos - lo).astype(np.float32)
        m[np.arange(n_out), lo] = 1.0 - frac
        m[np.arange(n_out), lo + 1] = frac
    return m


def _kron_resize(out_hw, in_hw):
    """(out_h*out_w, in_h*in_w) matrix == separable bilinear resize (numpy f32)."""
    a = _interp_matrix(out_hw[0], in_hw[0])
    b = _interp_matrix(out_hw[1], in_hw[1])
    return np.kron(a, b)


# ----------------------------------------------------------------------------
# The single fused Pallas kernel (grid over batch)
# ----------------------------------------------------------------------------
def _make_fused_kernel(level_sizes):
    offs = [0]
    for s in level_sizes:
        offs.append(offs[-1] + s)
    n_lvl = len(level_sizes)

    def kernel(xp_ref, xdct_ref,
               wbb_ref, bbb_ref, wlat_ref, blat_ref,
               wa_ref, ba_ref, wdct_ref, bdct_ref,
               wc1_ref, bc1_ref, rlvl_ref,
               wmix_ref, bmix_ref, wlat5_ref, blat5_ref,
               rcat_ref, wh_ref, bh_ref,
               wg1_ref, wg2_ref, wg34_ref, bg_ref, rbig_ref,
               o_ref):
        xp_all = xp_ref[0]                      # (Stot, 3)   bf16, all 4 levels packed
        xdct = xdct_ref[0]                      # (Sd, 24)    bf16
        rlvl = rlvl_ref[...]                    # (Stot, Sd)  f32, all 4 resize mats packed

        l5 = []
        for i in range(n_lvl):                  # static unroll over the 4 levels
            lo, hi = offs[i], offs[i + 1]
            xp = xp_all[lo:hi]                  # (S_i, 3)
            r_i = rlvl[lo:hi]                   # (S_i, Sd)
            # TODO(synk): real backbone (MambaVision / res2net50) unavailable;
            # stand-in = 1x1 conv on the pooled pyramid + ReLU.
            xb = jnp.maximum(
                jnp.dot(xp, wbb_ref[i], preferred_element_type=F32) + bbb_ref[i], 0.0)
            # TODO(synk): LateralBlock source unavailable; stand-in = 1x1 conv + ReLU.
            xl = jnp.maximum(
                jnp.dot(xb.astype(BF16), wlat_ref[i], preferred_element_type=F32)
                + blat_ref[i], 0.0)                                     # (S_i, CH)
            # TODO(synk): EnhancedBlock source unavailable; stand-in =
            #   sigmoid(dense(GAP(lateral))) * conv1x1(x_dct -> 192).
            gap = jnp.mean(xl, axis=0, keepdims=True)                   # (1, CH)
            attn = jax.nn.sigmoid(
                jnp.dot(gap.astype(BF16), wa_ref[i], preferred_element_type=F32)
                + ba_ref[i])                                            # (1, 192)
            base = jnp.maximum(
                jnp.dot(xdct, wdct_ref[i], preferred_element_type=F32) + bdct_ref[i],
                0.0)                                                    # (Sd, 192)
            scaled = base * attn                                        # fused channel attn
            # con1_x: 192 -> CH (no activation)
            feat = (jnp.dot(scaled.astype(BF16), wc1_ref[i], preferred_element_type=F32)
                    + bc1_ref[i])                                       # (Sd, CH)
            # bilinear align_corners=True resize (DCT grid -> level grid), f32 matmul
            feat = jnp.dot(r_i, feat, preferred_element_type=F32)       # (S_i, CH)
            # TODO(synk): MixBlock source unavailable; stand-in =
            # conv1x1(xl + feat) + ReLU (residual add fused).
            mix = jnp.maximum(
                jnp.dot((xl + feat).astype(BF16), wmix_ref[i], preferred_element_type=F32)
                + bmix_ref[i], 0.0)                                     # (S_i, CH)
            # lateral_block5 stand-in (weights zero-block-widened to 192 cols so
            # the MSF channel concat below is a sum of disjoint column blocks)
            l5.append(jnp.maximum(
                jnp.dot(mix.astype(BF16), wlat5_ref[i], preferred_element_type=F32)
                + blat5_ref[i], 0.0))                                   # (S_i, 192)

        # TODO(synk): MSF source unavailable; stand-in = upsample levels 2..4 to
        # level-1 grid + channel concat.  Because each l5[i] only occupies its
        # own disjoint 48-column block, the concat is an exact SUM, and the
        # three upsamples collapse into ONE K=84 matmul.
        v234 = jnp.concatenate([l5[1], l5[2], l5[3]], axis=0)           # (S2+S3+S4, 192)
        pcat = l5[0] + jnp.dot(rcat_ref[...], v234, preferred_element_type=F32)

        # TODO(synk): HeadBlock source unavailable; stand-in =
        #   coarse -> conv1x1(192->192)+ReLU; guide = conv1x1(coarse->1)  (x unused).
        c2 = jnp.maximum(
            jnp.dot(pcat.astype(BF16), wh_ref[0], preferred_element_type=F32)
            + bh_ref[0], 0.0)                                           # (S1, 192)
        c3 = jnp.maximum(
            jnp.dot(c2.astype(BF16), wh_ref[1], preferred_element_type=F32)
            + bh_ref[1], 0.0)
        c4 = jnp.maximum(
            jnp.dot(c3.astype(BF16), wh_ref[2], preferred_element_type=F32)
            + bh_ref[2], 0.0)

        # guide1 / guide2 / guide3 / conv_out4 packed into zero-column-structured
        # weights -> one (S1, 8) slab that never leaves VMEM (f32 for accuracy).
        g = (jnp.dot(c2, wg1_ref[...], preferred_element_type=F32)
             + jnp.dot(c3, wg2_ref[...], preferred_element_type=F32)
             + jnp.dot(c4, wg34_ref[...], preferred_element_type=F32)
             + bg_ref[...])                                             # (S1, 8)

        # final bilinear (align_corners=True) upsample of all 4 maps at once:
        # ONE transposed kron matmul -> lane-dense (8, H*W) store.
        gT = jnp.transpose(g).astype(BF16)                              # (8, S1)
        out = jnp.dot(gT, rbig_ref[...], preferred_element_type=F32)    # (8, H*W)
        o_ref[0] = out.astype(o_ref.dtype)

    return kernel


# ----------------------------------------------------------------------------
# Parameter construction (deterministic, conv2d-style uniform init)
# ----------------------------------------------------------------------------
def _dense_init(key, cin, cout):
    kw, kb = jax.random.split(key)
    s = 1.0 / np.sqrt(cin)
    w = jax.random.uniform(kw, (cout, cin), jnp.float32, -s, s)
    b = jax.random.uniform(kb, (1, cout), jnp.float32, -s, s)
    return w, b


def init_params(key):
    p = {}
    names = (
        [("bb", 3, CH)] * 4 +                      # backbone stand-in convs
        [("lat", CH, CH)] * 4 +                    # lateral_block1..4
        [("lat5", CH, CH)] * 4 +                   # lateral_block5_1..4
        [("enh_dct", C_DCT, D_ENH)] * 4 +          # enhanced blocks, DCT conv
        [("enh_att", CH, D_ENH)] * 4 +             # enhanced blocks, attn dense
        [("con1", D_ENH, CH)] * 4 +                # con1_2..con1_5
        [("mix", CH, CH)] * 4 +                    # mix_block1..4
        [("head", D_ENH, D_ENH)] * 3 +             # head_block conv
        [("guide", D_ENH, 1)] * 3 +                # head_block guide conv
        [("conv_out4", D_ENH, 1)]                  # conv_out4
    )
    counters = {}
    keys = jax.random.split(key, len(names))
    for k, (tag, cin, cout) in zip(keys, names):
        idx = counters.get(tag, 0)
        counters[tag] = idx + 1
        p[f"{tag}{idx + 1}"] = _dense_init(k, cin, cout)
    return p


# ----------------------------------------------------------------------------
# FDNet forward (channel-last everywhere; NCHW only at the boundaries)
# ----------------------------------------------------------------------------
def _avg_pool_nhwc(x, f):   # glue (backbone stand-in pyramid)
    B, H, W, C = x.shape
    return x.reshape(B, H // f, f, W // f, f, C).mean(axis=(2, 4))


def fdnet_forward(params, x, x_dct):
    p = params
    B, _, H, W = x.shape
    _, _, Hd, Wd = x_dct.shape
    Sd = Hd * Wd

    # single layout change at the model boundary (NCHW -> channel-last)
    x_nhwc = jnp.transpose(x, (0, 2, 3, 1))
    xdct = jnp.transpose(x_dct, (0, 2, 3, 1)).reshape(B, Sd, C_DCT).astype(BF16)

    # TODO(synk): real backbone (MambaVision / res2net50) unavailable;
    # stand-in pyramid input = hierarchical average pooling of the RGB input.
    pools = [_avg_pool_nhwc(x_nhwc, 4)]
    for _ in range(3):
        pools.append(_avg_pool_nhwc(pools[-1], 2))
    level_hw = [(q.shape[1], q.shape[2]) for q in pools]
    level_sizes = tuple(h * w for h, w in level_hw)
    stot = sum(level_sizes)
    h1, w1 = level_hw[0]

    # pack all 4 levels' rows into ONE slab -> one DMA instead of four
    xp_all = jnp.concatenate(
        [q.reshape(B, hw[0] * hw[1], 3) for q, hw in zip(pools, level_hw)],
        axis=1).astype(BF16)                                              # (B, Stot, 3)

    # --- stacked per-level weights (one array per role, indexed by level) ---
    def stack_w(tag):
        return jnp.stack([p[f"{tag}{i + 1}"][0].T for i in range(4)]).astype(BF16)

    def stack_b(tag):
        return jnp.stack([p[f"{tag}{i + 1}"][1] for i in range(4)])

    wbb, bbb = stack_w("bb"), stack_b("bb")
    wlat, blat = stack_w("lat"), stack_b("lat")
    wa, ba = stack_w("enh_att"), stack_b("enh_att")
    wdct, bdct = stack_w("enh_dct"), stack_b("enh_dct")
    wc1, bc1 = stack_w("con1"), stack_b("con1")
    wmix, bmix = stack_w("mix"), stack_b("mix")

    # lateral_block5: zero-block-widen to 192 output channels so the MSF channel
    # concat is an exact sum of disjoint column blocks (no in-kernel lane concat)
    wlat5w = jnp.zeros((4, CH, 4 * CH), F32)
    blat5w = jnp.zeros((4, 1, 4 * CH), F32)
    for i in range(4):
        wlat5w = wlat5w.at[i, :, i * CH:(i + 1) * CH].set(p[f"lat5{i + 1}"][0].T)
        blat5w = blat5w.at[i, :, i * CH:(i + 1) * CH].set(p[f"lat5{i + 1}"][1])
    wlat5w = wlat5w.astype(BF16)

    # --- interpolation matrices (f32 inside the decoder, bf16 for final kron) ---
    rlvl = jnp.asarray(
        np.concatenate([_kron_resize(hw, (Hd, Wd)) for hw in level_hw], axis=0), F32)
    rcat = jnp.asarray(
        np.concatenate([_kron_resize((h1, w1), level_hw[j]) for j in (1, 2, 3)],
                       axis=1), F32)                                      # (S1, S2+S3+S4)
    rbigT = jnp.asarray(_kron_resize((H, W), (h1, w1)).T, BF16)           # (S1, H*W)

    # --- head chain + guide / conv_out4 weights ---
    wh = jnp.stack([p[f"head{s + 1}"][0].T for s in range(3)]).astype(BF16)   # (3,192,192)
    bh = jnp.stack([p[f"head{s + 1}"][1] for s in range(3)])                  # (3,1,192)
    wg1 = jnp.zeros((D_ENH, N_OUT_PAD), F32).at[:, 0].set(p["guide1"][0][0])
    wg2 = jnp.zeros((D_ENH, N_OUT_PAD), F32).at[:, 1].set(p["guide2"][0][0])
    wg34 = (jnp.zeros((D_ENH, N_OUT_PAD), F32)
            .at[:, 2].set(p["guide3"][0][0])
            .at[:, 3].set(p["conv_out41"][0][0]))
    bg = jnp.concatenate([p["guide1"][1], p["guide2"][1], p["guide3"][1],
                          p["conv_out41"][1],
                          jnp.zeros((1, N_OUT_PAD - N_OUT), F32)], axis=1)    # (1, 8)

    wargs = (wbb, bbb, wlat, blat, wa, ba, wdct, bdct, wc1, bc1, rlvl,
             wmix, bmix, wlat5w, blat5w, rcat, wh, bh, wg1, wg2, wg34, bg, rbigT)

    kernel = _make_fused_kernel(level_sizes)
    in_specs = [pl.BlockSpec((1, stot, 3), lambda b: (b, 0, 0)),
                pl.BlockSpec((1, Sd, C_DCT), lambda b: (b, 0, 0))]
    in_specs += [_full(a) for a in wargs]

    out_flat = pl.pallas_call(
        kernel,
        out_shape=jax.ShapeDtypeStruct((B, N_OUT_PAD, H * W), F32),
        grid=(B,),
        in_specs=in_specs,
        out_specs=pl.BlockSpec((1, N_OUT_PAD, H * W), lambda b: (b, 0, 0)),
        compiler_params=pltpu.CompilerParams(
            dimension_semantics=("parallel",),
            vmem_limit_bytes=40 * 1024 * 1024),
    )(xp_all, xdct, *wargs)

    outs = out_flat[:, :N_OUT].reshape(B, N_OUT, H, W)
    return outs[:, 0:1], outs[:, 1:2], outs[:, 2:3], outs[:, 3:4]


# ----------------------------------------------------------------------------
if __name__ == "__main__":
    key = jax.random.PRNGKey(0)
    kp, kx, kd = jax.random.split(key, 3)

    params = init_params(kp)
    x = jax.random.normal(kx, (2, 3, 64, 64), jnp.float32)        # spatial input
    x_dct = jax.random.normal(kd, (2, C_DCT, 8, 8), jnp.float32)  # DCT input

    # TODO(synk): the torch forward also torch.save()'s its inputs to disk;
    # that file-I/O side effect is intentionally omitted.
    fwd = jax.jit(fdnet_forward)
    outs = fwd(params, x, x_dct)
    jax.block_until_ready(outs)

    assert all(o.shape == (2, 1, 64, 64) for o in outs)
    assert all(bool(jnp.all(jnp.isfinite(o))) for o in outs)
    print("KERNEL_OK")
</pallas_src>

<mosaic_0001>
module attributes {stable_mosaic.version = 11 : i64} {
  func.func @kernel(%arg0: i32, %arg1: memref<1x340x3xbf16, #tpu.memory_space<vmem>>, %arg2: memref<1x64x24xbf16, #tpu.memory_space<vmem>>, %arg3: memref<4x3x48xbf16, #tpu.memory_space<vmem>>, %arg4: memref<4x1x48xf32, #tpu.memory_space<vmem>>, %arg5: memref<4x48x48xbf16, #tpu.memory_space<vmem>>, %arg6: memref<4x1x48xf32, #tpu.memory_space<vmem>>, %arg7: memref<4x48x192xbf16, #tpu.memory_space<vmem>>, %arg8: memref<4x1x192xf32, #tpu.memory_space<vmem>>, %arg9: memref<4x24x192xbf16, #tpu.memory_space<vmem>>, %arg10: memref<4x1x192xf32, #tpu.memory_space<vmem>>, %arg11: memref<4x192x48xbf16, #tpu.memory_space<vmem>>, %arg12: memref<4x1x48xf32, #tpu.memory_space<vmem>>, %arg13: memref<340x64xf32, #tpu.memory_space<vmem>>, %arg14: memref<4x48x48xbf16, #tpu.memory_space<vmem>>, %arg15: memref<4x1x48xf32, #tpu.memory_space<vmem>>, %arg16: memref<4x48x192xbf16, #tpu.memory_space<vmem>>, %arg17: memref<4x1x192xf32, #tpu.memory_space<vmem>>, %arg18: memref<256x84xf32, #tpu.memory_space<vmem>>, %arg19: memref<3x192x192xbf16, #tpu.memory_space<vmem>>, %arg20: memref<3x1x192xf32, #tpu.memory_space<vmem>>, %arg21: memref<192x8xf32, #tpu.memory_space<vmem>>, %arg22: memref<192x8xf32, #tpu.memory_space<vmem>>, %arg23: memref<192x8xf32, #tpu.memory_space<vmem>>, %arg24: memref<1x8xf32, #tpu.memory_space<vmem>>, %arg25: memref<256x4096xbf16, #tpu.memory_space<vmem>>, %arg26: memref<1x8x4096xf32, #tpu.memory_space<vmem>>) attributes {dimension_semantics = [#tpu.dimension_semantics<parallel>], iteration_bounds = array<i64: 2>, scalar_prefetch = 0 : i64, scratch_operands = 0 : i64, tpu.core_type = #tpu.core_type<tc>, window_params = [{transform_indices = @transform_0, window_bounds = array<i64: 1, 340, 3>}, {transform_indices = @transform_1, window_bounds = array<i64: 1, 64, 24>}, {pipeline_mode = #tpu.pipeline_mode<synchronous>, transform_indices = @transform_2, window_bounds = array<i64: 4, 3, 48>}, {pipeline_mode = #tpu.pipeline_mode<synchronous>, transform_indices = @transform_3, window_bounds = array<i64: 4, 1, 48>}, {pipeline_mode = #tpu.pipeline_mode<synchronous>, transform_indices = @transform_4, window_bounds = array<i64: 4, 48, 48>}, {pipeline_mode = #tpu.pipeline_mode<synchronous>, transform_indices = @transform_5, window_bounds = array<i64: 4, 1, 48>}, {pipeline_mode = #tpu.pipeline_mode<synchronous>, transform_indices = @transform_6, window_bounds = array<i64: 4, 48, 192>}, {pipeline_mode = #tpu.pipeline_mode<synchronous>, transform_indices = @transform_7, window_bounds = array<i64: 4, 1, 192>}, {pipeline_mode = #tpu.pipeline_mode<synchronous>, transform_indices = @transform_8, window_bounds = array<i64: 4, 24, 192>}, {pipeline_mode = #tpu.pipeline_mode<synchronous>, transform_indices = @transform_9, window_bounds = array<i64: 4, 1, 192>}, {pipeline_mode = #tpu.pipeline_mode<synchronous>, transform_indices = @transform_10, window_bounds = array<i64: 4, 192, 48>}, {pipeline_mode = #tpu.pipeline_mode<synchronous>, transform_indices = @transform_11, window_bounds = array<i64: 4, 1, 48>}, {pipeline_mode = #tpu.pipeline_mode<synchronous>, transform_indices = @transform_12, window_bounds = array<i64: 340, 64>}, {pipeline_mode = #tpu.pipeline_mode<synchronous>, transform_indices = @transform_13, window_bounds = array<i64: 4, 48, 48>}, {pipeline_mode = #tpu.pipeline_mode<synchronous>, transform_indices = @transform_14, window_bounds = array<i64: 4, 1, 48>}, {pipeline_mode = #tpu.pipeline_mode<synchronous>, transform_indices = @transform_15, window_bounds = array<i64: 4, 48, 192>}, {pipeline_mode = #tpu.pipeline_mode<synchronous>, transform_indices = @transform_16, window_bounds = array<i64: 4, 1, 192>}, {pipeline_mode = #tpu.pipeline_mode<synchronous>, transform_indices = @transform_17, window_bounds = array<i64: 256, 84>}, {pipeline_mode = #tpu.pipeline_mode<synchronous>, transform_indices = @transform_18, window_bounds = array<i64: 3, 192, 192>}, {pipeline_mode = #tpu.pipeline_mode<synchronous>, transform_indices = @transform_19, window_bounds = array<i64: 3, 1, 192>}, {pipeline_mode = #tpu.pipeline_mode<synchronous>, transform_indices = @transform_20, window_bounds = array<i64: 192, 8>}, {pipeline_mode = #tpu.pipeline_mode<synchronous>, transform_indices = @transform_21, window_bounds = array<i64: 192, 8>}, {pipeline_mode = #tpu.pipeline_mode<synchronous>, transform_indices = @transform_22, window_bounds = array<i64: 192, 8>}, {pipeline_mode = #tpu.pipeline_mode<synchronous>, transform_indices = @transform_23, window_bounds = array<i64: 1, 8>}, {pipeline_mode = #tpu.pipeline_mode<synchronous>, transform_indices = @transform_24, window_bounds = array<i64: 256, 4096>}, {transform_indices = @transform_25, window_bounds = array<i64: 1, 8, 4096>}]} {
    %c0 = arith.constant 0 : index
    %c0_0 = arith.constant 0 : index
    %c0_1 = arith.constant 0 : index
    %0 = vector.load %arg1[%c0, %c0_0, %c0_1] : memref<1x340x3xbf16, #tpu.memory_space<vmem>>, vector<1x340x3xbf16>
    %1 = vector.shape_cast %0 : vector<1x340x3xbf16> to vector<340x3xbf16>
    %c0_2 = arith.constant 0 : index
    %c0_3 = arith.constant 0 : index
    %c0_4 = arith.constant 0 : index
    %2 = vector.load %arg2[%c0_2, %c0_3, %c0_4] : memref<1x64x24xbf16, #tpu.memory_space<vmem>>, vector<1x64x24xbf16>
    %3 = vector.shape_cast %2 : vector<1x64x24xbf16> to vector<64x24xbf16>
    %c0_5 = arith.constant 0 : index
    %c0_6 = arith.constant 0 : index
    %4 = vector.load %arg13[%c0_5, %c0_6] : memref<340x64xf32, #tpu.memory_space<vmem>>, vector<340x64xf32>
    %5 = vector.extract_strided_slice %1 {offsets = [0, 0], sizes = [256, 3], strides = [1, 1]} : vector<340x3xbf16> to vector<256x3xbf16>
    %6 = vector.extract_strided_slice %4 {offsets = [0, 0], sizes = [256, 64], strides = [1, 1]} : vector<340x64xf32> to vector<256x64xf32>
    %c0_7 = arith.constant 0 : index
    %c0_8 = arith.constant 0 : index
    %c0_9 = arith.constant 0 : index
    %7 = vector.load %arg3[%c0_7, %c0_8, %c0_9] : memref<4x3x48xbf16, #tpu.memory_space<vmem>>, vector<1x3x48xbf16>
    %8 = vector.shape_cast %7 : vector<1x3x48xbf16> to vector<3x48xbf16>
    %cst = arith.constant dense<0.000000e+00> : vector<256x48xf32>
    %9 = tpu.matmul %5, %8, %cst {dimension_numbers = #tpu.dot_dimension_numbers<[1], [0], [0], [1], [0, 0, 1, 1], [], []>} : vector<256x3xbf16>, vector<3x48xbf16>, vector<256x48xf32> -> vector<256x48xf32>
    %c0_10 = arith.constant 0 : index
    %c0_11 = arith.constant 0 : index
    %c0_12 = arith.constant 0 : index
    %10 = vector.load %arg4[%c0_10, %c0_11, %c0_12] : memref<4x1x48xf32, #tpu.memory_space<vmem>>, vector<1x1x48xf32>
    %11 = vector.shape_cast %10 : vector<1x1x48xf32> to vector<1x48xf32>
    %12 = vector.broadcast %11 : vector<1x48xf32> to vector<256x48xf32>
    %13 = arith.addf %9, %12 : vector<256x48xf32>
    %cst_13 = arith.constant 0.000000e+00 : f32
    %14 = vector.broadcast %cst_13 : f32 to vector<256x48xf32>
    %15 = arith.maximumf %13, %14 : vector<256x48xf32>
    %16 = arith.truncf %15 : vector<256x48xf32> to vector<256x48xbf16>
    %c0_14 = arith.constant 0 : index
    %c0_15 = arith.constant 0 : index
    %c0_16 = arith.constant 0 : index
    %17 = vector.load %arg5[%c0_14, %c0_15, %c0_16] : memref<4x48x48xbf16, #tpu.memory_space<vmem>>, vector<1x48x48xbf16>
    %18 = vector.shape_cast %17 : vector<1x48x48xbf16> to vector<48x48xbf16>
    %cst_17 = arith.constant dense<0.000000e+00> : vector<256x48xf32>
    %19 = tpu.matmul %16, %18, %cst_17 {dimension_numbers = #tpu.dot_dimension_numbers<[1], [0], [0], [1], [0, 0, 1, 1], [], []>} : vector<256x48xbf16>, vector<48x48xbf16>, vector<256x48xf32> -> vector<256x48xf32>
    %c0_18 = arith.constant 0 : index
    %c0_19 = arith.constant 0 : index
    %c0_20 = arith.constant 0 : index
    %20 = vector.load %arg6[%c0_18, %c0_19, %c0_20] : memref<4x1x48xf32, #tpu.memory_space<vmem>>, vector<1x1x48xf32>
    %21 = vector.shape_cast %20 : vector<1x1x48xf32> to vector<1x48xf32>
    %22 = vector.broadcast %21 : vector<1x48xf32> to vector<256x48xf32>
    %23 = arith.addf %19, %22 : vector<256x48xf32>
    %cst_21 = arith.constant 0.000000e+00 : f32
    %24 = vector.broadcast %cst_21 : f32 to vector<256x48xf32>
    %25 = arith.maximumf %23, %24 : vector<256x48xf32>
    %cst_22 = arith.constant dense<0.000000e+00> : vector<48xf32>
    %26 = vector.multi_reduction <add>, %25, %cst_22 [0] : vector<256x48xf32> to vector<48xf32>
    %27 = vector.shape_cast %26 : vector<48xf32> to vector<1x48xf32>
    %cst_23 = arith.constant 2.560000e+02 : f32
    %28 = vector.broadcast %cst_23 : f32 to vector<1x48xf32>
    %29 = arith.divf %27, %28 : vector<1x48xf32>
    %30 = arith.truncf %29 : vector<1x48xf32> to vector<1x48xbf16>
    %c0_24 = arith.constant 0 : index
    %c0_25 = arith.constant 0 : index
    %c0_26 = arith.constant 0 : index
    %31 = vector.load %arg7[%c0_24, %c0_25, %c0_26] : memref<4x48x192xbf16, #tpu.memory_space<vmem>>, vector<1x48x192xbf16>
    %32 = vector.shape_cast %31 : vector<1x48x192xbf16> to vector<48x192xbf16>
    %cst_27 = arith.constant dense<0.000000e+00> : vector<1x192xf32>
    %33 = tpu.matmul %30, %32, %cst_27 {dimension_numbers = #tpu.dot_dimension_numbers<[1], [0], [0], [1], [0, 0, 1, 1], [], []>} : vector<1x48xbf16>, vector<48x192xbf16>, vector<1x192xf32> -> vector<1x192xf32>
    %c0_28 = arith.constant 0 : index
    %c0_29 = arith.constant 0 : index
    %c0_30 = arith.constant 0 : index
    %34 = vector.load %arg8[%c0_28, %c0_29, %c0_30] : memref<4x1x192xf32, #tpu.memory_space<vmem>>, vector<1x1x192xf32>
    %35 = vector.shape_cast %34 : vector<1x1x192xf32> to vector<1x192xf32>
    %36 = arith.addf %33, %35 : vector<1x192xf32>
    %37 = arith.negf %36 : vector<1x192xf32>
    %38 = math.exp %37 : vector<1x192xf32>
    %cst_31 = arith.constant 1.000000e+00 : f32
    %39 = vector.broadcast %cst_31 : f32 to vector<1x192xf32>
    %40 = arith.addf %39, %38 : vector<1x192xf32>
    %41 = arith.divf %39, %40 : vector<1x192xf32>
    %c0_32 = arith.constant 0 : index
    %c0_33 = arith.constant 0 : index
    %c0_34 = arith.constant 0 : index
    %42 = vector.load %arg9[%c0_32, %c0_33, %c0_34] : memref<4x24x192xbf16, #tpu.memory_space<vmem>>, vector<1x24x192xbf16>
    %43 = vector.shape_cast %42 : vector<1x24x192xbf16> to vector<24x192xbf16>
    %cst_35 = arith.constant dense<0.000000e+00> : vector<64x192xf32>
    %44 = tpu.matmul %3, %43, %cst_35 {dimension_numbers = #tpu.dot_dimension_numbers<[1], [0], [0], [1], [0, 0, 1, 1], [], []>} : vector<64x24xbf16>, vector<24x192xbf16>, vector<64x192xf32> -> vector<64x192xf32>
    %c0_36 = arith.constant 0 : index
    %c0_37 = arith.constant 0 : index
    %c0_38 = arith.constant 0 : index
    %45 = vector.load %arg10[%c0_36, %c0_37, %c0_38] : memref<4x1x192xf32, #tpu.memory_space<vmem>>, vector<1x1x192xf32>
    %46 = vector.shape_cast %45 : vector<1x1x192xf32> to vector<1x192xf32>
    %47 = vector.broadcast %46 : vector<1x192xf32> to vector<64x192xf32>
    %48 = arith.addf %44, %47 : vector<64x192xf32>
    %cst_39 = arith.constant 0.000000e+00 : f32
    %49 = vector.broadcast %cst_39 : f32 to vector<64x192xf32>
    %50 = arith.maximumf %48, %49 : vector<64x192xf32>
    %51 = vector.broadcast %41 : vector<1x192xf32> to vector<64x192xf32>
    %52 = arith.mulf %50, %51 : vector<64x192xf32>
    %53 = arith.truncf %52 : vector<64x192xf32> to vector<64x192xbf16>
    %c0_40 = arith.constant 0 : index
    %c0_41 = arith.constant 0 : index
    %c0_42 = arith.constant 0 : index
    %54 = vector.load %arg11[%c0_40, %c0_41, %c0_42] : memref<4x192x48xbf16, #tpu.memory_space<vmem>>, vector<1x192x48xbf16>
    %55 = vector.shape_cast %54 : vector<1x192x48xbf16> to vector<192x48xbf16>
    %cst_43 = arith.constant dense<0.000000e+00> : vector<64x48xf32>
    %56 = tpu.matmul %53, %55, %cst_43 {dimension_numbers = #tpu.dot_dimension_numbers<[1], [0], [0], [1], [0, 0, 1, 1], [], []>} : vector<64x192xbf16>, vector<192x48xbf16>, vector<64x48xf32> -> vector<64x48xf32>
    %c0_44 = arith.constant 0 : index
    %c0_45 = arith.constant 0 : index
    %c0_46 = arith.constant 0 : index
    %57 = vector.load %arg12[%c0_44, %c0_45, %c0_46] : memref<4x1x48xf32, #tpu.memory_space<vmem>>, vector<1x1x48xf32>
    %58 = vector.shape_cast %57 : vector<1x1x48xf32> to vector<1x48xf32>
    %59 = vector.broadcast %58 : vector<1x48xf32> to vector<64x48xf32>
    %60 = arith.addf %56, %59 : vector<64x48xf32>
    %cst_47 = arith.constant dense<0.000000e+00> : vector<256x48xf32>
    %61 = tpu.matmul %6, %60, %cst_47 {dimension_numbers = #tpu.dot_dimension_numbers<[1], [0], [0], [1], [0, 0, 1, 1], [], []>} : vector<256x64xf32>, vector<64x48xf32>, vector<256x48xf32> -> vector<256x48xf32>
    %62 = arith.addf %25, %61 : vector<256x48xf32>
    %63 = arith.truncf %62 : vector<256x48xf32> to vector<256x48xbf16>
    %c0_48 = arith.constant 0 : index
    %c0_49 = arith.constant 0 : index
    %c0_50 = arith.constant 0 : index
    %64 = vector.load %arg14[%c0_48, %c0_49, %c0_50] : memref<4x48x48xbf16, #tpu.memory_space<vmem>>, vector<1x48x48xbf16>
    %65 = vector.shape_cast %64 : vector<1x48x48xbf16> to vector<48x48xbf16>
    %cst_51 = arith.constant dense<0.000000e+00> : vector<256x48xf32>
    %66 = tpu.matmul %63, %65, %cst_51 {dimension_numbers = #tpu.dot_dimension_numbers<[1], [0], [0], [1], [0, 0, 1, 1], [], []>} : vector<256x48xbf16>, vector<48x48xbf16>, vector<256x48xf32> -> vector<256x48xf32>
    %c0_52 = arith.constant 0 : index
    %c0_53 = arith.constant 0 : index
    %c0_54 = arith.constant 0 : index
    %67 = vector.load %arg15[%c0_52, %c0_53, %c0_54] : memref<4x1x48xf32, #tpu.memory_space<vmem>>, vector<1x1x48xf32>
    %68 = vector.shape_cast %67 : vector<1x1x48xf32> to vector<1x48xf32>
    %69 = vector.broadcast %68 : vector<1x48xf32> to vector<256x48xf32>
    %70 = arith.addf %66, %69 : vector<256x48xf32>
    %cst_55 = arith.constant 0.000000e+00 : f32
    %71 = vector.broadcast %cst_55 : f32 to vector<256x48xf32>
    %72 = arith.maximumf %70, %71 : vector<256x48xf32>
    %73 = arith.truncf %72 : vector<256x48xf32> to vector<256x48xbf16>
    %c0_56 = arith.constant 0 : index
    %c0_57 = arith.constant 0 : index
    %c0_58 = arith.constant 0 : index
    %74 = vector.load %arg16[%c0_56, %c0_57, %c0_58] : memref<4x48x192xbf16, #tpu.memory_space<vmem>>, vector<1x48x192xbf16>
    %75 = vector.shape_cast %74 : vector<1x48x192xbf16> to vector<48x192xbf16>
    %cst_59 = arith.constant dense<0.000000e+00> : vector<256x192xf32>
    %76 = tpu.matmul %73, %75, %cst_59 {dimension_numbers = #tpu.dot_dimension_numbers<[1], [0], [0], [1], [0, 0, 1, 1], [], []>} : vector<256x48xbf16>, vector<48x192xbf16>, vector<256x192xf32> -> vector<256x192xf32>
    %c0_60 = arith.constant 0 : index
    %c0_61 = arith.constant 0 : index
    %c0_62 = arith.constant 0 : index
    %77 = vector.load %arg17[%c0_60, %c0_61, %c0_62] : memref<4x1x192xf32, #tpu.memory_space<vmem>>, vector<1x1x192xf32>
    %78 = vector.shape_cast %77 : vector<1x1x192xf32> to vector<1x192xf32>
    %79 = vector.broadcast %78 : vector<1x192xf32> to vector<256x192xf32>
    %80 = arith.addf %76, %79 : vector<256x192xf32>
    %cst_63 = arith.constant 0.000000e+00 : f32
    %81 = vector.broadcast %cst_63 : f32 to vector<256x192xf32>
    %82 = arith.maximumf %80, %81 : vector<256x192xf32>
    %83 = vector.extract_strided_slice %1 {offsets = [256, 0], sizes = [64, 3], strides = [1, 1]} : vector<340x3xbf16> to vector<64x3xbf16>
    %84 = vector.extract_strided_slice %4 {offsets = [256, 0], sizes = [64, 64], strides = [1, 1]} : vector<340x64xf32> to vector<64x64xf32>
    %c1 = arith.constant 1 : index
    %c0_64 = arith.constant 0 : index
    %c0_65 = arith.constant 0 : index
    %85 = vector.load %arg3[%c1, %c0_64, %c0_65] : memref<4x3x48xbf16, #tpu.memory_space<vmem>>, vector<1x3x48xbf16>
    %86 = vector.shape_cast %85 : vector<1x3x48xbf16> to vector<3x48xbf16>
    %cst_66 = arith.constant dense<0.000000e+00> : vector<64x48xf32>
    %87 = tpu.matmul %83, %86, %cst_66 {dimension_numbers = #tpu.dot_dimension_numbers<[1], [0], [0], [1], [0, 0, 1, 1], [], []>} : vector<64x3xbf16>, vector<3x48xbf16>, vector<64x48xf32> -> vector<64x48xf32>
    %c1_67 = arith.constant 1 : index
    %c0_68 = arith.constant 0 : index
    %c0_69 = arith.constant 0 : index
    %88 = vector.load %arg4[%c1_67, %c0_68, %c0_69] : memref<4x1x48xf32, #tpu.memory_space<vmem>>, vector<1x1x48xf32>
    %89 = vector.shape_cast %88 : vector<1x1x48xf32> to vector<1x48xf32>
    %90 = vector.broadcast %89 : vector<1x48xf32> to vector<64x48xf32>
    %91 = arith.addf %87, %90 : vector<64x48xf32>
    %cst_70 = arith.constant 0.000000e+00 : f32
    %92 = vector.broadcast %cst_70 : f32 to vector<64x48xf32>
    %93 = arith.maximumf %91, %92 : vector<64x48xf32>
    %94 = arith.truncf %93 : vector<64x48xf32> to vector<64x48xbf16>
    %c1_71 = arith.constant 1 : index
    %c0_72 = arith.constant 0 : index
    %c0_73 = arith.constant 0 : index
    %95 = vector.load %arg5[%c1_71, %c0_72, %c0_73] : memref<4x48x48xbf16, #tpu.memory_space<vmem>>, vector<1x48x48xbf16>
    %96 = vector.shape_cast %95 : vector<1x48x48xbf16> to vector<48x48xbf16>
    %cst_74 = arith.constant dense<0.000000e+00> : vector<64x48xf32>
    %97 = tpu.matmul %94, %96, %cst_74 {dimension_numbers = #tpu.dot_dimension_numbers<[1], [0], [0], [1], [0, 0, 1, 1], [], []>} : vector<64x48xbf16>, vector<48x48xbf16>, vector<64x48xf32> -> vector<64x48xf32>
    %c1_75 = arith.constant 1 : index
    %c0_76 = arith.constant 0 : index
    %c0_77 = arith.constant 0 : index
    %98 = vector.load %arg6[%c1_75, %c0_76, %c0_77] : memref<4x1x48xf32, #tpu.memory_space<vmem>>, vector<1x1x48xf32>
    %99 = vector.shape_cast %98 : vector<1x1x48xf32> to vector<1x48xf32>
    %100 = vector.broadcast %99 : vector<1x48xf32> to vector<64x48xf32>
    %101 = arith.addf %97, %100 : vector<64x48xf32>
    %cst_78 = arith.constant 0.000000e+00 : f32
    %102 = vector.broadcast %cst_78 : f32 to vector<64x48xf32>
    %103 = arith.maximumf %101, %102 : vector<64x48xf32>
    %cst_79 = arith.constant dense<0.000000e+00> : vector<48xf32>
    %104 = vector.multi_reduction <add>, %103, %cst_79 [0] : vector<64x48xf32> to vector<48xf32>
    %105 = vector.shape_cast %104 : vector<48xf32> to vector<1x48xf32>
    %cst_80 = arith.constant 6.400000e+01 : f32
    %106 = vector.broadcast %cst_80 : f32 to vector<1x48xf32>
    %107 = arith.divf %105, %106 : vector<1x48xf32>
    %108 = arith.truncf %107 : vector<1x48xf32> to vector<1x48xbf16>
    %c1_81 = arith.constant 1 : index
    %c0_82 = arith.constant 0 : index
    %c0_83 = arith.constant 0 : index
    %109 = vector.load %arg7[%c1_81, %c0_82, %c0_83] : memref<4x48x192xbf16, #tpu.memory_space<vmem>>, vector<1x48x192xbf16>
    %110 = vector.shape_cast %109 : vector<1x48x192xbf16> to vector<48x192xbf16>
    %cst_84 = arith.constant dense<0.000000e+00> : vector<1x192xf32>
    %111 = tpu.matmul %108, %110, %cst_84 {dimension_numbers = #tpu.dot_dimension_numbers<[1], [0], [0], [1], [0, 0, 1, 1], [], []>} : vector<1x48xbf16>, vector<48x192xbf16>, vector<1x192xf32> -> vector<1x192xf32>
    %c1_85 = arith.constant 1 : index
    %c0_86 = arith.constant 0 : index
    %c0_87 = arith.constant 0 : index
    %112 = vector.load %arg8[%c1_85, %c0_86, %c0_87] : memref<4x1x192xf32, #tpu.memory_space<vmem>>, vector<1x1x192xf32>
    %113 = vector.shape_cast %112 : vector<1x1x192xf32> to vector<1x192xf32>
    %114 = arith.addf %111, %113 : vector<1x192xf32>
    %115 = arith.negf %114 : vector<1x192xf32>
    %116 = math.exp %115 : vector<1x192xf32>
    %cst_88 = arith.constant 1.000000e+00 : f32
    %117 = vector.broadcast %cst_88 : f32 to vector<1x192xf32>
    %118 = arith.addf %117, %116 : vector<1x192xf32>
    %119 = arith.divf %117, %118 : vector<1x192xf32>
    %c1_89 = arith.constant 1 : index
    %c0_90 = arith.constant 0 : index
    %c0_91 = arith.constant 0 : index
    %120 = vector.load %arg9[%c1_89, %c0_90, %c0_91] : memref<4x24x192xbf16, #tpu.memory_space<vmem>>, vector<1x24x192xbf16>
    %121 = vector.shape_cast %120 : vector<1x24x192xbf16> to vector<24x192xbf16>
    %cst_92 = arith.constant dense<0.000000e+00> : vector<64x192xf32>
    %122 = tpu.matmul %3, %121, %cst_92 {dimension_numbers = #tpu.dot_dimension_numbers<[1], [0], [0], [1], [0, 0, 1, 1], [], []>} : vector<64x24xbf16>, vector<24x192xbf16>, vector<64x192xf32> -> vector<64x192xf32>
    %c1_93 = arith.constant 1 : index
    %c0_94 = arith.constant 0 : index
    %c0_95 = arith.constant 0 : index
    %123 = vector.load %arg10[%c1_93, %c0_94, %c0_95] : memref<4x1x192xf32, #tpu.memory_space<vmem>>, vector<1x1x192xf32>
    %124 = vector.shape_cast %123 : vector<1x1x192xf32> to vector<1x192xf32>
    %125 = vector.broadcast %124 : vector<1x192xf32> to vector<64x192xf32>
    %126 = arith.addf %122, %125 : vector<64x192xf32>
    %cst_96 = arith.constant 0.000000e+00 : f32
    %127 = vector.broadcast %cst_96 : f32 to vector<64x192xf32>
    %128 = arith.maximumf %126, %127 : vector<64x192xf32>
    %129 = vector.broadcast %119 : vector<1x192xf32> to vector<64x192xf32>
    %130 = arith.mulf %128, %129 : vector<64x192xf32>
    %131 = arith.truncf %130 : vector<64x192xf32> to vector<64x192xbf16>
    %c1_97 = arith.constant 1 : index
    %c0_98 = arith.constant 0 : index
    %c0_99 = arith.constant 0 : index
    %132 = vector.load %arg11[%c1_97, %c0_98, %c0_99] : memref<4x192x48xbf16, #tpu.memory_space<vmem>>, vector<1x192x48xbf16>
    %133 = vector.shape_cast %132 : vector<1x192x48xbf16> to vector<192x48xbf16>
    %cst_100 = arith.constant dense<0.000000e+00> : vector<64x48xf32>
    %134 = tpu.matmul %131, %133, %cst_100 {dimension_numbers = #tpu.dot_dimension_numbers<[1], [0], [0], [1], [0, 0, 1, 1], [], []>} : vector<64x192xbf16>, vector<192x48xbf16>, vector<64x48xf32> -> vector<64x48xf32>
    %c1_101 = arith.constant 1 : index
    %c0_102 = arith.constant 0 : index
    %c0_103 = arith.constant 0 : index
    %135 = vector.load %arg12[%c1_101, %c0_102, %c0_103] : memref<4x1x48xf32, #tpu.memory_space<vmem>>, vector<1x1x48xf32>
    %136 = vector.shape_cast %135 : vector<1x1x48xf32> to vector<1x48xf32>
    %137 = vector.broadcast %136 : vector<1x48xf32> to vector<64x48xf32>
    %138 = arith.addf %134, %137 : vector<64x48xf32>
    %cst_104 = arith.constant dense<0.000000e+00> : vector<64x48xf32>
    %139 = tpu.matmul %84, %138, %cst_104 {dimension_numbers = #tpu.dot_dimension_numbers<[1], [0], [0], [1], [0, 0, 1, 1], [], []>} : vector<64x64xf32>, vector<64x48xf32>, vector<64x48xf32> -> vector<64x48xf32>
    %140 = arith.addf %103, %139 : vector<64x48xf32>
    %141 = arith.truncf %140 : vector<64x48xf32> to vector<64x48xbf16>
    %c1_105 = arith.constant 1 : index
    %c0_106 = arith.constant 0 : index
    %c0_107 = arith.constant 0 : index
    %142 = vector.load %arg14[%c1_105, %c0_106, %c0_107] : memref<4x48x48xbf16, #tpu.memory_space<vmem>>, vector<1x48x48xbf16>
    %143 = vector.shape_cast %142 : vector<1x48x48xbf16> to vector<48x48xbf16>
    %cst_108 = arith.constant dense<0.000000e+00> : vector<64x48xf32>
    %144 = tpu.matmul %141, %143, %cst_108 {dimension_numbers = #tpu.dot_dimension_numbers<[1], [0], [0], [1], [0, 0, 1, 1], [], []>} : vector<64x48xbf16>, vector<48x48xbf16>, vector<64x48xf32> -> vector<64x48xf32>
    %c1_109 = arith.constant 1 : index
    %c0_110 = arith.constant 0 : index
    %c0_111 = arith.constant 0 : index
    %145 = vector.load %arg15[%c1_109, %c0_110, %c0_111] : memref<4x1x48xf32, #tpu.memory_space<vmem>>, vector<1x1x48xf32>
    %146 = vector.shape_cast %145 : vector<1x1x48xf32> to vector<1x48xf32>
    %147 = vector.broadcast %146 : vector<1x48xf32> to vector<64x48xf32>
    %148 = arith.addf %144, %147 : vector<64x48xf32>
    %cst_112 = arith.constant 0.000000e+00 : f32
    %149 = vector.broadcast %cst_112 : f32 to vector<64x48xf32>
    %150 = arith.maximumf %148, %149 : vector<64x48xf32>
    %151 = arith.truncf %150 : vector<64x48xf32> to vector<64x48xbf16>
    %c1_113 = arith.constant 1 : index
    %c0_114 = arith.constant 0 : index
    %c0_115 = arith.constant 0 : index
    %152 = vector.load %arg16[%c1_113, %c0_114, %c0_115] : memref<4x48x192xbf16, #tpu.memory_space<vmem>>, vector<1x48x192xbf16>
    %153 = vector.shape_cast %152 : vector<1x48x192xbf16> to vector<48x192xbf16>
    %cst_116 = arith.constant dense<0.000000e+00> : vector<64x192xf32>
    %154 = tpu.matmul %151, %153, %cst_116 {dimension_numbers = #tpu.dot_dimension_numbers<[1], [0], [0], [1], [0, 0, 1, 1], [], []>} : vector<64x48xbf16>, vector<48x192xbf16>, vector<64x192xf32> -> vector<64x192xf32>
    %c1_117 = arith.constant 1 : index
    %c0_118 = arith.constant 0 : index
    %c0_119 = arith.constant 0 : index
    %155 = vector.load %arg17[%c1_117, %c0_118, %c0_119] : memref<4x1x192xf32, #tpu.memory_space<vmem>>, vector<1x1x192xf32>
    %156 = vector.shape_cast %155 : vector<1x1x192xf32> to vector<1x192xf32>
    %157 = vector.broadcast %156 : vector<1x192xf32> to vector<64x192xf32>
    %158 = arith.addf %154, %157 : vector<64x192xf32>
    %cst_120 = arith.constant 0.000000e+00 : f32
    %159 = vector.broadcast %cst_120 : f32 to vector<64x192xf32>
    %160 = arith.maximumf %158, %159 : vector<64x192xf32>
    %161 = vector.extract_strided_slice %1 {offsets = [320, 0], sizes = [16, 3], strides = [1, 1]} : vector<340x3xbf16> to vector<16x3xbf16>
    %162 = vector.extract_strided_slice %4 {offsets = [320, 0], sizes = [16, 64], strides = [1, 1]} : vector<340x64xf32> to vector<16x64xf32>
    %c2 = arith.constant 2 : index
    %c0_121 = arith.constant 0 : index
    %c0_122 = arith.constant 0 : index
    %163 = vector.load %arg3[%c2, %c0_121, %c0_122] : memref<4x3x48xbf16, #tpu.memory_space<vmem>>, vector<1x3x48xbf16>
    %164 = vector.shape_cast %163 : vector<1x3x48xbf16> to vector<3x48xbf16>
    %cst_123 = arith.constant dense<0.000000e+00> : vector<16x48xf32>
    %165 = tpu.matmul %161, %164, %cst_123 {dimension_numbers = #tpu.dot_dimension_numbers<[1], [0], [0], [1], [0, 0, 1, 1], [], []>} : vector<16x3xbf16>, vector<3x48xbf16>, vector<16x48xf32> -> vector<16x48xf32>
    %c2_124 = arith.constant 2 : index
    %c0_125 = arith.constant 0 : index
    %c0_126 = arith.constant 0 : index
    %166 = vector.load %arg4[%c2_124, %c0_125, %c0_126] : memref<4x1x48xf32, #tpu.memory_space<vmem>>, vector<1x1x48xf32>
    %167 = vector.shape_cast %166 : vector<1x1x48xf32> to vector<1x48xf32>
    %168 = vector.broadcast %167 : vector<1x48xf32> to vector<16x48xf32>
    %169 = arith.addf %165, %168 : vector<16x48xf32>
    %cst_127 = arith.constant 0.000000e+00 : f32
    %170 = vector.broadcast %cst_127 : f32 to vector<16x48xf32>
    %171 = arith.maximumf %169, %170 : vector<16x48xf32>
    %172 = arith.truncf %171 : vector<16x48xf32> to vector<16x48xbf16>
    %c2_128 = arith.constant 2 : index
    %c0_129 = arith.constant 0 : index
    %c0_130 = arith.constant 0 : index
    %173 = vector.load %arg5[%c2_128, %c0_129, %c0_130] : memref<4x48x48xbf16, #tpu.memory_space<vmem>>, vector<1x48x48xbf16>
    %174 = vector.shape_cast %173 : vector<1x48x48xbf16> to vector<48x48xbf16>
    %cst_131 = arith.constant dense<0.000000e+00> : vector<16x48xf32>
    %175 = tpu.matmul %172, %174, %cst_131 {dimension_numbers = #tpu.dot_dimension_numbers<[1], [0], [0], [1], [0, 0, 1, 1], [], []>} : vector<16x48xbf16>, vector<48x48xbf16>, vector<16x48xf32> -> vector<16x48xf32>
    %c2_132 = arith.constant 2 : index
    %c0_133 = arith.constant 0 : index
    %c0_134 = arith.constant 0 : index
    %176 = vector.load %arg6[%c2_132, %c0_133, %c0_134] : memref<4x1x48xf32, #tpu.memory_space<vmem>>, vector<1x1x48xf32>
    %177 = vector.shape_cast %176 : vector<1x1x48xf32> to vector<1x48xf32>
    %178 = vector.broadcast %177 : vector<1x48xf32> to vector<16x48xf32>
    %179 = arith.addf %175, %178 : vector<16x48xf32>
    %cst_135 = arith.constant 0.000000e+00 : f32
    %180 = vector.broadcast %cst_135 : f32 to vector<16x48xf32>
    %181 = arith.maximumf %179, %180 : vector<16x48xf32>
    %cst_136 = arith.constant dense<0.000000e+00> : vector<48xf32>
    %182 = vector.multi_reduction <add>, %181, %cst_136 [0] : vector<16x48xf32> to vector<48xf32>
    %183 = vector.shape_cast %182 : vector<48xf32> to vector<1x48xf32>
    %cst_137 = arith.constant 1.600000e+01 : f32
    %184 = vector.broadcast %cst_137 : f32 to vector<1x48xf32>
    %185 = arith.divf %183, %184 : vector<1x48xf32>
    %186 = arith.truncf %185 : vector<1x48xf32> to vector<1x48xbf16>
    %c2_138 = arith.constant 2 : index
    %c0_139 = arith.constant 0 : index
    %c0_140 = arith.constant 0 : index
    %187 = vector.load %arg7[%c2_138, %c0_139, %c0_140] : memref<4x48x192xbf16, #tpu.memory_space<vmem>>, vector<1x48x192xbf16>
    %188 = vector.shape_cast %187 : vector<1x48x192xbf16> to vector<48x192xbf16>
    %cst_141 = arith.constant dense<0.000000e+00> : vector<1x192xf32>
    %189 = tpu.matmul %186, %188, %cst_141 {dimension_numbers = #tpu.dot_dimension_numbers<[1], [0], [0], [1], [0, 0, 1, 1], [], []>} : vector<1x48xbf16>, vector<48x192xbf16>, vector<1x192xf32> -> vector<1x192xf32>
    %c2_142 = arith.constant 2 : index
    %c0_143 = arith.constant 0 : index
    %c0_144 = arith.constant 0 : index
    %190 = vector.load %arg8[%c2_142, %c0_143, %c0_144] : memref<4x1x192xf32, #tpu.memory_space<vmem>>, vector<1x1x192xf32>
    %191 = vector.shape_cast %190 : vector<1x1x192xf32> to vector<1x192xf32>
    %192 = arith.addf %189, %191 : vector<1x192xf32>
    %193 = arith.negf %192 : vector<1x192xf32>
    %194 = math.exp %193 : vector<1x192xf32>
    %cst_145 = arith.constant 1.000000e+00 : f32
    %195 = vector.broadcast %cst_145 : f32 to vector<1x192xf32>
    %196 = arith.addf %195, %194 : vector<1x192xf32>
    %197 = arith.divf %195, %196 : vector<1x192xf32>
    %c2_146 = arith.constant 2 : index
    %c0_147 = arith.constant 0 : index
    %c0_148 = arith.constant 0 : index
    %198 = vector.load %arg9[%c2_146, %c0_147, %c0_148] : memref<4x24x192xbf16, #tpu.memory_space<vmem>>, vector<1x24x192xbf16>
    %199 = vector.shape_cast %198 : vector<1x24x192xbf16> to vector<24x192xbf16>
    %cst_149 = arith.constant dense<0.000000e+00> : vector<64x192xf32>
    %200 = tpu.matmul %3, %199, %cst_149 {dimension_numbers = #tpu.dot_dimension_numbers<[1], [0], [0], [1], [0, 0, 1, 1], [], []>} : vector<64x24xbf16>, vector<24x192xbf16>, vector<64x192xf32> -> vector<64x192xf32>
    %c2_150 = arith.constant 2 : index
    %c0_151 = arith.constant 0 : index
    %c0_152 = arith.constant 0 : index
    %201 = vector.load %arg10[%c2_150, %c0_151, %c0_152] : memref<4x1x192xf32, #tpu.memory_space<vmem>>, vector<1x1x192xf32>
    %202 = vector.shape_cast %201 : vector<1x1x192xf32> to vector<1x192xf32>
    %203 = vector.broadcast %202 : vector<1x192xf32> to vector<64x192xf32>
    %204 = arith.addf %200, %203 : vector<64x192xf32>
    %cst_153 = arith.constant 0.000000e+00 : f32
    %205 = vector.broadcast %cst_153 : f32 to vector<64x192xf32>
    %206 = arith.maximumf %204, %205 : vector<64x192xf32>
    %207 = vector.broadcast %197 : vector<1x192xf32> to vector<64x192xf32>
    %208 = arith.mulf %206, %207 : vector<64x192xf32>
    %209 = arith.truncf %208 : vector<64x192xf32> to vector<64x192xbf16>
    %c2_154 = arith.constant 2 : index
    %c0_155 = arith.constant 0 : index
    %c0_156 = arith.constant 0 : index
    %210 = vector.load %arg11[%c2_154, %c0_155, %c0_156] : memref<4x192x48xbf16, #tpu.memory_space<vmem>>, vector<1x192x48xbf16>
    %211 = vector.shape_cast %210 : vector<1x192x48xbf16> to vector<192x48xbf16>
    %cst_157 = arith.constant dense<0.000000e+00> : vector<64x48xf32>
    %212 = tpu.matmul %209, %211, %cst_157 {dimension_numbers = #tpu.dot_dimension_numbers<[1], [0], [0], [1], [0, 0, 1, 1], [], []>} : vector<64x192xbf16>, vector<192x48xbf16>, vector<64x48xf32> -> vector<64x48xf32>
    %c2_158 = arith.constant 2 : index
    %c0_159 = arith.constant 0 : index
    %c0_160 = arith.constant 0 : index
    %213 = vector.load %arg12[%c2_158, %c0_159, %c0_160] : memref<4x1x48xf32, #tpu.memory_space<vmem>>, vector<1x1x48xf32>
    %214 = vector.shape_cast %213 : vector<1x1x48xf32> to vector<1x48xf32>
    %215 = vector.broadcast %214 : vector<1x48xf32> to vector<64x48xf32>
    %216 = arith.addf %212, %215 : vector<64x48xf32>
    %cst_161 = arith.constant dense<0.000000e+00> : vector<16x48xf32>
    %217 = tpu.matmul %162, %216, %cst_161 {dimension_numbers = #tpu.dot_dimension_numbers<[1], [0], [0], [1], [0, 0, 1, 1], [], []>} : vector<16x64xf32>, vector<64x48xf32>, vector<16x48xf32> -> vector<16x48xf32>
    %218 = arith.addf %181, %217 : vector<16x48xf32>
    %219 = arith.truncf %218 : vector<16x48xf32> to vector<16x48xbf16>
    %c2_162 = arith.constant 2 : index
    %c0_163 = arith.constant 0 : index
    %c0_164 = arith.constant 0 : index
    %220 = vector.load %arg14[%c2_162, %c0_163, %c0_164] : memref<4x48x48xbf16, #tpu.memory_space<vmem>>, vector<1x48x48xbf16>
    %221 = vector.shape_cast %220 : vector<1x48x48xbf16> to vector<48x48xbf16>
    %cst_165 = arith.constant dense<0.000000e+00> : vector<16x48xf32>
    %222 = tpu.matmul %219, %221, %cst_165 {dimension_numbers = #tpu.dot_dimension_numbers<[1], [0], [0], [1], [0, 0, 1, 1], [], []>} : vector<16x48xbf16>, vector<48x48xbf16>, vector<16x48xf32> -> vector<16x48xf32>
    %c2_166 = arith.constant 2 : index
    %c0_167 = arith.constant 0 : index
    %c0_168 = arith.constant 0 : index
    %223 = vector.load %arg15[%c2_166, %c0_167, %c0_168] : memref<4x1x48xf32, #tpu.memory_space<vmem>>, vector<1x1x48xf32>
    %224 = vector.shape_cast %223 : vector<1x1x48xf32> to vector<1x48xf32>
    %225 = vector.broadcast %224 : vector<1x48xf32> to vector<16x48xf32>
    %226 = arith.addf %222, %225 : vector<16x48xf32>
    %cst_169 = arith.constant 0.000000e+00 : f32
    %227 = vector.broadcast %cst_169 : f32 to vector<16x48xf32>
    %228 = arith.maximumf %226, %227 : vector<16x48xf32>
    %229 = arith.truncf %228 : vector<16x48xf32> to vector<16x48xbf16>
    %c2_170 = arith.constant 2 : index
    %c0_171 = arith.constant 0 : index
    %c0_172 = arith.constant 0 : index
    %230 = vector.load %arg16[%c2_170, %c0_171, %c0_172] : memref<4x48x192xbf16, #tpu.memory_space<vmem>>, vector<1x48x192xbf16>
    %231 = vector.shape_cast %230 : vector<1x48x192xbf16> to vector<48x192xbf16>
    %cst_173 = arith.constant dense<0.000000e+00> : vector<16x192xf32>
    %232 = tpu.matmul %229, %231, %cst_173 {dimension_numbers = #tpu.dot_dimension_numbers<[1], [0], [0], [1], [0, 0, 1, 1], [], []>} : vector<16x48xbf16>, vector<48x192xbf16>, vector<16x192xf32> -> vector<16x192xf32>
    %c2_174 = arith.constant 2 : index
    %c0_175 = arith.constant 0 : index
    %c0_176 = arith.constant 0 : index
    %233 = vector.load %arg17[%c2_174, %c0_175, %c0_176] : memref<4x1x192xf32, #tpu.memory_space<vmem>>, vector<1x1x192xf32>
    %234 = vector.shape_cast %233 : vector<1x1x192xf32> to vector<1x192xf32>
    %235 = vector.broadcast %234 : vector<1x192xf32> to vector<16x192xf32>
    %236 = arith.addf %232, %235 : vector<16x192xf32>
    %cst_177 = arith.constant 0.000000e+00 : f32
    %237 = vector.broadcast %cst_177 : f32 to vector<16x192xf32>
    %238 = arith.maximumf %236, %237 : vector<16x192xf32>
    %239 = vector.extract_strided_slice %1 {offsets = [336, 0], sizes = [4, 3], strides = [1, 1]} : vector<340x3xbf16> to vector<4x3xbf16>
    %240 = vector.extract_strided_slice %4 {offsets = [336, 0], sizes = [4, 64], strides = [1, 1]} : vector<340x64xf32> to vector<4x64xf32>
    %c3 = arith.constant 3 : index
    %c0_178 = arith.constant 0 : index
    %c0_179 = arith.constant 0 : index
    %241 = vector.load %arg3[%c3, %c0_178, %c0_179] : memref<4x3x48xbf16, #tpu.memory_space<vmem>>, vector<1x3x48xbf16>
    %242 = vector.shape_cast %241 : vector<1x3x48xbf16> to vector<3x48xbf16>
    %cst_180 = arith.constant dense<0.000000e+00> : vector<4x48xf32>
    %243 = tpu.matmul %239, %242, %cst_180 {dimension_numbers = #tpu.dot_dimension_numbers<[1], [0], [0], [1], [0, 0, 1, 1], [], []>} : vector<4x3xbf16>, vector<3x48xbf16>, vector<4x48xf32> -> vector<4x48xf32>
    %c3_181 = arith.constant 3 : index
    %c0_182 = arith.constant 0 : index
    %c0_183 = arith.constant 0 : index
    %244 = vector.load %arg4[%c3_181, %c0_182, %c0_183] : memref<4x1x48xf32, #tpu.memory_space<vmem>>, vector<1x1x48xf32>
    %245 = vector.shape_cast %244 : vector<1x1x48xf32> to vector<1x48xf32>
    %246 = vector.broadcast %245 : vector<1x48xf32> to vector<4x48xf32>
    %247 = arith.addf %243, %246 : vector<4x48xf32>
    %cst_184 = arith.constant 0.000000e+00 : f32
    %248 = vector.broadcast %cst_184 : f32 to vector<4x48xf32>
    %249 = arith.maximumf %247, %248 : vector<4x48xf32>
    %250 = arith.truncf %249 : vector<4x48xf32> to vector<4x48xbf16>
    %c3_185 = arith.constant 3 : index
    %c0_186 = arith.constant 0 : index
    %c0_187 = arith.constant 0 : index
    %251 = vector.load %arg5[%c3_185, %c0_186, %c0_187] : memref<4x48x48xbf16, #tpu.memory_space<vmem>>, vector<1x48x48xbf16>
    %252 = vector.shape_cast %251 : vector<1x48x48xbf16> to vector<48x48xbf16>
    %cst_188 = arith.constant dense<0.000000e+00> : vector<4x48xf32>
    %253 = tpu.matmul %250, %252, %cst_188 {dimension_numbers = #tpu.dot_dimension_numbers<[1], [0], [0], [1], [0, 0, 1, 1], [], []>} : vector<4x48xbf16>, vector<48x48xbf16>, vector<4x48xf32> -> vector<4x48xf32>
    %c3_189 = arith.constant 3 : index
    %c0_190 = arith.constant 0 : index
    %c0_191 = arith.constant 0 : index
    %254 = vector.load %arg6[%c3_189, %c0_190, %c0_191] : memref<4x1x48xf32, #tpu.memory_space<vmem>>, vector<1x1x48xf32>
    %255 = vector.shape_cast %254 : vector<1x1x48xf32> to vector<1x48xf32>
    %256 = vector.broadcast %255 : vector<1x48xf32> to vector<4x48xf32>
    %257 = arith.addf %253, %256 : vector<4x48xf32>
    %cst_192 = arith.constant 0.000000e+00 : f32
    %258 = vector.broadcast %cst_192 : f32 to vector<4x48xf32>
    %259 = arith.maximumf %257, %258 : vector<4x48xf32>
    %cst_193 = arith.constant dense<0.000000e+00> : vector<48xf32>
    %260 = vector.multi_reduction <add>, %259, %cst_193 [0] : vector<4x48xf32> to vector<48xf32>
    %261 = vector.shape_cast %260 : vector<48xf32> to vector<1x48xf32>
    %cst_194 = arith.constant 4.000000e+00 : f32
    %262 = vector.broadcast %cst_194 : f32 to vector<1x48xf32>
    %263 = arith.divf %261, %262 : vector<1x48xf32>
    %264 = arith.truncf %263 : vector<1x48xf32> to vector<1x48xbf16>
    %c3_195 = arith.constant 3 : index
    %c0_196 = arith.constant 0 : index
    %c0_197 = arith.constant 0 : index
    %265 = vector.load %arg7[%c3_195, %c0_196, %c0_197] : memref<4x48x192xbf16, #tpu.memory_space<vmem>>, vector<1x48x192xbf16>
    %266 = vector.shape_cast %265 : vector<1x48x192xbf16> to vector<48x192xbf16>
    %cst_198 = arith.constant dense<0.000000e+00> : vector<1x192xf32>
    %267 = tpu.matmul %264, %266, %cst_198 {dimension_numbers = #tpu.dot_dimension_numbers<[1], [0], [0], [1], [0, 0, 1, 1], [], []>} : vector<1x48xbf16>, vector<48x192xbf16>, vector<1x192xf32> -> vector<1x192xf32>
    %c3_199 = arith.constant 3 : index
    %c0_200 = arith.constant 0 : index
    %c0_201 = arith.constant 0 : index
    %268 = vector.load %arg8[%c3_199, %c0_200, %c0_201] : memref<4x1x192xf32, #tpu.memory_space<vmem>>, vector<1x1x192xf32>
    %269 = vector.shape_cast %268 : vector<1x1x192xf32> to vector<1x192xf32>
    %270 = arith.addf %267, %269 : vector<1x192xf32>
    %271 = arith.negf %270 : vector<1x192xf32>
    %272 = math.exp %271 : vector<1x192xf32>
    %cst_202 = arith.constant 1.000000e+00 : f32
    %273 = vector.broadcast %cst_202 : f32 to vector<1x192xf32>
    %274 = arith.addf %273, %272 : vector<1x192xf32>
    %275 = arith.divf %273, %274 : vector<1x192xf32>
    %c3_203 = arith.constant 3 : index
    %c0_204 = arith.constant 0 : index
    %c0_205 = arith.constant 0 : index
    %276 = vector.load %arg9[%c3_203, %c0_204, %c0_205] : memref<4x24x192xbf16, #tpu.memory_space<vmem>>, vector<1x24x192xbf16>
    %277 = vector.shape_cast %276 : vector<1x24x192xbf16> to vector<24x192xbf16>
    %cst_206 = arith.constant dense<0.000000e+00> : vector<64x192xf32>
    %278 = tpu.matmul %3, %277, %cst_206 {dimension_numbers = #tpu.dot_dimension_numbers<[1], [0], [0], [1], [0, 0, 1, 1], [], []>} : vector<64x24xbf16>, vector<24x192xbf16>, vector<64x192xf32> -> vector<64x192xf32>
    %c3_207 = arith.constant 3 : index
    %c0_208 = arith.constant 0 : index
    %c0_209 = arith.constant 0 : index
    %279 = vector.load %arg10[%c3_207, %c0_208, %c0_209] : memref<4x1x192xf32, #tpu.memory_space<vmem>>, vector<1x1x192xf32>
    %280 = vector.shape_cast %279 : vector<1x1x192xf32> to vector<1x192xf32>
    %281 = vector.broadcast %280 : vector<1x192xf32> to vector<64x192xf32>
    %282 = arith.addf %278, %281 : vector<64x192xf32>
    %cst_210 = arith.constant 0.000000e+00 : f32
    %283 = vector.broadcast %cst_210 : f32 to vector<64x192xf32>
    %284 = arith.maximumf %282, %283 : vector<64x192xf32>
    %285 = vector.broadcast %275 : vector<1x192xf32> to vector<64x192xf32>
    %286 = arith.mulf %284, %285 : vector<64x192xf32>
    %287 = arith.truncf %286 : vector<64x192xf32> to vector<64x192xbf16>
    %c3_211 = arith.constant 3 : index
    %c0_212 = arith.constant 0 : index
    %c0_213 = arith.constant 0 : index
    %288 = vector.load %arg11[%c3_211, %c0_212, %c0_213] : memref<4x192x48xbf16, #tpu.memory_space<vmem>>, vector<1x192x48xbf16>
    %289 = vector.shape_cast %288 : vector<1x192x48xbf16> to vector<192x48xbf16>
    %cst_214 = arith.constant dense<0.000000e+00> : vector<64x48xf32>
    %290 = tpu.matmul %287, %289, %cst_214 {dimension_numbers = #tpu.dot_dimension_numbers<[1], [0], [0], [1], [0, 0, 1, 1], [], []>} : vector<64x192xbf16>, vector<192x48xbf16>, vector<64x48xf32> -> vector<64x48xf32>
    %c3_215 = arith.constant 3 : index
    %c0_216 = arith.constant 0 : index
    %c0_217 = arith.constant 0 : index
    %291 = vector.load %arg12[%c3_215, %c0_216, %c0_217] : memref<4x1x48xf32, #tpu.memory_space<vmem>>, vector<1x1x48xf32>
    %292 = vector.shape_cast %291 : vector<1x1x48xf32> to vector<1x48xf32>
    %293 = vector.broadcast %292 : vector<1x48xf32> to vector<64x48xf32>
    %294 = arith.addf %290, %293 : vector<64x48xf32>
    %cst_218 = arith.constant dense<0.000000e+00> : vector<4x48xf32>
    %295 = tpu.matmul %240, %294, %cst_218 {dimension_numbers = #tpu.dot_dimension_numbers<[1], [0], [0], [1], [0, 0, 1, 1], [], []>} : vector<4x64xf32>, vector<64x48xf32>, vector<4x48xf32> -> vector<4x48xf32>
    %296 = arith.addf %259, %295 : vector<4x48xf32>
    %297 = arith.truncf %296 : vector<4x48xf32> to vector<4x48xbf16>
    %c3_219 = arith.constant 3 : index
    %c0_220 = arith.constant 0 : index
    %c0_221 = arith.constant 0 : index
    %298 = vector.load %arg14[%c3_219, %c0_220, %c0_221] : memref<4x48x48xbf16, #tpu.memory_space<vmem>>, vector<1x48x48xbf16>
    %299 = vector.shape_cast %298 : vector<1x48x48xbf16> to vector<48x48xbf16>
    %cst_222 = arith.constant dense<0.000000e+00> : vector<4x48xf32>
    %300 = tpu.matmul %297, %299, %cst_222 {dimension_numbers = #tpu.dot_dimension_numbers<[1], [0], [0], [1], [0, 0, 1, 1], [], []>} : vector<4x48xbf16>, vector<48x48xbf16>, vector<4x48xf32> -> vector<4x48xf32>
    %c3_223 = arith.constant 3 : index
    %c0_224 = arith.constant 0 : index
    %c0_225 = arith.constant 0 : index
    %301 = vector.load %arg15[%c3_223, %c0_224, %c0_225] : memref<4x1x48xf32, #tpu.memory_space<vmem>>, vector<1x1x48xf32>
    %302 = vector.shape_cast %301 : vector<1x1x48xf32> to vector<1x48xf32>
    %303 = vector.broadcast %302 : vector<1x48xf32> to vector<4x48xf32>
    %304 = arith.addf %300, %303 : vector<4x48xf32>
    %cst_226 = arith.constant 0.000000e+00 : f32
    %305 = vector.broadcast %cst_226 : f32 to vector<4x48xf32>
    %306 = arith.maximumf %304, %305 : vector<4x48xf32>
    %307 = arith.truncf %306 : vector<4x48xf32> to vector<4x48xbf16>
    %c3_227 = arith.constant 3 : index
    %c0_228 = arith.constant 0 : index
    %c0_229 = arith.constant 0 : index
    %308 = vector.load %arg16[%c3_227, %c0_228, %c0_229] : memref<4x48x192xbf16, #tpu.memory_space<vmem>>, vector<1x48x192xbf16>
    %309 = vector.shape_cast %308 : vector<1x48x192xbf16> to vector<48x192xbf16>
    %cst_230 = arith.constant dense<0.000000e+00> : vector<4x192xf32>
    %310 = tpu.matmul %307, %309, %cst_230 {dimension_numbers = #tpu.dot_dimension_numbers<[1], [0], [0], [1], [0, 0, 1, 1], [], []>} : vector<4x48xbf16>, vector<48x192xbf16>, vector<4x192xf32> -> vector<4x192xf32>
    %c3_231 = arith.constant 3 : index
    %c0_232 = arith.constant 0 : index
    %c0_233 = arith.constant 0 : index
    %311 = vector.load %arg17[%c3_231, %c0_232, %c0_233] : memref<4x1x192xf32, #tpu.memory_space<vmem>>, vector<1x1x192xf32>
    %312 = vector.shape_cast %311 : vector<1x1x192xf32> to vector<1x192xf32>
    %313 = vector.broadcast %312 : vector<1x192xf32> to vector<4x192xf32>
    %314 = arith.addf %310, %313 : vector<4x192xf32>
    %cst_234 = arith.constant 0.000000e+00 : f32
    %315 = vector.broadcast %cst_234 : f32 to vector<4x192xf32>
    %316 = arith.maximumf %314, %315 : vector<4x192xf32>
    %317 = tpu.concatenate %160, %238, %316 in 0 : vector<64x192xf32>, vector<16x192xf32>, vector<4x192xf32> -> vector<84x192xf32>
    %c0_235 = arith.constant 0 : index
    %c0_236 = arith.constant 0 : index
    %318 = vector.load %arg18[%c0_235, %c0_236] : memref<256x84xf32, #tpu.memory_space<vmem>>, vector<256x84xf32>
    %cst_237 = arith.constant dense<0.000000e+00> : vector<256x192xf32>
    %319 = tpu.matmul %318, %317, %cst_237 {dimension_numbers = #tpu.dot_dimension_numbers<[1], [0], [0], [1], [0, 0, 1, 1], [], []>} : vector<256x84xf32>, vector<84x192xf32>, vector<256x192xf32> -> vector<256x192xf32>
    %320 = arith.addf %82, %319 : vector<256x192xf32>
    %321 = arith.truncf %320 : vector<256x192xf32> to vector<256x192xbf16>
    %c0_238 = arith.constant 0 : index
    %c0_239 = arith.constant 0 : index
    %c0_240 = arith.constant 0 : index
    %322 = vector.load %arg19[%c0_238, %c0_239, %c0_240] : memref<3x192x192xbf16, #tpu.memory_space<vmem>>, vector<1x192x192xbf16>
    %323 = vector.shape_cast %322 : vector<1x192x192xbf16> to vector<192x192xbf16>
    %cst_241 = arith.constant dense<0.000000e+00> : vector<256x192xf32>
    %324 = tpu.matmul %321, %323, %cst_241 {dimension_numbers = #tpu.dot_dimension_numbers<[1], [0], [0], [1], [0, 0, 1, 1], [], []>} : vector<256x192xbf16>, vector<192x192xbf16>, vector<256x192xf32> -> vector<256x192xf32>
    %c0_242 = arith.constant 0 : index
    %c0_243 = arith.constant 0 : index
    %c0_244 = arith.constant 0 : index
    %325 = vector.load %arg20[%c0_242, %c0_243, %c0_244] : memref<3x1x192xf32, #tpu.memory_space<vmem>>, vector<1x1x192xf32>
    %326 = vector.shape_cast %325 : vector<1x1x192xf32> to vector<1x192xf32>
    %327 = vector.broadcast %326 : vector<1x192xf32> to vector<256x192xf32>
    %328 = arith.addf %324, %327 : vector<256x192xf32>
    %cst_245 = arith.constant 0.000000e+00 : f32
    %329 = vector.broadcast %cst_245 : f32 to vector<256x192xf32>
    %330 = arith.maximumf %328, %329 : vector<256x192xf32>
    %331 = arith.truncf %330 : vector<256x192xf32> to vector<256x192xbf16>
    %c1_246 = arith.constant 1 : index
    %c0_247 = arith.constant 0 : index
    %c0_248 = arith.constant 0 : index
    %332 = vector.load %arg19[%c1_246, %c0_247, %c0_248] : memref<3x192x192xbf16, #tpu.memory_space<vmem>>, vector<1x192x192xbf16>
    %333 = vector.shape_cast %332 : vector<1x192x192xbf16> to vector<192x192xbf16>
    %cst_249 = arith.constant dense<0.000000e+00> : vector<256x192xf32>
    %334 = tpu.matmul %331, %333, %cst_249 {dimension_numbers = #tpu.dot_dimension_numbers<[1], [0], [0], [1], [0, 0, 1, 1], [], []>} : vector<256x192xbf16>, vector<192x192xbf16>, vector<256x192xf32> -> vector<256x192xf32>
    %c1_250 = arith.constant 1 : index
    %c0_251 = arith.constant 0 : index
    %c0_252 = arith.constant 0 : index
    %335 = vector.load %arg20[%c1_250, %c0_251, %c0_252] : memref<3x1x192xf32, #tpu.memory_space<vmem>>, vector<1x1x192xf32>
    %336 = vector.shape_cast %335 : vector<1x1x192xf32> to vector<1x192xf32>
    %337 = vector.broadcast %336 : vector<1x192xf32> to vector<256x192xf32>
    %338 = arith.addf %334, %337 : vector<256x192xf32>
    %cst_253 = arith.constant 0.000000e+00 : f32
    %339 = vector.broadcast %cst_253 : f32 to vector<256x192xf32>
    %340 = arith.maximumf %338, %339 : vector<256x192xf32>
    %341 = arith.truncf %340 : vector<256x192xf32> to vector<256x192xbf16>
    %c2_254 = arith.constant 2 : index
    %c0_255 = arith.constant 0 : index
    %c0_256 = arith.constant 0 : index
    %342 = vector.load %arg19[%c2_254, %c0_255, %c0_256] : memref<3x192x192xbf16, #tpu.memory_space<vmem>>, vector<1x192x192xbf16>
    %343 = vector.shape_cast %342 : vector<1x192x192xbf16> to vector<192x192xbf16>
    %cst_257 = arith.constant dense<0.000000e+00> : vector<256x192xf32>
    %344 = tpu.matmul %341, %343, %cst_257 {dimension_numbers = #tpu.dot_dimension_numbers<[1], [0], [0], [1], [0, 0, 1, 1], [], []>} : vector<256x192xbf16>, vector<192x192xbf16>, vector<256x192xf32> -> vector<256x192xf32>
    %c2_258 = arith.constant 2 : index
    %c0_259 = arith.constant 0 : index
    %c0_260 = arith.constant 0 : index
    %345 = vector.load %arg20[%c2_258, %c0_259, %c0_260] : memref<3x1x192xf32, #tpu.memory_space<vmem>>, vector<1x1x192xf32>
    %346 = vector.shape_cast %345 : vector<1x1x192xf32> to vector<1x192xf32>
    %347 = vector.broadcast %346 : vector<1x192xf32> to vector<256x192xf32>
    %348 = arith.addf %344, %347 : vector<256x192xf32>
    %cst_261 = arith.constant 0.000000e+00 : f32
    %349 = vector.broadcast %cst_261 : f32 to vector<256x192xf32>
    %350 = arith.maximumf %348, %349 : vector<256x192xf32>
    %c0_262 = arith.constant 0 : index
    %c0_263 = arith.constant 0 : index
    %351 = vector.load %arg21[%c0_262, %c0_263] : memref<192x8xf32, #tpu.memory_space<vmem>>, vector<192x8xf32>
    %cst_264 = arith.constant dense<0.000000e+00> : vector<256x8xf32>
    %352 = tpu.matmul %330, %351, %cst_264 {dimension_numbers = #tpu.dot_dimension_numbers<[1], [0], [0], [1], [0, 0, 1, 1], [], []>} : vector<256x192xf32>, vector<192x8xf32>, vector<256x8xf32> -> vector<256x8xf32>
    %c0_265 = arith.constant 0 : index
    %c0_266 = arith.constant 0 : index
    %353 = vector.load %arg22[%c0_265, %c0_266] : memref<192x8xf32, #tpu.memory_space<vmem>>, vector<192x8xf32>
    %cst_267 = arith.constant dense<0.000000e+00> : vector<256x8xf32>
    %354 = tpu.matmul %340, %353, %cst_267 {dimension_numbers = #tpu.dot_dimension_numbers<[1], [0], [0], [1], [0, 0, 1, 1], [], []>} : vector<256x192xf32>, vector<192x8xf32>, vector<256x8xf32> -> vector<256x8xf32>
    %355 = arith.addf %352, %354 : vector<256x8xf32>
    %c0_268 = arith.constant 0 : index
    %c0_269 = arith.constant 0 : index
    %356 = vector.load %arg23[%c0_268, %c0_269] : memref<192x8xf32, #tpu.memory_space<vmem>>, vector<192x8xf32>
    %cst_270 = arith.constant dense<0.000000e+00> : vector<256x8xf32>
    %357 = tpu.matmul %350, %356, %cst_270 {dimension_numbers = #tpu.dot_dimension_numbers<[1], [0], [0], [1], [0, 0, 1, 1], [], []>} : vector<256x192xf32>, vector<192x8xf32>, vector<256x8xf32> -> vector<256x8xf32>
    %358 = arith.addf %355, %357 : vector<256x8xf32>
    %c0_271 = arith.constant 0 : index
    %c0_272 = arith.constant 0 : index
    %359 = vector.load %arg24[%c0_271, %c0_272] : memref<1x8xf32, #tpu.memory_space<vmem>>, vector<1x8xf32>
    %360 = vector.broadcast %359 : vector<1x8xf32> to vector<256x8xf32>
    %361 = arith.addf %358, %360 : vector<256x8xf32>
    %362 = tpu.transpose %361, [1, 0] : vector<256x8xf32> -> vector<8x256xf32>
    %363 = arith.truncf %362 : vector<8x256xf32> to vector<8x256xbf16>
    %c0_273 = arith.constant 0 : index
    %c0_274 = arith.constant 0 : index
    %364 = vector.load %arg25[%c0_273, %c0_274] : memref<256x4096xbf16, #tpu.memory_space<vmem>>, vector<256x4096xbf16>
    %cst_275 = arith.constant dense<0.000000e+00> : vector<8x4096xf32>
    %365 = tpu.matmul %363, %364, %cst_275 {dimension_numbers = #tpu.dot_dimension_numbers<[1], [0], [0], [1], [0, 0, 1, 1], [], []>} : vector<8x256xbf16>, vector<256x4096xbf16>, vector<8x4096xf32> -> vector<8x4096xf32>
    %c0_276 = arith.constant 0 : index
    %c0_277 = arith.constant 0 : index
    %c0_278 = arith.constant 0 : index
    %366 = vector.load %arg26[%c0_276, %c0_277, %c0_278] : memref<1x8x4096xf32, #tpu.memory_space<vmem>>, vector<1x8x4096xf32>
    %367 = vector.shape_cast %366 : vector<1x8x4096xf32> to vector<8x4096xf32>
    %368 = vector.shape_cast %365 : vector<8x4096xf32> to vector<1x8x4096xf32>
    tpu.vector_store %arg26[%c0_276, %c0_277, %c0_278], %368 {strides = array<i32>} : memref<1x8x4096xf32, #tpu.memory_space<vmem>>, vector<1x8x4096xf32>,
    return
  }
  func.func @transform_0(%arg0: i32) -> (i32, i32, i32) {
    %c0_i32 = arith.constant 0 : i32
    %c0_i32_0 = arith.constant 0 : i32
    %c0_i32_1 = arith.constant 0 : i32
    return %arg0, %c0_i32, %c0_i32_0 : i32, i32, i32
  }
  func.func @transform_1(%arg0: i32) -> (i32, i32, i32) {
    %c0_i32 = arith.constant 0 : i32
    %c0_i32_0 = arith.constant 0 : i32
    %c0_i32_1 = arith.constant 0 : i32
    return %arg0, %c0_i32, %c0_i32_0 : i32, i32, i32
  }
  func.func @transform_2(%arg0: i32) -> (i32, i32, i32) {
    %c0_i32 = arith.constant 0 : i32
    %c0_i32_0 = arith.constant 0 : i32
    %c0_i32_1 = arith.constant 0 : i32
    %c0_i32_2 = arith.constant 0 : i32
    return %c0_i32, %c0_i32_0, %c0_i32_1 : i32, i32, i32
  }
  func.func @transform_3(%arg0: i32) -> (i32, i32, i32) {
    %c0_i32 = arith.constant 0 : i32
    %c0_i32_0 = arith.constant 0 : i32
    %c0_i32_1 = arith.constant 0 : i32
    %c0_i32_2 = arith.constant 0 : i32
    return %c0_i32, %c0_i32_0, %c0_i32_1 : i32, i32, i32
  }
  func.func @transform_4(%arg0: i32) -> (i32, i32, i32) {
    %c0_i32 = arith.constant 0 : i32
    %c0_i32_0 = arith.constant 0 : i32
    %c0_i32_1 = arith.constant 0 : i32
    %c0_i32_2 = arith.constant 0 : i32
    return %c0_i32, %c0_i32_0, %c0_i32_1 : i32, i32, i32
  }
  func.func @transform_5(%arg0: i32) -> (i32, i32, i32) {
    %c0_i32 = arith.constant 0 : i32
    %c0_i32_0 = arith.constant 0 : i32
    %c0_i32_1 = arith.constant 0 : i32
    %c0_i32_2 = arith.constant 0 : i32
    return %c0_i32, %c0_i32_0, %c0_i32_1 : i32, i32, i32
  }
  func.func @transform_6(%arg0: i32) -> (i32, i32, i32) {
    %c0_i32 = arith.constant 0 : i32
    %c0_i32_0 = arith.constant 0 : i32
    %c0_i32_1 = arith.constant 0 : i32
    %c0_i32_2 = arith.constant 0 : i32
    return %c0_i32, %c0_i32_0, %c0_i32_1 : i32, i32, i32
  }
  func.func @transform_7(%arg0: i32) -> (i32, i32, i32) {
    %c0_i32 = arith.constant 0 : i32
    %c0_i32_0 = arith.constant 0 : i32
    %c0_i32_1 = arith.constant 0 : i32
    %c0_i32_2 = arith.constant 0 : i32
    return %c0_i32, %c0_i32_0, %c0_i32_1 : i32, i32, i32
  }
  func.func @transform_8(%arg0: i32) -> (i32, i32, i32) {
    %c0_i32 = arith.constant 0 : i32
    %c0_i32_0 = arith.constant 0 : i32
    %c0_i32_1 = arith.constant 0 : i32
    %c0_i32_2 = arith.constant 0 : i32
    return %c0_i32, %c0_i32_0, %c0_i32_1 : i32, i32, i32
  }
  func.func @transform_9(%arg0: i32) -> (i32, i32, i32) {
    %c0_i32 = arith.constant 0 : i32
    %c0_i32_0 = arith.constant 0 : i32
    %c0_i32_1 = arith.constant 0 : i32
    %c0_i32_2 = arith.constant 0 : i32
    return %c0_i32, %c0_i32_0, %c0_i32_1 : i32, i32, i32
  }
  func.func @transform_10(%arg0: i32) -> (i32, i32, i32) {
    %c0_i32 = arith.constant 0 : i32
    %c0_i32_0 = arith.constant 0 : i32
    %c0_i32_1 = arith.constant 0 : i32
    %c0_i32_2 = arith.constant 0 : i32
    return %c0_i32, %c0_i32_0, %c0_i32_1 : i32, i32, i32
  }
  func.func @transform_11(%arg0: i32) -> (i32, i32, i32) {
    %c0_i32 = arith.constant 0 : i32
    %c0_i32_0 = arith.constant 0 : i32
    %c0_i32_1 = arith.constant 0 : i32
    %c0_i32_2 = arith.constant 0 : i32
    return %c0_i32, %c0_i32_0, %c0_i32_1 : i32, i32, i32
  }
  func.func @transform_12(%arg0: i32) -> (i32, i32) {
    %c0_i32 = arith.constant 0 : i32
    %c0_i32_0 = arith.constant 0 : i32
    %c0_i32_1 = arith.constant 0 : i32
    return %c0_i32, %c0_i32_0 : i32, i32
  }
  func.func @transform_13(%arg0: i32) -> (i32, i32, i32) {
    %c0_i32 = arith.constant 0 : i32
    %c0_i32_0 = arith.constant 0 : i32
    %c0_i32_1 = arith.constant 0 : i32
    %c0_i32_2 = arith.constant 0 : i32
    return %c0_i32, %c0_i32_0, %c0_i32_1 : i32, i32, i32
  }
  func.func @transform_14(%arg0: i32) -> (i32, i32, i32) {
    %c0_i32 = arith.constant 0 : i32
    %c0_i32_0 = arith.constant 0 : i32
    %c0_i32_1 = arith.constant 0 : i32
    %c0_i32_2 = arith.constant 0 : i32
    return %c0_i32, %c0_i32_0, %c0_i32_1 : i32, i32, i32
  }
  func.func @transform_15(%arg0: i32) -> (i32, i32, i32) {
    %c0_i32 = arith.constant 0 : i32
    %c0_i32_0 = arith.constant 0 : i32
    %c0_i32_1 = arith.constant 0 : i32
    %c0_i32_2 = arith.constant 0 : i32
    return %c0_i32, %c0_i32_0, %c0_i32_1 : i32, i32, i32
  }
  func.func @transform_16(%arg0: i32) -> (i32, i32, i32) {
    %c0_i32 = arith.constant 0 : i32
    %c0_i32_0 = arith.constant 0 : i32
    %c0_i32_1 = arith.constant 0 : i32
    %c0_i32_2 = arith.constant 0 : i32
    return %c0_i32, %c0_i32_0, %c0_i32_1 : i32, i32, i32
  }
  func.func @transform_17(%arg0: i32) -> (i32, i32) {
    %c0_i32 = arith.constant 0 : i32
    %c0_i32_0 = arith.constant 0 : i32
    %c0_i32_1 = arith.constant 0 : i32
    return %c0_i32, %c0_i32_0 : i32, i32
  }
  func.func @transform_18(%arg0: i32) -> (i32, i32, i32) {
    %c0_i32 = arith.constant 0 : i32
    %c0_i32_0 = arith.constant 0 : i32
    %c0_i32_1 = arith.constant 0 : i32
    %c0_i32_2 = arith.constant 0 : i32
    return %c0_i32, %c0_i32_0, %c0_i32_1 : i32, i32, i32
  }
  func.func @transform_19(%arg0: i32) -> (i32, i32, i32) {
    %c0_i32 = arith.constant 0 : i32
    %c0_i32_0 = arith.constant 0 : i32
    %c0_i32_1 = arith.constant 0 : i32
    %c0_i32_2 = arith.constant 0 : i32
    return %c0_i32, %c0_i32_0, %c0_i32_1 : i32, i32, i32
  }
  func.func @transform_20(%arg0: i32) -> (i32, i32) {
    %c0_i32 = arith.constant 0 : i32
    %c0_i32_0 = arith.constant 0 : i32
    %c0_i32_1 = arith.constant 0 : i32
    return %c0_i32, %c0_i32_0 : i32, i32
  }
  func.func @transform_21(%arg0: i32) -> (i32, i32) {
    %c0_i32 = arith.constant 0 : i32
    %c0_i32_0 = arith.constant 0 : i32
    %c0_i32_1 = arith.constant 0 : i32
    return %c0_i32, %c0_i32_0 : i32, i32
  }
  func.func @transform_22(%arg0: i32) -> (i32, i32) {
    %c0_i32 = arith.constant 0 : i32
    %c0_i32_0 = arith.constant 0 : i32
    %c0_i32_1 = arith.constant 0 : i32
    return %c0_i32, %c0_i32_0 : i32, i32
  }
  func.func @transform_23(%arg0: i32) -> (i32, i32) {
    %c0_i32 = arith.constant 0 : i32
    %c0_i32_0 = arith.constant 0 : i32
    %c0_i32_1 = arith.constant 0 : i32
    return %c0_i32, %c0_i32_0 : i32, i32
  }
  func.func @transform_24(%arg0: i32) -> (i32, i32) {
    %c0_i32 = arith.constant 0 : i32
    %c0_i32_0 = arith.constant 0 : i32
    %c0_i32_1 = arith.constant 0 : i32
    return %c0_i32, %c0_i32_0 : i32, i32
  }
  func.func @transform_25(%arg0: i32) -> (i32, i32, i32) {
    %c0_i32 = arith.constant 0 : i32
    %c0_i32_0 = arith.constant 0 : i32
    %c0_i32_1 = arith.constant 0 : i32
    return %arg0, %c0_i32, %c0_i32_0 : i32, i32, i32
  }
}

</mosaic_0001>

<bundles_post_ra>
// kernel: fdnet_forward.1
= control target key start
LH: loop header
LB: loop body
LE: loop exit
PB: predicated region body
PF: predicated region fallthrough
CT: control target
= control target key end

     0   :  { %s15414_s29 = smov 0   ;;  %s20572_s0 = inlined_call_operand.vmem [shape: bf16[2,340,3], index: 0, kind: input, shape index: {}]   ;;  %s20573_s1 = inlined_call_operand.vmem [shape: bf16[2,64,24], index: 1, kind: input, shape index: {}]   ;;  %s20574_s2 = inlined_call_operand.vmem [shape: bf16[4,3,48], index: 2, kind: input, shape index: {}]   ;;  %s20575_s3 = inlined_call_operand.vmem [shape: f32[4,1,48], index: 3, kind: input, shape index: {}]   ;;  %s20576_s4 = inlined_call_operand.vmem [shape: bf16[4,48,48], index: 4, kind: input, shape index: {}]   ;;  %s20577_s5 = inlined_call_operand.vmem [shape: f32[4,1,48], index: 5, kind: input, shape index: {}]   ;;  %s20578_s6 = inlined_call_operand.vmem [shape: bf16[4,48,192], index: 6, kind: input, shape index: {}]   ;;  %s20579_s7 = inlined_call_operand.vmem [shape: f32[4,1,192], index: 7, kind: input, shape index: {}]   ;;  %s20580_s8 = inlined_call_operand.vmem [shape: bf16[4,24,192], index: 8, kind: input, shape index: {}]   ;;  %s20581_s9 = inlined_call_operand.vmem [shape: f32[4,1,192], index: 9, kind: input, shape index: {}]   ;;  %s20582_s10 = inlined_call_operand.vmem [shape: bf16[4,192,48], index: 10, kind: input, shape index: {}]   ;;  %s20583_s11 = inlined_call_operand.vmem [shape: f32[4,1,48], index: 11, kind: input, shape index: {}]   ;;  %s20584_s12 = inlined_call_operand.vmem [shape: f32[340,64], index: 12, kind: input, shape index: {}]   ;;  %s20585_s13 = inlined_call_operand.vmem [shape: bf16[4,48,48], index: 13, kind: input, shape index: {}]   ;;  %s20586_s14 = inlined_call_operand.vmem [shape: f32[4,1,48], index: 14, kind: input, shape index: {}]   ;;  %s20587_s15 = inlined_call_operand.vmem [shape: bf16[4,48,192], index: 15, kind: input, shape index: {}]   ;;  %s20588_s16 = inlined_call_operand.vmem [shape: f32[4,1,192], index: 16, kind: input, shape index: {}]   ;;  %s20589_s17 = inlined_call_operand.vmem [shape: f32[256,84], index: 17, kind: input, shape index: {}]   ;;  %s20590_s18 = inlined_call_operand.vmem [shape: bf16[3,192,192], index: 18, kind: input, shape index: {}]   ;;  %s20591_s19 = inlined_call_operand.vmem [shape: f32[3,1,192], index: 19, kind: input, shape index: {}]   ;;  %s20592_s20 = inlined_call_operand.vmem [shape: f32[192,8], index: 20, kind: input, shape index: {}]   ;;  %s20593_s21 = inlined_call_operand.vmem [shape: f32[192,8], index: 21, kind: input, shape index: {}]   ;;  %s20594_s22 = inlined_call_operand.vmem [shape: f32[192,8], index: 22, kind: input, shape index: {}]   ;;  %s20595_s23 = inlined_call_operand.vmem [shape: f32[1,8], index: 23, kind: input, shape index: {}]   ;;  %s20596_s24 = inlined_call_operand.vmem [shape: bf16[256,4096], index: 24, kind: input, shape index: {}]   ;;  %s20597_s25 = inlined_call_operand.vmem [shape: f32[2,8,4096], index: 25, kind: output, shape index: {}]  }
   0x1   :  { %20758 = sst [smem:[#allocation58_spill]] %s20572_s0 }
   0x2   :  { %20759 = sst [smem:[#allocation59_spill]] %s20573_s1 }
   0x3   :  { %20760 = sst [smem:[#allocation60_spill]] %s20574_s2 }
   0x4   :  { %20761 = sst [smem:[#allocation61_spill]] %s20575_s3 }
   0x5   :  { %20762 = sst [smem:[#allocation62_spill]] %s20576_s4 }
   0x6   :  { %20763 = sst [smem:[#allocation63_spill]] %s20577_s5 }
   0x7   :  { %20764 = sst [smem:[#allocation64_spill]] %s20578_s6 }
   0x8   :  { %20765 = sst [smem:[#allocation65_spill]] %s20579_s7 }
   0x9   :  { %20766 = sst [smem:[#allocation66_spill]] %s20580_s8 }
   0xa   :  { %20767 = sst [smem:[#allocation67_spill]] %s20581_s9 }
   0xb   :  { %20768 = sst [smem:[#allocation68_spill]] %s20592_s20 }
   0xc   :  { %20769 = sst [smem:[#allocation69_spill]] %s20594_s22 }
   0xd   :  { %20770 = sst [smem:[#allocation70_spill]] %s20595_s23 }
   0xe   :  { %20771 = sst [smem:[#allocation71_spill]] %s20596_s24 }
   0xf   :  { %20772 = sst [smem:[#allocation72_spill]] %s20597_s25 }
  0x10 LB: > { %20773 = sst [smem:[#allocation2_spill]] %s15277_s29  ;;  %s12836_s2 = sadd.s32 4294967295, %s15277_s29   ;;  %s15277_s29 = sphi %s15414_s29, %s35_s29  }
  0x11   : > { %p12840_p0 = scmp.ge.s32.totalorder %s15277_s29, 1  ;;  %p697_p1 = scmp.lt.s32.totalorder %s15277_s29, 3 }
  0x13   : > { %p698_p2 = pnand %p12840_p0, %p697_p1 }
  0x15   : > { %701 = sbr.rel (%p698_p2) target bundleno = 7563 (0x1d8b), region = 120 }
  0x1c   : > { %s20774_s7 = sld [smem:[#allocation60_spill]]  ;;  %vm1017_vm0 = vcmask 1040384   ;;  %vm1018_vm1 = vcmask 1041408   ;;  %p770_p3 = scmp.lt.s32.totalorder %s12836_s2, 1  ;;  %v15279_v1 = vmov 65535   ;;  %vm968_vm2 = vcmask 23552  }
  0x1d   : > { %v1019_v2 = vsel %vm1017_vm0, 4294967295, %v15279_v1  ;;  %s20776_s1 = sld [smem:[#allocation62_spill]]  ;;  %s20777_s28 = sld [smem:[#allocation58_spill]]  ;;  %vm1264_vm3 = vcmask 392192   ;;  %vm1745_vm4 = vcmask 1043456   ;;  %vm1732_vm5 = vcmask 195584  }
  0x1e   : > { %v15425_v3 = vsel %vm1018_vm1, %v1019_v2, 0  ;;  %s21069_s2 = smov (!%p770_p3, %s12836_s2), 1  ;;  %s20780_s30 = sld [smem:[#allocation66_spill]]  ;;  %vm1976_vm6 = vcmask 523264   ;;  %vm15282_vm7 = vmmov 0   ;;  %vm5191_vm8 = vcmask 388096  }
  0x1f   : > { %20775 = sst [smem:[#allocation3_spill]] %s21069_s2  ;;  %s14883_s8 = smul.u32 172, %s21069_s2  ;;  %vm5930_vm9 = vcmask 687104  }
  0x20   : > { %s14194_s3 = sshll.u32 %s21069_s2, 5  ;;  %s20781_s27 = sld [smem:[#allocation59_spill]] }
  0x21   : > { %s20782_s29 = sld [smem:[#allocation63_spill]]  ;;  %s20793_s4 = sld [smem:[#allocation67_spill]] }
  0x22   : > { %v880_v0 = vld [vmem:[%s20774_s7] sm:$0x3]  ;;  %s20972_s24 = sld [smem:[#allocation69_spill]]  ;;  %s20973_s0 = sld [smem:[#allocation68_spill]] }
  0x23   : > { %v14950_v4 = vld [vmem:[%s20776_s1] sm:$0xff]   ;;  %v1022_v5 = vand.u32 %v15425_v3, %v880_v0  ;;  %s15437_s9 = scalar_lea.vmem %s20777_s28, %s14883_s8  ;;  %v14951_v22 = vld [vmem:[%s20776_s1 + $0x8] sm:$0xff]   ;;  %v14952_v23 = vld [vmem:[%s20776_s1 + $0x10] sm:$0xff]   ;;  %s20778_s8 = sld [smem:[#allocation61_spill]] }
  0x24   : > { %14399 = vmatprep.subr.bf16.mxu1 %v14950_v4  ;;  %v14934_v6 = vld [vmem:[%s15437_s9] sm:$0xff]   ;;  %v14935_v7 = vld [vmem:[%s15437_s9 + $0x8] sm:$0xff]   ;;  %v14936_v8 = vld [vmem:[%s15437_s9 + $0x10] sm:$0xff]   ;;  %s20779_s28 = sld [smem:[#allocation64_spill]]  ;;  %s21063_s2 = sld [smem:[#allocation71_spill]] }
  0x25   : > { %14365 = vmatprep.subr.bf16.mxu0 %v1022_v5  ;;  %14400 = vmatpush3.bf16.msra.mxu1 %v14950_v4  ;;  %v14937_v9 = vld [vmem:[%s15437_s9 + $0x18] sm:$0xff]   ;;  %v14938_v10 = vld [vmem:[%s15437_s9 + $0x20] sm:$0xff]   ;;  %v14939_v11 = vld [vmem:[%s15437_s9 + $0x28] sm:$0xff]   ;;  %s21064_s22 = sld [smem:[#allocation70_spill]] }
  0x26   : > { %14366 = vmatpush3.bf16.msra.mxu0 %v1022_v5  ;;  %14367 = vmatprep.mubr.msk.bf16.mxu0 %vm968_vm2, %v14934_v6  ;;  %v14940_v12 = vld [vmem:[%s15437_s9 + $0x30] sm:$0xff]   ;;  %v14941_v13 = vld [vmem:[%s15437_s9 + $0x38] sm:$0xff]   ;;  %v14942_v14 = vld [vmem:[%s15437_s9 + $0x40] sm:$0xff]   ;;  %s15557_s25 = scalar_lea.vmem %s20781_s27, %s14194_s3  ;;  %s20791_s3 = sld [smem:[#allocation65_spill]] }
  0x27   : > { %v14943_v15 = vld [vmem:[%s15437_s9 + $0x48] sm:$0xff]   ;;  %v14944_v16 = vld [vmem:[%s15437_s9 + $0x50] sm:$0xff]   ;;  %v14945_v17 = vld [vmem:[%s15437_s9 + $0x58] sm:$0xff]   ;;  %14401 = vmatprep.subr.bf16.mxu1 %v14951_v22  ;;  %s20783_s27 = smov %s20782_s29 }
  0x28   : > { %v14946_v18 = vld [vmem:[%s15437_s9 + $0x60] sm:$0xff]   ;;  %v14947_v19 = vld [vmem:[%s15437_s9 + $0x68] sm:$0xff]   ;;  %v14948_v20 = vld [vmem:[%s15437_s9 + $0x70] sm:$0xff]  }
  0x29   : > { %14368 = vmatmul.mubr.msk.bf16.vlgmr.msra.gmra.mrb[0].mxu0 %vm968_vm2, %v14935_v7  ;;  %v14949_v21 = vld [vmem:[%s15437_s9 + $0x78] sm:$0xff]   ;;  %14402 = vmatpush3.bf16.msra.mxu1 %v14951_v22  ;;  %v15480_v24 = vld [vmem:[%s20778_s8] ss:$0 sm:$0xff] }
  0x2a   : > { %14371 = vmatprep.mubr.msk.bf16.mxu0 %vm968_vm2, %v14936_v8  ;;  %14403 = vmatprep.subr.bf16.mxu1 %v14952_v23 }
  0x2d   : > { %14404 = vmatpush3.bf16.msra.mxu1 %v14952_v23 }
  0x31   : > { %14372 = vmatmul.mubr.msk.bf16.gmra.mrb[4].mxu0 %vm968_vm2, %v14937_v9 }
  0x32   : > { %14375 = vmatprep.mubr.msk.bf16.mxu0 %vm968_vm2, %v14938_v10 }
  0x39   : > { %14376 = vmatmul.mubr.msk.bf16.gmra.mrb[8].mxu0 %vm968_vm2, %v14939_v11 }
  0x3a   : > { %14379 = vmatprep.mubr.msk.bf16.mxu0 %vm968_vm2, %v14940_v12 }
  0x41   : > { %14380 = vmatmul.mubr.msk.bf16.gmra.mrb[12].mxu0 %vm968_vm2, %v14941_v13 }
  0x42   : > { %14383 = vmatprep.mubr.msk.bf16.mxu0 %vm968_vm2, %v14942_v14 }
  0x49   : > { %14384 = vmatmul.mubr.msk.bf16.gmra.mrb[16].mxu0 %vm968_vm2, %v14943_v15 }
  0x4a   : > { %14387 = vmatprep.mubr.msk.bf16.mxu0 %vm968_vm2, %v14944_v16 }
  0x51   : > { %14388 = vmatmul.mubr.msk.bf16.gmra.mrb[20].mxu0 %vm968_vm2, %v14945_v17 }
  0x52   : > { %14391 = vmatprep.mubr.msk.bf16.mxu0 %vm968_vm2, %v14946_v18 }
  0x59   : > { %14392 = vmatmul.mubr.msk.bf16.gmra.mrb[24].mxu0 %vm968_vm2, %v14947_v19 }
  0x5a   : > { %14395 = vmatprep.mubr.msk.bf16.mxu0 %vm968_vm2, %v14948_v20 }
  0x61   : > { %14396 = vmatmul.mubr.msk.bf16.gmra.mrb[28].mxu0 %vm968_vm2, %v14949_v21 }
  0xfc   : > { %v14369_v25 = vpop.f32.mrb[0].mxu0 }
  0xfd   : > { %v1067_v26 = vadd.f32 %v14369_v25, %v15480_v24  ;;  %v1058_v27 = vpop.f32.mrb[1].mxu0 }
  0xfe   : > { %v1059_v28 = vadd.f32 %v15480_v24, %v1058_v27  ;;  %v14370_v29 = vpop.f32.mrb[2].mxu0 }
  0xff   : > { %v1070_v30 = vadd.f32 %v14370_v29, %v15480_v24  ;;  %v1061_v31 = vpop.f32.mrb[3].mxu0  ;;  %v1187_v33 = vmax.f32 %v1067_v26, 0.0 }
 0x100   : > { %v1062_v32 = vadd.f32 %v15480_v24, %v1061_v31  ;;  %v1185_v35 = vmax.f32 %v1059_v28, 0.0 }
 0x101   : > { %v1188_v34 = vmax.f32 %v1070_v30, 0.0 }
 0x102   : > { %v1186_v36 = vmax.f32 %v1062_v32, 0.0 }
 0x103   : > { %v1218_v37 = vpack.c.bf16 %v1188_v34, %v1187_v33 }
 0x104   : > { %v14373_v38 = vpop.f32.mrb[4].mxu0  ;;  %v1217_v39 = vpack.c.bf16 %v1186_v36, %v1185_v35 }
 0x105   : > { %v1083_v40 = vadd.f32 %v14373_v38, %v15480_v24  ;;  %v1074_v41 = vpop.f32.mrb[5].mxu0 }
 0x106   : > { %v1075_v42 = vadd.f32 %v15480_v24, %v1074_v41  ;;  %v14374_v43 = vpop.f32.mrb[6].mxu0  ;;  %14405 = vmatprep.mubr.msk.bf16.mxu1 %vm1264_vm3, %v1217_v39 }
 0x107   : > { %v1086_v44 = vadd.f32 %v14374_v43, %v15480_v24  ;;  %v1077_v45 = vpop.f32.mrb[7].mxu0  ;;  %14406 = vmatmul.mubr.msk.bf16.vlgmr.msra.gmra.mrb[0].mxu1 %vm1264_vm3, %v1218_v37  ;;  %v1191_v47 = vmax.f32 %v1083_v40, 0.0 }
 0x108   : > { %v1078_v46 = vadd.f32 %v15480_v24, %v1077_v45  ;;  %v1189_v49 = vmax.f32 %v1075_v42, 0.0 }
 0x109   : > { %v1192_v48 = vmax.f32 %v1086_v44, 0.0 }
 0x10a   : > { %v1190_v50 = vmax.f32 %v1078_v46, 0.0 }
 0x10b   : > { %v1220_v51 = vpack.c.bf16 %v1192_v48, %v1191_v47 }
 0x10c   : > { %v1219_v52 = vpack.c.bf16 %v1190_v50, %v1189_v49  ;;  %v14377_v53 = vpop.f32.mrb[8].mxu0 }
 0x10d   : > { %v1099_v54 = vadd.f32 %v14377_v53, %v15480_v24  ;;  %v1090_v55 = vpop.f32.mrb[9].mxu0 }
 0x10e   : > { %v1091_v56 = vadd.f32 %v15480_v24, %v1090_v55  ;;  %v14378_v57 = vpop.f32.mrb[10].mxu0  ;;  %14409 = vmatprep.mubr.msk.bf16.mxu1 %vm1264_vm3, %v1219_v52 }
 0x10f   : > { %v1102_v58 = vadd.f32 %v14378_v57, %v15480_v24  ;;  %v1093_v59 = vpop.f32.mrb[11].mxu0  ;;  %14410 = vmatmul.mubr.msk.bf16.gmra.mrb[4].mxu1 %vm1264_vm3, %v1220_v51  ;;  %v1195_v61 = vmax.f32 %v1099_v54, 0.0 }
 0x110   : > { %v1094_v60 = vadd.f32 %v15480_v24, %v1093_v59  ;;  %v1193_v63 = vmax.f32 %v1091_v56, 0.0 }
 0x111   : > { %v1196_v62 = vmax.f32 %v1102_v58, 0.0 }
 0x112   : > { %v1194_v0 = vmax.f32 %v1094_v60, 0.0 }
 0x113   : > { %v1222_v1 = vpack.c.bf16 %v1196_v62, %v1195_v61 }
 0x114   : > { %v1221_v2 = vpack.c.bf16 %v1194_v0, %v1193_v63  ;;  %v14381_v4 = vpop.f32.mrb[12].mxu0 }
 0x115   : > { %v1115_v5 = vadd.f32 %v14381_v4, %v15480_v24  ;;  %v1106_v6 = vpop.f32.mrb[13].mxu0 }
 0x116   : > { %v1107_v7 = vadd.f32 %v15480_v24, %v1106_v6  ;;  %v14382_v8 = vpop.f32.mrb[14].mxu0  ;;  %14413 = vmatprep.mubr.msk.bf16.mxu1 %vm1264_vm3, %v1221_v2 }
 0x117   : > { %v1118_v9 = vadd.f32 %v14382_v8, %v15480_v24  ;;  %v1109_v10 = vpop.f32.mrb[15].mxu0  ;;  %14414 = vmatmul.mubr.msk.bf16.gmra.mrb[8].mxu1 %vm1264_vm3, %v1222_v1  ;;  %v1199_v12 = vmax.f32 %v1115_v5, 0.0 }
 0x118   : > { %v1110_v11 = vadd.f32 %v15480_v24, %v1109_v10  ;;  %v1197_v14 = vmax.f32 %v1107_v7, 0.0 }
 0x119   : > { %v1200_v13 = vmax.f32 %v1118_v9, 0.0 }
 0x11a   : > { %v1198_v15 = vmax.f32 %v1110_v11, 0.0 }
 0x11b   : > { %v1224_v16 = vpack.c.bf16 %v1200_v13, %v1199_v12  ;;  %v14953_v12 = vld [vmem:[%s20779_s28] ss:$8 sps:$4 sm:$0xff]   ;;  %v14955_v13 = vld [vmem:[%s20779_s28 + $0x4] ss:$8 sps:$4 sm:$0xff]  }
 0x11c   : > { %v1223_v17 = vpack.c.bf16 %v1198_v15, %v1197_v14  ;;  %v14385_v18 = vpop.f32.mrb[16].mxu0  ;;  %1629 = vmatprep.subr.bf16.mxu0 %v14955_v13  ;;  %v14958_v14 = vld [vmem:[%s20779_s28 + $0x14] ss:$8 sps:$4 sm:$0xff]   ;;  %v14961_v15 = vld [vmem:[%s20779_s28 + $0x24] ss:$8 sps:$4 sm:$0xff]  }
 0x11d   : > { %v1131_v19 = vadd.f32 %v14385_v18, %v15480_v24  ;;  %v1122_v20 = vpop.f32.mrb[17].mxu0  ;;  %1630 = vmatpush1.bf16.msra.mxu0 %v14953_v12  ;;  %v14964_v18 = vld [vmem:[%s20780_s30 + $0x4] ss:$8 sps:$4 sm:$0xff]  }
 0x11e   : > { %v1123_v21 = vadd.f32 %v15480_v24, %v1122_v20  ;;  %v14386_v22 = vpop.f32.mrb[18].mxu0  ;;  %14417 = vmatprep.mubr.msk.bf16.mxu1 %vm1264_vm3, %v1223_v17  ;;  %1631 = vmatprep.subr.bf16.mxu0 %v14958_v14  ;;  %v20640_v17 = vmov 0   ;;  %v14972_v20 = vld [vmem:[%s20582_s10 + $0x8] sm:$0xff]  }
 0x11f   : > { %v1134_v23 = vadd.f32 %v14386_v22, %v15480_v24  ;;  %v1125_v25 = vpop.f32.mrb[19].mxu0  ;;  %14418 = vmatmul.mubr.msk.bf16.gmra.mrb[12].mxu1 %vm1264_vm3, %v1224_v16  ;;  %v1203_v27 = vmax.f32 %v1131_v19, 0.0  ;;  %v14959_v16 = vld [vmem:[%s20779_s28 + $0x20] ss:$8 sps:$4 sm:$0xff]   ;;  %1661 = vmatprep.mubr.bf16.mxu0 %v20640_v17 }
 0x120   : > { %v1126_v26 = vadd.f32 %v15480_v24, %v1125_v25  ;;  %v1201_v29 = vmax.f32 %v1123_v21, 0.0  ;;  %1989 = vmatprep.subr.bf16.mxu1 %v20640_v17  ;;  %v14971_v19 = vld [vmem:[%s20582_s10] sm:$0xff]   ;;  %v14973_v21 = vld [vmem:[%s20582_s10 + $0x10] sm:$0xff]  }
 0x121   : > { %v1204_v28 = vmax.f32 %v1134_v23, 0.0  ;;  %1990 = vmatpush1.bf16.msra.mxu1 %v14971_v19  ;;  %v15573_v22 = vld [vmem:[%s20782_s29] ss:$0 sm:$0xff] }
 0x122   : > { %v1202_v30 = vmax.f32 %v1126_v26, 0.0  ;;  %1991 = vmatprep.subr.bf16.mxu1 %v20640_v17  ;;  %v14974_v26 = vld [vmem:[%s20582_s10 + $0x18] sm:$0xff]  }
 0x123   : > { %v1226_v31 = vpack.c.bf16 %v1204_v28, %v1203_v27 }
 0x124   : > { %v1225_v32 = vpack.c.bf16 %v1202_v30, %v1201_v29  ;;  %v14389_v33 = vpop.f32.mrb[20].mxu0 }
 0x125   : > { %v1147_v34 = vadd.f32 %v14389_v33, %v15480_v24  ;;  %v1138_v35 = vpop.f32.mrb[21].mxu0  ;;  %1992 = vmatpush1.bf16.msra.mxu1 %v14972_v20 }
 0x126   : > { %v1139_v36 = vadd.f32 %v15480_v24, %v1138_v35  ;;  %v14390_v37 = vpop.f32.mrb[22].mxu0  ;;  %14421 = vmatprep.mubr.msk.bf16.mxu1 %vm1264_vm3, %v1225_v32  ;;  %1993 = vmatprep.subr.bf16.mxu1 %v20640_v17 }
 0x127   : > { %v1150_v38 = vadd.f32 %v14390_v37, %v15480_v24  ;;  %v1141_v39 = vpop.f32.mrb[23].mxu0  ;;  %14422 = vmatmul.mubr.msk.bf16.gmra.mrb[16].mxu1 %vm1264_vm3, %v1226_v31  ;;  %v1207_v41 = vmax.f32 %v1147_v34, 0.0 }
 0x128   : > { %v1142_v40 = vadd.f32 %v15480_v24, %v1141_v39  ;;  %v1205_v43 = vmax.f32 %v1139_v36, 0.0 }
 0x129   : > { %v1208_v42 = vmax.f32 %v1150_v38, 0.0  ;;  %1994 = vmatpush1.bf16.msra.mxu1 %v14973_v21 }
 0x12a   : > { %v1206_v44 = vmax.f32 %v1142_v40, 0.0  ;;  %1995 = vmatprep.subr.bf16.mxu1 %v20640_v17 }
 0x12b   : > { %v1228_v45 = vpack.c.bf16 %v1208_v42, %v1207_v41 }
 0x12c   : > { %v1227_v46 = vpack.c.bf16 %v1206_v44, %v1205_v43  ;;  %v14393_v47 = vpop.f32.mrb[24].mxu0 }
 0x12d   : > { %v1163_v48 = vadd.f32 %v14393_v47, %v15480_v24  ;;  %v1154_v49 = vpop.f32.mrb[25].mxu0  ;;  %1996 = vmatpush1.bf16.msra.mxu1 %v14974_v26 }
 0x12e   : > { %v1155_v50 = vadd.f32 %v15480_v24, %v1154_v49  ;;  %v14394_v51 = vpop.f32.mrb[26].mxu0  ;;  %14425 = vmatprep.mubr.msk.bf16.mxu1 %vm1264_vm3, %v1227_v46  ;;  %1997 = vmatprep.subr.bf16.mxu1 %v20640_v17 }
 0x12f   : > { %v1166_v52 = vadd.f32 %v14394_v51, %v15480_v24  ;;  %v1157_v53 = vpop.f32.mrb[27].mxu0  ;;  %14426 = vmatmul.mubr.msk.bf16.gmra.mrb[20].mxu1 %vm1264_vm3, %v1228_v45  ;;  %v1211_v55 = vmax.f32 %v1163_v48, 0.0 }
 0x130   : > { %v1158_v54 = vadd.f32 %v15480_v24, %v1157_v53  ;;  %v1209_v57 = vmax.f32 %v1155_v50, 0.0 }
 0x131   : > { %v1212_v56 = vmax.f32 %v1166_v52, 0.0 }
 0x132   : > { %v1210_v58 = vmax.f32 %v1158_v54, 0.0 }
 0x133   : > { %v1230_v59 = vpack.c.bf16 %v1212_v56, %v1211_v55 }
 0x134   : > { %v1229_v60 = vpack.c.bf16 %v1210_v58, %v1209_v57  ;;  %v14397_v61 = vpop.f32.mrb[28].mxu0 }
 0x135   : > { %v1179_v62 = vadd.f32 %v14397_v61, %v15480_v24  ;;  %v1170_v63 = vpop.f32.mrb[29].mxu0 }
 0x136   : > { %v1171_v0 = vadd.f32 %v15480_v24, %v1170_v63  ;;  %v14398_v1 = vpop.f32.mrb[30].mxu0  ;;  %14429 = vmatprep.mubr.msk.bf16.mxu1 %vm1264_vm3, %v1229_v60 }
 0x137   : > { %v1182_v2 = vadd.f32 %v14398_v1, %v15480_v24  ;;  %v1173_v4 = vpop.f32.mrb[31].mxu0  ;;  %14430 = vmatmul.mubr.msk.bf16.gmra.mrb[24].mxu1 %vm1264_vm3, %v1230_v59  ;;  %v1215_v6 = vmax.f32 %v1179_v62, 0.0 }
 0x138   : > { %v1174_v5 = vadd.f32 %v15480_v24, %v1173_v4  ;;  %v1213_v8 = vmax.f32 %v1171_v0, 0.0  ;;  %v14956_v24 = vld [vmem:[%s20779_s28 + $0x10] ss:$8 sps:$4 sm:$0xff]  }
 0x139   : > { %v1216_v7 = vmax.f32 %v1182_v2, 0.0  ;;  %1632 = vmatpush1.bf16.msra.mxu0 %v14956_v24 }
 0x13a   : > { %v1214_v9 = vmax.f32 %v1174_v5, 0.0  ;;  %1633 = vmatprep.subr.bf16.mxu0 %v14961_v15 }
 0x13b   : > { %v1232_v10 = vpack.c.bf16 %v1216_v7, %v1215_v6 }
 0x13c   : > { %v1231_v11 = vpack.c.bf16 %v1214_v9, %v1213_v8 }
 0x13d   : > { %1634 = vmatpush1.bf16.msra.mxu0 %v14959_v16 }
 0x13e   : > { %14433 = vmatprep.mubr.msk.bf16.mxu1 %vm1264_vm3, %v1231_v11  ;;  %1752 = vmatprep.subr.bf16.mxu0 %v14964_v18 }
 0x13f   : > { %14434 = vmatmul.mubr.msk.bf16.gmra.mrb[28].mxu1 %vm1264_vm3, %v1232_v10 }
 0x1da   : > { %v14407_v23 = vpop.f32.mrb[0].mxu1 }
 0x1db   : > { %v1347_v25 = vpop.f32.mrb[1].mxu1  ;;  %v15579_v27 = vadd.f32 %v14407_v23, %v15573_v22 }
 0x1dc   : > { %v15582_v28 = vadd.f32 %v15573_v22, %v1347_v25  ;;  %v14408_v29 = vpop.f32.mrb[2].mxu1 }
 0x1dd   : > { %v1350_v30 = vpop.f32.mrb[3].mxu1  ;;  %v15587_v32 = vadd.f32 %v14408_v29, %v15573_v22  ;;  %v20636_v34 = vmax.f32 %v15579_v27, 0.0 }
 0x1de   : > { %v20638_v31 = vmax.f32 %v15582_v28, 0.0  ;;  %v15590_v33 = vadd.f32 %v15573_v22, %v1350_v30 }
 0x1df   : > { %v20637_v37 = vmax.f32 %v15587_v32, 0.0  ;;  %v1509_v42 = vsel %vm1264_vm3, %v20636_v34, 0.0 }
 0x1e0   : > { %v20639_v35 = vmax.f32 %v15590_v33, 0.0  ;;  %v1506_v36 = vsel %vm1264_vm3, %v20638_v31, 0.0 }
 0x1e1   : > { %v1511_v48 = vsel %vm1264_vm3, %v20637_v37, 0.0 }
 0x1e2   : > { %v1507_v38 = vsel %vm1264_vm3, %v20639_v35, 0.0  ;;  %v14411_v39 = vpop.f32.mrb[4].mxu1 }
 0x1e3   : > { %v1508_v40 = vadd.f32 %v1507_v38, %v1506_v36  ;;  %v1363_v41 = vpop.f32.mrb[5].mxu1  ;;  %v15606_v43 = vadd.f32 %v14411_v39, %v15573_v22 }
 0x1e4   : > { %v15609_v44 = vadd.f32 %v15573_v22, %v1363_v41  ;;  %v14412_v45 = vpop.f32.mrb[6].mxu1 }
 0x1e5   : > { %v1510_v46 = vadd.f32 %v1509_v42, %v1508_v40  ;;  %v1366_v47 = vpop.f32.mrb[7].mxu1  ;;  %v15616_v50 = vadd.f32 %v14412_v45, %v15573_v22  ;;  %v20632_v53 = vmax.f32 %v15606_v43, 0.0 }
 0x1e6   : > { %v20634_v49 = vmax.f32 %v15609_v44, 0.0  ;;  %v15619_v51 = vadd.f32 %v15573_v22, %v1366_v47 }
 0x1e7   : > { %v1512_v52 = vadd.f32 %v1511_v48, %v1510_v46  ;;  %v20633_v57 = vmax.f32 %v15616_v50, 0.0  ;;  %v1517_v62 = vsel %vm1264_vm3, %v20632_v53, 0.0 }
 0x1e8   : > { %v1513_v54 = vsel %vm1264_vm3, %v20634_v49, 0.0  ;;  %v20635_v55 = vmax.f32 %v15619_v51, 0.0 }
 0x1e9   : > { %v1514_v56 = vadd.f32 %v1513_v54, %v1512_v52  ;;  %v1519_v5 = vsel %vm1264_vm3, %v20633_v57, 0.0 }
 0x1ea   : > { %v1515_v58 = vsel %vm1264_vm3, %v20635_v55, 0.0  ;;  %v14415_v59 = vpop.f32.mrb[8].mxu1 }
 0x1eb   : > { %v1516_v60 = vadd.f32 %v1515_v58, %v1514_v56  ;;  %v1379_v61 = vpop.f32.mrb[9].mxu1  ;;  %v15634_v63 = vadd.f32 %v14415_v59, %v15573_v22 }
 0x1ec   : > { %v15637_v0 = vadd.f32 %v15573_v22, %v1379_v61  ;;  %v14416_v1 = vpop.f32.mrb[10].mxu1 }
 0x1ed   : > { %v1518_v2 = vadd.f32 %v1517_v62, %v1516_v60  ;;  %v1382_v4 = vpop.f32.mrb[11].mxu1  ;;  %v15644_v7 = vadd.f32 %v14416_v1, %v15573_v22  ;;  %v20628_v10 = vmax.f32 %v15634_v63, 0.0 }
 0x1ee   : > { %v20630_v6 = vmax.f32 %v15637_v0, 0.0  ;;  %v15647_v8 = vadd.f32 %v15573_v22, %v1382_v4 }
 0x1ef   : > { %v1520_v9 = vadd.f32 %v1519_v5, %v1518_v2  ;;  %v20629_v24 = vmax.f32 %v15644_v7, 0.0  ;;  %v1525_v19 = vsel %vm1264_vm3, %v20628_v10, 0.0 }
 0x1f0   : > { %v1521_v11 = vsel %vm1264_vm3, %v20630_v6, 0.0  ;;  %v20631_v12 = vmax.f32 %v15647_v8, 0.0 }
 0x1f1   : > { %v1522_v13 = vadd.f32 %v1521_v11, %v1520_v9  ;;  %v1527_v29 = vsel %vm1264_vm3, %v20629_v24, 0.0 }
 0x1f2   : > { %v1523_v14 = vsel %vm1264_vm3, %v20631_v12, 0.0  ;;  %v14419_v15 = vpop.f32.mrb[12].mxu1 }
 0x1f3   : > { %v1524_v16 = vadd.f32 %v1523_v14, %v1522_v13  ;;  %v1395_v18 = vpop.f32.mrb[13].mxu1  ;;  %v15662_v20 = vadd.f32 %v14419_v15, %v15573_v22 }
 0x1f4   : > { %v15665_v21 = vadd.f32 %v15573_v22, %v1395_v18  ;;  %v14420_v23 = vpop.f32.mrb[14].mxu1 }
 0x1f5   : > { %v1526_v25 = vadd.f32 %v1525_v19, %v1524_v16  ;;  %v1398_v26 = vpop.f32.mrb[15].mxu1  ;;  %v15672_v36 = vadd.f32 %v14420_v23, %v15573_v22  ;;  %v20621_v40 = vmax.f32 %v15662_v20, 0.0 }
 0x1f6   : > { %v20626_v30 = vmax.f32 %v15665_v21, 0.0  ;;  %v15675_v38 = vadd.f32 %v15573_v22, %v1398_v26 }
 0x1f7   : > { %v1528_v39 = vadd.f32 %v1527_v29, %v1526_v25  ;;  %v20622_v46 = vmax.f32 %v15672_v36, 0.0  ;;  %v1533_v56 = vsel %vm1264_vm3, %v20621_v40, 0.0 }
 0x1f8   : > { %v1529_v41 = vsel %vm1264_vm3, %v20626_v30, 0.0  ;;  %v20627_v42 = vmax.f32 %v15675_v38, 0.0 }
 0x1f9   : > { %v1530_v45 = vadd.f32 %v1529_v41, %v1528_v39  ;;  %v1535_v1 = vsel %vm1264_vm3, %v20622_v46, 0.0 }
 0x1fa   : > { %v1531_v47 = vsel %vm1264_vm3, %v20627_v42, 0.0  ;;  %v14423_v48 = vpop.f32.mrb[16].mxu1 }
 0x1fb   : > { %v1532_v52 = vadd.f32 %v1531_v47, %v1530_v45  ;;  %v1411_v54 = vpop.f32.mrb[17].mxu1  ;;  %v15690_v58 = vadd.f32 %v14423_v48, %v15573_v22 }
 0x1fc   : > { %v15693_v59 = vadd.f32 %v15573_v22, %v1411_v54  ;;  %v14424_v60 = vpop.f32.mrb[18].mxu1 }
 0x1fd   : > { %v1534_v61 = vadd.f32 %v1533_v56, %v1532_v52  ;;  %v1414_v62 = vpop.f32.mrb[19].mxu1  ;;  %v15700_v4 = vadd.f32 %v14424_v60, %v15573_v22  ;;  %v20613_v11 = vmax.f32 %v15690_v58, 0.0 }
 0x1fe   : > { %v20618_v2 = vmax.f32 %v15693_v59, 0.0  ;;  %v15703_v5 = vadd.f32 %v15573_v22, %v1414_v62 }
 0x1ff   : > { %v1536_v9 = vadd.f32 %v1535_v1, %v1534_v61  ;;  %v20616_v16 = vmax.f32 %v15700_v4, 0.0  ;;  %v1541_v26 = vsel %vm1264_vm3, %v20613_v11, 0.0 }
 0x200   : > { %v1537_v13 = vsel %vm1264_vm3, %v20618_v2, 0.0  ;;  %v20620_v14 = vmax.f32 %v15703_v5, 0.0 }
 0x201   : > { %v1538_v15 = vadd.f32 %v1537_v13, %v1536_v9  ;;  %v1543_v48 = vsel %vm1264_vm3, %v20616_v16, 0.0 }
 0x202   : > { %v1539_v18 = vsel %vm1264_vm3, %v20620_v14, 0.0  ;;  %v14427_v19 = vpop.f32.mrb[20].mxu1 }
 0x203   : > { %v1540_v23 = vadd.f32 %v1539_v18, %v1538_v15  ;;  %v1427_v25 = vpop.f32.mrb[21].mxu1  ;;  %v15718_v29 = vadd.f32 %v14427_v19, %v15573_v22 }
 0x204   : > { %v15721_v39 = vadd.f32 %v15573_v22, %v1427_v25  ;;  %v14428_v41 = vpop.f32.mrb[22].mxu1 }
 0x205   : > { %v1542_v45 = vadd.f32 %v1541_v26, %v1540_v23  ;;  %v1430_v47 = vpop.f32.mrb[23].mxu1  ;;  %v15728_v54 = vadd.f32 %v14428_v41, %v15573_v22  ;;  %v20608_v61 = vmax.f32 %v15718_v29, 0.0 }
 0x206   : > { %v20610_v52 = vmax.f32 %v15721_v39, 0.0  ;;  %v15731_v56 = vadd.f32 %v15573_v22, %v1430_v47 }
 0x207   : > { %v1544_v60 = vadd.f32 %v1543_v48, %v1542_v45  ;;  %v20609_v13 = vmax.f32 %v15728_v54, 0.0  ;;  %v1549_v25 = vsel %vm1264_vm3, %v20608_v61, 0.0 }
 0x208   : > { %v1545_v62 = vsel %vm1264_vm3, %v20610_v52, 0.0  ;;  %v20611_v1 = vmax.f32 %v15731_v56, 0.0 }
 0x209   : > { %v1546_v9 = vadd.f32 %v1545_v62, %v1544_v60  ;;  %v1551_v60 = vsel %vm1264_vm3, %v20609_v13, 0.0 }
 0x20a   : > { %v1547_v15 = vsel %vm1264_vm3, %v20611_v1, 0.0  ;;  %v14431_v18 = vpop.f32.mrb[24].mxu1 }
 0x20b   : > { %v1548_v19 = vadd.f32 %v1547_v15, %v1546_v9  ;;  %v1443_v23 = vpop.f32.mrb[25].mxu1  ;;  %v15746_v26 = vadd.f32 %v14431_v18, %v15573_v22 }
 0x20c   : > { %v15749_v41 = vadd.f32 %v15573_v22, %v1443_v23  ;;  %v14432_v45 = vpop.f32.mrb[26].mxu1 }
 0x20d   : > { %20784 = vst [vmem:[#allocation4_spill] sm:$0xff] %v15746_v26  ;;  %v1550_v47 = vadd.f32 %v1549_v25, %v1548_v19  ;;  %v1446_v48 = vpop.f32.mrb[27].mxu1  ;;  %v15756_v9 = vadd.f32 %v14432_v45, %v15573_v22  ;;  %v20615_v61 = vmax.f32 %v15746_v26, 0.0 }
 0x20e   : > { %v20612_v62 = vmax.f32 %v15749_v41, 0.0  ;;  %v15759_v15 = vadd.f32 %v15573_v22, %v1446_v48 }
 0x20f   : > { %20785 = vst [vmem:[#allocation5_spill] sm:$0xff] %v15756_v9  ;;  %v1552_v18 = vadd.f32 %v1551_v60, %v1550_v47  ;;  %v20617_v13 = vmax.f32 %v15756_v9, 0.0  ;;  %v1557_v47 = vsel %vm1264_vm3, %v20615_v61, 0.0 }
 0x210   : > { %v1553_v19 = vsel %vm1264_vm3, %v20612_v62, 0.0  ;;  %v20614_v23 = vmax.f32 %v15759_v15, 0.0 }
 0x211   : > { %v1554_v25 = vadd.f32 %v1553_v19, %v1552_v18 }
 0x212   : > { %v1555_v45 = vsel %vm1264_vm3, %v20614_v23, 0.0  ;;  %v14435_v52 = vpop.f32.mrb[28].mxu1  ;;  %v1559_v23 = vsel %vm1264_vm3, %v20617_v13, 0.0 }
 0x213   : > { %v1556_v1 = vadd.f32 %v1555_v45, %v1554_v25  ;;  %v1459_v48 = vpop.f32.mrb[29].mxu1  ;;  %v15774_v60 = vadd.f32 %v14435_v52, %v15573_v22 }
 0x214   : > { %v15777_v62 = vadd.f32 %v15573_v22, %v1459_v48  ;;  %v14436_v18 = vpop.f32.mrb[30].mxu1 }
 0x215   : > { %20786 = vst [vmem:[#allocation6_spill] sm:$0xff] %v15774_v60  ;;  %v1558_v19 = vadd.f32 %v1557_v47, %v1556_v1  ;;  %v1462_v11 = vpop.f32.mrb[31].mxu1  ;;  %v15784_v45 = vadd.f32 %v14436_v18, %v15573_v22  ;;  %v20623_v16 = vmax.f32 %v15774_v60, 0.0 }
 0x216   : > { %20787 = vst [vmem:[#allocation7_spill] sm:$0xff] %v15777_v62  ;;  %v20619_v25 = vmax.f32 %v15777_v62, 0.0  ;;  %v15787_v61 = vadd.f32 %v15573_v22, %v1462_v11 }
 0x217   : > { %20788 = vst [vmem:[#allocation8_spill] sm:$0xff] %v15784_v45  ;;  %v1560_v52 = vadd.f32 %v1559_v23, %v1558_v19  ;;  %v20624_v13 = vmax.f32 %v15784_v45, 0.0  ;;  %v1565_v22 = vsel %vm1264_vm3, %v20623_v16, 0.0 }
 0x218   : > { %20789 = vst [vmem:[#allocation9_spill] sm:$0xff] %v15787_v61  ;;  %v1561_v1 = vsel %vm1264_vm3, %v20619_v25, 0.0  ;;  %v20625_v48 = vmax.f32 %v15787_v61, 0.0 }
 0x219   : > { %v1562_v47 = vadd.f32 %v1561_v1, %v1560_v52  ;;  %v1567_v23 = vsel %vm1264_vm3, %v20624_v13, 0.0 }
 0x21a   : > { %v1563_v18 = vsel %vm1264_vm3, %v20625_v48, 0.0 }
 0x21b   : > { %v1564_v2 = vadd.f32 %v1563_v18, %v1562_v47  ;;  %v1684_v47 = vld [vmem:[%s20780_s30 + $0x10] sm:$0xff] }
 0x21c   : > { %v12915_v16 = vcombine.high %v1684_v47, %v1684_v47 }
 0x21d   : > { %v1566_v11 = vadd.f32 %v1565_v22, %v1564_v2  ;;  %v14962_v2 = vld [vmem:[%s20780_s30] ss:$8 sps:$4 sm:$0xff]  }
 0x21f   : > { %v1568_v19 = vadd.f32 %v1567_v23, %v1566_v11  ;;  %v12914_v11 = vcombine.low %v1684_v47, %v1684_v47  ;;  %v14975_v23 = vld [vmem:[%s20582_s10 + $0x20] sm:$0xff]  }
 0x220   : > { %1998 = vmatpush1.bf16.msra.mxu1 %v14975_v23  ;;  %v14979_v47 = vld [vmem:[%s20582_s10 + $0x40] sm:$0xff]  }
 0x221   : > { %v1569_v25 = vrot.slane %v1568_v19, 4  ;;  %1999 = vmatprep.subr.bf16.mxu1 %v20640_v17 }
 0x223   : > { %v1570_v14 = vadd.f32 %v1569_v25, %v1568_v19  ;;  %v14969_v25 = vld [vmem:[%s15557_s25 + $0x10] sm:$0xff]   ;;  %v14976_v19 = vld [vmem:[%s20582_s10 + $0x28] sm:$0xff]  }
 0x224   : > { %2000 = vmatpush1.bf16.msra.mxu1 %v14976_v19 }
 0x225   : > { %v1571_v52 = vrot.slane %v1570_v14, 2  ;;  %2001 = vmatprep.subr.bf16.mxu1 %v20640_v17 }
 0x227   : > { %v1572_v1 = vadd.f32 %v1571_v52, %v1570_v14  ;;  %v14968_v14 = vld [vmem:[%s15557_s25 + $0x8] sm:$0xff]   ;;  %v14977_v52 = vld [vmem:[%s20582_s10 + $0x30] sm:$0xff]  }
 0x228   : > { %2002 = vmatpush1.bf16.msra.mxu1 %v14977_v52 }
 0x229   : > { %v1573_v40 = vrot.slane %v1572_v1, 1  ;;  %2003 = vmatprep.subr.bf16.mxu1 %v20640_v17 }
 0x22b   : > { %v1574_v46 = vadd.f32 %v1573_v40, %v1572_v1  ;;  %v1747_v40 = vsel %vm1745_vm4, %v12914_v11, 0  ;;  %v14978_v1 = vld [vmem:[%s20582_s10 + $0x38] sm:$0xff]   ;;  %v1616_v11 = vlaneseq }
 0x22c   : > { %2004 = vmatpush1.bf16.msra.mxu1 %v14978_v1 }
 0x22d   : > { %v1576_v18 = vmul.f32 0.00390625, %v1574_v46  ;;  %v14967_v46 = vld [vmem:[%s15557_s25] sm:$0xff]   ;;  %2005 = vmatprep.subr.bf16.mxu1 %v20640_v17 }
 0x22f   : > { %v1577_v22 = vpack.c.bf16 %v1576_v18, %v1576_v18  ;;  %v14980_v18 = vld [vmem:[%s20582_s10 + $0x48] sm:$0xff]  }
 0x230   : > { %2006 = vmatpush1.bf16.msra.mxu1 %v14979_v47 }
 0x231   : > { %12905 = vmatmul.mubr.msk.bf16.vlgmr.msra.gmra.mrb[32].mxu0 %vm1264_vm3, %v1577_v22  ;;  %2007 = vmatprep.subr.bf16.mxu1 %v20640_v17  ;;  %v14982_v22 = vld [vmem:[%s20582_s10 + $0x58] sm:$0xff]  }
 0x232   : > { %1753 = vmatpush1.bf16.msra.mxu0 %v14962_v2  ;;  %1784 = vmatprep.mubr.bf16.mxu0 %v20640_v17  ;;  %v14981_v2 = vld [vmem:[%s20582_s10 + $0x50] sm:$0xff]  }
 0x233   : > { %12916 = vmatprep.subr.msk.bf16.mxu0 %vm1745_vm4, %v12915_v16  ;;  %v14970_v16 = vld [vmem:[%s15557_s25 + $0x18] sm:$0xff]  }
 0x234   : > { %2008 = vmatpush1.bf16.msra.mxu1 %v14980_v18 }
 0x235   : > { %2009 = vmatprep.subr.bf16.mxu1 %v20640_v17 }
 0x236   : > { %1755 = vmatpush1.bf16.msra.mxu0 %v1747_v40  ;;  %v1617_v40 = vshrl.u32 %v1616_v11, 7 }
 0x238   : > { %2010 = vmatpush1.bf16.msra.mxu1 %v14981_v2 }
 0x239   : > { %12917 = vmatmul.mubr.msk.bf16.vlgmr.msra.gmra.mrb[36].mxu0 %vm1732_vm5, %v14967_v46  ;;  %2011 = vmatprep.subr.bf16.mxu1 %v20640_v17  ;;  %v15856_v46 = vsub.s32 0, %v1617_v40 }
 0x23a   : > { %1794 = vmatprep.mubr.bf16.mxu0 %v20640_v17 }
 0x23b   : > { %20790 = vst [vmem:[#allocation10_spill] sm:$0xff] %v15856_v46 }
 0x23c   : > { %2012 = vmatpush1.bf16.msra.mxu1 %v14982_v22 }
 0x241   : > { %12918 = vmatmul.mubr.msk.bf16.gmra.mrb[40].mxu0 %vm1732_vm5, %v14968_v14  ;;  %v1584_v14 = vld [vmem:[%s20791_s3] sm:$0x3] }
 0x242   : > { %1804 = vmatprep.mubr.bf16.mxu0 %v20640_v17 }
 0x249   : > { %12919 = vmatmul.mubr.msk.bf16.gmra.mrb[44].mxu0 %vm1732_vm5, %v14969_v25  ;;  %v15861_v25 = vsub.s32 1, %v1617_v40 }
 0x24a   : > { %1814 = vmatprep.mubr.bf16.mxu0 %v20640_v17 }
 0x24b   : > { %20792 = vst [vmem:[#allocation11_spill] sm:$0xff] %v15861_v25  ;;  %v1623_v23 = vrot.slane %v1584_v14, %v15861_v25 }
 0x251   : > { %12920 = vmatmul.mubr.msk.bf16.gmra.mrb[48].mxu0 %vm1732_vm5, %v14970_v16  ;;  %v1619_v16 = vrot.slane %v1584_v14, %v15856_v46  ;;  %v1685_v14 = vld [vmem:[%s20793_s4] sm:$0x3] }
 0x304   : > { %v1663_v19 = vpop.f32.mrb[32].mxu0 }
 0x305   : > { %v1664_v52 = vadd.f32 %v1663_v19, %v1619_v16  ;;  %v1665_v1 = vpop.f32.mrb[33].mxu0 }
 0x306   : > { %v1666_v47 = vadd.f32 %v1665_v1, %v1623_v23  ;;  %v1667_v18 = vpop.f32.mrb[34].mxu0  ;;  %v1690_v1 = vrot.slane %v1685_v14, %v15856_v46 }
 0x307   : > { %v12906_v2 = vmul.f32 -1.442695, %v1664_v52  ;;  %v1668_v22 = vpop.f32.mrb[35].mxu0  ;;  %v1694_v18 = vrot.slane %v1685_v14, %v15861_v25 }
 0x308   : > { %v12907_v11 = vmul.f32 -1.442695, %v1666_v47 }
 0x309   : > { %15231 = vpow2.f32 %v12906_v2 }
 0x30a   : > { %15233 = vpow2.f32 %v12907_v11 }
 0x30c   : > { %v1786_v13 = vpop.f32.mrb[36].mxu0 }
 0x30d   : > { %v1788_v48 = vpop.f32.mrb[37].mxu0  ;;  %v1787_v2 = vadd.f32 %v1786_v13, %v1690_v1 }
 0x30e   : > { %v1790_v30 = vpop.f32.mrb[38].mxu0  ;;  %v1789_v6 = vadd.f32 %v1788_v48, %v1694_v18 }
 0x30f   : > { %v1792_v42 = vpop.f32.mrb[39].mxu0  ;;  %v1791_v57 = vadd.f32 %v1790_v30, %v1690_v1 }
 0x310   : > { %v1793_v49 = vadd.f32 %v1792_v42, %v1694_v18  ;;  %v1826_v13 = vmax.f32 %v1789_v6, 0.0 }
 0x311   : > { %v1827_v30 = vmax.f32 %v1791_v57, 0.0 }
 0x312   : > { %v1828_v42 = vmax.f32 %v1793_v49, 0.0 }
 0x313   : > { %v15232_v40 = vpop.eup %15231 }
 0x314   : > { %v15234_v10 = vpop.eup %15233  ;;  %v1676_v24 = vadd.f32 1.0, %v15232_v40  ;;  %v1796_v16 = vpop.f32.mrb[40].mxu0 }
 0x315   : > { %v1677_v19 = vadd.f32 1.0, %v15234_v10  ;;  %v1798_v23 = vpop.f32.mrb[41].mxu0  ;;  %v1797_v22 = vadd.f32 %v1796_v16, %v1690_v1 }
 0x316   : > { %15235 = vrcp.f32 %v1676_v24  ;;  %v1800_v52 = vpop.f32.mrb[42].mxu0  ;;  %v1799_v40 = vadd.f32 %v1798_v23, %v1694_v18 }
 0x317   : > { %15237 = vrcp.f32 %v1677_v19  ;;  %v1802_v47 = vpop.f32.mrb[43].mxu0  ;;  %v1801_v11 = vadd.f32 %v1800_v52, %v1690_v1  ;;  %v1825_v19 = vmax.f32 %v1787_v2, 0.0  ;;  %v1829_v37 = vmax.f32 %v1797_v22, 0.0 }
 0x318   : > { %v1803_v12 = vadd.f32 %v1802_v47, %v1694_v18  ;;  %v1830_v16 = vmax.f32 %v1799_v40, 0.0 }
 0x319   : > { %v1831_v31 = vmax.f32 %v1801_v11, 0.0 }
 0x31a   : > { %v1832_v52 = vmax.f32 %v1803_v12, 0.0 }
 0x31c   : > { %v1806_v53 = vpop.f32.mrb[44].mxu0 }
 0x31d   : > { %v1808_v55 = vpop.f32.mrb[45].mxu0  ;;  %v1807_v10 = vadd.f32 %v1806_v53, %v1690_v1 }
 0x31e   : > { %v1809_v34 = vadd.f32 %v1808_v55, %v1694_v18  ;;  %v1810_v24 = vpop.f32.mrb[46].mxu0 }
 0x31f   : > { %v1811_v35 = vadd.f32 %v1810_v24, %v1690_v1  ;;  %v1812_v17 = vpop.f32.mrb[47].mxu0  ;;  %v1833_v55 = vmax.f32 %v1807_v10, 0.0 }
 0x320   : > { %v15236_v14 = vpop.eup %15235  ;;  %v1813_v48 = vadd.f32 %v1812_v17, %v1694_v18  ;;  %v1834_v25 = vmax.f32 %v1809_v34, 0.0 }
 0x321   : > { %v15238_v23 = vpop.eup %15237  ;;  %v1844_v47 = vrot.slane %v15236_v14, %v15856_v46  ;;  %v1835_v60 = vmax.f32 %v1811_v35, 0.0 }
 0x322   : > { %v1848_v53 = vrot.slane %v15238_v23, %v15856_v46  ;;  %v1836_v2 = vmax.f32 %v1813_v48, 0.0 }
 0x323   : > { %v1849_v22 = vmul.f32 %v1844_v47, %v1825_v19  ;;  %v1851_v11 = vmul.f32 %v1844_v47, %v1827_v30  ;;  %v1853_v24 = vmul.f32 %v1844_v47, %v1829_v37  ;;  %v1855_v45 = vmul.f32 %v1844_v47, %v1831_v31 }
 0x324   : > { %v1850_v62 = vmul.f32 %v1848_v53, %v1826_v13  ;;  %v1852_v6 = vmul.f32 %v1848_v53, %v1828_v42  ;;  %v1854_v40 = vmul.f32 %v1848_v53, %v1830_v16  ;;  %v1856_v12 = vmul.f32 %v1848_v53, %v1832_v52  ;;  %v1816_v17 = vpop.f32.mrb[48].mxu0 }
 0x325   : > { %v1865_v61 = vpack.c.bf16 %v1851_v11, %v1849_v22  ;;  %v1858_v26 = vmul.f32 %v1848_v53, %v1834_v25  ;;  %v1860_v14 = vmul.f32 %v1848_v53, %v1836_v2  ;;  %v1817_v57 = vadd.f32 %v1816_v17, %v1690_v1  ;;  %v1818_v49 = vpop.f32.mrb[49].mxu0 }
 0x326   : > { %v1819_v34 = vadd.f32 %v1818_v49, %v1694_v18  ;;  %v1820_v9 = vpop.f32.mrb[50].mxu0  ;;  %v1866_v23 = vpack.c.bf16 %v1852_v6, %v1850_v62  ;;  %v1868_v10 = vpack.c.bf16 %v1856_v12, %v1854_v40  ;;  %v1867_v35 = vpack.c.bf16 %v1855_v45, %v1853_v24 }
 0x327   : > { %v1837_v48 = vmax.f32 %v1817_v57, 0.0  ;;  %v1821_v19 = vadd.f32 %v1820_v9, %v1690_v1  ;;  %v1822_v30 = vpop.f32.mrb[51].mxu0  ;;  %v1870_v37 = vpack.c.bf16 %v1860_v14, %v1858_v26  ;;  %v1857_v31 = vmul.f32 %v1844_v47, %v1833_v55  ;;  %v14983_v26 = vld [vmem:[%s20585_s13] sm:$0xff]  }
 0x328   : > { %v1838_v13 = vmax.f32 %v1819_v34, 0.0  ;;  %v1823_v42 = vadd.f32 %v1822_v30, %v1694_v18  ;;  %12934 = vmatprep.mubr.msk.bf16.mxu1 %vm1976_vm6, %v1866_v23  ;;  %v1859_v16 = vmul.f32 %v1844_v47, %v1835_v60  ;;  %v14984_v60 = vld [vmem:[%s20585_s13 + $0x8] sm:$0xff]   ;;  %14501 = vmatprep.subr.bf16.mxu1 %v14983_v26  ;;  %v12921_v1 = vld [vmem:[%s20583_s11] ss:$0 sm:$0xff] }
 0x329   : > { %v1839_v52 = vmax.f32 %v1821_v19, 0.0  ;;  %2022 = vmatmul.mubr.bf16.vlgmr.msra.gmra.mrb[32].mxu1 %v1865_v61  ;;  %v1861_v25 = vmul.f32 %v1844_v47, %v1837_v48  ;;  %v837_v61 = vld [vmem:[%s20584_s12] sm:$0xff] }
 0x32a   : > { %v1862_v2 = vmul.f32 %v1848_v53, %v1838_v13  ;;  %v1840_v22 = vmax.f32 %v1823_v42, 0.0  ;;  %12935 = vmatprep.mubr.msk.bf16.mxu1 %vm1976_vm6, %v1868_v10  ;;  %v1869_v62 = vpack.c.bf16 %v1859_v16, %v1857_v31  ;;  %14453 = vmatprep.mubr.msk.f32.mxu0 %vm1976_vm6, %v837_v61  ;;  %v842_v61 = vld [vmem:[%s20584_s12 + $0x28] sm:$0xff] }
 0x32b   : > { %v1863_v11 = vmul.f32 %v1844_v47, %v1839_v52  ;;  %14502 = vmatpush3.bf16.msra.mxu1 %v14983_v26  ;;  %v843_v26 = vld [vmem:[%s20584_s12 + $0x30] sm:$0xff] }
 0x32c   : > { %v1864_v45 = vmul.f32 %v1848_v53, %v1840_v22  ;;  %14503 = vmatprep.subr.bf16.mxu1 %v14984_v60 }
 0x32d   : > { %v1871_v24 = vpack.c.bf16 %v1863_v11, %v1861_v25  ;;  %v838_v11 = vld [vmem:[%s20584_s12 + $0x8] sm:$0xff] }
 0x32e   : > { %v1872_v9 = vpack.c.bf16 %v1864_v45, %v1862_v2  ;;  %v839_v45 = vld [vmem:[%s20584_s12 + $0x10] sm:$0xff] }
 0x32f   : > { %14504 = vmatpush3.bf16.msra.mxu1 %v14984_v60  ;;  %v844_v60 = vld [vmem:[%s20584_s12 + $0x38] sm:$0xff] }
 0x331   : > { %2030 = vmatmul.mubr.bf16.gmra.mrb[36].mxu1 %v1867_v35 }
 0x332   : > { %12936 = vmatprep.mubr.msk.bf16.mxu1 %vm1976_vm6, %v1870_v37 }
 0x339   : > { %2038 = vmatmul.mubr.bf16.gmra.mrb[40].mxu1 %v1869_v62 }
 0x33a   : > { %12937 = vmatprep.mubr.msk.bf16.mxu1 %vm1976_vm6, %v1872_v9  ;;  %v841_v9 = vld [vmem:[%s20584_s12 + $0x20] sm:$0xff] }
 0x341   : > { %2046 = vmatmul.mubr.bf16.gmra.mrb[44].mxu1 %v1871_v24  ;;  %v840_v24 = vld [vmem:[%s20584_s12 + $0x18] sm:$0xff] }
 0x3fc   : > { %v2023_v18 = vpop.f32.mrb[32].mxu1 }
 0x3fd   : > { %v2025_v47 = vpop.f32.mrb[33].mxu1  ;;  %v2024_v55 = vadd.f32 %v12921_v1, %v2023_v18  ;;  %v846_v18 = vld [vmem:[%s20584_s12 + $0x48] sm:$0xff] }
 0x3fe   : > { %v2026_v53 = vpop.f32.mrb[34].mxu1  ;;  %v847_v47 = vld [vmem:[%s20584_s12 + $0x50] sm:$0xff] }
 0x3ff   : > { %v2027_v6 = vadd.f32 %v12921_v1, %v2026_v53  ;;  %v2028_v40 = vpop.f32.mrb[35].mxu1  ;;  %v848_v53 = vld [vmem:[%s20584_s12 + $0x58] sm:$0xff] }
 0x400   : > { %v851_v40 = vld [vmem:[%s20584_s12 + $0x70] sm:$0xff] }
 0x401   : > { %v14695_v12 = vpack.c.bf16 %v2027_v6, %v2024_v55  ;;  %v849_v55 = vld [vmem:[%s20584_s12 + $0x60] sm:$0xff]  ;;  %v850_v6 = vld [vmem:[%s20584_s12 + $0x68] sm:$0xff] }
 0x403   : > { %14696 = vmatprep.subr.bf16.mxu0 %v14695_v12 }
 0x404   : > { %v2031_v17 = vpop.f32.mrb[36].mxu1  ;;  %14698 = vmatpush3.bf16.msra.mxu0 %v14695_v12  ;;  %v852_v12 = vld [vmem:[%s20584_s12 + $0x78] sm:$0xff] }
 0x405   : > { %v2033_v14 = vpop.f32.mrb[37].mxu1  ;;  %v2032_v49 = vadd.f32 %v12921_v1, %v2031_v17  ;;  %v853_v17 = vld [vmem:[%s20584_s12 + $0x80] sm:$0xff] }
 0x406   : > { %v2034_v57 = vpop.f32.mrb[38].mxu1  ;;  %v854_v14 = vld [vmem:[%s20584_s12 + $0x88] sm:$0xff] }
 0x407   : > { %v2035_v34 = vadd.f32 %v12921_v1, %v2034_v57  ;;  %v2036_v23 = vpop.f32.mrb[39].mxu1  ;;  %v855_v57 = vld [vmem:[%s20584_s12 + $0x90] sm:$0xff] }
 0x408   : > { %v858_v23 = vld [vmem:[%s20584_s12 + $0xa8] sm:$0xff] }
 0x409   : > { %v14699_v10 = vpack.c.bf16 %v2035_v34, %v2032_v49  ;;  %v856_v49 = vld [vmem:[%s20584_s12 + $0x98] sm:$0xff]  ;;  %v857_v34 = vld [vmem:[%s20584_s12 + $0xa0] sm:$0xff] }
 0x40b   : > { %14700 = vmatprep.subr.bf16.mxu0 %v14699_v10 }
 0x40c   : > { %v2039_v35 = vpop.f32.mrb[40].mxu1  ;;  %14702 = vmatpush3.bf16.msra.mxu0 %v14699_v10  ;;  %v859_v10 = vld [vmem:[%s20584_s12 + $0xb0] sm:$0xff] }
 0x40d   : > { %v2041_v48 = vpop.f32.mrb[41].mxu1  ;;  %v2040_v30 = vadd.f32 %v12921_v1, %v2039_v35  ;;  %v860_v35 = vld [vmem:[%s20584_s12 + $0xb8] sm:$0xff] }
 0x40e   : > { %v2042_v19 = vpop.f32.mrb[42].mxu1  ;;  %v861_v48 = vld [vmem:[%s20584_s12 + $0xc0] sm:$0xff] }
 0x40f   : > { %v2043_v37 = vadd.f32 %v12921_v1, %v2042_v19  ;;  %v2044_v31 = vpop.f32.mrb[43].mxu1  ;;  %v862_v19 = vld [vmem:[%s20584_s12 + $0xc8] sm:$0xff] }
 0x410   : > { %v865_v31 = vld [vmem:[%s20584_s12 + $0xe0] sm:$0xff] }
 0x411   : > { %v14703_v13 = vpack.c.bf16 %v2043_v37, %v2040_v30  ;;  %v863_v30 = vld [vmem:[%s20584_s12 + $0xd0] sm:$0xff]  ;;  %v864_v37 = vld [vmem:[%s20584_s12 + $0xd8] sm:$0xff] }
 0x413   : > { %14704 = vmatprep.subr.bf16.mxu0 %v14703_v13 }
 0x414   : > { %v2047_v42 = vpop.f32.mrb[44].mxu1  ;;  %14706 = vmatpush3.bf16.msra.mxu0 %v14703_v13  ;;  %v866_v13 = vld [vmem:[%s20584_s12 + $0xe8] sm:$0xff] }
 0x415   : > { %v2049_v16 = vpop.f32.mrb[45].mxu1  ;;  %v2048_v25 = vadd.f32 %v12921_v1, %v2047_v42  ;;  %v867_v42 = vld [vmem:[%s20584_s12 + $0xf0] sm:$0xff] }
 0x416   : > { %v2050_v52 = vpop.f32.mrb[46].mxu1  ;;  %v868_v16 = vld [vmem:[%s20584_s12 + $0xf8] sm:$0xff] }
 0x417   : > { %v2051_v2 = vadd.f32 %v12921_v1, %v2050_v52  ;;  %v2052_v22 = vpop.f32.mrb[47].mxu1  ;;  %v845_v1 = vld [vmem:[%s20584_s12 + $0x40] sm:$0xff]  ;;  %v20794_v52 = vmov 0  }
 0x419   : > { %v14707_v62 = vpack.c.bf16 %v2051_v2, %v2048_v25  ;;  %v14985_v25 = vld [vmem:[%s20585_s13 + $0x10] sm:$0xff]   ;;  %v13012_v2 = vld [vmem:[%s20774_s7 + $0x2] sm:$0x3] }
 0x41a   : > { %14505 = vmatprep.subr.bf16.mxu1 %v14985_v25  ;;  %v3107_v22 = vand.u32 %v13012_v2, %v15425_v3  ;;  %v20806_v2 = vmax.f32 %v15634_v63, 0.0 }
 0x41b   : > { %14708 = vmatprep.subr.bf16.mxu0 %v14707_v62  ;;  %14506 = vmatpush3.bf16.msra.mxu1 %v14985_v25 }
 0x41c   : > { %14710 = vmatpush3.bf16.msra.mxu0 %v14707_v62  ;;  %14539 = vmatprep.subr.bf16.mxu1 %v3107_v22  ;;  %v14990_v62 = vld [vmem:[%s20587_s15] ss:$8 sps:$4 sm:$0xff]  }
 0x41f   : > { %14454 = vmatmul.mubr.msk.f32.vlgmr.msra.gmra.mrb[52].mxu0 %vm1976_vm6, %v838_v11  ;;  %v14992_v11 = vld [vmem:[%s20587_s15 + $0x4] ss:$8 sps:$4 sm:$0xff]  }
 0x420   : > { %14456 = vmatprep.mubr.msk.f32.mxu0 %vm1976_vm6, %v839_v45  ;;  %2807 = vmatprep.subr.bf16.mxu0 %v14992_v11  ;;  %v20807_v11 = vmax.f32 %v15675_v38, 0.0 }
 0x421   : > { %2808 = vmatpush1.bf16.msra.mxu0 %v14990_v62 }
 0x423   : > { %14457 = vmatmul.mubr.msk.f32.gmra.mrb[54].mxu0 %vm1976_vm6, %v840_v24  ;;  %v20795_v24 = vmax.f32 %v15590_v33, 0.0  ;;  %v20799_v33 = vmax.f32 %v15619_v51, 0.0 }
 0x424   : > { %14459 = vmatprep.mubr.msk.f32.mxu0 %vm1976_vm6, %v841_v9 }
 0x427   : > { %14460 = vmatmul.mubr.msk.f32.gmra.mrb[56].mxu0 %vm1976_vm6, %v842_v61 }
 0x428   : > { %14462 = vmatprep.mubr.msk.f32.mxu0 %vm1976_vm6, %v843_v26  ;;  %v20796_v26 = vmax.f32 %v15582_v28, 0.0  ;;  %v20800_v28 = vmax.f32 %v15609_v44, 0.0 }
 0x42b   : > { %14463 = vmatmul.mubr.msk.f32.gmra.mrb[58].mxu0 %vm1976_vm6, %v844_v60 }
 0x42c   : > { %14465 = vmatprep.mubr.msk.f32.mxu0 %vm1976_vm6, %v845_v1 }
 0x42f   : > { %14466 = vmatmul.mubr.msk.f32.gmra.mrb[60].mxu0 %vm1976_vm6, %v846_v18 }
 0x430   : > { %14468 = vmatprep.mubr.msk.f32.mxu0 %vm1976_vm6, %v847_v47  ;;  %v20797_v47 = vmax.f32 %v15587_v32, 0.0 }
 0x433   : > { %14469 = vmatmul.mubr.msk.f32.gmra.mrb[62].mxu0 %vm1976_vm6, %v848_v53 }
 0x434   : > { %14471 = vmatprep.mubr.msk.f32.mxu0 %vm1976_vm6, %v849_v55 }
 0x437   : > { %14472 = vmatmul.mubr.msk.f32.gmra.mrb[64].mxu0 %vm1976_vm6, %v850_v6  ;;  %v20798_v6 = vmax.f32 %v15579_v27, 0.0 }
 0x438   : > { %14474 = vmatprep.mubr.msk.f32.mxu0 %vm1976_vm6, %v851_v40 }
 0x43b   : > { %14475 = vmatmul.mubr.msk.f32.gmra.mrb[66].mxu0 %vm1976_vm6, %v852_v12 }
 0x43c   : > { %14477 = vmatprep.mubr.msk.f32.mxu0 %vm1976_vm6, %v853_v17 }
 0x43f   : > { %14478 = vmatmul.mubr.msk.f32.gmra.mrb[68].mxu0 %vm1976_vm6, %v854_v14 }
 0x440   : > { %14480 = vmatprep.mubr.msk.f32.mxu0 %vm1976_vm6, %v855_v57 }
 0x443   : > { %14481 = vmatmul.mubr.msk.f32.gmra.mrb[70].mxu0 %vm1976_vm6, %v856_v49 }
 0x444   : > { %14483 = vmatprep.mubr.msk.f32.mxu0 %vm1976_vm6, %v857_v34 }
 0x447   : > { %14484 = vmatmul.mubr.msk.f32.gmra.mrb[72].mxu0 %vm1976_vm6, %v858_v23  ;;  %v20801_v23 = vmax.f32 %v15616_v50, 0.0 }
 0x448   : > { %14486 = vmatprep.mubr.msk.f32.mxu0 %vm1976_vm6, %v859_v10 }
 0x44b   : > { %14487 = vmatmul.mubr.msk.f32.gmra.mrb[74].mxu0 %vm1976_vm6, %v860_v35  ;;  %v20802_v35 = vmax.f32 %v15606_v43, 0.0 }
 0x44c   : > { %14489 = vmatprep.mubr.msk.f32.mxu0 %vm1976_vm6, %v861_v48 }
 0x44f   : > { %14490 = vmatmul.mubr.msk.f32.gmra.mrb[76].mxu0 %vm1976_vm6, %v862_v19 }
 0x450   : > { %14492 = vmatprep.mubr.msk.f32.mxu0 %vm1976_vm6, %v863_v30  ;;  %v20803_v30 = vmax.f32 %v15647_v8, 0.0 }
 0x453   : > { %14493 = vmatmul.mubr.msk.f32.gmra.mrb[78].mxu0 %vm1976_vm6, %v864_v37 }
 0x454   : > { %14495 = vmatprep.mubr.msk.f32.mxu0 %vm1976_vm6, %v865_v31  ;;  %v20804_v31 = vmax.f32 %v15637_v0, 0.0 }
 0x457   : > { %14496 = vmatmul.mubr.msk.f32.gmra.mrb[80].mxu0 %vm1976_vm6, %v866_v13 }
 0x458   : > { %14498 = vmatprep.mubr.msk.f32.mxu0 %vm1976_vm6, %v867_v42 }
 0x45b   : > { %14499 = vmatmul.mubr.msk.f32.gmra.mrb[82].mxu0 %vm1976_vm6, %v868_v16  ;;  %v20805_v16 = vmax.f32 %v15644_v7, 0.0 }
 0x45c   : > { %2839 = vmatprep.mubr.bf16.mxu0 %v20794_v52 }
 0x4f2   : > { %v14455_v45 = vpop.f32.mrb[52].mxu0 }
 0x4f3   : > { %v2376_v9 = vadd.f32 %v14455_v45, %v20795_v24  ;;  %v2216_v61 = vpop.f32.mrb[53].mxu0  ;;  %v20808_v24 = vmax.f32 %v15665_v21, 0.0 }
 0x4f4   : > { %v2375_v60 = vadd.f32 %v2216_v61, %v20796_v26  ;;  %v20809_v26 = vmax.f32 %v15672_v36, 0.0 }
 0x4f6   : > { %v2407_v1 = vpack.c.bf16 %v2376_v9, %v2375_v60  ;;  %v14458_v18 = vpop.f32.mrb[54].mxu0 }
 0x4f7   : > { %v2378_v53 = vadd.f32 %v14458_v18, %v20797_v47  ;;  %v2226_v55 = vpop.f32.mrb[55].mxu0 }
 0x4f8   : > { %v2377_v40 = vadd.f32 %v2226_v55, %v20798_v6  ;;  %14507 = vmatprep.mubr.msk.bf16.mxu1 %vm1264_vm3, %v2407_v1  ;;  %v20810_v1 = vmax.f32 %v15662_v20, 0.0  ;;  %v20812_v6 = vmax.f32 %v15693_v59, 0.0 }
 0x4fa   : > { %v2408_v12 = vpack.c.bf16 %v2378_v53, %v2377_v40  ;;  %v14461_v17 = vpop.f32.mrb[56].mxu0  ;;  %v20811_v53 = vmax.f32 %v15703_v5, 0.0 }
 0x4fb   : > { %v2380_v14 = vadd.f32 %v14461_v17, %v20799_v33  ;;  %v2236_v57 = vpop.f32.mrb[57].mxu0  ;;  %v20813_v17 = vmax.f32 %v15700_v4, 0.0 }
 0x4fc   : > { %v2379_v49 = vadd.f32 %v2236_v57, %v20800_v28  ;;  %14508 = vmatmul.mubr.msk.bf16.vlgmr.msra.gmra.mrb[48].mxu1 %vm1264_vm3, %v2408_v12 }
 0x4fd   : > { %14540 = vmatpush3.bf16.msra.mxu1 %v3107_v22 }
 0x4fe   : > { %v2409_v32 = vpack.c.bf16 %v2380_v14, %v2379_v49  ;;  %v14464_v34 = vpop.f32.mrb[58].mxu0  ;;  %v20814_v14 = vmax.f32 %v15690_v58, 0.0  ;;  %v20815_v49 = vmax.f32 %v15731_v56, 0.0 }
 0x4ff   : > { %v2382_v27 = vadd.f32 %v14464_v34, %v20801_v23  ;;  %v2246_v10 = vpop.f32.mrb[59].mxu0  ;;  %v20816_v34 = vmax.f32 %v15721_v39, 0.0 }
 0x500   : > { %v2381_v48 = vadd.f32 %v2246_v10, %v20802_v35  ;;  %14511 = vmatprep.mubr.msk.bf16.mxu1 %vm1264_vm3, %v2409_v32  ;;  %v20817_v10 = vmax.f32 %v15728_v54, 0.0 }
 0x502   : > { %v2410_v51 = vpack.c.bf16 %v2382_v27, %v2381_v48  ;;  %v14467_v19 = vpop.f32.mrb[60].mxu0  ;;  %v20818_v48 = vmax.f32 %v15718_v29, 0.0 }
 0x503   : > { %v2384_v44 = vadd.f32 %v14467_v19, %v20803_v30  ;;  %v2256_v37 = vpop.f32.mrb[61].mxu0  ;;  %v20819_v30 = vmax.f32 %v15759_v15, 0.0 }
 0x504   : > { %v2383_v13 = vadd.f32 %v2256_v37, %v20804_v31  ;;  %14512 = vmatmul.mubr.msk.bf16.gmra.mrb[52].mxu1 %vm1264_vm3, %v2410_v51  ;;  %v20820_v37 = vmax.f32 %v15749_v41, 0.0 }
 0x506   : > { %v2411_v42 = vpack.c.bf16 %v2384_v44, %v2383_v13  ;;  %v14470_v50 = vpop.f32.mrb[62].mxu0 }
 0x507   : > { %v2386_v25 = vadd.f32 %v14470_v50, %v20805_v16  ;;  %v2266_v43 = vpop.f32.mrb[63].mxu0 }
 0x508   : > { %v2385_v22 = vadd.f32 %v2266_v43, %v20806_v2  ;;  %14515 = vmatprep.mubr.msk.bf16.mxu1 %vm1264_vm3, %v2411_v42  ;;  %v20821_v42 = vld [vmem:[#allocation5_spill] sm:$0xff] }
 0x509   : > { %v20822_v50 = vmax.f32 %v20821_v42, 0.0 }
 0x50a   : > { %v2412_v62 = vpack.c.bf16 %v2386_v25, %v2385_v22  ;;  %v14473_v8 = vpop.f32.mrb[64].mxu0  ;;  %v20823_v25 = vld [vmem:[#allocation4_spill] sm:$0xff] }
 0x50b   : > { %v2388_v45 = vadd.f32 %v14473_v8, %v20807_v11  ;;  %v2276_v0 = vpop.f32.mrb[65].mxu0  ;;  %v20824_v43 = vmax.f32 %v20823_v25, 0.0 }
 0x50c   : > { %v2387_v9 = vadd.f32 %v2276_v0, %v20808_v24  ;;  %14516 = vmatmul.mubr.msk.bf16.gmra.mrb[56].mxu1 %vm1264_vm3, %v2412_v62  ;;  %v20825_v62 = vld [vmem:[#allocation9_spill] sm:$0xff] }
 0x50d   : > { %v20826_v41 = vmax.f32 %v20825_v62, 0.0 }
 0x50e   : > { %v2413_v61 = vpack.c.bf16 %v2388_v45, %v2387_v9  ;;  %v14476_v7 = vpop.f32.mrb[66].mxu0  ;;  %v20827_v45 = vld [vmem:[#allocation7_spill] sm:$0xff] }
 0x50f   : > { %v2390_v60 = vadd.f32 %v14476_v7, %v20809_v26  ;;  %v2286_v63 = vpop.f32.mrb[67].mxu0  ;;  %v20828_v0 = vmax.f32 %v20827_v45, 0.0  ;;  %v20829_v7 = vld [vmem:[#allocation8_spill] sm:$0xff] }
 0x510   : > { %v2389_v18 = vadd.f32 %v2286_v63, %v20810_v1  ;;  %14519 = vmatprep.mubr.msk.bf16.mxu1 %vm1264_vm3, %v2413_v61  ;;  %v20830_v26 = vmax.f32 %v20829_v7, 0.0  ;;  %v20831_v1 = vld [vmem:[#allocation6_spill] sm:$0xff] }
 0x512   : > { %v2414_v47 = vpack.c.bf16 %v2390_v60, %v2389_v18  ;;  %v14479_v38 = vpop.f32.mrb[68].mxu0  ;;  %v20832_v18 = vmax.f32 %v20831_v1, 0.0 }
 0x513   : > { %v2392_v55 = vadd.f32 %v14479_v38, %v20811_v53  ;;  %v2296_v21 = vpop.f32.mrb[69].mxu0  ;;  %v14986_v38 = vld [vmem:[%s15437_s9 + $0x80] sm:$0xff]  }
 0x514   : > { %v2391_v40 = vadd.f32 %v2296_v21, %v20812_v6  ;;  %14520 = vmatmul.mubr.msk.bf16.gmra.mrb[60].mxu1 %vm1264_vm3, %v2414_v47  ;;  %v14988_v21 = vld [vmem:[%s15437_s9 + $0x90] sm:$0xff]   ;;  %v14989_v6 = vld [vmem:[%s15437_s9 + $0x98] sm:$0xff]  }
 0x516   : > { %v2415_v12 = vpack.c.bf16 %v2392_v55, %v2391_v40  ;;  %v14482_v36 = vpop.f32.mrb[70].mxu0  ;;  %v14987_v55 = vld [vmem:[%s15437_s9 + $0x88] sm:$0xff]   ;;  %v14995_v40 = vld [vmem:[%s20587_s15 + $0x14] ss:$8 sps:$4 sm:$0xff]  }
 0x517   : > { %v2394_v33 = vadd.f32 %v14482_v36, %v20813_v17  ;;  %v2306_v20 = vpop.f32.mrb[71].mxu0  ;;  %2809 = vmatprep.subr.bf16.mxu0 %v14995_v40  ;;  %v14996_v36 = vld [vmem:[%s20587_s15 + $0x20] ss:$8 sps:$4 sm:$0xff]   ;;  %v14998_v17 = vld [vmem:[%s20587_s15 + $0x24] ss:$8 sps:$4 sm:$0xff]  }
 0x518   : > { %v2393_v57 = vadd.f32 %v2306_v20, %v20814_v14  ;;  %14523 = vmatprep.mubr.msk.bf16.mxu1 %vm1264_vm3, %v2415_v12  ;;  %v14993_v12 = vld [vmem:[%s20587_s15 + $0x10] ss:$8 sps:$4 sm:$0xff]   ;;  %v15000_v20 = vld [vmem:[%s20776_s1 + $0x20] sm:$0xff]   ;;  %v15001_v14 = vld [vmem:[%s20776_s1 + $0x28] sm:$0xff]  }
 0x519   : > { %2810 = vmatpush1.bf16.msra.mxu0 %v14993_v12 }
 0x51a   : > { %v2416_v28 = vpack.c.bf16 %v2394_v33, %v2393_v57  ;;  %v14485_v5 = vpop.f32.mrb[72].mxu0  ;;  %2811 = vmatprep.subr.bf16.mxu0 %v14998_v17  ;;  %v14999_v33 = vld [vmem:[%s20776_s1 + $0x18] sm:$0xff]   ;;  %v16139_v57 = vld [vmem:[%s20586_s14] ss:$0 sm:$0xff] }
 0x51b   : > { %v2396_v32 = vadd.f32 %v14485_v5, %v20815_v49  ;;  %v2316_v59 = vpop.f32.mrb[73].mxu0  ;;  %14549 = vmatprep.subr.bf16.mxu1 %v14999_v33 }
 0x51c   : > { %v2395_v23 = vadd.f32 %v2316_v59, %v20816_v34  ;;  %14524 = vmatmul.mubr.msk.bf16.gmra.mrb[64].mxu1 %vm1264_vm3, %v2416_v28 }
 0x51d   : > { %2812 = vmatpush1.bf16.msra.mxu0 %v14996_v36 }
 0x51e   : > { %v2417_v27 = vpack.c.bf16 %v2396_v32, %v2395_v23  ;;  %v14488_v4 = vpop.f32.mrb[74].mxu0 }
 0x51f   : > { %v2398_v35 = vadd.f32 %v14488_v4, %v20817_v10  ;;  %v2326_v58 = vpop.f32.mrb[75].mxu0 }
 0x520   : > { %v2397_v51 = vadd.f32 %v2326_v58, %v20818_v48  ;;  %14527 = vmatprep.mubr.msk.bf16.mxu1 %vm1264_vm3, %v2417_v27 }
 0x522   : > { %v2418_v19 = vpack.c.bf16 %v2398_v35, %v2397_v51  ;;  %v14491_v56 = vpop.f32.mrb[76].mxu0 }
 0x523   : > { %v2400_v44 = vadd.f32 %v14491_v56, %v20819_v30  ;;  %v2336_v39 = vpop.f32.mrb[77].mxu0 }
 0x524   : > { %v2399_v31 = vadd.f32 %v2336_v39, %v20820_v37  ;;  %14528 = vmatmul.mubr.msk.bf16.gmra.mrb[68].mxu1 %vm1264_vm3, %v2418_v19 }
 0x526   : > { %v2419_v13 = vpack.c.bf16 %v2400_v44, %v2399_v31  ;;  %v14494_v54 = vpop.f32.mrb[78].mxu0 }
 0x527   : > { %v2402_v16 = vadd.f32 %v14494_v54, %v20822_v50  ;;  %v2346_v29 = vpop.f32.mrb[79].mxu0 }
 0x528   : > { %v2401_v2 = vadd.f32 %v2346_v29, %v20824_v43  ;;  %14531 = vmatprep.mubr.msk.bf16.mxu1 %vm1264_vm3, %v2419_v13 }
 0x52a   : > { %v2420_v15 = vpack.c.bf16 %v2402_v16, %v2401_v2  ;;  %v14497_v22 = vpop.f32.mrb[80].mxu0 }
 0x52b   : > { %v2404_v8 = vadd.f32 %v14497_v22, %v20826_v41  ;;  %v2356_v11 = vpop.f32.mrb[81].mxu0 }
 0x52c   : > { %v2403_v24 = vadd.f32 %v2356_v11, %v20828_v0  ;;  %14532 = vmatmul.mubr.msk.bf16.gmra.mrb[72].mxu1 %vm1264_vm3, %v2420_v15 }
 0x52e   : > { %v2421_v9 = vpack.c.bf16 %v2404_v8, %v2403_v24  ;;  %v14500_v61 = vpop.f32.mrb[82].mxu0 }
 0x52f   : > { %v2406_v60 = vadd.f32 %v14500_v61, %v20830_v26  ;;  %v2366_v63 = vpop.f32.mrb[83].mxu0 }
 0x530   : > { %v2405_v47 = vadd.f32 %v2366_v63, %v20832_v18  ;;  %14535 = vmatprep.mubr.msk.bf16.mxu1 %vm1264_vm3, %v2421_v9 }
 0x532   : > { %v2422_v53 = vpack.c.bf16 %v2406_v60, %v2405_v47 }
 0x534   : > { %14536 = vmatmul.mubr.msk.bf16.gmra.mrb[76].mxu1 %vm1264_vm3, %v2422_v53 }
 0x535   : > { %14541 = vmatprep.mubr.msk.bf16.mxu1 %vm968_vm2, %v14986_v38 }
 0x53c   : > { %14542 = vmatmul.mubr.msk.bf16.vlgmr.msra.gmra.mrb[80].mxu1 %vm968_vm2, %v14987_v55 }
 0x53d   : > { %14545 = vmatprep.mubr.msk.bf16.mxu1 %vm968_vm2, %v14988_v21  ;;  %14550 = vmatpush3.bf16.msra.mxu1 %v14999_v33 }
 0x53e   : > { %14551 = vmatprep.subr.bf16.mxu1 %v15000_v20 }
 0x541   : > { %14552 = vmatpush3.bf16.msra.mxu1 %v15000_v20 }
 0x542   : > { %14553 = vmatprep.subr.bf16.mxu1 %v15001_v14 }
 0x544   : > { %14546 = vmatmul.mubr.msk.bf16.gmra.mrb[84].mxu1 %vm968_vm2, %v14989_v6 }
 0x545   : > { %14554 = vmatpush3.bf16.msra.mxu1 %v15001_v14 }
 0x5cf   : > { %v14509_v28 = vpop.f32.mrb[48].mxu1 }
 0x5d0   : > { %v2545_v5 = vadd.f32 %v14509_v28, %v16139_v57  ;;  %v2536_v49 = vpop.f32.mrb[49].mxu1 }
 0x5d1   : > { %v2537_v32 = vadd.f32 %v16139_v57, %v2536_v49  ;;  %v14510_v59 = vpop.f32.mrb[50].mxu1 }
 0x5d2   : > { %v2548_v34 = vadd.f32 %v14510_v59, %v16139_v57  ;;  %v2539_v23 = vpop.f32.mrb[51].mxu1  ;;  %v2665_v4 = vmax.f32 %v2545_v5, 0.0 }
 0x5d3   : > { %v2540_v27 = vadd.f32 %v16139_v57, %v2539_v23  ;;  %v2663_v35 = vmax.f32 %v2537_v32, 0.0 }
 0x5d4   : > { %v2666_v10 = vmax.f32 %v2548_v34, 0.0 }
 0x5d5   : > { %v2664_v58 = vmax.f32 %v2540_v27, 0.0 }
 0x5d6   : > { %v2696_v48 = vpack.c.bf16 %v2666_v10, %v2665_v4 }
 0x5d7   : > { %v2695_v51 = vpack.c.bf16 %v2664_v58, %v2663_v35  ;;  %v14513_v19 = vpop.f32.mrb[52].mxu1 }
 0x5d8   : > { %v2561_v56 = vadd.f32 %v14513_v19, %v16139_v57  ;;  %v2552_v30 = vpop.f32.mrb[53].mxu1 }
 0x5d9   : > { %v2553_v44 = vadd.f32 %v16139_v57, %v2552_v30  ;;  %v14514_v39 = vpop.f32.mrb[54].mxu1  ;;  %12996 = vmatmul.mubr.msk.bf16.vlgmr.msra.gmra.mrb[84].mxu0 %vm1264_vm3, %v2695_v51 }
 0x5da   : > { %v2564_v37 = vadd.f32 %v14514_v39, %v16139_v57  ;;  %v2555_v31 = vpop.f32.mrb[55].mxu1  ;;  %2849 = vmatprep.mubr.bf16.mxu0 %v20794_v52  ;;  %v2669_v54 = vmax.f32 %v2561_v56, 0.0 }
 0x5db   : > { %v2556_v13 = vadd.f32 %v16139_v57, %v2555_v31  ;;  %v2667_v50 = vmax.f32 %v2553_v44, 0.0 }
 0x5dc   : > { %v2670_v42 = vmax.f32 %v2564_v37, 0.0 }
 0x5dd   : > { %v2668_v16 = vmax.f32 %v2556_v13, 0.0 }
 0x5de   : > { %v2698_v29 = vpack.c.bf16 %v2670_v42, %v2669_v54 }
 0x5df   : > { %v2697_v25 = vpack.c.bf16 %v2668_v16, %v2667_v50  ;;  %v14517_v43 = vpop.f32.mrb[56].mxu1 }
 0x5e0   : > { %v2577_v2 = vadd.f32 %v14517_v43, %v16139_v57  ;;  %v2568_v15 = vpop.f32.mrb[57].mxu1 }
 0x5e1   : > { %v2569_v22 = vadd.f32 %v16139_v57, %v2568_v15  ;;  %v14518_v62 = vpop.f32.mrb[58].mxu1  ;;  %12997 = vmatmul.mubr.msk.bf16.gmra.mrb[88].mxu0 %vm1264_vm3, %v2696_v48 }
 0x5e2   : > { %v2580_v41 = vadd.f32 %v14518_v62, %v16139_v57  ;;  %v2571_v8 = vpop.f32.mrb[59].mxu1  ;;  %2859 = vmatprep.mubr.bf16.mxu0 %v20794_v52  ;;  %v2673_v45 = vmax.f32 %v2577_v2, 0.0 }
 0x5e3   : > { %v2572_v11 = vadd.f32 %v16139_v57, %v2571_v8  ;;  %v2671_v24 = vmax.f32 %v2569_v22, 0.0 }
 0x5e4   : > { %v2674_v0 = vmax.f32 %v2580_v41, 0.0 }
 0x5e5   : > { %v2672_v9 = vmax.f32 %v2572_v11, 0.0 }
 0x5e6   : > { %v2700_v61 = vpack.c.bf16 %v2674_v0, %v2673_v45 }
 0x5e7   : > { %v2699_v7 = vpack.c.bf16 %v2672_v9, %v2671_v24  ;;  %v14521_v26 = vpop.f32.mrb[60].mxu1 }
 0x5e8   : > { %v2593_v60 = vadd.f32 %v14521_v26, %v16139_v57  ;;  %v2584_v63 = vpop.f32.mrb[61].mxu1 }
 0x5e9   : > { %v2585_v1 = vadd.f32 %v16139_v57, %v2584_v63  ;;  %v14522_v18 = vpop.f32.mrb[62].mxu1  ;;  %12998 = vmatmul.mubr.msk.bf16.gmra.mrb[92].mxu0 %vm1264_vm3, %v2697_v25 }
 0x5ea   : > { %v2596_v47 = vadd.f32 %v14522_v18, %v16139_v57  ;;  %v2587_v38 = vpop.f32.mrb[63].mxu1  ;;  %2869 = vmatprep.mubr.bf16.mxu0 %v20794_v52  ;;  %v2677_v55 = vmax.f32 %v2593_v60, 0.0 }
 0x5eb   : > { %v2588_v53 = vadd.f32 %v16139_v57, %v2587_v38  ;;  %v2675_v6 = vmax.f32 %v2585_v1, 0.0 }
 0x5ec   : > { %v2678_v21 = vmax.f32 %v2596_v47, 0.0 }
 0x5ed   : > { %v2676_v40 = vmax.f32 %v2588_v53, 0.0 }
 0x5ee   : > { %v16163_v12 = vpack.c.bf16 %v2678_v21, %v2677_v55  ;;  %v13014_v55 = vld [vmem:[%s20778_s8 + $0x1] ss:$0 sm:$0xff] }
 0x5ef   : > { %v2701_v36 = vpack.c.bf16 %v2676_v40, %v2675_v6  ;;  %v14525_v17 = vpop.f32.mrb[64].mxu1 }
 0x5f0   : > { %v2609_v33 = vadd.f32 %v14525_v17, %v16139_v57  ;;  %v2600_v20 = vpop.f32.mrb[65].mxu1 }
 0x5f1   : > { %v2601_v14 = vadd.f32 %v16139_v57, %v2600_v20  ;;  %v14526_v28 = vpop.f32.mrb[66].mxu1  ;;  %12999 = vmatmul.mubr.msk.bf16.gmra.mrb[96].mxu0 %vm1264_vm3, %v2698_v29 }
 0x5f2   : > { %v2612_v5 = vadd.f32 %v14526_v28, %v16139_v57  ;;  %v2603_v49 = vpop.f32.mrb[67].mxu1  ;;  %2879 = vmatprep.mubr.bf16.mxu0 %v20794_v52  ;;  %v2681_v59 = vmax.f32 %v2609_v33, 0.0 }
 0x5f3   : > { %v2604_v32 = vadd.f32 %v16139_v57, %v2603_v49  ;;  %v2679_v23 = vmax.f32 %v2601_v14, 0.0 }
 0x5f4   : > { %v2682_v34 = vmax.f32 %v2612_v5, 0.0 }
 0x5f5   : > { %v2680_v27 = vmax.f32 %v2604_v32, 0.0 }
 0x5f6   : > { %v16171_v4 = vpack.c.bf16 %v2682_v34, %v2681_v59 }
 0x5f7   : > { %v16173_v10 = vpack.c.bf16 %v2680_v27, %v2679_v23  ;;  %v14529_v35 = vpop.f32.mrb[68].mxu1 }
 0x5f8   : > { %v2625_v58 = vadd.f32 %v14529_v35, %v16139_v57  ;;  %v2616_v48 = vpop.f32.mrb[69].mxu1 }
 0x5f9   : > { %v2617_v51 = vadd.f32 %v16139_v57, %v2616_v48  ;;  %v14530_v19 = vpop.f32.mrb[70].mxu1  ;;  %13000 = vmatmul.mubr.msk.bf16.gmra.mrb[100].mxu0 %vm1264_vm3, %v2699_v7 }
 0x5fa   : > { %v2628_v56 = vadd.f32 %v14530_v19, %v16139_v57  ;;  %v2619_v30 = vpop.f32.mrb[71].mxu1  ;;  %2889 = vmatprep.mubr.bf16.mxu0 %v20794_v52  ;;  %v2685_v39 = vmax.f32 %v2625_v58, 0.0 }
 0x5fb   : > { %v2620_v44 = vadd.f32 %v16139_v57, %v2619_v30  ;;  %v2683_v31 = vmax.f32 %v2617_v51, 0.0 }
 0x5fc   : > { %v2686_v37 = vmax.f32 %v2628_v56, 0.0 }
 0x5fd   : > { %v2684_v13 = vmax.f32 %v2620_v44, 0.0 }
 0x5fe   : > { %v16181_v54 = vpack.c.bf16 %v2686_v37, %v2685_v39 }
 0x5ff   : > { %v16183_v42 = vpack.c.bf16 %v2684_v13, %v2683_v31  ;;  %v14533_v50 = vpop.f32.mrb[72].mxu1 }
 0x600   : > { %v2641_v16 = vadd.f32 %v14533_v50, %v16139_v57  ;;  %v2632_v29 = vpop.f32.mrb[73].mxu1  ;;  %v15010_v50 = vld [vmem:[%s20779_s28 + $0x54] ss:$8 sps:$4 sm:$0xff]  }
 0x601   : > { %v2633_v25 = vadd.f32 %v16139_v57, %v2632_v29  ;;  %v14534_v43 = vpop.f32.mrb[74].mxu1  ;;  %13001 = vmatmul.mubr.msk.bf16.gmra.mrb[104].mxu0 %vm1264_vm3, %v2700_v61  ;;  %v15013_v29 = vld [vmem:[%s20780_s30 + $0x1c] ss:$8 sps:$4 sm:$0xff]  }
 0x602   : > { %v2644_v2 = vadd.f32 %v14534_v43, %v16139_v57  ;;  %v2635_v15 = vpop.f32.mrb[75].mxu1  ;;  %2899 = vmatprep.mubr.bf16.mxu0 %v20794_v52  ;;  %v2689_v62 = vmax.f32 %v2641_v16, 0.0  ;;  %v15008_v16 = vld [vmem:[%s20779_s28 + $0x50] ss:$8 sps:$4 sm:$0xff]  }
 0x603   : > { %v2636_v22 = vadd.f32 %v16139_v57, %v2635_v15  ;;  %v2687_v8 = vmax.f32 %v2633_v25, 0.0 }
 0x604   : > { %v2690_v41 = vmax.f32 %v2644_v2, 0.0 }
 0x605   : > { %v2688_v11 = vmax.f32 %v2636_v22, 0.0 }
 0x606   : > { %v16191_v45 = vpack.c.bf16 %v2690_v41, %v2689_v62 }
 0x607   : > { %v2707_v0 = vpack.c.bf16 %v2688_v11, %v2687_v8  ;;  %v14537_v24 = vpop.f32.mrb[76].mxu1 }
 0x608   : > { %v2657_v9 = vadd.f32 %v14537_v24, %v16139_v57  ;;  %v2648_v7 = vpop.f32.mrb[77].mxu1 }
 0x609   : > { %v2649_v61 = vadd.f32 %v16139_v57, %v2648_v7  ;;  %v14538_v26 = vpop.f32.mrb[78].mxu1  ;;  %13002 = vmatmul.mubr.msk.bf16.gmra.mrb[108].mxu0 %vm1264_vm3, %v2701_v36 }
 0x60a   : > { %v2660_v60 = vadd.f32 %v14538_v26, %v16139_v57  ;;  %v2651_v63 = vpop.f32.mrb[79].mxu1  ;;  %2909 = vmatprep.mubr.bf16.mxu0 %v20794_v52  ;;  %v2693_v18 = vmax.f32 %v2657_v9, 0.0 }
 0x60b   : > { %v2652_v1 = vadd.f32 %v16139_v57, %v2651_v63  ;;  %v2691_v38 = vmax.f32 %v2649_v61, 0.0 }
 0x60c   : > { %v2694_v47 = vmax.f32 %v2660_v60, 0.0 }
 0x60d   : > { %v2692_v53 = vmax.f32 %v2652_v1, 0.0 }
 0x60e   : > { %v2710_v21 = vpack.c.bf16 %v2694_v47, %v2693_v18 }
 0x60f   : > { %v2709_v6 = vpack.c.bf16 %v2692_v53, %v2691_v38  ;;  %v14543_v40 = vpop.f32.mrb[80].mxu1 }
 0x610   : > { %v3152_v17 = vadd.f32 %v14543_v40, %v13014_v55  ;;  %v3143_v36 = vpop.f32.mrb[81].mxu1 }
 0x611   : > { %v3144_v33 = vadd.f32 %v13014_v55, %v3143_v36  ;;  %13003 = vmatmul.mubr.msk.bf16.gmra.mrb[112].mxu0 %vm1264_vm3, %v16163_v12  ;;  %v14544_v20 = vpop.f32.mrb[82].mxu1 }
 0x612   : > { %v3155_v14 = vadd.f32 %v14544_v20, %v13014_v55  ;;  %v3146_v57 = vpop.f32.mrb[83].mxu1  ;;  %2919 = vmatprep.mubr.bf16.mxu0 %v20794_v52  ;;  %v3176_v5 = vmax.f32 %v3152_v17, 0.0 }
 0x613   : > { %v3147_v28 = vadd.f32 %v13014_v55, %v3146_v57  ;;  %v3174_v32 = vmax.f32 %v3144_v33, 0.0 }
 0x614   : > { %v3177_v49 = vmax.f32 %v3155_v14, 0.0 }
 0x615   : > { %v3175_v59 = vmax.f32 %v3147_v28, 0.0  ;;  %v13030_v28 = vld [vmem:[%s20783_s27 + $0x1] ss:$0 sm:$0xff] }
 0x616   : > { %v3183_v34 = vpack.c.bf16 %v3177_v49, %v3176_v5 }
 0x617   : > { %v3182_v23 = vpack.c.bf16 %v3175_v59, %v3174_v32  ;;  %v14547_v27 = vpop.f32.mrb[84].mxu1 }
 0x618   : > { %v3168_v35 = vadd.f32 %v14547_v27, %v13014_v55  ;;  %v3159_v58 = vpop.f32.mrb[85].mxu1 }
 0x619   : > { %v3160_v48 = vadd.f32 %v13014_v55, %v3159_v58  ;;  %13004 = vmatmul.mubr.msk.bf16.gmra.mrb[116].mxu0 %vm1264_vm3, %v16173_v10  ;;  %v14548_v12 = vpop.f32.mrb[86].mxu1  ;;  %14555 = vmatprep.mubr.msk.bf16.mxu1 %vm1264_vm3, %v3182_v23  ;;  %v15002_v10 = vld [vmem:[%s20779_s28 + $0x30] ss:$8 sps:$4 sm:$0xff]  }
 0x61a   : > { %v3171_v51 = vadd.f32 %v14548_v12, %v13014_v55  ;;  %v3162_v19 = vpop.f32.mrb[87].mxu1  ;;  %14556 = vmatmul.mubr.msk.bf16.vlgmr.msra.gmra.mrb[88].mxu1 %vm1264_vm3, %v3183_v34  ;;  %2929 = vmatprep.mubr.bf16.mxu0 %v20794_v52  ;;  %v3180_v30 = vmax.f32 %v3168_v35, 0.0 }
 0x61b   : > { %v3163_v56 = vadd.f32 %v13014_v55, %v3162_v19  ;;  %v3178_v39 = vmax.f32 %v3160_v48, 0.0 }
 0x61c   : > { %v3181_v44 = vmax.f32 %v3171_v51, 0.0 }
 0x61d   : > { %v3179_v37 = vmax.f32 %v3163_v56, 0.0 }
 0x61e   : > { %v3185_v31 = vpack.c.bf16 %v3181_v44, %v3180_v30 }
 0x61f   : > { %v3184_v13 = vpack.c.bf16 %v3179_v37, %v3178_v39 }
 0x621   : > { %13005 = vmatmul.mubr.msk.bf16.gmra.mrb[120].mxu0 %vm1264_vm3, %v16171_v4  ;;  %14559 = vmatprep.mubr.msk.bf16.mxu1 %vm1264_vm3, %v3184_v13  ;;  %v15004_v4 = vld [vmem:[%s20779_s28 + $0x34] ss:$8 sps:$4 sm:$0xff]  }
 0x622   : > { %14560 = vmatmul.mubr.msk.bf16.gmra.mrb[92].mxu1 %vm1264_vm3, %v3185_v31  ;;  %2939 = vmatprep.mubr.bf16.mxu0 %v20794_v52 }
 0x623   : > { %3413 = vmatprep.mubr.bf16.mxu1 %v20794_v52  ;;  %3381 = vmatprep.subr.bf16.mxu1 %v15004_v4 }
 0x624   : > { %3382 = vmatpush1.bf16.msra.mxu1 %v15002_v10 }
 0x629   : > { %13006 = vmatmul.mubr.msk.bf16.gmra.mrb[124].mxu0 %vm1264_vm3, %v16183_v42  ;;  %v15005_v42 = vld [vmem:[%s20779_s28 + $0x40] ss:$8 sps:$4 sm:$0xff]  }
 0x62a   : > { %2949 = vmatprep.mubr.bf16.mxu0 %v20794_v52 }
 0x631   : > { %13007 = vmatmul.mubr.msk.bf16.gmra.mrb[128].mxu0 %vm1264_vm3, %v16181_v54  ;;  %v15007_v54 = vld [vmem:[%s20779_s28 + $0x44] ss:$8 sps:$4 sm:$0xff]  }
 0x632   : > { %2959 = vmatprep.mubr.bf16.mxu0 %v20794_v52  ;;  %3383 = vmatprep.subr.bf16.mxu1 %v15007_v54 }
 0x633   : > { %3384 = vmatpush1.bf16.msra.mxu1 %v15005_v42 }
 0x634   : > { %3385 = vmatprep.subr.bf16.mxu1 %v15010_v50 }
 0x637   : > { %3386 = vmatpush1.bf16.msra.mxu1 %v15008_v16 }
 0x638   : > { %3472 = vmatprep.subr.bf16.mxu1 %v15013_v29 }
 0x639   : > { %13008 = vmatmul.mubr.msk.bf16.gmra.mrb[132].mxu0 %vm1264_vm3, %v2707_v0 }
 0x63a   : > { %2969 = vmatprep.mubr.bf16.mxu0 %v20794_v52 }
 0x641   : > { %13009 = vmatmul.mubr.msk.bf16.gmra.mrb[136].mxu0 %vm1264_vm3, %v16191_v45 }
 0x642   : > { %2979 = vmatprep.mubr.bf16.mxu0 %v20794_v52 }
 0x649   : > { %13010 = vmatmul.mubr.msk.bf16.gmra.mrb[140].mxu0 %vm1264_vm3, %v2709_v6 }
 0x64a   : > { %2989 = vmatprep.mubr.bf16.mxu0 %v20794_v52 }
 0x651   : > { %13011 = vmatmul.mubr.msk.bf16.gmra.mrb[144].mxu0 %vm1264_vm3, %v2710_v21 }
 0x6ac   : > { %v16251_v25 = vpop.f32.mrb[84].mxu0 }
 0x6ad   : > { %v16253_v43 = vpop.f32.mrb[85].mxu0 }
 0x6ae   : > { %v16255_v2 = vpop.f32.mrb[86].mxu0 }
 0x6af   : > { %v16257_v15 = vpop.f32.mrb[87].mxu0 }
 0x6b4   : > { %v16259_v22 = vpop.f32.mrb[88].mxu0 }
 0x6b5   : > { %v16261_v62 = vpop.f32.mrb[89].mxu0 }
 0x6b6   : > { %v16263_v41 = vpop.f32.mrb[90].mxu0 }
 0x6b7   : > { %v16265_v8 = vpop.f32.mrb[91].mxu0 }
 0x6bc   : > { %v16267_v11 = vpop.f32.mrb[92].mxu0 }
 0x6bd   : > { %v16269_v45 = vpop.f32.mrb[93].mxu0 }
 0x6be   : > { %v16271_v0 = vpop.f32.mrb[94].mxu0 }
 0x6bf   : > { %v16273_v24 = vpop.f32.mrb[95].mxu0 }
 0x6c4   : > { %v16275_v9 = vpop.f32.mrb[96].mxu0 }
 0x6c5   : > { %20833 = vst [vmem:[#allocation5_spill] sm:$0xff] %v16275_v9  ;;  %v16277_v7 = vpop.f32.mrb[97].mxu0 }
 0x6c6   : > { %20834 = vst [vmem:[#allocation4_spill] sm:$0xff] %v16277_v7  ;;  %v16279_v61 = vpop.f32.mrb[98].mxu0 }
 0x6c7   : > { %20835 = vst [vmem:[#allocation9_spill] sm:$0xff] %v16279_v61  ;;  %v16281_v26 = vpop.f32.mrb[99].mxu0 }
 0x6c8   : > { %20836 = vst [vmem:[#allocation7_spill] sm:$0xff] %v16281_v26 }
 0x6cc   : > { %v16283_v60 = vpop.f32.mrb[100].mxu0 }
 0x6cd   : > { %20837 = vst [vmem:[#allocation8_spill] sm:$0xff] %v16283_v60  ;;  %v16285_v63 = vpop.f32.mrb[101].mxu0 }
 0x6ce   : > { %20838 = vst [vmem:[#allocation6_spill] sm:$0xff] %v16285_v63  ;;  %v16287_v1 = vpop.f32.mrb[102].mxu0 }
 0x6cf   : > { %20839 = vst [vmem:[#allocation12_spill] sm:$0xff] %v16287_v1  ;;  %v16289_v18 = vpop.f32.mrb[103].mxu0 }
 0x6d0   : > { %20840 = vst [vmem:[#allocation13_spill] sm:$0xff] %v16289_v18 }
 0x6d4   : > { %v16291_v47 = vpop.f32.mrb[104].mxu0 }
 0x6d5   : > { %20841 = vst [vmem:[#allocation14_spill] sm:$0xff] %v16291_v47  ;;  %v16293_v38 = vpop.f32.mrb[105].mxu0 }
 0x6d6   : > { %20842 = vst [vmem:[#allocation15_spill] sm:$0xff] %v16293_v38  ;;  %v16295_v53 = vpop.f32.mrb[106].mxu0 }
 0x6d7   : > { %20843 = vst [vmem:[#allocation16_spill] sm:$0xff] %v16295_v53  ;;  %v16297_v55 = vpop.f32.mrb[107].mxu0 }
 0x6d8   : > { %20844 = vst [vmem:[#allocation17_spill] sm:$0xff] %v16297_v55 }
 0x6dc   : > { %v16299_v21 = vpop.f32.mrb[108].mxu0 }
 0x6dd   : > { %20845 = vst [vmem:[#allocation18_spill] sm:$0xff] %v16299_v21  ;;  %v16301_v6 = vpop.f32.mrb[109].mxu0 }
 0x6de   : > { %20846 = vst [vmem:[#allocation19_spill] sm:$0xff] %v16301_v6  ;;  %v16303_v40 = vpop.f32.mrb[110].mxu0 }
 0x6df   : > { %20847 = vst [vmem:[#allocation20_spill] sm:$0xff] %v16303_v40  ;;  %v16305_v17 = vpop.f32.mrb[111].mxu0 }
 0x6e0   : > { %20848 = vst [vmem:[#allocation21_spill] sm:$0xff] %v16305_v17 }
 0x6e4   : > { %v16307_v36 = vpop.f32.mrb[112].mxu0 }
 0x6e5   : > { %20849 = vst [vmem:[#allocation22_spill] sm:$0xff] %v16307_v36  ;;  %v16309_v33 = vpop.f32.mrb[113].mxu0 }
 0x6e6   : > { %20850 = vst [vmem:[#allocation23_spill] sm:$0xff] %v16309_v33  ;;  %v16311_v20 = vpop.f32.mrb[114].mxu0 }
 0x6e7   : > { %20851 = vst [vmem:[#allocation24_spill] sm:$0xff] %v16311_v20  ;;  %v16313_v14 = vpop.f32.mrb[115].mxu0 }
 0x6e8   : > { %20852 = vst [vmem:[#allocation25_spill] sm:$0xff] %v16313_v14 }
 0x6ec   : > { %v16315_v57 = vpop.f32.mrb[116].mxu0 }
 0x6ed   : > { %20853 = vst [vmem:[#allocation26_spill] sm:$0xff] %v16315_v57  ;;  %v16320_v5 = vpop.f32.mrb[117].mxu0  ;;  %v14557_v49 = vpop.f32.mrb[88].mxu1 }
 0x6ee   : > { %20854 = vst [vmem:[#allocation27_spill] sm:$0xff] %v16320_v5  ;;  %v16322_v32 = vpop.f32.mrb[118].mxu0  ;;  %v3265_v59 = vpop.f32.mrb[89].mxu1  ;;  %v16324_v34 = vadd.f32 %v14557_v49, %v13030_v28 }
 0x6ef   : > { %20855 = vst [vmem:[#allocation28_spill] sm:$0xff] %v16322_v32  ;;  %v16326_v23 = vadd.f32 %v13030_v28, %v3265_v59  ;;  %v16328_v27 = vpop.f32.mrb[119].mxu0  ;;  %v14558_v35 = vpop.f32.mrb[90].mxu1 }
 0x6f0   : > { %20856 = vst [vmem:[#allocation29_spill] sm:$0xff] %v16328_v27  ;;  %v3268_v58 = vpop.f32.mrb[91].mxu1  ;;  %v16331_v12 = vadd.f32 %v14558_v35, %v13030_v28  ;;  %v20654_v19 = vmax.f32 %v16324_v34, 0.0 }
 0x6f1   : > { %v20653_v48 = vmax.f32 %v16326_v23, 0.0  ;;  %v16333_v51 = vadd.f32 %v13030_v28, %v3268_v58 }
 0x6f2   : > { %v20656_v39 = vmax.f32 %v16331_v12, 0.0  ;;  %v3307_v42 = vsel %vm1264_vm3, %v20654_v19, 0.0 }
 0x6f3   : > { %v20655_v56 = vmax.f32 %v16333_v51, 0.0  ;;  %v3304_v44 = vsel %vm1264_vm3, %v20653_v48, 0.0 }
 0x6f4   : > { %v16337_v30 = vpop.f32.mrb[120].mxu0  ;;  %v3309_v58 = vsel %vm1264_vm3, %v20656_v39, 0.0 }
 0x6f5   : > { %20857 = vst [vmem:[#allocation30_spill] sm:$0xff] %v16337_v30  ;;  %v3305_v37 = vsel %vm1264_vm3, %v20655_v56, 0.0  ;;  %v16346_v31 = vpop.f32.mrb[121].mxu0  ;;  %v14561_v13 = vpop.f32.mrb[92].mxu1 }
 0x6f6   : > { %20858 = vst [vmem:[#allocation31_spill] sm:$0xff] %v16346_v31  ;;  %v3306_v4 = vadd.f32 %v3305_v37, %v3304_v44  ;;  %v16348_v10 = vpop.f32.mrb[122].mxu0  ;;  %v3281_v54 = vpop.f32.mrb[93].mxu1  ;;  %v16353_v50 = vadd.f32 %v14561_v13, %v13030_v28 }
 0x6f7   : > { %20859 = vst [vmem:[#allocation32_spill] sm:$0xff] %v16348_v10  ;;  %v16355_v16 = vadd.f32 %v13030_v28, %v3281_v54  ;;  %v16357_v29 = vpop.f32.mrb[123].mxu0  ;;  %v14562_v49 = vpop.f32.mrb[94].mxu1 }
 0x6f8   : > { %20860 = vst [vmem:[#allocation33_spill] sm:$0xff] %v16357_v29  ;;  %v3308_v59 = vadd.f32 %v3307_v42, %v3306_v4  ;;  %v3284_v35 = vpop.f32.mrb[95].mxu1  ;;  %v16363_v37 = vadd.f32 %v14562_v49, %v13030_v28  ;;  %v20659_v13 = vmax.f32 %v16353_v50, 0.0 }
 0x6f9   : > { %v20657_v44 = vmax.f32 %v16355_v16, 0.0  ;;  %v16365_v48 = vadd.f32 %v13030_v28, %v3284_v35 }
 0x6fa   : > { %v3310_v19 = vadd.f32 %v3309_v58, %v3308_v59  ;;  %v20660_v39 = vmax.f32 %v16363_v37, 0.0  ;;  %v3315_v58 = vsel %vm1264_vm3, %v20659_v13, 0.0 }
 0x6fb   : > { %v3311_v54 = vsel %vm1264_vm3, %v20657_v44, 0.0  ;;  %v20658_v4 = vmax.f32 %v16365_v48, 0.0 }
 0x6fc   : > { %v3312_v42 = vadd.f32 %v3311_v54, %v3310_v19  ;;  %v16372_v56 = vpop.f32.mrb[124].mxu0  ;;  %v3317_v54 = vsel %vm1264_vm3, %v20660_v39, 0.0 }
 0x6fd   : > { %20861 = vst [vmem:[#allocation34_spill] sm:$0xff] %v16372_v56  ;;  %v3313_v49 = vsel %vm1264_vm3, %v20658_v4, 0.0  ;;  %v16378_v28 = vpop.f32.mrb[125].mxu0 }
 0x6fe   : > { %20862 = vst [vmem:[#allocation35_spill] sm:$0xff] %v16378_v28  ;;  %v3314_v59 = vadd.f32 %v3313_v49, %v3312_v42  ;;  %v16380_v35 = vpop.f32.mrb[126].mxu0 }
 0x6ff   : > { %20863 = vst [vmem:[#allocation36_spill] sm:$0xff] %v16380_v35  ;;  %v16385_v44 = vpop.f32.mrb[127].mxu0 }
 0x700   : > { %20864 = vst [vmem:[#allocation37_spill] sm:$0xff] %v16385_v44  ;;  %v3316_v19 = vadd.f32 %v3315_v58, %v3314_v59 }
 0x702   : > { %v3318_v56 = vadd.f32 %v3317_v54, %v3316_v19  ;;  %v15011_v54 = vld [vmem:[%s20780_s30 + $0x18] ss:$8 sps:$4 sm:$0xff]  }
 0x704   : > { %v3319_v29 = vrot.slane %v3318_v56, 4  ;;  %v16390_v10 = vpop.f32.mrb[128].mxu0 }
 0x705   : > { %20865 = vst [vmem:[#allocation38_spill] sm:$0xff] %v16390_v10  ;;  %v16392_v4 = vpop.f32.mrb[129].mxu0 }
 0x706   : > { %20866 = vst [vmem:[#allocation39_spill] sm:$0xff] %v16392_v4  ;;  %v3320_v42 = vadd.f32 %v3319_v29, %v3318_v56  ;;  %v16394_v49 = vpop.f32.mrb[130].mxu0  ;;  %v13056_v56 = vld [vmem:[%s20780_s30 + $0x28] sm:$0xff] }
 0x707   : > { %20867 = vst [vmem:[#allocation40_spill] sm:$0xff] %v16394_v49  ;;  %v16396_v35 = vpop.f32.mrb[131].mxu0 }
 0x708   : > { %20868 = vst [vmem:[#allocation41_spill] sm:$0xff] %v16396_v35  ;;  %v3321_v28 = vrot.slane %v3320_v42, 2 }
 0x70a   : > { %v3322_v13 = vadd.f32 %v3321_v28, %v3320_v42  ;;  %v13061_v42 = vcombine.high %v13056_v56, %v13056_v56 }
 0x70c   : > { %v3323_v31 = vrot.slane %v3322_v13, 1  ;;  %v16398_v44 = vpop.f32.mrb[132].mxu0 }
 0x70d   : > { %20869 = vst [vmem:[#allocation42_spill] sm:$0xff] %v16398_v44  ;;  %v16400_v59 = vpop.f32.mrb[133].mxu0  ;;  %v13060_v44 = vcombine.low %v13056_v56, %v13056_v56  ;;  %v15016_v56 = vld [vmem:[%s20582_s10 + $0x60] sm:$0xff]  }
 0x70e   : > { %20870 = vst [vmem:[#allocation43_spill] sm:$0xff] %v16400_v59  ;;  %v3324_v58 = vadd.f32 %v3323_v31, %v3322_v13  ;;  %v16402_v39 = vpop.f32.mrb[134].mxu0 }
 0x70f   : > { %20871 = vst [vmem:[#allocation44_spill] sm:$0xff] %v16402_v39  ;;  %v16404_v19 = vpop.f32.mrb[135].mxu0 }
 0x710   : > { %20872 = vst [vmem:[#allocation45_spill] sm:$0xff] %v16404_v19  ;;  %v3326_v29 = vmul.f32 0.015625, %v3324_v58  ;;  %v3467_v58 = vsel %vm1745_vm4, %v13060_v44, 0  ;;  %v15017_v44 = vld [vmem:[%s20582_s10 + $0x68] sm:$0xff]  }
 0x712   : > { %v3327_v28 = vpack.c.bf16 %v3326_v29, %v3326_v29 }
 0x714   : > { %v16412_v35 = vpop.f32.mrb[136].mxu0  ;;  %13051 = vmatmul.mubr.msk.bf16.vlgmr.msra.gmra.mrb[96].mxu1 %vm1264_vm3, %v3327_v28 }
 0x715   : > { %20873 = vst [vmem:[#allocation46_spill] sm:$0xff] %v16412_v35  ;;  %v16415_v31 = vpop.f32.mrb[137].mxu0  ;;  %3473 = vmatpush1.bf16.msra.mxu1 %v15011_v54  ;;  %3504 = vmatprep.mubr.bf16.mxu1 %v20794_v52  ;;  %v16431_v54 = vld [vmem:[%s15557_s25] sm:$0xff]  }
 0x716   : > { %20874 = vst [vmem:[#allocation47_spill] sm:$0xff] %v16415_v31  ;;  %v16418_v13 = vpop.f32.mrb[138].mxu0  ;;  %13062 = vmatprep.subr.msk.bf16.mxu1 %vm1745_vm4, %v13061_v42 }
 0x717   : > { %20875 = vst [vmem:[#allocation48_spill] sm:$0xff] %v16418_v13  ;;  %v16422_v19 = vpop.f32.mrb[139].mxu0  ;;  %v20885_v13 = vld [vmem:[#allocation11_spill] sm:$0xff] }
 0x718   : > { %20876 = vst [vmem:[#allocation49_spill] sm:$0xff] %v16422_v19  ;;  %v16466_v19 = vld [vmem:[%s15557_s25 + $0x10] sm:$0xff]  }
 0x719   : > { %3475 = vmatpush1.bf16.msra.mxu1 %v3467_v58 }
 0x71a   : > { %3710 = vmatprep.subr.bf16.mxu1 %v20794_v52 }
 0x71c   : > { %v16428_v29 = vpop.f32.mrb[140].mxu0  ;;  %13063 = vmatmul.mubr.msk.bf16.vlgmr.msra.gmra.mrb[100].mxu1 %vm1732_vm5, %v16431_v54 }
 0x71d   : > { %20877 = vst [vmem:[#allocation50_spill] sm:$0xff] %v16428_v29  ;;  %v16435_v28 = vpop.f32.mrb[141].mxu0  ;;  %3514 = vmatprep.mubr.bf16.mxu1 %v20794_v52  ;;  %3711 = vmatpush1.bf16.msra.mxu1 %v15016_v56  ;;  %v16453_v29 = vld [vmem:[%s15557_s25 + $0x8] sm:$0xff]  }
 0x71e   : > { %20878 = vst [vmem:[#allocation51_spill] sm:$0xff] %v16435_v28  ;;  %v16441_v42 = vpop.f32.mrb[142].mxu0  ;;  %3712 = vmatprep.subr.bf16.mxu1 %v20794_v52  ;;  %v15018_v28 = vld [vmem:[%s20582_s10 + $0x70] sm:$0xff]  }
 0x71f   : > { %20879 = vst [vmem:[#allocation52_spill] sm:$0xff] %v16441_v42  ;;  %v16444_v58 = vpop.f32.mrb[143].mxu0 }
 0x720   : > { %20880 = vst [vmem:[#allocation53_spill] sm:$0xff] %v16444_v58 }
 0x721   : > { %3713 = vmatpush1.bf16.msra.mxu1 %v15017_v44 }
 0x722   : > { %3714 = vmatprep.subr.bf16.mxu1 %v20794_v52 }
 0x724   : > { %v16450_v56 = vpop.f32.mrb[144].mxu0  ;;  %13064 = vmatmul.mubr.msk.bf16.gmra.mrb[104].mxu1 %vm1732_vm5, %v16453_v29 }
 0x725   : > { %20881 = vst [vmem:[#allocation54_spill] sm:$0xff] %v16450_v56  ;;  %v16457_v42 = vpop.f32.mrb[145].mxu0  ;;  %3524 = vmatprep.mubr.bf16.mxu1 %v20794_v52  ;;  %3715 = vmatpush1.bf16.msra.mxu1 %v15018_v28  ;;  %v16472_v56 = vld [vmem:[%s15557_s25 + $0x18] sm:$0xff]  }
 0x726   : > { %20882 = vst [vmem:[#allocation55_spill] sm:$0xff] %v16457_v42  ;;  %v16460_v58 = vpop.f32.mrb[146].mxu0  ;;  %3716 = vmatprep.subr.bf16.mxu1 %v20794_v52  ;;  %v15019_v28 = vld [vmem:[%s20582_s10 + $0x78] sm:$0xff]   ;;  %v13044_v42 = vld [vmem:[%s20791_s3 + $0x2] sm:$0x3] }
 0x727   : > { %20883 = vst [vmem:[#allocation56_spill] sm:$0xff] %v16460_v58  ;;  %v16463_v44 = vpop.f32.mrb[147].mxu0  ;;  %v15021_v58 = vld [vmem:[%s20582_s10 + $0x88] sm:$0xff]   ;;  %v3375_v31 = vrot.slane %v13044_v42, %v20885_v13 }
 0x728   : > { %20884 = vst [vmem:[#allocation57_spill] sm:$0xff] %v16463_v44  ;;  %v15020_v44 = vld [vmem:[%s20582_s10 + $0x80] sm:$0xff]  }
 0x729   : > { %3717 = vmatpush1.bf16.msra.mxu1 %v15019_v28  ;;  %v15022_v28 = vld [vmem:[%s20582_s10 + $0x90] sm:$0xff]  }
 0x72a   : > { %3718 = vmatprep.subr.bf16.mxu1 %v20794_v52 }
 0x72c   : > { %13065 = vmatmul.mubr.msk.bf16.gmra.mrb[108].mxu1 %vm1732_vm5, %v16466_v19 }
 0x72d   : > { %3534 = vmatprep.mubr.bf16.mxu1 %v20794_v52  ;;  %3719 = vmatpush1.bf16.msra.mxu1 %v15020_v44  ;;  %v15023_v44 = vld [vmem:[%s20582_s10 + $0x98] sm:$0xff]  }
 0x72e   : > { %3720 = vmatprep.subr.bf16.mxu1 %v20794_v52 }
 0x731   : > { %3721 = vmatpush1.bf16.msra.mxu1 %v15021_v58  ;;  %v15024_v58 = vld [vmem:[%s20582_s10 + $0xa0] sm:$0xff]  }
 0x732   : > { %3722 = vmatprep.subr.bf16.mxu1 %v20794_v52 }
 0x734   : > { %13066 = vmatmul.mubr.msk.bf16.gmra.mrb[112].mxu1 %vm1732_vm5, %v16472_v56 }
 0x735   : > { %3723 = vmatpush1.bf16.msra.mxu1 %v15022_v28  ;;  %v15025_v28 = vld [vmem:[%s20582_s10 + $0xa8] sm:$0xff]  }
 0x736   : > { %3724 = vmatprep.subr.bf16.mxu1 %v20794_v52 }
 0x739   : > { %3725 = vmatpush1.bf16.msra.mxu1 %v15023_v44  ;;  %v15026_v44 = vld [vmem:[%s20582_s10 + $0xb0] sm:$0xff]  }
 0x73a   : > { %3726 = vmatprep.subr.bf16.mxu1 %v20794_v52 }
 0x73d   : > { %3727 = vmatpush1.bf16.msra.mxu1 %v15024_v58  ;;  %v15027_v58 = vld [vmem:[%s20582_s10 + $0xb8] sm:$0xff]  }
 0x73e   : > { %3728 = vmatprep.subr.bf16.mxu1 %v20794_v52 }
 0x741   : > { %3729 = vmatpush1.bf16.msra.mxu1 %v15025_v28  ;;  %v3371_v28 = vrot.slane %v13044_v42, %v15856_v46  ;;  %v13057_v42 = vld [vmem:[%s20793_s4 + $0x2] sm:$0x3] }
 0x742   : > { %3730 = vmatprep.subr.bf16.mxu1 %v20794_v52 }
 0x745   : > { %3731 = vmatpush1.bf16.msra.mxu1 %v15026_v44 }
 0x746   : > { %3732 = vmatprep.subr.bf16.mxu1 %v20794_v52 }
 0x749   : > { %3733 = vmatpush1.bf16.msra.mxu1 %v15027_v58 }
 0x7e7   : > { %v3415_v35 = vpop.f32.mrb[96].mxu1 }
 0x7e8   : > { %v3416_v39 = vadd.f32 %v3415_v35, %v3371_v28  ;;  %v3417_v59 = vpop.f32.mrb[97].mxu1 }
 0x7e9   : > { %v3418_v49 = vadd.f32 %v3417_v59, %v3375_v31  ;;  %v3419_v44 = vpop.f32.mrb[98].mxu1 }
 0x7ea   : > { %v13052_v4 = vmul.f32 -1.442695, %v3416_v39  ;;  %v3420_v10 = vpop.f32.mrb[99].mxu1 }
 0x7eb   : > { %v13053_v30 = vmul.f32 -1.442695, %v3418_v49  ;;  %v3444_v10 = vrot.slane %v13057_v42, %v15856_v46 }
 0x7ec   : > { %15239 = vpow2.f32 %v13052_v4  ;;  %v3448_v4 = vrot.slane %v13057_v42, %v20885_v13 }
 0x7ed   : > { %15241 = vpow2.f32 %v13053_v30 }
 0x7ef   : > { %v3506_v27 = vpop.f32.mrb[100].mxu1 }
 0x7f0   : > { %v3508_v58 = vpop.f32.mrb[101].mxu1  ;;  %v3507_v49 = vadd.f32 %v3506_v27, %v3444_v10 }
 0x7f1   : > { %v3510_v32 = vpop.f32.mrb[102].mxu1  ;;  %v3509_v33 = vadd.f32 %v3508_v58, %v3448_v4 }
 0x7f2   : > { %v3512_v5 = vpop.f32.mrb[103].mxu1  ;;  %v3511_v40 = vadd.f32 %v3510_v32, %v3444_v10  ;;  %v3545_v53 = vmax.f32 %v3507_v49, 0.0 }
 0x7f3   : > { %v3513_v6 = vadd.f32 %v3512_v5, %v3448_v4  ;;  %v3546_v42 = vmax.f32 %v3509_v33, 0.0 }
 0x7f5   : > { %v3548_v32 = vmax.f32 %v3513_v6, 0.0 }
 0x7f6   : > { %v15240_v57 = vpop.eup %15239 }
 0x7f7   : > { %v15242_v14 = vpop.eup %15241  ;;  %v3428_v20 = vadd.f32 1.0, %v15240_v57  ;;  %v3516_v35 = vpop.f32.mrb[104].mxu1 }
 0x7f8   : > { %v3429_v28 = vadd.f32 1.0, %v15242_v14  ;;  %v3518_v59 = vpop.f32.mrb[105].mxu1  ;;  %v3517_v31 = vadd.f32 %v3516_v35, %v3444_v10 }
 0x7f9   : > { %15243 = vrcp.f32 %v3428_v20  ;;  %v3520_v39 = vpop.f32.mrb[106].mxu1  ;;  %v3519_v57 = vadd.f32 %v3518_v59, %v3448_v4 }
 0x7fa   : > { %15245 = vrcp.f32 %v3429_v28  ;;  %v3522_v30 = vpop.f32.mrb[107].mxu1  ;;  %v3521_v44 = vadd.f32 %v3520_v39, %v3444_v10  ;;  %v3549_v28 = vmax.f32 %v3517_v31, 0.0 }
 0x7fb   : > { %v3523_v36 = vadd.f32 %v3522_v30, %v3448_v4  ;;  %v3550_v27 = vmax.f32 %v3519_v57, 0.0  ;;  %v3547_v30 = vmax.f32 %v3511_v40, 0.0 }
 0x7fc   : > { %v3551_v38 = vmax.f32 %v3521_v44, 0.0 }
 0x7fd   : > { %v3552_v35 = vmax.f32 %v3523_v36, 0.0 }
 0x7ff   : > { %v3526_v17 = vpop.f32.mrb[108].mxu1 }
 0x800   : > { %v3528_v21 = vpop.f32.mrb[109].mxu1  ;;  %v3527_v14 = vadd.f32 %v3526_v17, %v3444_v10 }
 0x801   : > { %v3529_v55 = vadd.f32 %v3528_v21, %v3448_v4  ;;  %v3530_v20 = vpop.f32.mrb[110].mxu1 }
 0x802   : > { %v3531_v47 = vadd.f32 %v3530_v20, %v3444_v10  ;;  %v3532_v18 = vpop.f32.mrb[111].mxu1  ;;  %v3553_v21 = vmax.f32 %v3527_v14, 0.0 }
 0x803   : > { %v15244_v1 = vpop.eup %15243  ;;  %v3533_v39 = vadd.f32 %v3532_v18, %v3448_v4  ;;  %v3554_v5 = vmax.f32 %v3529_v55, 0.0 }
 0x804   : > { %v15246_v58 = vpop.eup %15245  ;;  %v3564_v59 = vrot.slane %v15244_v1, %v15856_v46  ;;  %v3555_v63 = vmax.f32 %v3531_v47, 0.0 }
 0x805   : > { %v3568_v17 = vrot.slane %v15246_v58, %v15856_v46  ;;  %v3556_v49 = vmax.f32 %v3533_v39, 0.0 }
 0x806   : > { %v3569_v31 = vmul.f32 %v3564_v59, %v3545_v53  ;;  %v3571_v44 = vmul.f32 %v3564_v59, %v3547_v30  ;;  %v3573_v20 = vmul.f32 %v3564_v59, %v3549_v28  ;;  %v3575_v60 = vmul.f32 %v3564_v59, %v3551_v38 }
 0x807   : > { %v3570_v26 = vmul.f32 %v3568_v17, %v3546_v42  ;;  %v3572_v33 = vmul.f32 %v3568_v17, %v3548_v32  ;;  %v3574_v57 = vmul.f32 %v3568_v17, %v3550_v27  ;;  %v3576_v36 = vmul.f32 %v3568_v17, %v3552_v35  ;;  %v3536_v18 = vpop.f32.mrb[112].mxu1 }
 0x808   : > { %v3585_v61 = vpack.c.bf16 %v3571_v44, %v3569_v31  ;;  %v3578_v7 = vmul.f32 %v3568_v17, %v3554_v5  ;;  %v3580_v1 = vmul.f32 %v3568_v17, %v3556_v49  ;;  %v3537_v40 = vadd.f32 %v3536_v18, %v3444_v10  ;;  %v3538_v6 = vpop.f32.mrb[113].mxu1 }
 0x809   : > { %v3539_v55 = vadd.f32 %v3538_v6, %v3448_v4  ;;  %v3540_v9 = vpop.f32.mrb[114].mxu1  ;;  %v3586_v58 = vpack.c.bf16 %v3572_v33, %v3570_v26  ;;  %v3588_v14 = vpack.c.bf16 %v3576_v36, %v3574_v57  ;;  %v3587_v47 = vpack.c.bf16 %v3575_v60, %v3573_v20 }
 0x80a   : > { %v3557_v39 = vmax.f32 %v3537_v40, 0.0  ;;  %v3541_v53 = vadd.f32 %v3540_v9, %v3444_v10  ;;  %v3542_v30 = vpop.f32.mrb[115].mxu1  ;;  %v3590_v28 = vpack.c.bf16 %v3580_v1, %v3578_v7  ;;  %v3577_v38 = vmul.f32 %v3564_v59, %v3553_v21  ;;  %v869_v7 = vld [vmem:[%s20584_s12 + $0x100] sm:$0xff]  ;;  %v15030_v10 = vld [vmem:[%s20585_s13 + $0x28] sm:$0xff]  }
 0x80b   : > { %v3558_v42 = vmax.f32 %v3539_v55, 0.0  ;;  %v3543_v32 = vadd.f32 %v3542_v30, %v3448_v4  ;;  %13105 = vmatprep.mubr.msk.bf16.mxu1 %vm1976_vm6, %v3586_v58  ;;  %v3579_v27 = vmul.f32 %v3564_v59, %v3555_v63  ;;  %v15029_v63 = vld [vmem:[%s20585_s13 + $0x20] sm:$0xff]  }
 0x80c   : > { %v3559_v35 = vmax.f32 %v3541_v53, 0.0  ;;  %3743 = vmatmul.mubr.bf16.vlgmr.msra.gmra.mrb[116].mxu1 %v3585_v61  ;;  %v3581_v5 = vmul.f32 %v3564_v59, %v3557_v39  ;;  %v15028_v61 = vld [vmem:[%s20585_s13 + $0x18] sm:$0xff]   ;;  %v13092_v4 = vld [vmem:[%s20583_s11 + $0x1] ss:$0 sm:$0xff] }
 0x80d   : > { %v3582_v49 = vmul.f32 %v3568_v17, %v3558_v42  ;;  %v3560_v31 = vmax.f32 %v3543_v32, 0.0  ;;  %13106 = vmatprep.mubr.msk.bf16.mxu1 %vm1976_vm6, %v3588_v14  ;;  %v3589_v26 = vpack.c.bf16 %v3579_v27, %v3577_v38  ;;  %14591 = vmatprep.subr.bf16.mxu0 %v15028_v61 }
 0x80e   : > { %v3583_v44 = vmul.f32 %v3564_v59, %v3559_v35  ;;  %14592 = vmatpush3.bf16.msra.mxu0 %v15028_v61  ;;  %v874_v61 = vld [vmem:[%s20584_s12 + $0x128] sm:$0xff] }
 0x80f   : > { %v3584_v60 = vmul.f32 %v3568_v17, %v3560_v31  ;;  %14593 = vmatprep.subr.bf16.mxu0 %v15029_v63 }
 0x810   : > { %v3591_v20 = vpack.c.bf16 %v3583_v44, %v3581_v5 }
 0x811   : > { %v3592_v9 = vpack.c.bf16 %v3584_v60, %v3582_v49  ;;  %v870_v60 = vld [vmem:[%s20584_s12 + $0x108] sm:$0xff] }
 0x812   : > { %14594 = vmatpush3.bf16.msra.mxu0 %v15029_v63  ;;  %v875_v63 = vld [vmem:[%s20584_s12 + $0x130] sm:$0xff] }
 0x813   : > { %14595 = vmatprep.subr.bf16.mxu0 %v15030_v10 }
 0x814   : > { %3751 = vmatmul.mubr.bf16.gmra.mrb[120].mxu1 %v3587_v47 }
 0x815   : > { %13107 = vmatprep.mubr.msk.bf16.mxu1 %vm1976_vm6, %v3590_v28 }
 0x816   : > { %14596 = vmatpush3.bf16.msra.mxu0 %v15030_v10  ;;  %v876_v10 = vld [vmem:[%s20584_s12 + $0x138] sm:$0xff] }
 0x81c   : > { %3759 = vmatmul.mubr.bf16.gmra.mrb[124].mxu1 %v3589_v26 }
 0x81d   : > { %13108 = vmatprep.mubr.msk.bf16.mxu1 %vm1976_vm6, %v3592_v9  ;;  %v872_v9 = vld [vmem:[%s20584_s12 + $0x118] sm:$0xff] }
 0x824   : > { %3767 = vmatmul.mubr.bf16.gmra.mrb[128].mxu1 %v3591_v20  ;;  %v871_v20 = vld [vmem:[%s20584_s12 + $0x110] sm:$0xff] }
 0x825   : > { %14579 = vmatprep.mubr.msk.f32.mxu1 %vm1976_vm6, %v869_v7  ;;  %v873_v7 = vld [vmem:[%s20584_s12 + $0x120] sm:$0xff] }
 0x8df   : > { %v3744_v59 = vpop.f32.mrb[116].mxu1 }
 0x8e0   : > { %v3746_v17 = vpop.f32.mrb[117].mxu1  ;;  %v3745_v33 = vadd.f32 %v13092_v4, %v3744_v59  ;;  %v15032_v59 = vld [vmem:[%s20587_s15 + $0x30] ss:$8 sps:$4 sm:$0xff]  }
 0x8e1   : > { %v3747_v21 = vpop.f32.mrb[118].mxu1  ;;  %v15034_v17 = vld [vmem:[%s20587_s15 + $0x34] ss:$8 sps:$4 sm:$0xff]  }
 0x8e2   : > { %v3748_v57 = vadd.f32 %v13092_v4, %v3747_v21  ;;  %v3749_v36 = vpop.f32.mrb[119].mxu1 }
 0x8e4   : > { %v14711_v18 = vpack.c.bf16 %v3748_v57, %v3745_v33  ;;  %v20886_v33 = vmax.f32 %v16333_v51, 0.0 }
 0x8e6   : > { %14712 = vmatprep.subr.bf16.mxu1 %v14711_v18 }
 0x8e7   : > { %v3752_v1 = vpop.f32.mrb[120].mxu1  ;;  %14714 = vmatpush3.bf16.msra.mxu1 %v14711_v18  ;;  %v20887_v18 = vmax.f32 %v16326_v23, 0.0 }
 0x8e8   : > { %v3754_v40 = vpop.f32.mrb[121].mxu1  ;;  %v3753_v55 = vadd.f32 %v13092_v4, %v3752_v1 }
 0x8e9   : > { %v3755_v6 = vpop.f32.mrb[122].mxu1 }
 0x8ea   : > { %v3756_v58 = vadd.f32 %v13092_v4, %v3755_v6  ;;  %v3757_v14 = vpop.f32.mrb[123].mxu1 }
 0x8ec   : > { %v14715_v47 = vpack.c.bf16 %v3756_v58, %v3753_v55  ;;  %v13149_v55 = vld [vmem:[%s20774_s7 + $0x4] sm:$0x3]  ;;  %v20888_v58 = vmax.f32 %v16331_v12, 0.0 }
 0x8ed   : > { %v4208_v51 = vand.u32 %v13149_v55, %v15425_v3 }
 0x8ee   : > { %14716 = vmatprep.subr.bf16.mxu1 %v14715_v47 }
 0x8ef   : > { %v3760_v39 = vpop.f32.mrb[124].mxu1  ;;  %14718 = vmatpush3.bf16.msra.mxu1 %v14715_v47 }
 0x8f0   : > { %v3762_v53 = vpop.f32.mrb[125].mxu1  ;;  %v3761_v28 = vadd.f32 %v13092_v4, %v3760_v39  ;;  %v20889_v39 = vmax.f32 %v16324_v34, 0.0 }
 0x8f1   : > { %v3763_v30 = vpop.f32.mrb[126].mxu1 }
 0x8f2   : > { %v3764_v38 = vadd.f32 %v13092_v4, %v3763_v30  ;;  %v3765_v42 = vpop.f32.mrb[127].mxu1 }
 0x8f4   : > { %v14719_v32 = vpack.c.bf16 %v3764_v38, %v3761_v28  ;;  %v20890_v28 = vmax.f32 %v16365_v48, 0.0 }
 0x8f6   : > { %14720 = vmatprep.subr.bf16.mxu1 %v14719_v32 }
 0x8f7   : > { %v3768_v27 = vpop.f32.mrb[128].mxu1  ;;  %14722 = vmatpush3.bf16.msra.mxu1 %v14719_v32  ;;  %v20891_v32 = vmax.f32 %v16355_v16, 0.0  ;;  %v15031_v16 = vld [vmem:[%s15437_s9 + $0xa0] sm:$0xff]  }
 0x8f8   : > { %v3770_v35 = vpop.f32.mrb[129].mxu1  ;;  %v3769_v49 = vadd.f32 %v13092_v4, %v3768_v27 }
 0x8f9   : > { %v3771_v5 = vpop.f32.mrb[130].mxu1  ;;  %v20892_v35 = vmax.f32 %v16363_v37, 0.0  ;;  %v15035_v37 = vld [vmem:[%s20587_s15 + $0x40] ss:$8 sps:$4 sm:$0xff]  }
 0x8fa   : > { %v3772_v31 = vadd.f32 %v13092_v4, %v3771_v5  ;;  %v3773_v26 = vpop.f32.mrb[131].mxu1  ;;  %v15281_v4 = vmov 0.0  }
 0x8fb   : > { %14605 = vmatprep.subr.bf16.mxu0 %v15281_v4 }
 0x8fc   : > { %v14723_v44 = vpack.c.bf16 %v3772_v31, %v3769_v49  ;;  %v20893_v31 = vmax.f32 %v16353_v50, 0.0  ;;  %v15037_v50 = vld [vmem:[%s20587_s15 + $0x44] ss:$8 sps:$4 sm:$0xff]  }
 0x8fe   : > { %14724 = vmatprep.subr.bf16.mxu1 %v14723_v44 }
 0x8ff   : > { %14726 = vmatpush3.bf16.msra.mxu1 %v14723_v44  ;;  %v15038_v44 = vld [vmem:[%s20587_s15 + $0x50] ss:$8 sps:$4 sm:$0xff]  }
 0x900   : > { %4100 = vmatprep.subr.bf16.mxu1 %v15034_v17 }
 0x902   : > { %14580 = vmatmul.mubr.msk.f32.vlgmr.msra.gmra.mrb[132].mxu1 %vm1976_vm6, %v870_v60  ;;  %v15040_v60 = vld [vmem:[%s20587_s15 + $0x54] ss:$8 sps:$4 sm:$0xff]  }
 0x903   : > { %14582 = vmatprep.mubr.msk.f32.mxu1 %vm1976_vm6, %v871_v20  ;;  %4101 = vmatpush1.bf16.msra.mxu1 %v15032_v59  ;;  %v15041_v20 = vld [vmem:[%s20776_s1 + $0x30] sm:$0xff]  }
 0x904   : > { %4102 = vmatprep.subr.bf16.mxu1 %v15037_v50 }
 0x906   : > { %14583 = vmatmul.mubr.msk.f32.gmra.mrb[134].mxu1 %vm1976_vm6, %v872_v9  ;;  %v15042_v9 = vld [vmem:[%s20776_s1 + $0x38] sm:$0xff]  }
 0x907   : > { %14585 = vmatprep.mubr.msk.f32.mxu1 %vm1976_vm6, %v873_v7  ;;  %4103 = vmatpush1.bf16.msra.mxu1 %v15035_v37  ;;  %v15043_v7 = vld [vmem:[%s20776_s1 + $0x40] sm:$0xff]  }
 0x908   : > { %4104 = vmatprep.subr.bf16.mxu1 %v15040_v60  ;;  %v15046_v60 = vld [vmem:[%s20779_s28 + $0x64] ss:$8 sps:$4 sm:$0xff]  }
 0x90a   : > { %14586 = vmatmul.mubr.msk.f32.gmra.mrb[136].mxu1 %vm1976_vm6, %v874_v61  ;;  %v13124_v61 = vld [vmem:[%s20586_s14 + $0x1] ss:$0 sm:$0xff] }
 0x90b   : > { %14588 = vmatprep.mubr.msk.f32.mxu1 %vm1976_vm6, %v875_v63  ;;  %4105 = vmatpush1.bf16.msra.mxu1 %v15038_v44 }
 0x90e   : > { %14589 = vmatmul.mubr.msk.f32.gmra.mrb[138].mxu1 %vm1976_vm6, %v876_v10 }
 0x90f   : > { %4132 = vmatprep.mubr.bf16.mxu1 %v20794_v52 }
 0x9d5   : > { %v14581_v21 = vpop.f32.mrb[132].mxu1 }
 0x9d6   : > { %v3905_v57 = vadd.f32 %v14581_v21, %v20886_v33  ;;  %v3865_v36 = vpop.f32.mrb[133].mxu1 }
 0x9d7   : > { %v3904_v1 = vadd.f32 %v3865_v36, %v20887_v18 }
 0x9d9   : > { %v3912_v40 = vpack.c.bf16 %v3905_v57, %v3904_v1  ;;  %v14584_v6 = vpop.f32.mrb[134].mxu1 }
 0x9da   : > { %v3907_v14 = vadd.f32 %v14584_v6, %v20888_v58  ;;  %v3875_v47 = vpop.f32.mrb[135].mxu1 }
 0x9db   : > { %v3906_v53 = vadd.f32 %v3875_v47, %v20889_v39  ;;  %14597 = vmatprep.mubr.msk.bf16.mxu0 %vm1264_vm3, %v3912_v40 }
 0x9dd   : > { %v3913_v30 = vpack.c.bf16 %v3907_v14, %v3906_v53  ;;  %v14587_v23 = vpop.f32.mrb[136].mxu1 }
 0x9de   : > { %v3909_v38 = vadd.f32 %v14587_v23, %v20890_v28  ;;  %v3885_v42 = vpop.f32.mrb[137].mxu1 }
 0x9df   : > { %v3908_v27 = vadd.f32 %v3885_v42, %v20891_v32  ;;  %14598 = vmatmul.mubr.msk.bf16.vlgmr.msra.gmra.mrb[148].mxu0 %vm1264_vm3, %v3913_v30 }
 0x9e0   : > { %14606 = vmatpush3.bf16.msra.mxu0 %v4208_v51 }
 0x9e1   : > { %v3914_v12 = vpack.c.bf16 %v3909_v38, %v3908_v27  ;;  %v14590_v34 = vpop.f32.mrb[138].mxu1  ;;  %14611 = vmatprep.subr.bf16.mxu0 %v15281_v4 }
 0x9e2   : > { %v3911_v5 = vadd.f32 %v14590_v34, %v20892_v35  ;;  %v3895_v49 = vpop.f32.mrb[139].mxu1 }
 0x9e3   : > { %v3910_v48 = vadd.f32 %v3895_v49, %v20893_v31  ;;  %14601 = vmatprep.mubr.msk.bf16.mxu0 %vm1264_vm3, %v3914_v12  ;;  %v13151_v12 = vld [vmem:[%s20778_s8 + $0x2] ss:$0 sm:$0xff] }
 0x9e5   : > { %v3915_v26 = vpack.c.bf16 %v3911_v5, %v3910_v48 }
 0x9e7   : > { %14602 = vmatmul.mubr.msk.bf16.gmra.mrb[152].mxu0 %vm1264_vm3, %v3915_v26 }
 0x9e8   : > { %14607 = vmatprep.mubr.msk.bf16.mxu0 %vm15282_vm7, %v15281_v4 }
 0x9ef   : > { %14608 = vmatmul.mubr.msk.bf16.vlgmr.msra.gmra.mrb[156].mxu0 %vm968_vm2, %v15031_v16 }
 0x9f0   : > { %14617 = vmatprep.mubr.msk.bf16.mxu0 %vm15282_vm7, %v15281_v4  ;;  %14612 = vmatpush3.bf16.msra.mxu0 %v15041_v20  ;;  %v15044_v20 = vld [vmem:[%s20779_s28 + $0x60] ss:$8 sps:$4 sm:$0xff]  }
 0x9f1   : > { %14613 = vmatprep.subr.bf16.mxu0 %v15281_v4 }
 0x9f4   : > { %14614 = vmatpush3.bf16.msra.mxu0 %v15042_v9  ;;  %v15049_v9 = vld [vmem:[%s20779_s28 + $0x74] ss:$8 sps:$4 sm:$0xff]  }
 0x9f5   : > { %14615 = vmatprep.subr.bf16.mxu0 %v15281_v4 }
 0x9f8   : > { %14616 = vmatpush3.bf16.msra.mxu0 %v15043_v7  ;;  %v15047_v7 = vld [vmem:[%s20779_s28 + $0x70] ss:$8 sps:$4 sm:$0xff]  }
 0x9f9   : > { %4398 = vmatprep.subr.bf16.mxu0 %v15046_v60 }
 0xab2   : > { %v14599_v63 = vpop.f32.mrb[148].mxu0 }
 0xab3   : > { %v4004_v10 = vadd.f32 %v14599_v63, %v13124_v61  ;;  %v3995_v59 = vpop.f32.mrb[149].mxu0  ;;  %v15050_v63 = vld [vmem:[%s20779_s28 + $0x80] ss:$8 sps:$4 sm:$0xff]  }
 0xab4   : > { %v3996_v17 = vadd.f32 %v13124_v61, %v3995_v59  ;;  %v14600_v21 = vpop.f32.mrb[150].mxu0  ;;  %v13138_v59 = vld [vmem:[%s20588_s16 + $0x2] sm:$0x3] }
 0xab5   : > { %v4007_v33 = vadd.f32 %v14600_v21, %v13124_v61  ;;  %v3998_v57 = vpop.f32.mrb[151].mxu0  ;;  %v4028_v18 = vmax.f32 %v4004_v10, 0.0  ;;  %v15055_v10 = vld [vmem:[%s20780_s30 + $0x34] ss:$8 sps:$4 sm:$0xff]   ;;  %v16676_v21 = vrot.slane %v13138_v59, %v20885_v13 }
 0xab6   : > { %v3999_v36 = vadd.f32 %v13124_v61, %v3998_v57  ;;  %v4026_v40 = vmax.f32 %v3996_v17, 0.0  ;;  %v16673_v17 = vrot.slane %v13138_v59, %v15856_v46 }
 0xab7   : > { %v4029_v1 = vmax.f32 %v4007_v33, 0.0 }
 0xab8   : > { %v4027_v6 = vmax.f32 %v3999_v36, 0.0 }
 0xab9   : > { %v4035_v55 = vpack.c.bf16 %v4029_v1, %v4028_v18 }
 0xaba   : > { %v4034_v58 = vpack.c.bf16 %v4027_v6, %v4026_v40  ;;  %v14603_v14 = vpop.f32.mrb[152].mxu0 }
 0xabb   : > { %v4020_v47 = vadd.f32 %v14603_v14, %v13124_v61  ;;  %v4011_v39 = vpop.f32.mrb[153].mxu0 }
 0xabc   : > { %v4012_v53 = vadd.f32 %v13124_v61, %v4011_v39  ;;  %v14604_v51 = vpop.f32.mrb[154].mxu0  ;;  %13145 = vmatmul.mubr.msk.bf16.vlgmr.msra.gmra.mrb[140].mxu1 %vm1264_vm3, %v4034_v58 }
 0xabd   : > { %v4023_v30 = vadd.f32 %v14604_v51, %v13124_v61  ;;  %v4014_v23 = vpop.f32.mrb[155].mxu0  ;;  %4142 = vmatprep.mubr.bf16.mxu1 %v20794_v52  ;;  %v4032_v38 = vmax.f32 %v4020_v47, 0.0 }
 0xabe   : > { %v4015_v28 = vadd.f32 %v13124_v61, %v4014_v23  ;;  %v4030_v32 = vmax.f32 %v4012_v53, 0.0  ;;  %v15052_v61 = vld [vmem:[%s20779_s28 + $0x84] ss:$8 sps:$4 sm:$0xff]  }
 0xabf   : > { %v4033_v42 = vmax.f32 %v4023_v30, 0.0 }
 0xac0   : > { %v4031_v27 = vmax.f32 %v4015_v28, 0.0 }
 0xac1   : > { %v4037_v34 = vpack.c.bf16 %v4033_v42, %v4032_v38 }
 0xac2   : > { %v4036_v35 = vpack.c.bf16 %v4031_v27, %v4030_v32  ;;  %v4244_v5 = vpop.f32.mrb[156].mxu0 }
 0xac3   : > { %v4245_v49 = vadd.f32 %v13151_v12, %v4244_v5  ;;  %v14609_v31 = vpop.f32.mrb[157].mxu0  ;;  %v13161_v5 = vld [vmem:[%s20783_s27 + $0x2] ss:$0 sm:$0xff] }
 0xac4   : > { %13146 = vmatmul.mubr.msk.bf16.gmra.mrb[144].mxu1 %vm1264_vm3, %v4035_v55  ;;  %v4247_v48 = vpop.f32.mrb[158].mxu0 }
 0xac5   : > { %v4248_v26 = vadd.f32 %v13151_v12, %v4247_v48  ;;  %v14610_v16 = vpop.f32.mrb[159].mxu0  ;;  %4152 = vmatprep.mubr.bf16.mxu1 %v20794_v52  ;;  %v4251_v50 = vmax.f32 %v4245_v49, 0.0 }
 0xac7   : > { %v4252_v37 = vmax.f32 %v4248_v26, 0.0 }
 0xac9   : > { %v4253_v44 = vpack.c.bf16 %v4252_v37, %v4251_v50 }
 0xacb   : > { %14618 = vmatmul.mubr.msk.bf16.vlgmr.msra.gmra.mrb[160].mxu0 %vm1264_vm3, %v4253_v44 }
 0xacc   : > { %13147 = vmatmul.mubr.msk.bf16.gmra.mrb[148].mxu1 %vm1264_vm3, %v4036_v35  ;;  %4430 = vmatprep.mubr.bf16.mxu0 %v20794_v52 }
 0xacd   : > { %4162 = vmatprep.mubr.bf16.mxu1 %v20794_v52  ;;  %4399 = vmatpush1.bf16.msra.mxu0 %v15044_v20 }
 0xace   : > { %4400 = vmatprep.subr.bf16.mxu0 %v15049_v9 }
 0xad1   : > { %4401 = vmatpush1.bf16.msra.mxu0 %v15047_v7 }
 0xad2   : > { %4402 = vmatprep.subr.bf16.mxu0 %v15052_v61 }
 0xad4   : > { %13148 = vmatmul.mubr.msk.bf16.gmra.mrb[152].mxu1 %vm1264_vm3, %v4037_v34 }
 0xad5   : > { %4403 = vmatpush1.bf16.msra.mxu0 %v15050_v63 }
 0xad6   : > { %4489 = vmatprep.subr.bf16.mxu0 %v15055_v10 }
 0xb8f   : > { %v4134_v33 = vpop.f32.mrb[140].mxu1 }
 0xb90   : > { %v4135_v57 = vadd.f32 %v4134_v33, %v16673_v17  ;;  %v4136_v36 = vpop.f32.mrb[141].mxu1 }
 0xb91   : > { %v4137_v18 = vadd.f32 %v4136_v36, %v16676_v21  ;;  %v4138_v1 = vpop.f32.mrb[142].mxu1 }
 0xb92   : > { %v4139_v40 = vadd.f32 %v4138_v1, %v16673_v17  ;;  %v4140_v6 = vpop.f32.mrb[143].mxu1  ;;  %v4173_v58 = vmax.f32 %v4135_v57, 0.0 }
 0xb93   : > { %v4141_v55 = vadd.f32 %v4140_v6, %v16676_v21  ;;  %v4174_v47 = vmax.f32 %v4137_v18, 0.0 }
 0xb94   : > { %v4175_v14 = vmax.f32 %v4139_v40, 0.0 }
 0xb95   : > { %v4176_v39 = vmax.f32 %v4141_v55, 0.0 }
 0xb96   : > { %v16682_v53 = vpack.c.bf16 %v4175_v14, %v4173_v58 }
 0xb97   : > { %v4144_v51 = vpop.f32.mrb[144].mxu1  ;;  %v16684_v30 = vpack.c.bf16 %v4176_v39, %v4174_v47 }
 0xb98   : > { %v4145_v23 = vadd.f32 %v4144_v51, %v16673_v17  ;;  %v4146_v28 = vpop.f32.mrb[145].mxu1 }
 0xb99   : > { %v4147_v38 = vadd.f32 %v4146_v28, %v16676_v21  ;;  %v4148_v42 = vpop.f32.mrb[146].mxu1 }
 0xb9a   : > { %v4149_v32 = vadd.f32 %v4148_v42, %v16673_v17  ;;  %v4150_v27 = vpop.f32.mrb[147].mxu1  ;;  %v4177_v34 = vmax.f32 %v4145_v23, 0.0 }
 0xb9b   : > { %v4151_v12 = vadd.f32 %v4150_v27, %v16676_v21  ;;  %v4178_v49 = vmax.f32 %v4147_v38, 0.0 }
 0xb9c   : > { %v4179_v35 = vmax.f32 %v4149_v32, 0.0 }
 0xb9d   : > { %v4180_v31 = vmax.f32 %v4151_v12, 0.0 }
 0xb9e   : > { %v16693_v48 = vpack.c.bf16 %v4179_v35, %v4177_v34  ;;  %v4324_v26 = vpop.f32.mrb[160].mxu0 }
 0xb9f   : > { %v16695_v16 = vadd.f32 %v13161_v5, %v4324_v26  ;;  %v4154_v50 = vpop.f32.mrb[148].mxu1  ;;  %v14619_v37 = vpop.f32.mrb[161].mxu0  ;;  %v16697_v44 = vpack.c.bf16 %v4180_v31, %v4178_v49 }
 0xba0   : > { %v4155_v60 = vadd.f32 %v4154_v50, %v16673_v17  ;;  %v4156_v20 = vpop.f32.mrb[149].mxu1  ;;  %v4327_v9 = vpop.f32.mrb[162].mxu0 }
 0xba1   : > { %v20661_v7 = vmax.f32 %v16695_v16, 0.0  ;;  %v4157_v61 = vadd.f32 %v4156_v20, %v16676_v21  ;;  %v16702_v63 = vadd.f32 %v13161_v5, %v4327_v9  ;;  %v4158_v10 = vpop.f32.mrb[150].mxu1  ;;  %v14620_v59 = vpop.f32.mrb[163].mxu0 }
 0xba2   : > { %v4159_v33 = vadd.f32 %v4158_v10, %v16673_v17  ;;  %v4160_v57 = vpop.f32.mrb[151].mxu1  ;;  %v4181_v1 = vmax.f32 %v4155_v60, 0.0  ;;  %v13184_v59 = vld [vmem:[%s20780_s30 + $0x40] sm:$0xff] }
 0xba3   : > { %v4332_v36 = vmax.f32 %v16702_v63, 0.0  ;;  %v4161_v18 = vadd.f32 %v4160_v57, %v16676_v21  ;;  %v4333_v6 = vsel %vm1264_vm3, %v20661_v7, 0.0  ;;  %v4182_v55 = vmax.f32 %v4157_v61, 0.0  ;;  %v15078_v63 = vld [vmem:[%s20587_s15 + $0x74] ss:$8 sps:$4 sm:$0xff]  }
 0xba4   : > { %v4183_v40 = vmax.f32 %v4159_v33, 0.0  ;;  %v13189_v57 = vcombine.high %v13184_v59, %v13184_v59 }
 0xba5   : > { %v4334_v58 = vsel %vm1264_vm3, %v4332_v36, 0.0  ;;  %v4184_v14 = vmax.f32 %v4161_v18, 0.0  ;;  %v13188_v18 = vcombine.low %v13184_v59, %v13184_v59 }
 0xba6   : > { %v4335_v47 = vadd.f32 %v4334_v58, %v4333_v6  ;;  %v16713_v39 = vpack.c.bf16 %v4183_v40, %v4181_v1  ;;  %v15058_v40 = vld [vmem:[%s20582_s10 + $0xc0] sm:$0xff]   ;;  %v15059_v6 = vld [vmem:[%s20582_s10 + $0xc8] sm:$0xff]   ;;  %v15065_v58 = vld [vmem:[%s20582_s10 + $0xf8] sm:$0xff]  }
 0xba7   : > { %v4164_v51 = vpop.f32.mrb[152].mxu1  ;;  %v16715_v23 = vpack.c.bf16 %v4184_v14, %v4182_v55  ;;  %v4484_v1 = vsel %vm1745_vm4, %v13188_v18, 0  ;;  %v15060_v55 = vld [vmem:[%s20582_s10 + $0xd0] sm:$0xff]   ;;  %v15066_v14 = vld [vmem:[%s20582_s10 + $0x100] sm:$0xff]  }
 0xba8   : > { %v4336_v28 = vrot.slane %v4335_v47, 4  ;;  %v4165_v38 = vadd.f32 %v4164_v51, %v16673_v17  ;;  %v4166_v42 = vpop.f32.mrb[153].mxu1  ;;  %v15068_v51 = vld [vmem:[%s20582_s10 + $0x110] sm:$0xff]  }
 0xba9   : > { %v4167_v32 = vadd.f32 %v4166_v42, %v16676_v21  ;;  %v4168_v27 = vpop.f32.mrb[154].mxu1 }
 0xbaa   : > { %v4337_v12 = vadd.f32 %v4336_v28, %v4335_v47  ;;  %v4169_v34 = vadd.f32 %v4168_v27, %v16673_v17  ;;  %v4170_v35 = vpop.f32.mrb[155].mxu1  ;;  %v4185_v31 = vmax.f32 %v4165_v38, 0.0  ;;  %v15067_v47 = vld [vmem:[%s20582_s10 + $0x108] sm:$0xff]   ;;  %v15069_v28 = vld [vmem:[%s20582_s10 + $0x118] sm:$0xff]   ;;  %v13172_v38 = vld [vmem:[%s20791_s3 + $0x4] sm:$0x3] }
 0xbab   : > { %v4171_v5 = vadd.f32 %v4170_v35, %v16676_v21  ;;  %v4186_v50 = vmax.f32 %v4167_v32, 0.0  ;;  %v15053_v21 = vld [vmem:[%s20780_s30 + $0x30] ss:$8 sps:$4 sm:$0xff]   ;;  %v4388_v42 = vrot.slane %v13172_v38, %v15856_v46  ;;  %v4392_v32 = vrot.slane %v13172_v38, %v20885_v13 }
 0xbac   : > { %v4338_v49 = vrot.slane %v4337_v12, 2  ;;  %v4187_v26 = vmax.f32 %v4169_v34, 0.0 }
 0xbad   : > { %v4188_v37 = vmax.f32 %v4171_v5, 0.0 }
 0xbae   : > { %v4339_v60 = vadd.f32 %v4338_v49, %v4337_v12  ;;  %v16721_v20 = vpack.c.bf16 %v4187_v26, %v4185_v31 }
 0xbaf   : > { %v16723_v9 = vpack.c.bf16 %v4188_v37, %v4186_v50 }
 0xbb0   : > { %v4340_v61 = vrot.slane %v4339_v60, 1 }
 0xbb2   : > { %v4341_v10 = vadd.f32 %v4340_v61, %v4339_v60 }
 0xbb4   : > { %v4343_v17 = vmul.f32 0.0625, %v4341_v10 }
 0xbb6   : > { %v4344_v33 = vpack.c.bf16 %v4343_v17, %v4343_v17 }
 0xbb8   : > { %13179 = vmatmul.mubr.msk.bf16.vlgmr.msra.gmra.mrb[164].mxu0 %vm1264_vm3, %v4344_v33 }
 0xbb9   : > { %4490 = vmatpush1.bf16.msra.mxu0 %v15053_v21  ;;  %4521 = vmatprep.mubr.bf16.mxu0 %v20794_v52  ;;  %v13185_v21 = vld [vmem:[%s20793_s4 + $0x4] sm:$0x3] }
 0xbba   : > { %13190 = vmatprep.subr.msk.bf16.mxu0 %vm1745_vm4, %v13189_v57 }
 0xbbd   : > { %4492 = vmatpush1.bf16.msra.mxu0 %v4484_v1 }
 0xbbe   : > { %4727 = vmatprep.subr.bf16.mxu0 %v20794_v52 }
 0xbc0   : > { %13191 = vmatmul.mubr.msk.bf16.vlgmr.msra.gmra.mrb[168].mxu0 %vm1732_vm5, %v16431_v54  ;;  %v15061_v54 = vld [vmem:[%s20582_s10 + $0xd8] sm:$0xff]  }
 0xbc1   : > { %4531 = vmatprep.mubr.bf16.mxu0 %v20794_v52  ;;  %4728 = vmatpush1.bf16.msra.mxu0 %v15058_v40  ;;  %v4461_v40 = vrot.slane %v13185_v21, %v15856_v46 }
 0xbc2   : > { %4729 = vmatprep.subr.bf16.mxu0 %v20794_v52 }
 0xbc5   : > { %4730 = vmatpush1.bf16.msra.mxu0 %v15059_v6 }
 0xbc6   : > { %4731 = vmatprep.subr.bf16.mxu0 %v20794_v52 }
 0xbc8   : > { %13192 = vmatmul.mubr.msk.bf16.gmra.mrb[172].mxu0 %vm1732_vm5, %v16453_v29  ;;  %v15062_v29 = vld [vmem:[%s20582_s10 + $0xe0] sm:$0xff]  }
 0xbc9   : > { %4541 = vmatprep.mubr.bf16.mxu0 %v20794_v52  ;;  %4732 = vmatpush1.bf16.msra.mxu0 %v15060_v55  ;;  %v4465_v55 = vrot.slane %v13185_v21, %v20885_v13 }
 0xbca   : > { %4733 = vmatprep.subr.bf16.mxu0 %v20794_v52 }
 0xbcd   : > { %4734 = vmatpush1.bf16.msra.mxu0 %v15061_v54 }
 0xbce   : > { %4735 = vmatprep.subr.bf16.mxu0 %v20794_v52 }
 0xbd0   : > { %13193 = vmatmul.mubr.msk.bf16.gmra.mrb[176].mxu0 %vm1732_vm5, %v16466_v19  ;;  %v15063_v19 = vld [vmem:[%s20582_s10 + $0xe8] sm:$0xff]  }
 0xbd1   : > { %4551 = vmatprep.mubr.bf16.mxu0 %v20794_v52  ;;  %4736 = vmatpush1.bf16.msra.mxu0 %v15062_v29 }
 0xbd2   : > { %4737 = vmatprep.subr.bf16.mxu0 %v20794_v52 }
 0xbd5   : > { %4738 = vmatpush1.bf16.msra.mxu0 %v15063_v19 }
 0xbd6   : > { %4739 = vmatprep.subr.bf16.mxu0 %v20794_v52 }
 0xbd8   : > { %13194 = vmatmul.mubr.msk.bf16.gmra.mrb[180].mxu0 %vm1732_vm5, %v16472_v56  ;;  %v15064_v56 = vld [vmem:[%s20582_s10 + $0xf0] sm:$0xff]  }
 0xbd9   : > { %4740 = vmatpush1.bf16.msra.mxu0 %v15064_v56 }
 0xbda   : > { %4741 = vmatprep.subr.bf16.mxu0 %v20794_v52 }
 0xbdd   : > { %4742 = vmatpush1.bf16.msra.mxu0 %v15065_v58 }
 0xbde   : > { %4743 = vmatprep.subr.bf16.mxu0 %v20794_v52 }
 0xbe1   : > { %4744 = vmatpush1.bf16.msra.mxu0 %v15066_v14 }
 0xbe2   : > { %4745 = vmatprep.subr.bf16.mxu0 %v20794_v52 }
 0xbe5   : > { %4746 = vmatpush1.bf16.msra.mxu0 %v15067_v47 }
 0xbe6   : > { %4747 = vmatprep.subr.bf16.mxu0 %v20794_v52 }
 0xbe9   : > { %4748 = vmatpush1.bf16.msra.mxu0 %v15068_v51 }
 0xbea   : > { %4749 = vmatprep.subr.bf16.mxu0 %v20794_v52 }
 0xbed   : > { %4750 = vmatpush1.bf16.msra.mxu0 %v15069_v28 }
 0xc8b   : > { %v4432_v27 = vpop.f32.mrb[164].mxu0 }
 0xc8c   : > { %v4433_v12 = vadd.f32 %v4432_v27, %v4388_v42  ;;  %v4434_v34 = vpop.f32.mrb[165].mxu0 }
 0xc8d   : > { %v4435_v35 = vadd.f32 %v4434_v34, %v4392_v32  ;;  %v4436_v5 = vpop.f32.mrb[166].mxu0 }
 0xc8e   : > { %v13180_v49 = vmul.f32 -1.442695, %v4433_v12  ;;  %v4437_v31 = vpop.f32.mrb[167].mxu0 }
 0xc8f   : > { %v13181_v26 = vmul.f32 -1.442695, %v4435_v35 }
 0xc90   : > { %15247 = vpow2.f32 %v13180_v49 }
 0xc91   : > { %15249 = vpow2.f32 %v13181_v26 }
 0xc93   : > { %v4523_v50 = vpop.f32.mrb[168].mxu0 }
 0xc94   : > { %v4525_v37 = vpop.f32.mrb[169].mxu0  ;;  %v4524_v54 = vadd.f32 %v4523_v50, %v4461_v40 }
 0xc95   : > { %v4527_v60 = vpop.f32.mrb[170].mxu0  ;;  %v4526_v56 = vadd.f32 %v4525_v37, %v4465_v55 }
 0xc96   : > { %v4529_v61 = vpop.f32.mrb[171].mxu0  ;;  %v4528_v51 = vadd.f32 %v4527_v60, %v4461_v40  ;;  %v4562_v12 = vmax.f32 %v4524_v54, 0.0 }
 0xc97   : > { %v4530_v28 = vadd.f32 %v4529_v61, %v4465_v55  ;;  %v4563_v26 = vmax.f32 %v4526_v56, 0.0 }
 0xc98   : > { %v4564_v21 = vmax.f32 %v4528_v51, 0.0 }
 0xc99   : > { %v4565_v60 = vmax.f32 %v4530_v28, 0.0 }
 0xc9a   : > { %v15248_v10 = vpop.eup %15247 }
 0xc9b   : > { %v15250_v59 = vpop.eup %15249  ;;  %v4445_v17 = vadd.f32 1.0, %v15248_v10  ;;  %v4533_v33 = vpop.f32.mrb[172].mxu0 }
 0xc9c   : > { %v4446_v57 = vadd.f32 1.0, %v15250_v59  ;;  %v4535_v18 = vpop.f32.mrb[173].mxu0  ;;  %v4534_v29 = vadd.f32 %v4533_v33, %v4461_v40 }
 0xc9d   : > { %15251 = vrcp.f32 %v4445_v17  ;;  %v4537_v1 = vpop.f32.mrb[174].mxu0  ;;  %v4536_v58 = vadd.f32 %v4535_v18, %v4465_v55 }
 0xc9e   : > { %15253 = vrcp.f32 %v4446_v57  ;;  %v4539_v6 = vpop.f32.mrb[175].mxu0  ;;  %v4538_v19 = vadd.f32 %v4537_v1, %v4461_v40  ;;  %v4566_v34 = vmax.f32 %v4534_v29, 0.0 }
 0xc9f   : > { %v4540_v14 = vadd.f32 %v4539_v6, %v4465_v55  ;;  %v4567_v50 = vmax.f32 %v4536_v58, 0.0 }
 0xca0   : > { %v4568_v35 = vmax.f32 %v4538_v19, 0.0 }
 0xca1   : > { %v4569_v10 = vmax.f32 %v4540_v14, 0.0 }
 0xca3   : > { %v4543_v47 = vpop.f32.mrb[176].mxu0 }
 0xca4   : > { %v4545_v38 = vpop.f32.mrb[177].mxu0  ;;  %v4544_v42 = vadd.f32 %v4543_v47, %v4461_v40 }
 0xca5   : > { %v4546_v32 = vadd.f32 %v4545_v38, %v4465_v55  ;;  %v4547_v27 = vpop.f32.mrb[178].mxu0 }
 0xca6   : > { %v4548_v5 = vadd.f32 %v4547_v27, %v4461_v40  ;;  %v4549_v49 = vpop.f32.mrb[179].mxu0  ;;  %v4570_v57 = vmax.f32 %v4544_v42, 0.0 }
 0xca7   : > { %v15252_v31 = vpop.eup %15251  ;;  %v4550_v59 = vadd.f32 %v4549_v49, %v4465_v55  ;;  %v4571_v61 = vmax.f32 %v4546_v32, 0.0 }
 0xca8   : > { %v15254_v37 = vpop.eup %15253  ;;  %v4581_v17 = vrot.slane %v15252_v31, %v15856_v46  ;;  %v4572_v18 = vmax.f32 %v4548_v5, 0.0 }
 0xca9   : > { %v4585_v33 = vrot.slane %v15254_v37, %v15856_v46  ;;  %v4573_v1 = vmax.f32 %v4550_v59, 0.0 }
 0xcaa   : > { %v4586_v6 = vmul.f32 %v4581_v17, %v4562_v12  ;;  %v4588_v54 = vmul.f32 %v4581_v17, %v4564_v21  ;;  %v4590_v29 = vmul.f32 %v4581_v17, %v4566_v34  ;;  %v4592_v19 = vmul.f32 %v4581_v17, %v4568_v35 }
 0xcab   : > { %v4587_v47 = vmul.f32 %v4585_v33, %v4563_v26  ;;  %v4589_v56 = vmul.f32 %v4585_v33, %v4565_v60  ;;  %v4591_v58 = vmul.f32 %v4585_v33, %v4567_v50  ;;  %v4593_v14 = vmul.f32 %v4585_v33, %v4569_v10  ;;  %v4553_v38 = vpop.f32.mrb[180].mxu0 }
 0xcac   : > { %v4602_v27 = vpack.c.bf16 %v4588_v54, %v4586_v6  ;;  %v4595_v49 = vmul.f32 %v4585_v33, %v4571_v61  ;;  %v4597_v31 = vmul.f32 %v4585_v33, %v4573_v1  ;;  %v4554_v51 = vadd.f32 %v4553_v38, %v4461_v40  ;;  %v4555_v28 = vpop.f32.mrb[181].mxu0 }
 0xcad   : > { %v4556_v32 = vadd.f32 %v4555_v28, %v4465_v55  ;;  %v4557_v7 = vpop.f32.mrb[182].mxu0  ;;  %v4603_v37 = vpack.c.bf16 %v4589_v56, %v4587_v47  ;;  %v4605_v42 = vpack.c.bf16 %v4593_v14, %v4591_v58  ;;  %v4604_v5 = vpack.c.bf16 %v4592_v19, %v4590_v29 }
 0xcae   : > { %v4574_v59 = vmax.f32 %v4554_v51, 0.0  ;;  %v4558_v12 = vadd.f32 %v4557_v7, %v4461_v40  ;;  %v4559_v21 = vpop.f32.mrb[183].mxu0  ;;  %v4607_v34 = vpack.c.bf16 %v4597_v31, %v4595_v49  ;;  %v4594_v35 = vmul.f32 %v4581_v17, %v4570_v57  ;;  %v877_v40 = vld [vmem:[%s20584_s12 + $0x140] sm:$0xff] }
 0xcaf   : > { %v4575_v26 = vmax.f32 %v4556_v32, 0.0  ;;  %v4560_v60 = vadd.f32 %v4559_v21, %v4465_v55  ;;  %13233 = vmatprep.mubr.msk.bf16.mxu0 %vm1976_vm6, %v4603_v37  ;;  %v4596_v50 = vmul.f32 %v4581_v17, %v4572_v18  ;;  %14637 = vmatprep.mubr.msk.f32.mxu1 %vm1976_vm6, %v877_v40  ;;  %v13220_v55 = vld [vmem:[%s20583_s11 + $0x2] ss:$0 sm:$0xff] }
 0xcb0   : > { %v4576_v10 = vmax.f32 %v4558_v12, 0.0  ;;  %4760 = vmatmul.mubr.bf16.vlgmr.msra.gmra.mrb[184].mxu0 %v4602_v27  ;;  %v4598_v61 = vmul.f32 %v4581_v17, %v4574_v59 }
 0xcb1   : > { %v4599_v1 = vmul.f32 %v4585_v33, %v4575_v26  ;;  %v4577_v6 = vmax.f32 %v4560_v60, 0.0  ;;  %13234 = vmatprep.mubr.msk.bf16.mxu0 %vm1976_vm6, %v4605_v42  ;;  %v4606_v54 = vpack.c.bf16 %v4596_v50, %v4594_v35 }
 0xcb2   : > { %v4600_v47 = vmul.f32 %v4581_v17, %v4576_v10 }
 0xcb3   : > { %v4601_v29 = vmul.f32 %v4585_v33, %v4577_v6  ;;  %v878_v6 = vld [vmem:[%s20584_s12 + $0x148] sm:$0xff] }
 0xcb4   : > { %v4608_v19 = vpack.c.bf16 %v4600_v47, %v4598_v61  ;;  %v15071_v47 = vld [vmem:[%s20585_s13 + $0x38] sm:$0xff]  }
 0xcb5   : > { %v4609_v7 = vpack.c.bf16 %v4601_v29, %v4599_v1  ;;  %v15072_v29 = vld [vmem:[%s20585_s13 + $0x40] sm:$0xff]  }
 0xcb8   : > { %4768 = vmatmul.mubr.bf16.gmra.mrb[188].mxu0 %v4604_v5 }
 0xcb9   : > { %13235 = vmatprep.mubr.msk.bf16.mxu0 %vm1976_vm6, %v4607_v34 }
 0xcc0   : > { %4776 = vmatmul.mubr.bf16.gmra.mrb[192].mxu0 %v4606_v54  ;;  %v15070_v54 = vld [vmem:[%s20585_s13 + $0x30] sm:$0xff]  }
 0xcc1   : > { %13236 = vmatprep.mubr.msk.bf16.mxu0 %vm1976_vm6, %v4609_v7 }
 0xcc8   : > { %4784 = vmatmul.mubr.bf16.gmra.mrb[196].mxu0 %v4608_v19  ;;  %v15075_v19 = vld [vmem:[%s20587_s15 + $0x64] ss:$8 sps:$4 sm:$0xff]  }
 0xcc9   : > { %5287 = vmatprep.mubr.bf16.mxu0 %v20794_v52 }
 0xd83   : > { %v4761_v17 = vpop.f32.mrb[184].mxu0 }
 0xd84   : > { %v4763_v33 = vpop.f32.mrb[185].mxu0  ;;  %v4762_v18 = vadd.f32 %v13220_v55, %v4761_v17  ;;  %v20894_v17 = vmax.f32 %v16695_v16, 0.0  ;;  %v15079_v16 = vld [vmem:[%s20587_s15 + $0x80] ss:$8 sps:$4 sm:$0xff]  }
 0xd85   : > { %v4764_v57 = vpop.f32.mrb[186].mxu0 }
 0xd86   : > { %v4765_v56 = vadd.f32 %v13220_v55, %v4764_v57  ;;  %v4766_v58 = vpop.f32.mrb[187].mxu0  ;;  %v15073_v57 = vld [vmem:[%s20587_s15 + $0x60] ss:$8 sps:$4 sm:$0xff]  }
 0xd87   : > { %v13246_v58 = vld [vmem:[%s20586_s14 + $0x2] ss:$0 sm:$0xff] }
 0xd88   : > { %v14727_v14 = vpack.c.bf16 %v4765_v56, %v4762_v18  ;;  %v15076_v56 = vld [vmem:[%s20587_s15 + $0x70] ss:$8 sps:$4 sm:$0xff]  }
 0xd8a   : > { %14728 = vmatprep.subr.bf16.mxu1 %v14727_v14 }
 0xd8b   : > { %v4769_v38 = vpop.f32.mrb[188].mxu0  ;;  %14730 = vmatpush3.bf16.msra.mxu1 %v14727_v14 }
 0xd8c   : > { %v4771_v27 = vpop.f32.mrb[189].mxu0  ;;  %v4770_v31 = vadd.f32 %v13220_v55, %v4769_v38 }
 0xd8d   : > { %v4772_v49 = vpop.f32.mrb[190].mxu0 }
 0xd8e   : > { %v4773_v51 = vadd.f32 %v13220_v55, %v4772_v49  ;;  %v4774_v28 = vpop.f32.mrb[191].mxu0 }
 0xd8f   : > { %v13265_v28 = vld [vmem:[%s20774_s7 + $0x6] sm:$0x3] }
 0xd90   : > { %v14731_v32 = vpack.c.bf16 %v4773_v51, %v4770_v31 }
 0xd92   : > { %14732 = vmatprep.subr.bf16.mxu1 %v14731_v32 }
 0xd93   : > { %v4777_v37 = vpop.f32.mrb[192].mxu0  ;;  %14734 = vmatpush3.bf16.msra.mxu1 %v14731_v32 }
 0xd94   : > { %v4779_v42 = vpop.f32.mrb[193].mxu0  ;;  %v4778_v59 = vadd.f32 %v13220_v55, %v4777_v37 }
 0xd95   : > { %v4780_v5 = vpop.f32.mrb[194].mxu0  ;;  %v5070_v42 = vand.u32 %v13265_v28, %v15425_v3  ;;  %v15083_v3 = vld [vmem:[%s20776_s1 + $0x50] sm:$0xff]  }
 0xd96   : > { %v4781_v12 = vadd.f32 %v13220_v55, %v4780_v5  ;;  %v4782_v21 = vpop.f32.mrb[195].mxu0  ;;  %v15094_v28 = vld [vmem:[%s20779_s28 + $0xb0] ss:$8 sps:$4 sm:$0xff]  }
 0xd97   : > { %v15084_v21 = vld [vmem:[%s20776_s1 + $0x58] sm:$0xff]  }
 0xd98   : > { %v14735_v34 = vpack.c.bf16 %v4781_v12, %v4778_v59  ;;  %v828_v59 = vld [vmem:[%s15437_s9 + $0xa8] sm:$0x3] }
 0xd99   : > { %v15082_v12 = vld [vmem:[%s20776_s1 + $0x48] sm:$0xff]  }
 0xd9a   : > { %14736 = vmatprep.subr.bf16.mxu1 %v14735_v34 }
 0xd9b   : > { %v4785_v35 = vpop.f32.mrb[196].mxu0  ;;  %14738 = vmatpush3.bf16.msra.mxu1 %v14735_v34  ;;  %v15085_v34 = vld [vmem:[%s20779_s28 + $0x90] ss:$8 sps:$4 sm:$0xff]  }
 0xd9c   : > { %v4787_v26 = vpop.f32.mrb[197].mxu0  ;;  %v4786_v50 = vadd.f32 %v13220_v55, %v4785_v35  ;;  %v15087_v35 = vld [vmem:[%s20779_s28 + $0x94] ss:$8 sps:$4 sm:$0xff]  }
 0xd9d   : > { %v4788_v60 = vpop.f32.mrb[198].mxu0  ;;  %5255 = vmatprep.subr.bf16.mxu0 %v15087_v35  ;;  %v13257_v26 = vld [vmem:[%s20588_s16 + $0x4] sm:$0x3]  ;;  %v13276_v35 = vld [vmem:[%s20783_s27 + $0x3] ss:$0 sm:$0xff] }
 0xd9e   : > { %v4789_v10 = vadd.f32 %v13220_v55, %v4788_v60  ;;  %v4790_v61 = vpop.f32.mrb[199].mxu0  ;;  %5256 = vmatpush1.bf16.msra.mxu0 %v15085_v34  ;;  %v4969_v60 = vrot.slane %v13257_v26, %v15856_v46  ;;  %v15270_v34 = vld [vmem:[%s15557_s25 + $0x18] sm:$0xff]  }
 0xda0   : > { %v14739_v1 = vpack.c.bf16 %v4789_v10, %v4786_v50  ;;  %v4973_v50 = vrot.slane %v13257_v26, %v20885_v13 }
 0xda2   : > { %14740 = vmatprep.subr.bf16.mxu1 %v14739_v1 }
 0xda3   : > { %14742 = vmatpush3.bf16.msra.mxu1 %v14739_v1 }
 0xda4   : > { %14640 = vmatprep.subr.bf16.mxu1 %v15281_v4 }
 0xda6   : > { %14638 = vmatmul.mubr.msk.f32.vlgmr.msra.gmra.mrb[156].mxu1 %vm1976_vm6, %v878_v6 }
 0xda7   : > { %14641 = vmatpush3.bf16.msra.mxu1 %v15070_v54  ;;  %14646 = vmatprep.mubr.msk.bf16.mxu1 %vm15282_vm7, %v15281_v4 }
 0xda8   : > { %14642 = vmatprep.subr.bf16.mxu1 %v15281_v4 }
 0xdab   : > { %14643 = vmatpush3.bf16.msra.mxu1 %v15071_v47 }
 0xdac   : > { %14644 = vmatprep.subr.bf16.mxu1 %v15281_v4 }
 0xdaf   : > { %14645 = vmatpush3.bf16.msra.mxu1 %v15072_v29 }
 0xdb0   : > { %5009 = vmatprep.subr.bf16.mxu1 %v15075_v19 }
 0xe79   : > { %v14639_v7 = vpop.f32.mrb[156].mxu1 }
 0xe7a   : > { %v4874_v40 = vadd.f32 %v14639_v7, %v4332_v36  ;;  %v4864_v55 = vpop.f32.mrb[157].mxu1  ;;  %v15081_v36 = vld [vmem:[%s20587_s15 + $0x84] ss:$8 sps:$4 sm:$0xff]  }
 0xe7b   : > { %v4873_v33 = vadd.f32 %v4864_v55, %v20894_v17 }
 0xe7d   : > { %v4875_v18 = vpack.c.bf16 %v4874_v40, %v4873_v33  ;;  %v13267_v33 = vld [vmem:[%s20778_s8 + $0x3] ss:$0 sm:$0xff] }
 0xe7f   : > { %14647 = vmatmul.mubr.msk.bf16.vlgmr.msra.gmra.mrb[160].mxu1 %vm1264_vm3, %v4875_v18 }
 0xe80   : > { %5010 = vmatpush1.bf16.msra.mxu1 %v15073_v57  ;;  %5041 = vmatprep.mubr.bf16.mxu1 %v20794_v52 }
 0xe81   : > { %5011 = vmatprep.subr.bf16.mxu1 %v15078_v63 }
 0xe84   : > { %5012 = vmatpush1.bf16.msra.mxu1 %v15076_v56 }
 0xe85   : > { %5013 = vmatprep.subr.bf16.mxu1 %v15081_v36 }
 0xe88   : > { %5014 = vmatpush1.bf16.msra.mxu1 %v15079_v16 }
 0xe89   : > { %14650 = vmatprep.subr.bf16.mxu1 %v15281_v4 }
 0xf52   : > { %v4946_v14 = vpop.f32.mrb[160].mxu1 }
 0xf53   : > { %v4947_v38 = vadd.f32 %v13246_v58, %v4946_v14  ;;  %v14648_v27 = vpop.f32.mrb[161].mxu1 }
 0xf54   : > { %v4949_v49 = vpop.f32.mrb[162].mxu1  ;;  %v15090_v27 = vld [vmem:[%s20779_s28 + $0xa4] ss:$8 sps:$4 sm:$0xff]  }
 0xf55   : > { %v4950_v31 = vadd.f32 %v13246_v58, %v4949_v49  ;;  %v14649_v51 = vpop.f32.mrb[163].mxu1  ;;  %v4953_v32 = vmax.f32 %v4947_v38, 0.0  ;;  %v15088_v49 = vld [vmem:[%s20779_s28 + $0xa0] ss:$8 sps:$4 sm:$0xff]   ;;  %5257 = vmatprep.subr.bf16.mxu0 %v15090_v27 }
 0xf56   : > { %v15091_v51 = vld [vmem:[%s20780_s30 + $0x48] ss:$8 sps:$4 sm:$0xff]   ;;  %5258 = vmatpush1.bf16.msra.mxu0 %v15088_v49  ;;  %v15107_v27 = vld [vmem:[%s20582_s10 + $0x160] sm:$0xff]  }
 0xf57   : > { %v4954_v37 = vmax.f32 %v4950_v31, 0.0  ;;  %v15093_v31 = vld [vmem:[%s20780_s30 + $0x4c] ss:$8 sps:$4 sm:$0xff]  }
 0xf58   : > { %v15108_v49 = vld [vmem:[%s20582_s10 + $0x168] sm:$0xff]  }
 0xf59   : > { %v4955_v5 = vpack.c.bf16 %v4954_v37, %v4953_v32  ;;  %v15096_v32 = vld [vmem:[%s20779_s28 + $0xb4] ss:$8 sps:$4 sm:$0xff]  }
 0xf5a   : > { %v13299_v37 = vld [vmem:[%s20780_s30 + $0x58] sm:$0xff]  ;;  %5259 = vmatprep.subr.bf16.mxu0 %v15096_v32 }
 0xf5b   : > { %13264 = vmatmul.mubr.msk.bf16.vlgmr.msra.gmra.mrb[164].mxu1 %vm1264_vm3, %v4955_v5  ;;  %v13303_v5 = vcombine.low %v13299_v37, %v13299_v37  ;;  %5260 = vmatpush1.bf16.msra.mxu0 %v15094_v28 }
 0xf5c   : > { %14651 = vmatpush3.bf16.msra.mxu1 %v5070_v42  ;;  %14652 = vmatprep.mubr.msk.bf16.mxu1 %vm15282_vm7, %v15281_v4  ;;  %v13304_v42 = vcombine.high %v13299_v37, %v13299_v37 }
 0xf5d   : > { %14656 = vmatprep.subr.bf16.mxu1 %v15281_v4  ;;  %5584 = vmatprep.subr.bf16.mxu0 %v20794_v52 }
 0xf63   : > { %14653 = vmatmul.mubr.msk.bf16.vlgmr.msra.gmra.mrb[168].mxu1 %vm968_vm2, %v828_v59  ;;  %v5341_v59 = vsel %vm1745_vm4, %v13303_v5, 0 }
 0xf64   : > { %14662 = vmatprep.mubr.msk.bf16.mxu1 %vm15282_vm7, %v15281_v4  ;;  %14657 = vmatpush3.bf16.msra.mxu1 %v15082_v12  ;;  %v15267_v12 = vld [vmem:[%s15557_s25] sm:$0xff]  }
 0xf65   : > { %14658 = vmatprep.subr.bf16.mxu1 %v15281_v4 }
 0xf68   : > { %14659 = vmatpush3.bf16.msra.mxu1 %v15083_v3  ;;  %v15268_v3 = vld [vmem:[%s15557_s25 + $0x8] sm:$0xff]  }
 0xf69   : > { %14660 = vmatprep.subr.bf16.mxu1 %v15281_v4 }
 0xf6c   : > { %14661 = vmatpush3.bf16.msra.mxu1 %v15084_v21  ;;  %v15269_v21 = vld [vmem:[%s15557_s25 + $0x10] sm:$0xff]   ;;  %s21065_s25 = sld [smem:[#allocation3_spill]] }
 0xf6d   : > { %5346 = vmatprep.subr.bf16.mxu1 %v15093_v31  ;;  %v15109_v31 = vld [vmem:[%s20582_s10 + $0x170] sm:$0xff]  }
0x102e   : > { %v5043_v10 = vpop.f32.mrb[164].mxu1 }
0x102f   : > { %v5044_v61 = vadd.f32 %v5043_v10, %v4969_v60  ;;  %v5045_v1 = vpop.f32.mrb[165].mxu1 }
0x1030   : > { %v5046_v6 = vadd.f32 %v5045_v1, %v4973_v50  ;;  %v5047_v54 = vpop.f32.mrb[166].mxu1 }
0x1031   : > { %v5048_v47 = vadd.f32 %v5047_v54, %v4969_v60  ;;  %v5049_v29 = vpop.f32.mrb[167].mxu1  ;;  %v5052_v7 = vmax.f32 %v5044_v61, 0.0 }
0x1032   : > { %v5050_v19 = vadd.f32 %v5049_v29, %v4973_v50  ;;  %v5053_v55 = vmax.f32 %v5046_v6, 0.0 }
0x1033   : > { %v5054_v40 = vmax.f32 %v5048_v47, 0.0 }
0x1034   : > { %v5055_v17 = vmax.f32 %v5050_v19, 0.0 }
0x1035   : > { %v16901_v57 = vpack.c.bf16 %v5054_v40, %v5052_v7 }
0x1036   : > { %v5106_v18 = vpop.f32.mrb[168].mxu1  ;;  %v16903_v56 = vpack.c.bf16 %v5055_v17, %v5053_v55  ;;  %v15099_v17 = vld [vmem:[%s20582_s10 + $0x120] sm:$0xff]  }
0x1037   : > { %v5107_v63 = vadd.f32 %v13267_v33, %v5106_v18  ;;  %v14654_v16 = vpop.f32.mrb[169].mxu1  ;;  %v15100_v18 = vld [vmem:[%s20582_s10 + $0x128] sm:$0xff]  }
0x1038   : > { %v5109_v36 = vpop.f32.mrb[170].mxu1  ;;  %v15102_v16 = vld [vmem:[%s20582_s10 + $0x138] sm:$0xff]  }
0x1039   : > { %v5112_v58 = vmax.f32 %v5107_v63, 0.0  ;;  %v14655_v14 = vpop.f32.mrb[171].mxu1  ;;  %v15101_v63 = vld [vmem:[%s20582_s10 + $0x130] sm:$0xff]   ;;  %v15103_v36 = vld [vmem:[%s20582_s10 + $0x140] sm:$0xff]  }
0x103a   : > { %v15105_v14 = vld [vmem:[%s20582_s10 + $0x150] sm:$0xff]  }
0x103b   : > { %v5113_v38 = vpack.c.bf16 %v5112_v58, %v5112_v58  ;;  %v15104_v58 = vld [vmem:[%s20582_s10 + $0x148] sm:$0xff]  }
0x103d   : > { %14663 = vmatmul.mubr.msk.bf16.vlgmr.msra.gmra.mrb[172].mxu1 %vm1264_vm3, %v5113_v38  ;;  %v15106_v38 = vld [vmem:[%s20582_s10 + $0x158] sm:$0xff]  }
0x103e   : > { %5378 = vmatprep.mubr.bf16.mxu1 %v20794_v52  ;;  %5347 = vmatpush1.bf16.msra.mxu1 %v15091_v51  ;;  %v15110_v51 = vld [vmem:[%s20582_s10 + $0x178] sm:$0xff]  }
0x103f   : > { %13305 = vmatprep.subr.msk.bf16.mxu1 %vm1745_vm4, %v13304_v42 }
0x1042   : > { %5349 = vmatpush1.bf16.msra.mxu1 %v5341_v59 }
0x1045   : > { %13306 = vmatmul.mubr.msk.bf16.vlgmr.msra.gmra.mrb[176].mxu1 %vm1732_vm5, %v15267_v12 }
0x1046   : > { %5388 = vmatprep.mubr.bf16.mxu1 %v20794_v52 }
0x104d   : > { %13307 = vmatmul.mubr.msk.bf16.gmra.mrb[180].mxu1 %vm1732_vm5, %v15268_v3 }
0x104e   : > { %5398 = vmatprep.mubr.bf16.mxu1 %v20794_v52 }
0x1055   : > { %13308 = vmatmul.mubr.msk.bf16.gmra.mrb[184].mxu1 %vm1732_vm5, %v15269_v21 }
0x1056   : > { %5408 = vmatprep.mubr.bf16.mxu1 %v20794_v52 }
0x105d   : > { %13309 = vmatmul.mubr.msk.bf16.gmra.mrb[188].mxu1 %vm1732_vm5, %v15270_v34 }
0x105e   : > { %14682 = vmatprep.mubr.msk.f32.mxu1 %vm15282_vm7, %v15281_v4 }
0x1110   : > { %v5184_v26 = vpop.f32.mrb[172].mxu1 }
0x1111   : > { %v16947_v60 = vadd.f32 %v13276_v35, %v5184_v26  ;;  %v14664_v50 = vpop.f32.mrb[173].mxu1 }
0x1112   : > { %v5187_v10 = vpop.f32.mrb[174].mxu1 }
0x1113   : > { %v20662_v61 = vmax.f32 %v16947_v60, 0.0  ;;  %v14665_v1 = vpop.f32.mrb[175].mxu1 }
0x1115   : > { %v5192_v6 = vsel %vm5191_vm8, %v20662_v61, 0.0 }
0x1116   : > { %v5193_v54 = vrot.slane %v5192_v6, 4 }
0x1118   : > { %v5194_v47 = vadd.f32 %v5193_v54, %v5192_v6  ;;  %v5380_v28 = vpop.f32.mrb[176].mxu1 }
0x1119   : > { %v5382_v32 = vpop.f32.mrb[177].mxu1 }
0x111a   : > { %v5195_v29 = vrot.slane %v5194_v47, 2  ;;  %v5384_v37 = vpop.f32.mrb[178].mxu1 }
0x111b   : > { %v5386_v42 = vpop.f32.mrb[179].mxu1 }
0x111c   : > { %v5196_v19 = vadd.f32 %v5195_v29, %v5194_v47 }
0x111e   : > { %v5197_v7 = vrot.slane %v5196_v19, 1 }
0x1120   : > { %v5198_v40 = vadd.f32 %v5197_v7, %v5196_v19  ;;  %v5390_v5 = vpop.f32.mrb[180].mxu1 }
0x1121   : > { %v5392_v59 = vpop.f32.mrb[181].mxu1 }
0x1122   : > { %v5200_v55 = vmul.f32 0.25, %v5198_v40  ;;  %v5394_v12 = vpop.f32.mrb[182].mxu1 }
0x1123   : > { %v5396_v3 = vpop.f32.mrb[183].mxu1 }
0x1124   : > { %v5201_v33 = vpack.c.bf16 %v5200_v55, %v5200_v55 }
0x1126   : > { %13294 = vmatmul.mubr.msk.bf16.vlgmr.msra.gmra.mrb[200].mxu0 %vm1264_vm3, %v5201_v33 }
0x1127   : > { %5585 = vmatpush1.bf16.msra.mxu0 %v15099_v17 }
0x1128   : > { %5586 = vmatprep.subr.bf16.mxu0 %v20794_v52  ;;  %v5400_v21 = vpop.f32.mrb[184].mxu1 }
0x1129   : > { %v5402_v34 = vpop.f32.mrb[185].mxu1 }
0x112a   : > { %v5404_v35 = vpop.f32.mrb[186].mxu1 }
0x112b   : > { %5587 = vmatpush1.bf16.msra.mxu0 %v15100_v18  ;;  %v5406_v26 = vpop.f32.mrb[187].mxu1 }
0x112c   : > { %5588 = vmatprep.subr.bf16.mxu0 %v20794_v52 }
0x112f   : > { %5589 = vmatpush1.bf16.msra.mxu0 %v15101_v63  ;;  %v13300_v63 = vld [vmem:[%s20793_s4 + $0x6] sm:$0x3] }
0x1130   : > { %5590 = vmatprep.subr.bf16.mxu0 %v20794_v52  ;;  %v5410_v50 = vpop.f32.mrb[188].mxu1 }
0x1131   : > { %v5412_v10 = vpop.f32.mrb[189].mxu1 }
0x1132   : > { %v5414_v1 = vpop.f32.mrb[190].mxu1 }
0x1133   : > { %5591 = vmatpush1.bf16.msra.mxu0 %v15102_v16  ;;  %v5416_v6 = vpop.f32.mrb[191].mxu1 }
0x1134   : > { %5592 = vmatprep.subr.bf16.mxu0 %v20794_v52 }
0x1137   : > { %5593 = vmatpush1.bf16.msra.mxu0 %v15103_v36 }
0x1138   : > { %5594 = vmatprep.subr.bf16.mxu0 %v20794_v52 }
0x113b   : > { %5595 = vmatpush1.bf16.msra.mxu0 %v15104_v58 }
0x113c   : > { %5596 = vmatprep.subr.bf16.mxu0 %v20794_v52 }
0x113f   : > { %5597 = vmatpush1.bf16.msra.mxu0 %v15105_v14 }
0x1140   : > { %5598 = vmatprep.subr.bf16.mxu0 %v20794_v52 }
0x1143   : > { %5599 = vmatpush1.bf16.msra.mxu0 %v15106_v38  ;;  %v5318_v38 = vrot.slane %v13300_v63, %v15856_v46 }
0x1144   : > { %5600 = vmatprep.subr.bf16.mxu0 %v20794_v52 }
0x1147   : > { %5601 = vmatpush1.bf16.msra.mxu0 %v15107_v27  ;;  %v5322_v27 = vrot.slane %v13300_v63, %v20885_v13 }
0x1148   : > { %5602 = vmatprep.subr.bf16.mxu0 %v20794_v52 }
0x1149   : > { %v5417_v61 = vadd.f32 %v5416_v6, %v5322_v27 }
0x114b   : > { %5603 = vmatpush1.bf16.msra.mxu0 %v15108_v49  ;;  %v5381_v49 = vadd.f32 %v5380_v28, %v5318_v38  ;;  %v5434_v6 = vmax.f32 %v5417_v61, 0.0 }
0x114c   : > { %5604 = vmatprep.subr.bf16.mxu0 %v20794_v52 }
0x114f   : > { %5605 = vmatpush1.bf16.msra.mxu0 %v15109_v31  ;;  %v5383_v31 = vadd.f32 %v5382_v32, %v5322_v27 }
0x1150   : > { %5606 = vmatprep.subr.bf16.mxu0 %v20794_v52 }
0x1153   : > { %5607 = vmatpush1.bf16.msra.mxu0 %v15110_v51  ;;  %v5385_v51 = vadd.f32 %v5384_v37, %v5318_v38 }
0x1154   : > { %14756 = vmatprep.subr.bf16.mxu0 %v16684_v30  ;;  %v13287_v30 = vld [vmem:[%s20791_s3 + $0x6] sm:$0x3]  ;;  %s21066_s3 = sld [smem:[#allocation72_spill]] }
0x1155   : > { %v5245_v54 = vrot.slane %v13287_v30, %v15856_v46  ;;  %v5249_v47 = vrot.slane %v13287_v30, %v20885_v13  ;;  %v5387_v30 = vadd.f32 %v5386_v42, %v5322_v27  ;;  %v5421_v63 = vmax.f32 %v5385_v51, 0.0 }
0x11f9   : > { %v5289_v29 = vpop.f32.mrb[200].mxu0 }
0x11fa   : > { %v5290_v19 = vadd.f32 %v5289_v29, %v5245_v54  ;;  %v5291_v7 = vpop.f32.mrb[201].mxu0  ;;  %v5391_v54 = vadd.f32 %v5390_v5, %v5318_v38  ;;  %v5393_v29 = vadd.f32 %v5392_v59, %v5322_v27 }
0x11fb   : > { %v5292_v40 = vadd.f32 %v5291_v7, %v5249_v47  ;;  %v5293_v55 = vpop.f32.mrb[202].mxu0  ;;  %v5395_v47 = vadd.f32 %v5394_v12, %v5318_v38  ;;  %v5401_v7 = vadd.f32 %v5400_v21, %v5318_v38 }
0x11fc   : > { %v13295_v17 = vmul.f32 -1.442695, %v5290_v19  ;;  %v5294_v33 = vpop.f32.mrb[203].mxu0  ;;  %v5397_v19 = vadd.f32 %v5396_v3, %v5322_v27  ;;  %v5419_v55 = vmax.f32 %v5381_v49, 0.0  ;;  %v5423_v28 = vmax.f32 %v5391_v54, 0.0 }
0x11fd   : > { %v13296_v18 = vmul.f32 -1.442695, %v5292_v40  ;;  %v5403_v40 = vadd.f32 %v5402_v34, %v5322_v27  ;;  %v5407_v33 = vadd.f32 %v5406_v26, %v5322_v27  ;;  %v5425_v32 = vmax.f32 %v5395_v47, 0.0 }
0x11fe   : > { %15255 = vpow2.f32 %v13295_v17  ;;  %v5405_v17 = vadd.f32 %v5404_v35, %v5318_v38  ;;  %v5424_v42 = vmax.f32 %v5393_v29, 0.0  ;;  %v5426_v5 = vmax.f32 %v5397_v19, 0.0 }
0x11ff   : > { %15257 = vpow2.f32 %v13296_v18  ;;  %v5411_v18 = vadd.f32 %v5410_v50, %v5318_v38  ;;  %v5427_v12 = vmax.f32 %v5401_v7, 0.0  ;;  %v5428_v59 = vmax.f32 %v5403_v40, 0.0 }
0x1200   : > { %v5429_v34 = vmax.f32 %v5405_v17, 0.0  ;;  %v5430_v35 = vmax.f32 %v5407_v33, 0.0 }
0x1201   : > { %v5431_v26 = vmax.f32 %v5411_v18, 0.0 }
0x1208   : > { %v15256_v16 = vpop.eup %15255 }
0x1209   : > { %v15258_v36 = vpop.eup %15257  ;;  %v5302_v58 = vadd.f32 1.0, %v15256_v16  ;;  %v5420_v16 = vmax.f32 %v5383_v31, 0.0 }
0x120a   : > { %v5303_v14 = vadd.f32 1.0, %v15258_v36  ;;  %v5413_v36 = vadd.f32 %v5412_v10, %v5322_v27 }
0x120b   : > { %15259 = vrcp.f32 %v5302_v58  ;;  %v5415_v58 = vadd.f32 %v5414_v1, %v5318_v38 }
0x120c   : > { %15261 = vrcp.f32 %v5303_v14  ;;  %v5422_v14 = vmax.f32 %v5387_v30, 0.0  ;;  %v5432_v10 = vmax.f32 %v5413_v36, 0.0 }
0x120d   : > { %v5433_v1 = vmax.f32 %v5415_v58, 0.0 }
0x1215   : > { %v15260_v37 = vpop.eup %15259 }
0x1216   : > { %v15262_v3 = vpop.eup %15261  ;;  %v5438_v21 = vrot.slane %v15260_v37, %v15856_v46 }
0x1217   : > { %v5442_v50 = vrot.slane %v15262_v3, %v15856_v46 }
0x1218   : > { %v5443_v38 = vmul.f32 %v5438_v21, %v5419_v55  ;;  %v5445_v27 = vmul.f32 %v5438_v21, %v5421_v63  ;;  %v5447_v49 = vmul.f32 %v5438_v21, %v5423_v28  ;;  %v5449_v31 = vmul.f32 %v5438_v21, %v5425_v32 }
0x1219   : > { %v5444_v51 = vmul.f32 %v5442_v50, %v5420_v16  ;;  %v5446_v30 = vmul.f32 %v5442_v50, %v5422_v14  ;;  %v5448_v54 = vmul.f32 %v5442_v50, %v5424_v42  ;;  %v5450_v47 = vmul.f32 %v5442_v50, %v5426_v5 }
0x121a   : > { %v5459_v29 = vpack.c.bf16 %v5445_v27, %v5443_v38  ;;  %v5451_v19 = vmul.f32 %v5438_v21, %v5427_v12  ;;  %v5452_v7 = vmul.f32 %v5442_v50, %v5428_v59  ;;  %v5453_v40 = vmul.f32 %v5438_v21, %v5429_v34 }
0x121b   : > { %v5460_v17 = vpack.c.bf16 %v5446_v30, %v5444_v51  ;;  %v5462_v33 = vpack.c.bf16 %v5450_v47, %v5448_v54  ;;  %v5454_v18 = vmul.f32 %v5442_v50, %v5430_v35  ;;  %v5455_v37 = vmul.f32 %v5438_v21, %v5431_v26  ;;  %v879_v47 = vld [vmem:[%s20584_s12 + $0x150] sm:$0xf] }
0x121c   : > { %v5456_v3 = vmul.f32 %v5442_v50, %v5432_v10  ;;  %v5457_v36 = vmul.f32 %v5438_v21, %v5433_v1  ;;  %v5458_v58 = vmul.f32 %v5442_v50, %v5434_v6  ;;  %v5461_v61 = vpack.c.bf16 %v5449_v31, %v5447_v49 }
0x121d   : > { %v5464_v55 = vpack.c.bf16 %v5454_v18, %v5452_v7  ;;  %13348 = vmatprep.mubr.msk.bf16.mxu0 %vm1976_vm6, %v5460_v17  ;;  %v5463_v63 = vpack.c.bf16 %v5453_v40, %v5451_v19  ;;  %v15112_v19 = vld [vmem:[%s20585_s13 + $0x50] sm:$0xff]   ;;  %v15113_v7 = vld [vmem:[%s20585_s13 + $0x58] sm:$0xff]  }
0x121e   : > { %v5466_v16 = vpack.c.bf16 %v5458_v58, %v5456_v3  ;;  %5617 = vmatmul.mubr.bf16.vlgmr.msra.gmra.mrb[204].mxu0 %v5459_v29  ;;  %v5465_v14 = vpack.c.bf16 %v5457_v36, %v5455_v37  ;;  %v15111_v29 = vld [vmem:[%s20585_s13 + $0x48] sm:$0xff]   ;;  %v15116_v40 = vld [vmem:[%s20587_s15 + $0x94] ss:$8 sps:$4 sm:$0xff]   ;;  %v15114_v3 = vld [vmem:[%s20587_s15 + $0x90] ss:$8 sps:$4 sm:$0xff]  }
0x121f   : > { %14758 = vmatpush1.bf16.msra.mxu0 %v16682_v53  ;;  %13349 = vmatprep.mubr.msk.bf16.mxu0 %vm1976_vm6, %v5462_v33  ;;  %v20707_v53 = vmov 0.0|0.0   ;;  %v20895_v33 = vmax.f32 %v16947_v60, 0.0  ;;  %v15119_v58 = vld [vmem:[%s20587_s15 + $0xa4] ss:$8 sps:$4 sm:$0xff]   ;;  %v15120_v60 = vld [vmem:[%s20587_s15 + $0xb0] ss:$8 sps:$4 sm:$0xff]  }
0x1220   : > { %14760 = vmatprep.subr.bf16.mxu0 %v16697_v44  ;;  %14743 = vmatprep.subr.bf16.mxu1 %v20707_v53 }
0x1223   : > { %14762 = vmatpush1.bf16.msra.mxu0 %v16693_v48  ;;  %v13335_v48 = vld [vmem:[%s20583_s11 + $0x3] ss:$0 sm:$0xff] }
0x1224   : > { %14764 = vmatprep.subr.bf16.mxu0 %v16715_v23 }
0x1226   : > { %5625 = vmatmul.mubr.bf16.gmra.mrb[208].mxu0 %v5461_v61  ;;  %v15117_v61 = vld [vmem:[%s20587_s15 + $0xa0] ss:$8 sps:$4 sm:$0xff]  }
0x1227   : > { %14766 = vmatpush1.bf16.msra.mxu0 %v16713_v39  ;;  %13350 = vmatprep.mubr.msk.bf16.mxu0 %vm1976_vm6, %v5464_v55  ;;  %v15122_v55 = vld [vmem:[%s20587_s15 + $0xb4] ss:$8 sps:$4 sm:$0xff]  }
0x1228   : > { %14768 = vmatprep.subr.bf16.mxu0 %v16723_v9 }
0x122b   : > { %14770 = vmatpush1.bf16.msra.mxu0 %v16721_v20 }
0x122c   : > { %14772 = vmatprep.subr.bf16.mxu0 %v16903_v56 }
0x122e   : > { %5633 = vmatmul.mubr.bf16.gmra.mrb[212].mxu0 %v5463_v63  ;;  %v13360_v63 = vld [vmem:[%s20586_s14 + $0x3] ss:$0 sm:$0xff] }
0x122f   : > { %14774 = vmatpush1.bf16.msra.mxu0 %v16901_v57  ;;  %13351 = vmatprep.mubr.msk.bf16.mxu0 %vm1976_vm6, %v5466_v16 }
0x1236   : > { %5641 = vmatmul.mubr.bf16.gmra.mrb[216].mxu0 %v5465_v14 }
0x1237   : > { %6097 = vmatprep.mubr.f32.mxu0 %v15281_v4 }
0x12f1   : > { %v5618_v44 = vpop.f32.mrb[204].mxu0 }
0x12f2   : > { %v5620_v39 = vpop.f32.mrb[205].mxu0  ;;  %v5619_v20 = vadd.f32 %v13335_v48, %v5618_v44 }
0x12f3   : > { %v5621_v23 = vpop.f32.mrb[206].mxu0 }
0x12f4   : > { %v5622_v9 = vadd.f32 %v13335_v48, %v5621_v23  ;;  %v5623_v56 = vpop.f32.mrb[207].mxu0 }
0x12f6   : > { %v14744_v28 = vpack.c.bf16 %v5622_v9, %v5619_v20  ;;  %v13371_v20 = vld [vmem:[%s20588_s16 + $0x6] sm:$0x3] }
0x12f7   : > { %v5815_v9 = vrot.slane %v13371_v20, %v15856_v46  ;;  %v5819_v56 = vrot.slane %v13371_v20, %v20885_v13  ;;  %v5915_v20 = vld [vmem:[%s20589_s17 + $0x88] sm:$0xff] }
0x12f8   : > { %14745 = vmatpush3.bf16.msra.mxu1 %v14744_v28 }
0x12f9   : > { %v5626_v57 = vpop.f32.mrb[208].mxu0  ;;  %14746 = vmatprep.subr.bf16.mxu1 %v20707_v53 }
0x12fa   : > { %v5628_v32 = vpop.f32.mrb[209].mxu0  ;;  %v5627_v5 = vadd.f32 %v13335_v48, %v5626_v57 }
0x12fb   : > { %v5629_v42 = vpop.f32.mrb[210].mxu0 }
0x12fc   : > { %v5630_v12 = vadd.f32 %v13335_v48, %v5629_v42  ;;  %v5631_v59 = vpop.f32.mrb[211].mxu0 }
0x12fe   : > { %v14747_v21 = vpack.c.bf16 %v5630_v12, %v5627_v5 }
0x1300   : > { %14748 = vmatpush3.bf16.msra.mxu1 %v14747_v21  ;;  %v15123_v21 = vld [vmem:[%s20590_s18] ss:$8 sps:$4 sm:$0xff]  }
0x1301   : > { %v5634_v34 = vpop.f32.mrb[212].mxu0  ;;  %14749 = vmatprep.subr.bf16.mxu1 %v20707_v53 }
0x1302   : > { %v5636_v35 = vpop.f32.mrb[213].mxu0  ;;  %v5635_v50 = vadd.f32 %v13335_v48, %v5634_v34  ;;  %v15125_v34 = vld [vmem:[%s20590_s18 + $0x4] ss:$8 sps:$4 sm:$0xff]  }
0x1303   : > { %v5637_v26 = vpop.f32.mrb[214].mxu0 }
0x1304   : > { %v5638_v10 = vadd.f32 %v13335_v48, %v5637_v26  ;;  %v5639_v1 = vpop.f32.mrb[215].mxu0  ;;  %v5898_v26 = vld [vmem:[%s20589_s17] sm:$0xff] }
0x1305   : > { %v15131_v1 = vld [vmem:[%s20590_s18 + $0x24] ss:$8 sps:$4 sm:$0xff]  }
0x1306   : > { %v14750_v6 = vpack.c.bf16 %v5638_v10, %v5635_v50  ;;  %v15128_v50 = vld [vmem:[%s20590_s18 + $0x14] ss:$8 sps:$4 sm:$0xff]   ;;  %v15126_v10 = vld [vmem:[%s20590_s18 + $0x10] ss:$8 sps:$4 sm:$0xff]  }
0x1308   : > { %14751 = vmatpush3.bf16.msra.mxu1 %v14750_v6  ;;  %v5899_v6 = vld [vmem:[%s20589_s17 + $0x8] sm:$0xff] }
0x1309   : > { %v5642_v38 = vpop.f32.mrb[216].mxu0  ;;  %14752 = vmatprep.subr.bf16.mxu1 %v20707_v53 }
0x130a   : > { %v5644_v27 = vpop.f32.mrb[217].mxu0  ;;  %v5643_v31 = vadd.f32 %v13335_v48, %v5642_v38  ;;  %v15129_v38 = vld [vmem:[%s20590_s18 + $0x20] ss:$8 sps:$4 sm:$0xff]  }
0x130b   : > { %v5645_v49 = vpop.f32.mrb[218].mxu0  ;;  %v15134_v27 = vld [vmem:[%s20590_s18 + $0x34] ss:$8 sps:$4 sm:$0xff]  }
0x130c   : > { %v5646_v51 = vadd.f32 %v13335_v48, %v5645_v49  ;;  %v5647_v30 = vpop.f32.mrb[219].mxu0  ;;  %v5900_v49 = vld [vmem:[%s20589_s17 + $0x10] sm:$0xff] }
0x130d   : > { %v5901_v30 = vld [vmem:[%s20589_s17 + $0x18] sm:$0xff] }
0x130e   : > { %v14753_v54 = vpack.c.bf16 %v5646_v51, %v5643_v31  ;;  %v15132_v31 = vld [vmem:[%s20590_s18 + $0x30] ss:$8 sps:$4 sm:$0xff]   ;;  %v15137_v51 = vld [vmem:[%s20590_s18 + $0x44] ss:$8 sps:$4 sm:$0xff]  }
0x1310   : > { %14754 = vmatpush3.bf16.msra.mxu1 %v14753_v54  ;;  %v15135_v54 = vld [vmem:[%s20590_s18 + $0x40] ss:$8 sps:$4 sm:$0xff]  }
0x1311   : > { %14685 = vmatprep.subr.bf16.mxu1 %v15281_v4 }
0x1313   : > { %14683 = vmatmul.mubr.msk.f32.vlgmr.msra.gmra.mrb[158].mxu1 %vm1976_vm6, %v879_v47  ;;  %v15140_v47 = vld [vmem:[%s20590_s18 + $0x54] ss:$8 sps:$4 sm:$0xff]  }
0x1314   : > { %14686 = vmatpush3.bf16.msra.mxu1 %v15111_v29  ;;  %14691 = vmatprep.mubr.msk.bf16.mxu1 %vm15282_vm7, %v15281_v4  ;;  %v5902_v29 = vld [vmem:[%s20589_s17 + $0x20] sm:$0xff] }
0x1315   : > { %14687 = vmatprep.subr.bf16.mxu1 %v15281_v4 }
0x1318   : > { %14688 = vmatpush3.bf16.msra.mxu1 %v15112_v19  ;;  %v15138_v19 = vld [vmem:[%s20590_s18 + $0x50] ss:$8 sps:$4 sm:$0xff]  }
0x1319   : > { %14689 = vmatprep.subr.bf16.mxu1 %v15281_v4 }
0x131c   : > { %14690 = vmatpush3.bf16.msra.mxu1 %v15113_v7  ;;  %v15143_v7 = vld [vmem:[%s20590_s18 + $0x64] ss:$8 sps:$4 sm:$0xff]  }
0x131d   : > { %5855 = vmatprep.subr.bf16.mxu1 %v15116_v40  ;;  %v5903_v40 = vld [vmem:[%s20589_s17 + $0x28] sm:$0xff] }
0x13e6   : > { %v5718_v17 = vpop.f32.mrb[158].mxu1 }
0x13e7   : > { %v5722_v18 = vadd.f32 %v5718_v17, %v20895_v33  ;;  %v14684_v37 = vpop.f32.mrb[159].mxu1  ;;  %v15141_v17 = vld [vmem:[%s20590_s18 + $0x60] ss:$8 sps:$4 sm:$0xff]   ;;  %v15146_v33 = vld [vmem:[%s20590_s18 + $0x74] ss:$8 sps:$4 sm:$0xff]  }
0x13e8   : > { %v15144_v37 = vld [vmem:[%s20590_s18 + $0x70] ss:$8 sps:$4 sm:$0xff]  }
0x13e9   : > { %v5723_v36 = vpack.c.bf16 %v5722_v18, %v5722_v18  ;;  %v5904_v18 = vld [vmem:[%s20589_s17 + $0x30] sm:$0xff] }
0x13eb   : > { %14692 = vmatmul.mubr.msk.bf16.vlgmr.msra.gmra.mrb[192].mxu1 %vm1264_vm3, %v5723_v36  ;;  %v5905_v36 = vld [vmem:[%s20589_s17 + $0x38] sm:$0xff] }
0x13ec   : > { %5856 = vmatpush1.bf16.msra.mxu1 %v15114_v3  ;;  %5887 = vmatprep.mubr.bf16.mxu1 %v20794_v52  ;;  %v15149_v3 = vld [vmem:[%s20590_s18 + $0x84] ss:$8 sps:$4 sm:$0xff]  }
0x13ed   : > { %5857 = vmatprep.subr.bf16.mxu1 %v15119_v58  ;;  %v15147_v58 = vld [vmem:[%s20590_s18 + $0x80] ss:$8 sps:$4 sm:$0xff]  }
0x13f0   : > { %5858 = vmatpush1.bf16.msra.mxu1 %v15117_v61  ;;  %v15152_v61 = vld [vmem:[%s20590_s18 + $0x94] ss:$8 sps:$4 sm:$0xff]  }
0x13f1   : > { %5859 = vmatprep.subr.bf16.mxu1 %v15122_v55  ;;  %v15150_v55 = vld [vmem:[%s20590_s18 + $0x90] ss:$8 sps:$4 sm:$0xff]  }
0x13f4   : > { %5860 = vmatpush1.bf16.msra.mxu1 %v15120_v60  ;;  %v5906_v60 = vld [vmem:[%s20589_s17 + $0x40] sm:$0xff] }
0x13f5   : > { %6590 = vmatprep.subr.bf16.mxu1 %v15125_v34  ;;  %v5922_v34 = vld [vmem:[%s20589_s17 + $0xc0] sm:$0xff] }
0x14be   : > { %v5794_v16 = vpop.f32.mrb[192].mxu1 }
0x14bf   : > { %v5795_v14 = vadd.f32 %v13360_v63, %v5794_v16  ;;  %v14693_v48 = vpop.f32.mrb[193].mxu1  ;;  %v5907_v63 = vld [vmem:[%s20589_s17 + $0x48] sm:$0xff]  ;;  %v5908_v16 = vld [vmem:[%s20589_s17 + $0x50] sm:$0xff] }
0x14c0   : > { %v5797_v52 = vpop.f32.mrb[194].mxu1  ;;  %v5910_v48 = vld [vmem:[%s20589_s17 + $0x60] sm:$0xff] }
0x14c1   : > { %v5800_v44 = vmax.f32 %v5795_v14, 0.0  ;;  %v14694_v39 = vpop.f32.mrb[195].mxu1  ;;  %v5909_v14 = vld [vmem:[%s20589_s17 + $0x58] sm:$0xff]  ;;  %v5911_v52 = vld [vmem:[%s20589_s17 + $0x68] sm:$0xff] }
0x14c2   : > { %v5913_v39 = vld [vmem:[%s20589_s17 + $0x78] sm:$0xff] }
0x14c3   : > { %v5801_v23 = vpack.c.bf16 %v5800_v44, %v5800_v44  ;;  %v5912_v44 = vld [vmem:[%s20589_s17 + $0x70] sm:$0xff] }
0x14c5   : > { %13378 = vmatmul.mubr.msk.bf16.vlgmr.msra.gmra.mrb[196].mxu1 %vm1264_vm3, %v5801_v23  ;;  %v5914_v23 = vld [vmem:[%s20589_s17 + $0x80] sm:$0xff] }
0x14c6   : > { %6591 = vmatpush1.bf16.msra.mxu1 %v15123_v21  ;;  %v15158_v21 = vld [vmem:[%s20590_s18 + $0xb4] ss:$8 sps:$4 sm:$0xff]  }
0x14c7   : > { %6592 = vmatprep.subr.bf16.mxu1 %v15128_v50  ;;  %v5925_v50 = vld [vmem:[%s20589_s17 + $0xd8] sm:$0xff] }
0x14ca   : > { %6593 = vmatpush1.bf16.msra.mxu1 %v15126_v10  ;;  %v5926_v10 = vld [vmem:[%s20589_s17 + $0xe0] sm:$0xff] }
0x14cb   : > { %6594 = vmatprep.subr.bf16.mxu1 %v15131_v1  ;;  %v5927_v1 = vld [vmem:[%s20589_s17 + $0xe8] sm:$0xff] }
0x14ce   : > { %6595 = vmatpush1.bf16.msra.mxu1 %v15129_v38  ;;  %v5929_v38 = vld [vmem:[%s20589_s17 + $0xf8] sm:$0xff] }
0x14cf   : > { %6596 = vmatprep.subr.bf16.mxu1 %v15134_v27  ;;  %v15159_v27 = vld [vmem:[%s20590_s18 + $0xc0] ss:$8 sps:$4 sm:$0xff]  }
0x14d2   : > { %6597 = vmatpush1.bf16.msra.mxu1 %v15132_v31 }
0x14d3   : > { %6598 = vmatprep.subr.bf16.mxu1 %v15137_v51 }
0x14d6   : > { %6599 = vmatpush1.bf16.msra.mxu1 %v15135_v54  ;;  %v15164_v54 = vld [vmem:[%s20590_s18 + $0xd4] ss:$8 sps:$4 sm:$0xff]  }
0x14d7   : > { %6600 = vmatprep.subr.bf16.mxu1 %v15140_v47 }
0x14da   : > { %6601 = vmatpush1.bf16.msra.mxu1 %v15138_v19 }
0x14db   : > { %6602 = vmatprep.subr.bf16.mxu1 %v15143_v7 }
0x14de   : > { %6603 = vmatpush1.bf16.msra.mxu1 %v15141_v17 }
0x14df   : > { %6604 = vmatprep.subr.bf16.mxu1 %v15146_v33 }
0x14e2   : > { %6605 = vmatpush1.bf16.msra.mxu1 %v15144_v37 }
0x14e3   : > { %6606 = vmatprep.subr.bf16.mxu1 %v15149_v3 }
0x14e6   : > { %6607 = vmatpush1.bf16.msra.mxu1 %v15147_v58 }
0x14e7   : > { %6608 = vmatprep.subr.bf16.mxu1 %v15152_v61 }
0x14ea   : > { %6609 = vmatpush1.bf16.msra.mxu1 %v15150_v55 }
0x1598   : > { %v5889_v28 = vpop.f32.mrb[196].mxu1 }
0x1599   : > { %v5890_v57 = vadd.f32 %v5889_v28, %v5815_v9  ;;  %v5891_v32 = vpop.f32.mrb[197].mxu1  ;;  %v5916_v9 = vld [vmem:[%s20589_s17 + $0x90] sm:$0xff]  ;;  %v5918_v28 = vld [vmem:[%s20589_s17 + $0xa0] sm:$0xff] }
0x159a   : > { %v5892_v42 = vadd.f32 %v5891_v32, %v5819_v56  ;;  %v5893_v5 = vpop.f32.mrb[198].mxu1  ;;  %v5917_v56 = vld [vmem:[%s20589_s17 + $0x98] sm:$0xff]  ;;  %v5920_v32 = vld [vmem:[%s20589_s17 + $0xb0] sm:$0xff] }
0x159b   : > { %v5894_v12 = vpop.f32.mrb[199].mxu1  ;;  %v5896_v35 = vmax.f32 %v5890_v57, 0.0  ;;  %v5919_v57 = vld [vmem:[%s20589_s17 + $0xa8] sm:$0xff] }
0x159c   : > { %v5897_v59 = vmax.f32 %v5892_v42, 0.0  ;;  %v15153_v42 = vld [vmem:[%s20590_s18 + $0xa0] ss:$8 sps:$4 sm:$0xff]   ;;  %v15155_v5 = vld [vmem:[%s20590_s18 + $0xa4] ss:$8 sps:$4 sm:$0xff]   ;;  %v5921_v12 = vld [vmem:[%s20589_s17 + $0xb8] sm:$0xff] }
0x159d   : > { %6610 = vmatprep.subr.bf16.mxu1 %v15155_v5 }
0x159e   : > { %13379 = vmatprep.subr.msk.mxu0 %vm1745_vm4, %v5897_v59  ;;  %6611 = vmatpush1.bf16.msra.mxu1 %v15153_v42  ;;  %v15156_v59 = vld [vmem:[%s20590_s18 + $0xb0] ss:$8 sps:$4 sm:$0xff]  }
0x159f   : > { %13380 = vmatpush1.msk.msra.mxu0 %vm1745_vm4, %v5896_v35  ;;  %6612 = vmatprep.subr.bf16.mxu1 %v15158_v21  ;;  %v5923_v35 = vld [vmem:[%s20589_s17 + $0xc8] sm:$0xff] }
0x15a0   : > { %13381 = vmatmul.mubr.msk.f32.vlgmr.msra.gmra.mrb[220].mxu0 %vm5930_vm9, %v5898_v26  ;;  %v5924_v26 = vld [vmem:[%s20589_s17 + $0xd0] sm:$0xff] }
0x15a1   : > { %6103 = vmatprep.mubr.f32.mxu0 %v15281_v4 }
0x15a2   : > { %6613 = vmatpush1.bf16.msra.mxu1 %v15156_v59 }
0x15a4   : > { %13382 = vmatmul.mubr.msk.f32.gmra.mrb[222].mxu0 %vm5930_vm9, %v5899_v6  ;;  %v5928_v6 = vld [vmem:[%s20589_s17 + $0xf0] sm:$0xff] }
0x15a5   : > { %6109 = vmatprep.mubr.f32.mxu0 %v15281_v4 }
0x15a8   : > { %13383 = vmatmul.mubr.msk.f32.gmra.mrb[224].mxu0 %vm5930_vm9, %v5900_v49  ;;  %v15161_v49 = vld [vmem:[%s20590_s18 + $0xc4] ss:$8 sps:$4 sm:$0xff]  }
0x15a9   : > { %6115 = vmatprep.mubr.f32.mxu0 %v15281_v4  ;;  %7085 = vmatprep.subr.bf16.mxu0 %v15161_v49 }
0x15aa   : > { %7086 = vmatpush1.bf16.msra.mxu0 %v15159_v27 }
0x15ab   : > { %7087 = vmatprep.subr.bf16.mxu0 %v15164_v54  ;;  %v20896_v54 = vld [vmem:[#allocation5_spill] sm:$0xff] }
0x15ac   : > { %13384 = vmatmul.mubr.msk.f32.gmra.mrb[226].mxu0 %vm5930_vm9, %v5901_v30  ;;  %v15162_v30 = vld [vmem:[%s20590_s18 + $0xd0] ss:$8 sps:$4 sm:$0xff]  }
0x15ad   : > { %6121 = vmatprep.mubr.f32.mxu0 %v15281_v4 }
0x15ae   : > { %7088 = vmatpush1.bf16.msra.mxu0 %v15162_v30 }
0x15b0   : > { %13385 = vmatmul.mubr.msk.f32.gmra.mrb[228].mxu0 %vm5930_vm9, %v5902_v29 }
0x15b1   : > { %6127 = vmatprep.mubr.f32.mxu0 %v15281_v4 }
0x15b4   : > { %13386 = vmatmul.mubr.msk.f32.gmra.mrb[230].mxu0 %vm5930_vm9, %v5903_v40 }
0x15b5   : > { %6133 = vmatprep.mubr.f32.mxu0 %v15281_v4 }
0x15b8   : > { %13387 = vmatmul.mubr.msk.f32.gmra.mrb[232].mxu0 %vm5930_vm9, %v5904_v18 }
0x15b9   : > { %6139 = vmatprep.mubr.f32.mxu0 %v15281_v4 }
0x15bc   : > { %13388 = vmatmul.mubr.msk.f32.gmra.mrb[234].mxu0 %vm5930_vm9, %v5905_v36 }
0x15bd   : > { %6145 = vmatprep.mubr.f32.mxu0 %v15281_v4 }
0x15c0   : > { %13389 = vmatmul.mubr.msk.f32.gmra.mrb[236].mxu0 %vm5930_vm9, %v5906_v60  ;;  %v15170_v60 = vld [vmem:[%s20590_s18 + $0xf4] ss:$8 sps:$4 sm:$0xff]  }
0x15c1   : > { %6151 = vmatprep.mubr.f32.mxu0 %v15281_v4 }
0x15c4   : > { %13390 = vmatmul.mubr.msk.f32.gmra.mrb[238].mxu0 %vm5930_vm9, %v5907_v63 }
0x15c5   : > { %6157 = vmatprep.mubr.f32.mxu0 %v15281_v4 }
0x15c8   : > { %13391 = vmatmul.mubr.msk.f32.gmra.mrb[240].mxu0 %vm5930_vm9, %v5908_v16  ;;  %v15168_v16 = vld [vmem:[%s20590_s18 + $0xf0] ss:$8 sps:$4 sm:$0xff]  }
0x15c9   : > { %6163 = vmatprep.mubr.f32.mxu0 %v15281_v4 }
0x15cc   : > { %13392 = vmatmul.mubr.msk.f32.gmra.mrb[242].mxu0 %vm5930_vm9, %v5909_v14 }
0x15cd   : > { %6169 = vmatprep.mubr.f32.mxu0 %v15281_v4 }
0x15d0   : > { %13393 = vmatmul.mubr.msk.f32.gmra.mrb[244].mxu0 %vm5930_vm9, %v5910_v48 }
0x15d1   : > { %6175 = vmatprep.mubr.f32.mxu0 %v15281_v4 }
0x15d4   : > { %13394 = vmatmul.mubr.msk.f32.gmra.mrb[246].mxu0 %vm5930_vm9, %v5911_v52 }
0x15d5   : > { %6181 = vmatprep.mubr.f32.mxu0 %v15281_v4 }
0x15d8   : > { %13395 = vmatmul.mubr.msk.f32.gmra.mrb[248].mxu0 %vm5930_vm9, %v5912_v44 }
0x15d9   : > { %6187 = vmatprep.mubr.f32.mxu0 %v15281_v4 }
0x15dc   : > { %13396 = vmatmul.mubr.msk.f32.gmra.mrb[250].mxu0 %vm5930_vm9, %v5913_v39 }
0x15dd   : > { %6193 = vmatprep.mubr.f32.mxu0 %v15281_v4 }
0x15e0   : > { %13397 = vmatmul.mubr.msk.f32.gmra.mrb[252].mxu0 %vm5930_vm9, %v5914_v23 }
0x15e1   : > { %6199 = vmatprep.mubr.f32.mxu0 %v15281_v4 }
0x15e4   : > { %13398 = vmatmul.mubr.msk.f32.gmra.mrb[254].mxu0 %vm5930_vm9, %v5915_v20 }
0x15e5   : > { %6205 = vmatprep.mubr.f32.mxu0 %v15281_v4 }
0x15e8   : > { %13399 = vmatmul.mubr.msk.f32.gmra.mrb[0].mxu0 %vm5930_vm9, %v5916_v9 }
0x15e9   : > { %6211 = vmatprep.mubr.f32.mxu0 %v15281_v4 }
0x15ec   : > { %13400 = vmatmul.mubr.msk.f32.gmra.mrb[2].mxu0 %vm5930_vm9, %v5917_v56 }
0x15ed   : > { %6217 = vmatprep.mubr.f32.mxu0 %v15281_v4 }
0x15f0   : > { %13401 = vmatmul.mubr.msk.f32.gmra.mrb[4].mxu0 %vm5930_vm9, %v5918_v28 }
0x15f1   : > { %6223 = vmatprep.mubr.f32.mxu0 %v15281_v4 }
0x15f4   : > { %13402 = vmatmul.mubr.msk.f32.gmra.mrb[6].mxu0 %vm5930_vm9, %v5919_v57 }
0x15f5   : > { %6229 = vmatprep.mubr.f32.mxu0 %v15281_v4 }
0x15f8   : > { %13403 = vmatmul.mubr.msk.f32.gmra.mrb[8].mxu0 %vm5930_vm9, %v5920_v32 }
0x15f9   : > { %6235 = vmatprep.mubr.f32.mxu0 %v15281_v4 }
0x15fc   : > { %13404 = vmatmul.mubr.msk.f32.gmra.mrb[10].mxu0 %vm5930_vm9, %v5921_v12 }
0x15fd   : > { %6241 = vmatprep.mubr.f32.mxu0 %v15281_v4 }
0x1600   : > { %13405 = vmatmul.mubr.msk.f32.gmra.mrb[12].mxu0 %vm5930_vm9, %v5922_v34 }
0x1601   : > { %6247 = vmatprep.mubr.f32.mxu0 %v15281_v4 }
0x1604   : > { %13406 = vmatmul.mubr.msk.f32.gmra.mrb[14].mxu0 %vm5930_vm9, %v5923_v35  ;;  %v15174_v35 = vld [vmem:[%s20590_s18 + $0x110] ss:$8 sps:$4 sm:$0xff]  }
0x1605   : > { %6253 = vmatprep.mubr.f32.mxu0 %v15281_v4 }
0x1608   : > { %13407 = vmatmul.mubr.msk.f32.gmra.mrb[16].mxu0 %vm5930_vm9, %v5924_v26 }
0x1609   : > { %6259 = vmatprep.mubr.f32.mxu0 %v15281_v4 }
0x160c   : > { %13408 = vmatmul.mubr.msk.f32.gmra.mrb[18].mxu0 %vm5930_vm9, %v5925_v50 }
0x160d   : > { %6265 = vmatprep.mubr.f32.mxu0 %v15281_v4 }
0x1610   : > { %13409 = vmatmul.mubr.msk.f32.gmra.mrb[20].mxu0 %vm5930_vm9, %v5926_v10  ;;  %v15179_v10 = vld [vmem:[%s20590_s18 + $0x124] ss:$8 sps:$4 sm:$0xff]  }
0x1611   : > { %6271 = vmatprep.mubr.f32.mxu0 %v15281_v4 }
0x1614   : > { %13410 = vmatmul.mubr.msk.f32.gmra.mrb[22].mxu0 %vm5930_vm9, %v5927_v1 }
0x1615   : > { %6277 = vmatprep.mubr.f32.mxu0 %v15281_v4 }
0x1618   : > { %13411 = vmatmul.mubr.msk.f32.gmra.mrb[24].mxu0 %vm5930_vm9, %v5928_v6 }
0x1619   : > { %6283 = vmatprep.mubr.f32.mxu0 %v15281_v4  ;;  %v2717_v4 = vld [vmem:[%s20588_s16] sm:$0x3] }
0x161a   : > { %v17326_v31 = vrot.slane %v2717_v4, %v15856_v46  ;;  %v17329_v51 = vrot.slane %v2717_v4, %v20885_v13 }
0x161c   : > { %13412 = vmatmul.mubr.msk.f32.gmra.mrb[26].mxu0 %vm5930_vm9, %v5929_v38  ;;  %v2842_v47 = vadd.f32 %v16251_v25, %v17326_v31  ;;  %v2844_v29 = vadd.f32 %v16253_v43, %v17329_v51  ;;  %v2846_v7 = vadd.f32 %v16255_v2, %v17326_v31  ;;  %v2848_v17 = vadd.f32 %v16257_v15, %v17329_v51  ;;  %v15165_v43 = vld [vmem:[%s20590_s18 + $0xe0] ss:$8 sps:$4 sm:$0xff]   ;;  %v15167_v2 = vld [vmem:[%s20590_s18 + $0xe4] ss:$8 sps:$4 sm:$0xff]  }
0x161d   : > { %v2852_v25 = vadd.f32 %v16259_v22, %v17326_v31  ;;  %v2854_v15 = vadd.f32 %v16261_v62, %v17329_v51  ;;  %7089 = vmatprep.subr.bf16.mxu0 %v15167_v2  ;;  %v2856_v48 = vadd.f32 %v16263_v41, %v17326_v31  ;;  %v15173_v62 = vld [vmem:[%s20590_s18 + $0x104] ss:$8 sps:$4 sm:$0xff]   ;;  %v2858_v39 = vadd.f32 %v16265_v8, %v17329_v51  ;;  %v15171_v41 = vld [vmem:[%s20590_s18 + $0x100] ss:$8 sps:$4 sm:$0xff]   ;;  %v15176_v8 = vld [vmem:[%s20590_s18 + $0x114] ss:$8 sps:$4 sm:$0xff]  }
0x161e   : > { %v3000_v19 = vmax.f32 %v2842_v47, 0.0  ;;  %v3001_v40 = vmax.f32 %v2844_v29, 0.0  ;;  %v3002_v36 = vmax.f32 %v2846_v7, 0.0  ;;  %v3003_v58 = vmax.f32 %v2848_v17, 0.0  ;;  %7090 = vmatpush1.bf16.msra.mxu0 %v15165_v43  ;;  %v15185_v2 = vld [vmem:[%s20590_s18 + $0x144] ss:$8 sps:$4 sm:$0xff]  }
0x161f   : > { %v3004_v14 = vmax.f32 %v2852_v25, 0.0  ;;  %7091 = vmatprep.subr.bf16.mxu0 %v15170_v60  ;;  %v3005_v44 = vmax.f32 %v2854_v15, 0.0  ;;  %v3006_v57 = vmax.f32 %v2856_v48, 0.0  ;;  %v2862_v32 = vadd.f32 %v16267_v11, %v17326_v31  ;;  %v20899_v15 = vld [vmem:[#allocation7_spill] sm:$0xff] }
0x1620   : > { %v3007_v42 = vmax.f32 %v2858_v39, 0.0  ;;  %v2864_v5 = vadd.f32 %v16269_v45, %v17329_v51  ;;  %v2866_v26 = vadd.f32 %v16271_v0, %v17326_v31  ;;  %v2868_v1 = vadd.f32 %v16273_v24, %v17329_v51  ;;  %v15177_v0 = vld [vmem:[%s20590_s18 + $0x120] ss:$8 sps:$4 sm:$0xff]   ;;  %v15182_v24 = vld [vmem:[%s20590_s18 + $0x134] ss:$8 sps:$4 sm:$0xff]  }
0x1621   : > { %v3008_v11 = vmax.f32 %v2862_v32, 0.0  ;;  %v2872_v47 = vadd.f32 %v20896_v54, %v17326_v31 }
0x1622   : > { %7092 = vmatpush1.bf16.msra.mxu0 %v15168_v16  ;;  %v3009_v45 = vmax.f32 %v2864_v5, 0.0  ;;  %v3010_v30 = vmax.f32 %v2866_v26, 0.0  ;;  %v3011_v29 = vmax.f32 %v2868_v1, 0.0 }
0x1623   : > { %7093 = vmatprep.subr.bf16.mxu0 %v15173_v62 }
0x1626   : > { %7094 = vmatpush1.bf16.msra.mxu0 %v15171_v41 }
0x1627   : > { %7095 = vmatprep.subr.bf16.mxu0 %v15176_v8  ;;  %v20902_v8 = vld [vmem:[#allocation12_spill] sm:$0xff] }
0x162a   : > { %7096 = vmatpush1.bf16.msra.mxu0 %v15174_v35 }
0x162b   : > { %7097 = vmatprep.subr.bf16.mxu0 %v15179_v10 }
0x162e   : > { %7098 = vmatpush1.bf16.msra.mxu0 %v15177_v0 }
0x162f   : > { %7099 = vmatprep.subr.bf16.mxu0 %v15182_v24 }
0x1673   : > { %v6099_v33 = vpop.f32.mrb[220].mxu0 }
0x1674   : > { %v6290_v18 = vadd.f32 %v6099_v33, %v3000_v19  ;;  %v6101_v37 = vpop.f32.mrb[221].mxu0  ;;  %v20897_v19 = vld [vmem:[#allocation4_spill] sm:$0xff] }
0x1675   : > { %v6291_v3 = vadd.f32 %v6101_v37, %v3001_v40  ;;  %v2874_v7 = vadd.f32 %v20897_v19, %v17329_v51  ;;  %v15180_v37 = vld [vmem:[%s20590_s18 + $0x130] ss:$8 sps:$4 sm:$0xff]  }
0x1676   : > { %7100 = vmatpush1.bf16.msra.mxu0 %v15180_v37 }
0x1677   : > { %v6105_v61 = vpop.f32.mrb[222].mxu0  ;;  %7101 = vmatprep.subr.bf16.mxu0 %v15185_v2  ;;  %v20908_v2 = vld [vmem:[#allocation18_spill] sm:$0xff] }
0x1678   : > { %v6292_v55 = vadd.f32 %v6105_v61, %v3002_v36  ;;  %v6107_v63 = vpop.f32.mrb[223].mxu0  ;;  %v20898_v36 = vld [vmem:[#allocation9_spill] sm:$0xff]  ;;  %v2878_v61 = vadd.f32 %v20899_v15, %v17329_v51 }
0x1679   : > { %v6293_v22 = vadd.f32 %v6107_v63, %v3003_v58  ;;  %v2876_v25 = vadd.f32 %v20898_v36, %v17326_v31  ;;  %v3013_v58 = vmax.f32 %v2874_v7, 0.0 }
0x167a   : > { %v6354_v52 = vpack.c.bf16 %v6292_v55, %v6290_v18  ;;  %v3015_v39 = vmax.f32 %v2878_v61, 0.0  ;;  %v20909_v61 = vld [vmem:[#allocation19_spill] sm:$0xff] }
0x167b   : > { %v6355_v23 = vpack.c.bf16 %v6293_v22, %v6291_v3  ;;  %v6111_v20 = vpop.f32.mrb[224].mxu0  ;;  %v3012_v3 = vmax.f32 %v2872_v47, 0.0  ;;  %v3014_v48 = vmax.f32 %v2876_v25, 0.0 }
0x167c   : > { %v6294_v9 = vadd.f32 %v6111_v20, %v3004_v14  ;;  %v6113_v56 = vpop.f32.mrb[225].mxu0  ;;  %v15183_v14 = vld [vmem:[%s20590_s18 + $0x140] ss:$8 sps:$4 sm:$0xff]  }
0x167d   : > { %v6295_v28 = vadd.f32 %v6113_v56, %v3005_v44  ;;  %13437 = vmatprep.mubr.msk.bf16.mxu1 %vm1976_vm6, %v6355_v23  ;;  %v15188_v44 = vld [vmem:[%s20590_s18 + $0x154] ss:$8 sps:$4 sm:$0xff]   ;;  %7102 = vmatpush1.bf16.msra.mxu0 %v15183_v14 }
0x167e   : > { %6623 = vmatmul.mubr.bf16.vlgmr.msra.gmra.mrb[200].mxu1 %v6354_v52  ;;  %v20900_v52 = vld [vmem:[#allocation8_spill] sm:$0xff]  ;;  %v20901_v23 = vld [vmem:[#allocation6_spill] sm:$0xff]  ;;  %7103 = vmatprep.subr.bf16.mxu0 %v15188_v44 }
0x167f   : > { %v6117_v12 = vpop.f32.mrb[226].mxu0  ;;  %v2882_v62 = vadd.f32 %v20900_v52, %v17326_v31  ;;  %v2884_v20 = vadd.f32 %v20901_v23, %v17329_v51 }
0x1680   : > { %v6296_v59 = vadd.f32 %v6117_v12, %v3006_v57  ;;  %v6119_v21 = vpop.f32.mrb[227].mxu0  ;;  %v15186_v57 = vld [vmem:[%s20590_s18 + $0x150] ss:$8 sps:$4 sm:$0xff]   ;;  %v15191_v12 = vld [vmem:[%s20590_s18 + $0x164] ss:$8 sps:$4 sm:$0xff]  }
0x1681   : > { %v6297_v34 = vadd.f32 %v6119_v21, %v3007_v42  ;;  %v3016_v32 = vmax.f32 %v2882_v62, 0.0  ;;  %v2886_v42 = vadd.f32 %v20902_v8, %v17326_v31  ;;  %v20903_v21 = vld [vmem:[#allocation13_spill] sm:$0xff]  ;;  %7104 = vmatpush1.bf16.msra.mxu0 %v15186_v57 }
0x1682   : > { %v6356_v50 = vpack.c.bf16 %v6296_v59, %v6294_v9  ;;  %v3017_v59 = vmax.f32 %v2884_v20, 0.0  ;;  %7105 = vmatprep.subr.bf16.mxu0 %v15191_v12  ;;  %v20913_v12 = vld [vmem:[#allocation23_spill] sm:$0xff] }
0x1683   : > { %v6357_v6 = vpack.c.bf16 %v6297_v34, %v6295_v28  ;;  %v6123_v38 = vpop.f32.mrb[228].mxu0  ;;  %v2888_v34 = vadd.f32 %v20903_v21, %v17329_v51  ;;  %v3018_v1 = vmax.f32 %v2886_v42, 0.0 }
0x1684   : > { %v6298_v27 = vadd.f32 %v6123_v38, %v3008_v11  ;;  %v6125_v49 = vpop.f32.mrb[229].mxu0 }
0x1685   : > { %v6299_v4 = vadd.f32 %v6125_v49, %v3009_v45  ;;  %13438 = vmatprep.mubr.msk.bf16.mxu1 %vm1976_vm6, %v6357_v6  ;;  %v15189_v45 = vld [vmem:[%s20590_s18 + $0x160] ss:$8 sps:$4 sm:$0xff]   ;;  %v20904_v6 = vld [vmem:[#allocation14_spill] sm:$0xff]  ;;  %v20905_v49 = vld [vmem:[#allocation15_spill] sm:$0xff] }
0x1686   : > { %6633 = vmatmul.mubr.bf16.gmra.mrb[204].mxu1 %v6356_v50  ;;  %v2892_v38 = vadd.f32 %v20904_v6, %v17326_v31  ;;  %7106 = vmatpush1.bf16.msra.mxu0 %v15189_v45 }
0x1687   : > { %v6129_v40 = vpop.f32.mrb[230].mxu0 }
0x1688   : > { %v6300_v17 = vadd.f32 %v6129_v40, %v3010_v30  ;;  %v6131_v33 = vpop.f32.mrb[231].mxu0  ;;  %v3020_v24 = vmax.f32 %v2892_v38, 0.0  ;;  %v20915_v38 = vld [vmem:[#allocation25_spill] sm:$0xff] }
0x1689   : > { %v6301_v18 = vadd.f32 %v6131_v33, %v3011_v29  ;;  %v20906_v29 = vld [vmem:[#allocation16_spill] sm:$0xff] }
0x168a   : > { %v6358_v43 = vpack.c.bf16 %v6300_v17, %v6298_v27  ;;  %v3019_v27 = vmax.f32 %v2888_v34, 0.0  ;;  %v2896_v19 = vadd.f32 %v20906_v29, %v17326_v31  ;;  %v20907_v17 = vld [vmem:[#allocation17_spill] sm:$0xff] }
0x168b   : > { %v6359_v60 = vpack.c.bf16 %v6301_v18, %v6299_v4  ;;  %v6135_v55 = vpop.f32.mrb[232].mxu0  ;;  %v2894_v4 = vadd.f32 %v20905_v49, %v17329_v51  ;;  %v2898_v33 = vadd.f32 %v20907_v17, %v17329_v51 }
0x168c   : > { %v6302_v63 = vadd.f32 %v6135_v55, %v3012_v3  ;;  %v6137_v22 = vpop.f32.mrb[233].mxu0 }
0x168d   : > { %v6303_v16 = vadd.f32 %v6137_v22, %v3013_v58  ;;  %13439 = vmatprep.mubr.msk.bf16.mxu1 %vm1976_vm6, %v6359_v60  ;;  %v3021_v40 = vmax.f32 %v2894_v4, 0.0  ;;  %v2902_v58 = vadd.f32 %v20908_v2, %v17326_v31  ;;  %v3023_v15 = vmax.f32 %v2898_v33, 0.0 }
0x168e   : > { %6643 = vmatmul.mubr.bf16.gmra.mrb[208].mxu1 %v6358_v43  ;;  %v3022_v43 = vmax.f32 %v2896_v19, 0.0  ;;  %v2904_v60 = vadd.f32 %v20909_v61, %v17329_v51  ;;  %v20917_v19 = vld [vmem:[#allocation27_spill] sm:$0xff] }
0x168f   : > { %v6141_v9 = vpop.f32.mrb[234].mxu0  ;;  %v3024_v14 = vmax.f32 %v2902_v58, 0.0  ;;  %v20919_v58 = vld [vmem:[#allocation29_spill] sm:$0xff] }
0x1690   : > { %v6304_v56 = vadd.f32 %v6141_v9, %v3014_v48  ;;  %v6143_v28 = vpop.f32.mrb[235].mxu0  ;;  %v20910_v48 = vld [vmem:[#allocation20_spill] sm:$0xff]  ;;  %v3025_v44 = vmax.f32 %v2904_v60, 0.0 }
0x1691   : > { %v6305_v41 = vadd.f32 %v6143_v28, %v3015_v39  ;;  %v2906_v52 = vadd.f32 %v20910_v48, %v17326_v31  ;;  %v20911_v39 = vld [vmem:[#allocation21_spill] sm:$0xff] }
0x1692   : > { %v6360_v5 = vpack.c.bf16 %v6304_v56, %v6302_v63  ;;  %v2908_v23 = vadd.f32 %v20911_v39, %v17329_v51 }
0x1693   : > { %v6361_v35 = vpack.c.bf16 %v6305_v41, %v6303_v16  ;;  %v6147_v11 = vpop.f32.mrb[236].mxu0  ;;  %v3026_v57 = vmax.f32 %v2906_v52, 0.0  ;;  %v20921_v52 = vld [vmem:[#allocation31_spill] sm:$0xff] }
0x1694   : > { %v6306_v26 = vadd.f32 %v6147_v11, %v3016_v32  ;;  %v6149_v50 = vpop.f32.mrb[237].mxu0  ;;  %v20912_v32 = vld [vmem:[#allocation22_spill] sm:$0xff]  ;;  %v3027_v42 = vmax.f32 %v2908_v23, 0.0 }
0x1695   : > { %v6307_v10 = vadd.f32 %v6149_v50, %v3017_v59  ;;  %13440 = vmatprep.mubr.msk.bf16.mxu1 %vm1976_vm6, %v6361_v35  ;;  %v2912_v8 = vadd.f32 %v20912_v32, %v17326_v31  ;;  %v2914_v59 = vadd.f32 %v20913_v12, %v17329_v51  ;;  %v20914_v50 = vld [vmem:[#allocation24_spill] sm:$0xff] }
0x1696   : > { %6653 = vmatmul.mubr.bf16.gmra.mrb[212].mxu1 %v6360_v5 }
0x1697   : > { %v6153_v0 = vpop.f32.mrb[238].mxu0  ;;  %v3028_v11 = vmax.f32 %v2912_v8, 0.0  ;;  %v3029_v6 = vmax.f32 %v2914_v59, 0.0  ;;  %v20923_v8 = vld [vmem:[#allocation33_spill] sm:$0xff] }
0x1698   : > { %v6308_v30 = vadd.f32 %v6153_v0, %v3018_v1  ;;  %v6155_v54 = vpop.f32.mrb[239].mxu0 }
0x1699   : > { %v6309_v47 = vadd.f32 %v6155_v54, %v3019_v27  ;;  %v2918_v27 = vadd.f32 %v20915_v38, %v17329_v51  ;;  %v20916_v54 = vld [vmem:[#allocation26_spill] sm:$0xff] }
0x169a   : > { %v6362_v7 = vpack.c.bf16 %v6308_v30, %v6306_v26 }
0x169b   : > { %v6363_v18 = vpack.c.bf16 %v6309_v47, %v6307_v10  ;;  %v6159_v37 = vpop.f32.mrb[240].mxu0  ;;  %v2916_v10 = vadd.f32 %v20914_v50, %v17326_v31  ;;  %v2922_v47 = vadd.f32 %v20916_v54, %v17326_v31  ;;  %v3031_v29 = vmax.f32 %v2918_v27, 0.0  ;;  %v20925_v50 = vld [vmem:[#allocation35_spill] sm:$0xff] }
0x169c   : > { %v6310_v3 = vadd.f32 %v6159_v37, %v3020_v24  ;;  %v6161_v36 = vpop.f32.mrb[241].mxu0 }
0x169d   : > { %v6311_v25 = vadd.f32 %v6161_v36, %v3021_v40  ;;  %13441 = vmatprep.mubr.msk.bf16.mxu1 %vm1976_vm6, %v6363_v18  ;;  %v3030_v30 = vmax.f32 %v2916_v10, 0.0  ;;  %v3032_v37 = vmax.f32 %v2922_v47, 0.0  ;;  %v2944_v10 = vadd.f32 %v20925_v50, %v17329_v51  ;;  %v20927_v47 = vld [vmem:[#allocation37_spill] sm:$0xff] }
0x169e   : > { %6663 = vmatmul.mubr.bf16.gmra.mrb[216].mxu1 %v6362_v7  ;;  %v2924_v7 = vadd.f32 %v20917_v19, %v17329_v51 }
0x169f   : > { %v6165_v55 = vpop.f32.mrb[242].mxu0  ;;  %v3041_v54 = vmax.f32 %v2944_v10, 0.0 }
0x16a0   : > { %v6312_v63 = vadd.f32 %v6165_v55, %v3022_v43  ;;  %v6167_v22 = vpop.f32.mrb[243].mxu0  ;;  %v3033_v2 = vmax.f32 %v2924_v7, 0.0 }
0x16a1   : > { %v6313_v16 = vadd.f32 %v6167_v22, %v3023_v15  ;;  %v2928_v15 = vadd.f32 %v20919_v58, %v17329_v51  ;;  %v20920_v22 = vld [vmem:[#allocation30_spill] sm:$0xff] }
0x16a2   : > { %v6364_v62 = vpack.c.bf16 %v6312_v63, %v6310_v3  ;;  %v20918_v3 = vld [vmem:[#allocation28_spill] sm:$0xff] }
0x16a3   : > { %v6365_v20 = vpack.c.bf16 %v6313_v16, %v6311_v25  ;;  %v6171_v9 = vpop.f32.mrb[244].mxu0  ;;  %v2926_v36 = vadd.f32 %v20918_v3, %v17326_v31  ;;  %v2932_v16 = vadd.f32 %v20920_v22, %v17326_v31  ;;  %v3035_v48 = vmax.f32 %v2928_v15, 0.0  ;;  %v20929_v3 = vld [vmem:[#allocation39_spill] sm:$0xff] }
0x16a4   : > { %v6314_v56 = vadd.f32 %v6171_v9, %v3024_v14  ;;  %v6173_v28 = vpop.f32.mrb[245].mxu0 }
0x16a5   : > { %v6315_v41 = vadd.f32 %v6173_v28, %v3025_v44  ;;  %13442 = vmatprep.mubr.msk.bf16.mxu1 %vm1976_vm6, %v6365_v20  ;;  %v3034_v63 = vmax.f32 %v2926_v36, 0.0  ;;  %v3036_v9 = vmax.f32 %v2932_v16, 0.0  ;;  %v2954_v36 = vadd.f32 %v20929_v3, %v17329_v51  ;;  %v20931_v16 = vld [vmem:[#allocation41_spill] sm:$0xff] }
0x16a6   : > { %6673 = vmatmul.mubr.bf16.gmra.mrb[220].mxu1 %v6364_v62  ;;  %v2934_v62 = vadd.f32 %v20921_v52, %v17329_v51 }
0x16a7   : > { %v6177_v5 = vpop.f32.mrb[246].mxu0  ;;  %v3045_v22 = vmax.f32 %v2954_v36, 0.0 }
0x16a8   : > { %v6316_v21 = vadd.f32 %v6177_v5, %v3026_v57  ;;  %v6179_v34 = vpop.f32.mrb[247].mxu0  ;;  %v3037_v32 = vmax.f32 %v2934_v62, 0.0 }
0x16a9   : > { %v6317_v35 = vadd.f32 %v6179_v34, %v3027_v42  ;;  %v2938_v42 = vadd.f32 %v20923_v8, %v17329_v51  ;;  %v20924_v34 = vld [vmem:[#allocation34_spill] sm:$0xff] }
0x16aa   : > { %v6366_v26 = vpack.c.bf16 %v6316_v21, %v6314_v56  ;;  %v20922_v56 = vld [vmem:[#allocation32_spill] sm:$0xff] }
0x16ab   : > { %v6367_v45 = vpack.c.bf16 %v6317_v35, %v6315_v41  ;;  %v6183_v1 = vpop.f32.mrb[248].mxu0  ;;  %v2936_v28 = vadd.f32 %v20922_v56, %v17326_v31  ;;  %v2942_v35 = vadd.f32 %v20924_v34, %v17326_v31  ;;  %v20933_v56 = vld [vmem:[#allocation43_spill] sm:$0xff] }
0x16ac   : > { %v6318_v49 = vadd.f32 %v6183_v1, %v3028_v11  ;;  %v6185_v4 = vpop.f32.mrb[249].mxu0 }
0x16ad   : > { %v6319_v0 = vadd.f32 %v6185_v4, %v3029_v6  ;;  %13443 = vmatprep.mubr.msk.bf16.mxu1 %vm1976_vm6, %v6367_v45  ;;  %v3038_v21 = vmax.f32 %v2936_v28, 0.0  ;;  %v3040_v27 = vmax.f32 %v2942_v35, 0.0  ;;  %v2964_v28 = vadd.f32 %v20933_v56, %v17329_v51  ;;  %v20935_v35 = vld [vmem:[#allocation45_spill] sm:$0xff] }
0x16ae   : > { %6683 = vmatmul.mubr.bf16.gmra.mrb[224].mxu1 %v6366_v26  ;;  %v3039_v26 = vmax.f32 %v2938_v42, 0.0 }
0x16af   : > { %v6189_v24 = vpop.f32.mrb[250].mxu0  ;;  %v3049_v34 = vmax.f32 %v2964_v28, 0.0 }
0x16b0   : > { %v6320_v40 = vadd.f32 %v6189_v24, %v3030_v30  ;;  %v6191_v17 = vpop.f32.mrb[251].mxu0  ;;  %v2948_v24 = vadd.f32 %v20927_v47, %v17329_v51  ;;  %v15192_v47 = vld [vmem:[%s20590_s18 + $0x170] ss:$8 sps:$4 sm:$0xff]  }
0x16b1   : > { %v6321_v33 = vadd.f32 %v6191_v17, %v3031_v29  ;;  %v20928_v17 = vld [vmem:[#allocation38_spill] sm:$0xff] }
0x16b2   : > { %v6368_v18 = vpack.c.bf16 %v6320_v40, %v6318_v49  ;;  %v20926_v49 = vld [vmem:[#allocation36_spill] sm:$0xff] }
0x16b3   : > { %v6369_v25 = vpack.c.bf16 %v6321_v33, %v6319_v0  ;;  %v6195_v43 = vpop.f32.mrb[252].mxu0  ;;  %v2946_v4 = vadd.f32 %v20926_v49, %v17326_v31  ;;  %v2952_v33 = vadd.f32 %v20928_v17, %v17326_v31  ;;  %v20937_v49 = vld [vmem:[#allocation47_spill] sm:$0xff] }
0x16b4   : > { %v6322_v61 = vadd.f32 %v6195_v43, %v3032_v37  ;;  %v6197_v60 = vpop.f32.mrb[253].mxu0  ;;  %v3043_v37 = vmax.f32 %v2948_v24, 0.0  ;;  %v15194_v24 = vld [vmem:[%s20590_s18 + $0x174] ss:$8 sps:$4 sm:$0xff]  }
0x16b5   : > { %v6323_v55 = vadd.f32 %v6197_v60, %v3033_v2  ;;  %13444 = vmatprep.mubr.msk.bf16.mxu1 %vm1976_vm6, %v6369_v25  ;;  %v3042_v40 = vmax.f32 %v2946_v4, 0.0  ;;  %v3044_v15 = vmax.f32 %v2952_v33, 0.0  ;;  %v2974_v4 = vadd.f32 %v20937_v49, %v17329_v51  ;;  %7107 = vmatprep.subr.bf16.mxu0 %v15194_v24 }
0x16b6   : > { %6693 = vmatmul.mubr.bf16.gmra.mrb[228].mxu1 %v6368_v18  ;;  %7108 = vmatpush1.bf16.msra.mxu0 %v15192_v47 }
0x16b7   : > { %v6201_v14 = vpop.f32.mrb[254].mxu0  ;;  %14775 = vmatprep.subr.bf16.mxu0 %v20707_v53 }
0x16b8   : > { %v6324_v44 = vadd.f32 %v6201_v14, %v3034_v63  ;;  %v6203_v39 = vpop.f32.mrb[255].mxu0  ;;  %v2958_v14 = vadd.f32 %v20931_v16, %v17329_v51 }
0x16b9   : > { %v6325_v23 = vadd.f32 %v6203_v39, %v3035_v48  ;;  %v20932_v39 = vld [vmem:[#allocation42_spill] sm:$0xff] }
0x16ba   : > { %v6370_v20 = vpack.c.bf16 %v6324_v44, %v6322_v61  ;;  %v20930_v61 = vld [vmem:[#allocation40_spill] sm:$0xff] }
0x16bb   : > { %v6371_v41 = vpack.c.bf16 %v6325_v23, %v6323_v55  ;;  %v6207_v57 = vpop.f32.mrb[0].mxu0  ;;  %v2956_v60 = vadd.f32 %v20930_v61, %v17326_v31  ;;  %v2962_v23 = vadd.f32 %v20932_v39, %v17326_v31 }
0x16bc   : > { %v6326_v5 = vadd.f32 %v6207_v57, %v3036_v9  ;;  %v6209_v12 = vpop.f32.mrb[1].mxu0  ;;  %v3047_v9 = vmax.f32 %v2958_v14, 0.0 }
0x16bd   : > { %v6327_v59 = vadd.f32 %v6209_v12, %v3037_v32  ;;  %13445 = vmatprep.mubr.msk.bf16.mxu1 %vm1976_vm6, %v6371_v41  ;;  %v3046_v44 = vmax.f32 %v2956_v60, 0.0  ;;  %v3048_v42 = vmax.f32 %v2962_v23, 0.0 }
0x16be   : > { %6703 = vmatmul.mubr.bf16.gmra.mrb[232].mxu1 %v6370_v20 }
0x16bf   : > { %v6213_v11 = vpop.f32.mrb[2].mxu0 }
0x16c0   : > { %v6328_v45 = vadd.f32 %v6213_v11, %v3038_v21  ;;  %v6215_v1 = vpop.f32.mrb[3].mxu0  ;;  %v2968_v11 = vadd.f32 %v20935_v35, %v17329_v51 }
0x16c1   : > { %v6329_v6 = vadd.f32 %v6215_v1, %v3039_v26  ;;  %v20936_v1 = vld [vmem:[#allocation46_spill] sm:$0xff] }
0x16c2   : > { %v6372_v38 = vpack.c.bf16 %v6328_v45, %v6326_v5  ;;  %v20934_v5 = vld [vmem:[#allocation44_spill] sm:$0xff] }
0x16c3   : > { %v6373_v0 = vpack.c.bf16 %v6329_v6, %v6327_v59  ;;  %v6219_v30 = vpop.f32.mrb[4].mxu0  ;;  %v2966_v12 = vadd.f32 %v20934_v5, %v17326_v31  ;;  %v2972_v6 = vadd.f32 %v20936_v1, %v17326_v31 }
0x16c4   : > { %v6330_v29 = vadd.f32 %v6219_v30, %v3040_v27  ;;  %v6221_v19 = vpop.f32.mrb[5].mxu0  ;;  %v3051_v27 = vmax.f32 %v2968_v11, 0.0 }
0x16c5   : > { %v6331_v7 = vadd.f32 %v6221_v19, %v3041_v54  ;;  %13446 = vmatprep.mubr.msk.bf16.mxu1 %vm1976_vm6, %v6373_v0  ;;  %v3050_v45 = vmax.f32 %v2966_v12, 0.0  ;;  %v3052_v19 = vmax.f32 %v2972_v6, 0.0 }
0x16c6   : > { %6713 = vmatmul.mubr.bf16.gmra.mrb[236].mxu1 %v6372_v38 }
0x16c7   : > { %v6225_v18 = vpop.f32.mrb[6].mxu0 }
0x16c8   : > { %v6332_v25 = vadd.f32 %v6225_v18, %v3042_v40  ;;  %v6227_v43 = vpop.f32.mrb[7].mxu0  ;;  %v3053_v18 = vmax.f32 %v2974_v4, 0.0 }
0x16c9   : > { %v6333_v2 = vadd.f32 %v6227_v43, %v3043_v37  ;;  %v20939_v37 = vld [vmem:[#allocation49_spill] sm:$0xff] }
0x16ca   : > { %v6374_v58 = vpack.c.bf16 %v6332_v25, %v6330_v29  ;;  %v2978_v3 = vadd.f32 %v20939_v37, %v17329_v51  ;;  %v15200_v37 = vld [vmem:[%s20590_s18 + $0x194] ss:$8 sps:$4 sm:$0xff]  }
0x16cb   : > { %v6375_v55 = vpack.c.bf16 %v6333_v2, %v6331_v7  ;;  %v6231_v63 = vpop.f32.mrb[8].mxu0  ;;  %v20938_v7 = vld [vmem:[#allocation48_spill] sm:$0xff] }
0x16cc   : > { %v6334_v48 = vadd.f32 %v6231_v63, %v3044_v15  ;;  %v6233_v52 = vpop.f32.mrb[9].mxu0  ;;  %v2976_v40 = vadd.f32 %v20938_v7, %v17326_v31  ;;  %v3055_v60 = vmax.f32 %v2978_v3, 0.0 }
0x16cd   : > { %v6335_v62 = vadd.f32 %v6233_v52, %v3045_v22  ;;  %13447 = vmatprep.mubr.msk.bf16.mxu1 %vm1976_vm6, %v6375_v55  ;;  %v20941_v55 = vld [vmem:[#allocation51_spill] sm:$0xff] }
0x16ce   : > { %6723 = vmatmul.mubr.bf16.gmra.mrb[240].mxu1 %v6374_v58  ;;  %v3054_v2 = vmax.f32 %v2976_v40, 0.0  ;;  %v20940_v58 = vld [vmem:[#allocation50_spill] sm:$0xff]  ;;  %v2984_v63 = vadd.f32 %v20941_v55, %v17329_v51  ;;  %v15201_v55 = vld [vmem:[%s20590_s18 + $0x1a0] ss:$8 sps:$4 sm:$0xff]  }
0x16cf   : > { %v6237_v20 = vpop.f32.mrb[10].mxu0  ;;  %v2982_v15 = vadd.f32 %v20940_v58, %v17326_v31 }
0x16d0   : > { %v6336_v41 = vadd.f32 %v6237_v20, %v3046_v44  ;;  %v6239_v57 = vpop.f32.mrb[11].mxu0  ;;  %v3057_v20 = vmax.f32 %v2984_v63, 0.0  ;;  %v15203_v63 = vld [vmem:[%s20590_s18 + $0x1a4] ss:$8 sps:$4 sm:$0xff]  }
0x16d1   : > { %v6337_v32 = vadd.f32 %v6239_v57, %v3047_v9  ;;  %v3056_v52 = vmax.f32 %v2982_v15, 0.0  ;;  %v20943_v9 = vld [vmem:[#allocation53_spill] sm:$0xff] }
0x16d2   : > { %v6376_v8 = vpack.c.bf16 %v6336_v41, %v6334_v48  ;;  %v2988_v56 = vadd.f32 %v20943_v9, %v17329_v51 }
0x16d3   : > { %v6377_v59 = vpack.c.bf16 %v6337_v32, %v6335_v62  ;;  %v6243_v21 = vpop.f32.mrb[12].mxu0  ;;  %v20942_v62 = vld [vmem:[#allocation52_spill] sm:$0xff] }
0x16d4   : > { %v6338_v26 = vadd.f32 %v6243_v21, %v3048_v42  ;;  %v6245_v50 = vpop.f32.mrb[13].mxu0  ;;  %v2986_v44 = vadd.f32 %v20942_v62, %v17326_v31  ;;  %v3059_v12 = vmax.f32 %v2988_v56, 0.0 }
0x16d5   : > { %v6339_v10 = vadd.f32 %v6245_v50, %v3049_v34  ;;  %13448 = vmatprep.mubr.msk.bf16.mxu1 %vm1976_vm6, %v6377_v59  ;;  %v20945_v59 = vld [vmem:[#allocation55_spill] sm:$0xff] }
0x16d6   : > { %6733 = vmatmul.mubr.bf16.gmra.mrb[244].mxu1 %v6376_v8  ;;  %v3058_v32 = vmax.f32 %v2986_v44, 0.0  ;;  %v20944_v8 = vld [vmem:[#allocation54_spill] sm:$0xff]  ;;  %v2994_v21 = vadd.f32 %v20945_v59, %v17329_v51 }
0x16d7   : > { %v6249_v38 = vpop.f32.mrb[14].mxu0  ;;  %v2992_v42 = vadd.f32 %v20944_v8, %v17326_v31  ;;  %v7864_v8 = vld [vmem:[%s20593_s21 + $0x18] sm:$0xff] }
0x16d8   : > { %v6340_v0 = vadd.f32 %v6249_v38, %v3050_v45  ;;  %v6251_v30 = vpop.f32.mrb[15].mxu0  ;;  %v3061_v38 = vmax.f32 %v2994_v21, 0.0 }
0x16d9   : > { %v6341_v54 = vadd.f32 %v6251_v30, %v3051_v27  ;;  %v3060_v50 = vmax.f32 %v2992_v42, 0.0  ;;  %v20947_v27 = vld [vmem:[#allocation57_spill] sm:$0xff] }
0x16da   : > { %v6378_v29 = vpack.c.bf16 %v6340_v0, %v6338_v26  ;;  %v2998_v49 = vadd.f32 %v20947_v27, %v17329_v51  ;;  %v15195_v51 = vld [vmem:[%s20590_s18 + $0x180] ss:$8 sps:$4 sm:$0xff]  }
0x16db   : > { %v6379_v17 = vpack.c.bf16 %v6341_v54, %v6339_v10  ;;  %v6255_v33 = vpop.f32.mrb[16].mxu0  ;;  %v20946_v10 = vld [vmem:[#allocation56_spill] sm:$0xff] }
0x16dc   : > { %v6342_v36 = vadd.f32 %v6255_v33, %v3052_v19  ;;  %v6257_v25 = vpop.f32.mrb[17].mxu0  ;;  %v2996_v45 = vadd.f32 %v20946_v10, %v17326_v31  ;;  %v3063_v24 = vmax.f32 %v2998_v49, 0.0  ;;  %v6410_v33 = vld [vmem:[%s20591_s19] sm:$0x3]  ;;  %v15215_v49 = vld [vmem:[%s20590_s18 + $0x1e4] ss:$8 sps:$4 sm:$0xff]  }
0x16dd   : > { %v6343_v43 = vadd.f32 %v6257_v25, %v3053_v18  ;;  %13449 = vmatprep.mubr.msk.bf16.mxu1 %vm1976_vm6, %v6379_v17  ;;  %v15197_v17 = vld [vmem:[%s20590_s18 + $0x184] ss:$8 sps:$4 sm:$0xff]   ;;  %v15198_v18 = vld [vmem:[%s20590_s18 + $0x190] ss:$8 sps:$4 sm:$0xff]   ;;  %v17558_v3 = vrot.slane %v6410_v33, %v20885_v13 }
0x16de   : > { %6743 = vmatmul.mubr.bf16.gmra.mrb[248].mxu1 %v6378_v29  ;;  %v3062_v54 = vmax.f32 %v2996_v45, 0.0  ;;  %7580 = vmatprep.subr.bf16.mxu1 %v15197_v17  ;;  %v7865_v10 = vld [vmem:[%s20593_s21 + $0x20] sm:$0xff]  ;;  %v7866_v45 = vld [vmem:[%s20593_s21 + $0x28] sm:$0xff] }
0x16df   : > { %v6261_v61 = vpop.f32.mrb[18].mxu0  ;;  %7581 = vmatpush1.bf16.msra.mxu1 %v15195_v51 }
0x16e0   : > { %v6344_v22 = vadd.f32 %v6261_v61, %v3054_v2  ;;  %v6263_v16 = vpop.f32.mrb[19].mxu0  ;;  %7582 = vmatprep.subr.bf16.mxu1 %v15200_v37 }
0x16e1   : > { %v6345_v14 = vadd.f32 %v6263_v16, %v3055_v60  ;;  %v15206_v16 = vld [vmem:[%s20590_s18 + $0x1b4] ss:$8 sps:$4 sm:$0xff]  }
0x16e2   : > { %v6380_v48 = vpack.c.bf16 %v6344_v22, %v6342_v36  ;;  %v17561_v36 = vrot.slane %v6410_v33, %v15856_v46  ;;  %v15218_v33 = vld [vmem:[%s20590_s18 + $0x1f4] ss:$8 sps:$4 sm:$0xff]  }
0x16e3   : > { %v6381_v39 = vpack.c.bf16 %v6345_v14, %v6343_v43  ;;  %v6267_v23 = vpop.f32.mrb[20].mxu0  ;;  %7583 = vmatpush1.bf16.msra.mxu1 %v15198_v18 }
0x16e4   : > { %v6346_v28 = vadd.f32 %v6267_v23, %v3056_v52  ;;  %v6269_v41 = vpop.f32.mrb[21].mxu0  ;;  %7584 = vmatprep.subr.bf16.mxu1 %v15203_v63  ;;  %v7862_v52 = vld [vmem:[%s20593_s21 + $0x8] sm:$0xff]  ;;  %v15216_v63 = vld [vmem:[%s20590_s18 + $0x1f0] ss:$8 sps:$4 sm:$0xff]  }
0x16e5   : > { %v6347_v57 = vadd.f32 %v6269_v41, %v3057_v20  ;;  %13450 = vmatprep.mubr.msk.bf16.mxu1 %vm1976_vm6, %v6381_v39  ;;  %v15204_v39 = vld [vmem:[%s20590_s18 + $0x1b0] ss:$8 sps:$4 sm:$0xff]   ;;  %v15209_v20 = vld [vmem:[%s20590_s18 + $0x1c4] ss:$8 sps:$4 sm:$0xff]  }
0x16e6   : > { %6753 = vmatmul.mubr.bf16.gmra.mrb[252].mxu1 %v6380_v48  ;;  %v7861_v48 = vld [vmem:[%s20593_s21] sm:$0xff] }
0x16e7   : > { %v6273_v5 = vpop.f32.mrb[22].mxu0  ;;  %7585 = vmatpush1.bf16.msra.mxu1 %v15201_v55 }
0x16e8   : > { %v6348_v34 = vadd.f32 %v6273_v5, %v3058_v32  ;;  %v6275_v35 = vpop.f32.mrb[23].mxu0  ;;  %7586 = vmatprep.subr.bf16.mxu1 %v15206_v16  ;;  %v7863_v32 = vld [vmem:[%s20593_s21 + $0x10] sm:$0xff] }
0x16e9   : > { %v6349_v11 = vadd.f32 %v6275_v35, %v3059_v12  ;;  %v15207_v12 = vld [vmem:[%s20590_s18 + $0x1c0] ss:$8 sps:$4 sm:$0xff]   ;;  %v15212_v35 = vld [vmem:[%s20590_s18 + $0x1d4] ss:$8 sps:$4 sm:$0xff]  }
0x16ea   : > { %v6382_v26 = vpack.c.bf16 %v6348_v34, %v6346_v28  ;;  %v14776_v28 = vpack.c.bf16 %v7862_v52, %v7861_v48  ;;  %v15221_v48 = vld [vmem:[%s20590_s18 + $0x204] ss:$8 sps:$4 sm:$0xff]  }
0x16eb   : > { %v6383_v1 = vpack.c.bf16 %v6349_v11, %v6347_v57  ;;  %v6279_v6 = vpop.f32.mrb[24].mxu0  ;;  %7587 = vmatpush1.bf16.msra.mxu1 %v15204_v39 }
0x16ec   : > { %v6350_v4 = vadd.f32 %v6279_v6, %v3060_v50  ;;  %v6281_v0 = vpop.f32.mrb[25].mxu0  ;;  %7588 = vmatprep.subr.bf16.mxu1 %v15209_v20 }
0x16ed   : > { %v6351_v30 = vadd.f32 %v6281_v0, %v3061_v38  ;;  %13451 = vmatprep.mubr.msk.bf16.mxu1 %vm1976_vm6, %v6383_v1  ;;  %v15210_v38 = vld [vmem:[%s20590_s18 + $0x1d0] ss:$8 sps:$4 sm:$0xff]  }
0x16ee   : > { %6763 = vmatmul.mubr.bf16.gmra.mrb[0].mxu1 %v6382_v26  ;;  %v14779_v26 = vpack.c.bf16 %v7864_v8, %v7863_v32  ;;  %v15219_v8 = vld [vmem:[%s20590_s18 + $0x200] ss:$8 sps:$4 sm:$0xff]  }
0x16ef   : > { %v6285_v47 = vpop.f32.mrb[26].mxu0  ;;  %7589 = vmatpush1.bf16.msra.mxu1 %v15207_v12 }
0x16f0   : > { %v6352_v29 = vadd.f32 %v6285_v47, %v3062_v54  ;;  %v6287_v19 = vpop.f32.mrb[27].mxu0  ;;  %7590 = vmatprep.subr.bf16.mxu1 %v15212_v35  ;;  %v15224_v35 = vld [vmem:[%s20590_s18 + $0x214] ss:$8 sps:$4 sm:$0xff]  }
0x16f1   : > { %v6353_v7 = vadd.f32 %v6287_v19, %v3063_v24  ;;  %v7867_v24 = vld [vmem:[%s20593_s21 + $0x30] sm:$0xff] }
0x16f2   : > { %v6384_v40 = vpack.c.bf16 %v6352_v29, %v6350_v4  ;;  %v7868_v29 = vld [vmem:[%s20593_s21 + $0x38] sm:$0xff] }
0x16f3   : > { %v6385_v31 = vpack.c.bf16 %v6353_v7, %v6351_v30  ;;  %v14782_v30 = vpack.c.bf16 %v7866_v45, %v7865_v10  ;;  %7591 = vmatpush1.bf16.msra.mxu1 %v15210_v38  ;;  %v14785_v37 = vpack.c.bf16 %v7868_v29, %v7867_v24  ;;  %v7873_v38 = vld [vmem:[%s20593_s21 + $0x60] sm:$0xff] }
0x16f4   : > { %7592 = vmatprep.subr.bf16.mxu1 %v15215_v49  ;;  %v7874_v49 = vld [vmem:[%s20593_s21 + $0x68] sm:$0xff] }
0x16f5   : > { %13452 = vmatprep.mubr.msk.bf16.mxu1 %vm1976_vm6, %v6385_v31 }
0x16f6   : > { %6773 = vmatmul.mubr.bf16.gmra.mrb[4].mxu1 %v6384_v40  ;;  %v15213_v40 = vld [vmem:[%s20590_s18 + $0x1e0] ss:$8 sps:$4 sm:$0xff]  }
0x16f7   : > { %7593 = vmatpush1.bf16.msra.mxu1 %v15213_v40 }
0x16f8   : > { %7594 = vmatprep.subr.bf16.mxu1 %v15218_v33  ;;  %v7875_v33 = vld [vmem:[%s20593_s21 + $0x70] sm:$0xff] }
0x16fb   : > { %7595 = vmatpush1.bf16.msra.mxu1 %v15216_v63  ;;  %v15225_v63 = vld [vmem:[%s20590_s18 + $0x220] ss:$8 sps:$4 sm:$0xff]  }
0x16fc   : > { %7596 = vmatprep.subr.bf16.mxu1 %v15221_v48 }
0x16ff   : > { %7597 = vmatpush1.bf16.msra.mxu1 %v15219_v8 }
0x1700   : > { %7598 = vmatprep.subr.bf16.mxu1 %v15224_v35 }
0x1751   : > { %v6624_v25 = vpop.f32.mrb[200].mxu1 }
0x1752   : > { %v6626_v43 = vpop.f32.mrb[201].mxu1  ;;  %v17567_v15 = vadd.f32 %v6624_v25, %v17561_v36 }
0x1753   : > { %v17564_v2 = vadd.f32 %v6626_v43, %v17558_v3  ;;  %v6628_v58 = vpop.f32.mrb[202].mxu1  ;;  %v7869_v43 = vld [vmem:[%s20593_s21 + $0x40] sm:$0xff] }
0x1754   : > { %v17570_v61 = vadd.f32 %v6628_v58, %v17561_v36  ;;  %v6630_v60 = vpop.f32.mrb[203].mxu1  ;;  %v20705_v23 = vmax.f32 %v17567_v15, 0.0  ;;  %v7870_v58 = vld [vmem:[%s20593_s21 + $0x48] sm:$0xff] }
0x1755   : > { %v17579_v22 = vadd.f32 %v6630_v60, %v17558_v3  ;;  %v20706_v62 = vmax.f32 %v17564_v2, 0.0  ;;  %v14788_v20 = vpack.c.bf16 %v7870_v58, %v7869_v43 }
0x1756   : > { %v20699_v14 = vmax.f32 %v17570_v61, 0.0 }
0x1757   : > { %v20704_v44 = vmax.f32 %v17579_v22, 0.0 }
0x1758   : > { %v6847_v41 = vpack.c.bf16 %v20699_v14, %v20705_v23 }
0x1759   : > { %v6848_v9 = vpack.c.bf16 %v20704_v44, %v20706_v62  ;;  %v6634_v56 = vpop.f32.mrb[204].mxu1 }
0x175a   : > { %v6636_v57 = vpop.f32.mrb[205].mxu1  ;;  %v17622_v59 = vadd.f32 %v6634_v56, %v17561_v36 }
0x175b   : > { %v17615_v42 = vadd.f32 %v6636_v57, %v17558_v3  ;;  %v6638_v5 = vpop.f32.mrb[206].mxu1  ;;  %13502 = vmatprep.mubr.msk.bf16.mxu0 %vm1976_vm6, %v6848_v9 }
0x175c   : > { %v17625_v21 = vadd.f32 %v6638_v5, %v17561_v36  ;;  %v6640_v34 = vpop.f32.mrb[207].mxu1  ;;  %7118 = vmatmul.mubr.bf16.vlgmr.msra.gmra.mrb[28].mxu0 %v6847_v41  ;;  %v20697_v27 = vmax.f32 %v17622_v59, 0.0  ;;  %v7872_v41 = vld [vmem:[%s20593_s21 + $0x58] sm:$0xff] }
0x175d   : > { %v17631_v11 = vadd.f32 %v6640_v34, %v17558_v3  ;;  %14777 = vmatpush1.bf16.msra.mxu0 %v14776_v28  ;;  %v20698_v1 = vmax.f32 %v17615_v42, 0.0  ;;  %v7871_v28 = vld [vmem:[%s20593_s21 + $0x50] sm:$0xff] }
0x175e   : > { %v20691_v50 = vmax.f32 %v17625_v21, 0.0  ;;  %14778 = vmatprep.subr.bf16.mxu0 %v20707_v53  ;;  %v14791_v10 = vpack.c.bf16 %v7872_v41, %v7871_v28  ;;  %v7877_v28 = vld [vmem:[%s20593_s21 + $0x80] sm:$0xff]  ;;  %v7878_v41 = vld [vmem:[%s20593_s21 + $0x88] sm:$0xff] }
0x175f   : > { %v20696_v6 = vmax.f32 %v17631_v11, 0.0 }
0x1760   : > { %v6849_v54 = vpack.c.bf16 %v20691_v50, %v20697_v27 }
0x1761   : > { %v6850_v4 = vpack.c.bf16 %v20696_v6, %v20698_v1  ;;  %v6644_v0 = vpop.f32.mrb[208].mxu1  ;;  %14780 = vmatpush1.bf16.msra.mxu0 %v14779_v26 }
0x1762   : > { %v6646_v47 = vpop.f32.mrb[209].mxu1  ;;  %14781 = vmatprep.subr.bf16.mxu0 %v20707_v53  ;;  %v17673_v31 = vadd.f32 %v6644_v0, %v17561_v36 }
0x1763   : > { %v17666_v19 = vadd.f32 %v6646_v47, %v17558_v3  ;;  %v6648_v7 = vpop.f32.mrb[210].mxu1  ;;  %13503 = vmatprep.mubr.msk.bf16.mxu0 %vm1976_vm6, %v6850_v4  ;;  %v15227_v47 = vld [vmem:[%s20590_s18 + $0x224] ss:$8 sps:$4 sm:$0xff]  }
0x1764   : > { %v17676_v51 = vadd.f32 %v6648_v7, %v17561_v36  ;;  %v6650_v17 = vpop.f32.mrb[211].mxu1  ;;  %7128 = vmatmul.mubr.bf16.gmra.mrb[32].mxu0 %v6849_v54  ;;  %v20689_v16 = vmax.f32 %v17673_v31, 0.0  ;;  %v14794_v7 = vpack.c.bf16 %v7874_v49, %v7873_v38  ;;  %v14800_v38 = vpack.c.bf16 %v7878_v41, %v7877_v28 }
0x1765   : > { %v17682_v18 = vadd.f32 %v6650_v17, %v17558_v3  ;;  %14783 = vmatpush1.bf16.msra.mxu0 %v14782_v30  ;;  %v20690_v60 = vmax.f32 %v17666_v19, 0.0  ;;  %v15222_v30 = vld [vmem:[%s20590_s18 + $0x210] ss:$8 sps:$4 sm:$0xff]  }
0x1766   : > { %v20683_v25 = vmax.f32 %v17676_v51, 0.0  ;;  %14784 = vmatprep.subr.bf16.mxu0 %v20707_v53  ;;  %7599 = vmatpush1.bf16.msra.mxu1 %v15222_v30 }
0x1767   : > { %v20688_v55 = vmax.f32 %v17682_v18, 0.0  ;;  %7600 = vmatprep.subr.bf16.mxu1 %v15227_v47  ;;  %v7879_v47 = vld [vmem:[%s20593_s21 + $0x90] sm:$0xff] }
0x1768   : > { %v6851_v9 = vpack.c.bf16 %v20683_v25, %v20689_v16 }
0x1769   : > { %v6852_v52 = vpack.c.bf16 %v20688_v55, %v20690_v60  ;;  %v6654_v39 = vpop.f32.mrb[212].mxu1  ;;  %14786 = vmatpush1.bf16.msra.mxu0 %v14785_v37  ;;  %v7876_v37 = vld [vmem:[%s20593_s21 + $0x78] sm:$0xff] }
0x176a   : > { %v6656_v56 = vpop.f32.mrb[213].mxu1  ;;  %14787 = vmatprep.subr.bf16.mxu0 %v20707_v53  ;;  %v17724_v5 = vadd.f32 %v6654_v39, %v17561_v36  ;;  %7601 = vmatpush1.bf16.msra.mxu1 %v15225_v63 }
0x176b   : > { %v17717_v57 = vadd.f32 %v6656_v56, %v17558_v3  ;;  %v6658_v32 = vpop.f32.mrb[214].mxu1  ;;  %13504 = vmatprep.mubr.msk.bf16.mxu0 %vm1976_vm6, %v6852_v52 }
0x176c   : > { %v17727_v12 = vadd.f32 %v6658_v32, %v17561_v36  ;;  %v6660_v34 = vpop.f32.mrb[215].mxu1  ;;  %7138 = vmatmul.mubr.bf16.gmra.mrb[36].mxu0 %v6851_v9  ;;  %v20681_v54 = vmax.f32 %v17724_v5, 0.0  ;;  %v14797_v9 = vpack.c.bf16 %v7876_v37, %v7875_v33 }
0x176d   : > { %v17733_v26 = vadd.f32 %v6660_v34, %v17558_v3  ;;  %14789 = vmatpush1.bf16.msra.mxu0 %v14788_v20  ;;  %v20682_v4 = vmax.f32 %v17717_v57, 0.0 }
0x176e   : > { %v20675_v45 = vmax.f32 %v17727_v12, 0.0  ;;  %14790 = vmatprep.subr.bf16.mxu0 %v20707_v53 }
0x176f   : > { %v20680_v0 = vmax.f32 %v17733_v26, 0.0 }
0x1770   : > { %v6853_v40 = vpack.c.bf16 %v20675_v45, %v20681_v54 }
0x1771   : > { %v6854_v24 = vpack.c.bf16 %v20680_v0, %v20682_v4  ;;  %v6664_v29 = vpop.f32.mrb[216].mxu1  ;;  %14792 = vmatpush1.bf16.msra.mxu0 %v14791_v10 }
0x1772   : > { %v6666_v17 = vpop.f32.mrb[217].mxu1  ;;  %14793 = vmatprep.subr.bf16.mxu0 %v20707_v53  ;;  %v17775_v48 = vadd.f32 %v6664_v29, %v17561_v36 }
0x1773   : > { %v17768_v43 = vadd.f32 %v6666_v17, %v17558_v3  ;;  %v6668_v58 = vpop.f32.mrb[218].mxu1  ;;  %13505 = vmatprep.mubr.msk.bf16.mxu0 %vm1976_vm6, %v6854_v24  ;;  %v7880_v24 = vld [vmem:[%s20593_s21 + $0x98] sm:$0xff] }
0x1774   : > { %v17778_v52 = vadd.f32 %v6668_v58, %v17561_v36  ;;  %v6670_v39 = vpop.f32.mrb[219].mxu1  ;;  %7148 = vmatmul.mubr.bf16.gmra.mrb[40].mxu0 %v6853_v40  ;;  %v20673_v34 = vmax.f32 %v17775_v48, 0.0  ;;  %v14803_v58 = vpack.c.bf16 %v7880_v24, %v7879_v47 }
0x1775   : > { %v17781_v20 = vadd.f32 %v6670_v39, %v17558_v3  ;;  %14795 = vmatpush1.bf16.msra.mxu0 %v14794_v7  ;;  %v20674_v32 = vmax.f32 %v17768_v43, 0.0 }
0x1776   : > { %v20667_v56 = vmax.f32 %v17778_v52, 0.0  ;;  %14796 = vmatprep.subr.bf16.mxu0 %v20707_v53 }
0x1777   : > { %v20672_v8 = vmax.f32 %v17781_v20, 0.0 }
0x1778   : > { %v6855_v49 = vpack.c.bf16 %v20667_v56, %v20673_v34 }
0x1779   : > { %v6856_v35 = vpack.c.bf16 %v20672_v8, %v20674_v32  ;;  %v6674_v10 = vpop.f32.mrb[220].mxu1  ;;  %14798 = vmatpush1.bf16.msra.mxu0 %v14797_v9 }
0x177a   : > { %v6676_v30 = vpop.f32.mrb[221].mxu1  ;;  %14799 = vmatprep.subr.bf16.mxu0 %v20707_v53  ;;  %v17814_v40 = vadd.f32 %v6674_v10, %v17561_v36 }
0x177b   : > { %v17810_v29 = vadd.f32 %v6676_v30, %v17558_v3  ;;  %v6678_v7 = vpop.f32.mrb[222].mxu1  ;;  %13506 = vmatprep.mubr.msk.bf16.mxu0 %vm1976_vm6, %v6856_v35 }
0x177c   : > { %v17817_v17 = vadd.f32 %v6678_v7, %v17561_v36  ;;  %v6680_v33 = vpop.f32.mrb[223].mxu1  ;;  %7158 = vmatmul.mubr.bf16.gmra.mrb[44].mxu0 %v6855_v49  ;;  %v20665_v28 = vmax.f32 %v17814_v40, 0.0 }
0x177d   : > { %v17820_v37 = vadd.f32 %v6680_v33, %v17558_v3  ;;  %14801 = vmatpush1.bf16.msra.mxu0 %v14800_v38  ;;  %v20666_v39 = vmax.f32 %v17810_v29, 0.0 }
0x177e   : > { %v20663_v63 = vmax.f32 %v17817_v17, 0.0  ;;  %14802 = vmatprep.subr.bf16.mxu0 %v20707_v53 }
0x177f   : > { %v20664_v9 = vmax.f32 %v17820_v37, 0.0 }
0x1780   : > { %v6857_v10 = vpack.c.bf16 %v20663_v63, %v20665_v28 }
0x1781   : > { %v6858_v41 = vpack.c.bf16 %v20664_v9, %v20666_v39  ;;  %v6684_v35 = vpop.f32.mrb[224].mxu1  ;;  %14804 = vmatpush1.bf16.msra.mxu0 %v14803_v58 }
0x1782   : > { %v6686_v38 = vpop.f32.mrb[225].mxu1  ;;  %14805 = vmatprep.subr.bf16.mxu0 %v20707_v53  ;;  %v17841_v47 = vadd.f32 %v6684_v35, %v17561_v36 }
0x1783   : > { %v17837_v49 = vadd.f32 %v6686_v38, %v17558_v3  ;;  %v6688_v30 = vpop.f32.mrb[226].mxu1  ;;  %13507 = vmatprep.mubr.msk.bf16.mxu0 %vm1976_vm6, %v6858_v41 }
0x1784   : > { %v17844_v24 = vadd.f32 %v6688_v30, %v17561_v36  ;;  %v6690_v7 = vpop.f32.mrb[227].mxu1  ;;  %7168 = vmatmul.mubr.bf16.gmra.mrb[48].mxu0 %v6857_v10  ;;  %v20671_v9 = vmax.f32 %v17841_v47, 0.0 }
0x1785   : > { %v17847_v33 = vadd.f32 %v6690_v7, %v17558_v3  ;;  %v20669_v63 = vmax.f32 %v17837_v49, 0.0 }
0x1786   : > { %v20670_v58 = vmax.f32 %v17844_v24, 0.0 }
0x1787   : > { %v20668_v38 = vmax.f32 %v17847_v33, 0.0 }
0x1788   : > { %v6859_v10 = vpack.c.bf16 %v20670_v58, %v20671_v9 }
0x1789   : > { %v6860_v41 = vpack.c.bf16 %v20668_v38, %v20669_v63  ;;  %v6694_v35 = vpop.f32.mrb[228].mxu1 }
0x178a   : > { %v6696_v30 = vpop.f32.mrb[229].mxu1  ;;  %v17866_v39 = vadd.f32 %v6694_v35, %v17561_v36 }
0x178b   : > { %v17862_v7 = vadd.f32 %v6696_v30, %v17558_v3  ;;  %v6698_v28 = vpop.f32.mrb[230].mxu1  ;;  %13508 = vmatprep.mubr.msk.bf16.mxu0 %vm1976_vm6, %v6860_v41 }
0x178c   : > { %v17869_v56 = vadd.f32 %v6698_v28, %v17561_v36  ;;  %v6700_v38 = vpop.f32.mrb[231].mxu1  ;;  %7178 = vmatmul.mubr.bf16.gmra.mrb[52].mxu0 %v6859_v10  ;;  %v20679_v8 = vmax.f32 %v17866_v39, 0.0 }
0x178d   : > { %v17872_v63 = vadd.f32 %v6700_v38, %v17558_v3  ;;  %v20677_v9 = vmax.f32 %v17862_v7, 0.0 }
0x178e   : > { %v20678_v58 = vmax.f32 %v17869_v56, 0.0 }
0x178f   : > { %v20676_v30 = vmax.f32 %v17872_v63, 0.0 }
0x1790   : > { %v6861_v38 = vpack.c.bf16 %v20678_v58, %v20679_v8 }
0x1791   : > { %v6862_v41 = vpack.c.bf16 %v20676_v30, %v20677_v9  ;;  %v6704_v28 = vpop.f32.mrb[232].mxu1 }
0x1792   : > { %v6706_v35 = vpop.f32.mrb[233].mxu1  ;;  %v17891_v32 = vadd.f32 %v6704_v28, %v17561_v36 }
0x1793   : > { %v17887_v10 = vadd.f32 %v6706_v35, %v17558_v3  ;;  %v6708_v34 = vpop.f32.mrb[234].mxu1  ;;  %13509 = vmatprep.mubr.msk.bf16.mxu0 %vm1976_vm6, %v6862_v41 }
0x1794   : > { %v17894_v45 = vadd.f32 %v6708_v34, %v17561_v36  ;;  %v6710_v30 = vpop.f32.mrb[235].mxu1  ;;  %7188 = vmatmul.mubr.bf16.gmra.mrb[56].mxu0 %v6861_v38  ;;  %v20687_v0 = vmax.f32 %v17891_v32, 0.0 }
0x1795   : > { %v17897_v9 = vadd.f32 %v6710_v30, %v17558_v3  ;;  %v20685_v8 = vmax.f32 %v17887_v10, 0.0 }
0x1796   : > { %v20686_v58 = vmax.f32 %v17894_v45, 0.0 }
0x1797   : > { %v20684_v35 = vmax.f32 %v17897_v9, 0.0 }
0x1798   : > { %v6863_v30 = vpack.c.bf16 %v20686_v58, %v20687_v0 }
0x1799   : > { %v6864_v41 = vpack.c.bf16 %v20684_v35, %v20685_v8  ;;  %v6714_v34 = vpop.f32.mrb[236].mxu1 }
0x179a   : > { %v6716_v28 = vpop.f32.mrb[237].mxu1  ;;  %v17916_v4 = vadd.f32 %v6714_v34, %v17561_v36 }
0x179b   : > { %v17912_v38 = vadd.f32 %v6716_v28, %v17558_v3  ;;  %v6718_v54 = vpop.f32.mrb[238].mxu1  ;;  %13510 = vmatprep.mubr.msk.bf16.mxu0 %vm1976_vm6, %v6864_v41 }
0x179c   : > { %v17919_v25 = vadd.f32 %v6718_v54, %v17561_v36  ;;  %v6720_v35 = vpop.f32.mrb[239].mxu1  ;;  %7198 = vmatmul.mubr.bf16.gmra.mrb[60].mxu0 %v6863_v30  ;;  %v20695_v55 = vmax.f32 %v17916_v4, 0.0 }
0x179d   : > { %v17922_v8 = vadd.f32 %v6720_v35, %v17558_v3  ;;  %v20693_v0 = vmax.f32 %v17912_v38, 0.0 }
0x179e   : > { %v20694_v58 = vmax.f32 %v17919_v25, 0.0 }
0x179f   : > { %v20692_v28 = vmax.f32 %v17922_v8, 0.0 }
0x17a0   : > { %v6865_v35 = vpack.c.bf16 %v20694_v58, %v20695_v55 }
0x17a1   : > { %v6866_v41 = vpack.c.bf16 %v20692_v28, %v20693_v0  ;;  %v6724_v54 = vpop.f32.mrb[240].mxu1 }
0x17a2   : > { %v6726_v34 = vpop.f32.mrb[241].mxu1  ;;  %v17941_v60 = vadd.f32 %v6724_v54, %v17561_v36 }
0x17a3   : > { %v17937_v30 = vadd.f32 %v6726_v34, %v17558_v3  ;;  %v6728_v16 = vpop.f32.mrb[242].mxu1  ;;  %13511 = vmatprep.mubr.msk.bf16.mxu0 %vm1976_vm6, %v6866_v41 }
0x17a4   : > { %20948 = vst [vmem:[#allocation5_spill] sm:$0xff] %v17941_v60  ;;  %v17944_v50 = vadd.f32 %v6728_v16, %v17561_v36  ;;  %v6730_v28 = vpop.f32.mrb[243].mxu1  ;;  %7208 = vmatmul.mubr.bf16.gmra.mrb[64].mxu0 %v6865_v35  ;;  %v20703_v6 = vmax.f32 %v17941_v60, 0.0 }
0x17a5   : > { %v17947_v0 = vadd.f32 %v6730_v28, %v17558_v3  ;;  %v20701_v55 = vmax.f32 %v17937_v30, 0.0 }
0x17a6   : > { %20949 = vst [vmem:[#allocation4_spill] sm:$0xff] %v17944_v50  ;;  %v20702_v58 = vmax.f32 %v17944_v50, 0.0 }
0x17a7   : > { %20950 = vst [vmem:[#allocation9_spill] sm:$0xff] %v17947_v0  ;;  %v20700_v34 = vmax.f32 %v17947_v0, 0.0 }
0x17a8   : > { %v6867_v28 = vpack.c.bf16 %v20702_v58, %v20703_v6 }
0x17a9   : > { %v6868_v41 = vpack.c.bf16 %v20700_v34, %v20701_v55  ;;  %v6734_v16 = vpop.f32.mrb[244].mxu1 }
0x17aa   : > { %v6736_v54 = vpop.f32.mrb[245].mxu1  ;;  %v17966_v1 = vadd.f32 %v6734_v16, %v17561_v36  ;;  %v7881_v16 = vld [vmem:[%s20593_s21 + $0xa0] sm:$0xff] }
0x17ab   : > { %v17962_v35 = vadd.f32 %v6736_v54, %v17558_v3  ;;  %v6738_v27 = vpop.f32.mrb[246].mxu1  ;;  %13512 = vmatprep.mubr.msk.bf16.mxu0 %vm1976_vm6, %v6868_v41 }
0x17ac   : > { %20952 = vst [vmem:[#allocation8_spill] sm:$0xff] %v17966_v1  ;;  %v17969_v14 = vadd.f32 %v6738_v27, %v17561_v36  ;;  %v6740_v34 = vpop.f32.mrb[247].mxu1  ;;  %7218 = vmatmul.mubr.bf16.gmra.mrb[68].mxu0 %v6867_v28  ;;  %v20715_v44 = vmax.f32 %v17966_v1, 0.0 }
0x17ad   : > { %20951 = vst [vmem:[#allocation7_spill] sm:$0xff] %v17962_v35  ;;  %v17972_v55 = vadd.f32 %v6740_v34, %v17558_v3  ;;  %v20710_v6 = vmax.f32 %v17962_v35, 0.0  ;;  %v7882_v34 = vld [vmem:[%s20593_s21 + $0xa8] sm:$0xff] }
0x17ae   : > { %20953 = vst [vmem:[#allocation6_spill] sm:$0xff] %v17969_v14  ;;  %v20714_v58 = vmax.f32 %v17969_v14, 0.0  ;;  %v14806_v62 = vpack.c.bf16 %v7882_v34, %v7881_v16  ;;  %v20959_v16 = vmov 0.0|0.0  }
0x17af   : > { %20954 = vst [vmem:[#allocation12_spill] sm:$0xff] %v17972_v55  ;;  %v20709_v54 = vmax.f32 %v17972_v55, 0.0 }
0x17b0   : > { %v6869_v28 = vpack.c.bf16 %v20714_v58, %v20715_v44  ;;  %14807 = vmatpush1.bf16.msra.mxu0 %v14806_v62  ;;  %v15228_v62 = vld [vmem:[%s20590_s18 + $0x230] ss:$8 sps:$4 sm:$0xff]  }
0x17b1   : > { %v6870_v41 = vpack.c.bf16 %v20709_v54, %v20710_v6  ;;  %v6744_v27 = vpop.f32.mrb[248].mxu1  ;;  %14808 = vmatprep.subr.bf16.mxu0 %v20959_v16 }
0x17b2   : > { %v6746_v23 = vpop.f32.mrb[249].mxu1  ;;  %v17997_v6 = vadd.f32 %v6744_v27, %v17561_v36 }
0x17b3   : > { %v17993_v53 = vadd.f32 %v6746_v23, %v17558_v3  ;;  %v6748_v54 = vpop.f32.mrb[250].mxu1  ;;  %13513 = vmatprep.mubr.msk.bf16.mxu0 %vm1976_vm6, %v6870_v41  ;;  %v7883_v23 = vld [vmem:[%s20593_s21 + $0xb0] sm:$0xff]  ;;  %v7884_v41 = vld [vmem:[%s20593_s21 + $0xb8] sm:$0xff] }
0x17b4   : > { %20956 = vst [vmem:[#allocation14_spill] sm:$0xff] %v17997_v6  ;;  %v18000_v55 = vadd.f32 %v6748_v54, %v17561_v36  ;;  %v6750_v35 = vpop.f32.mrb[251].mxu1  ;;  %7228 = vmatmul.mubr.bf16.gmra.mrb[72].mxu0 %v6869_v28  ;;  %v14809_v54 = vpack.c.bf16 %v7884_v41, %v7883_v23  ;;  %v20721_v58 = vmax.f32 %v17997_v6, 0.0 }
0x17b5   : > { %20955 = vst [vmem:[#allocation13_spill] sm:$0xff] %v17993_v53  ;;  %v18003_v1 = vadd.f32 %v6750_v35, %v17558_v3  ;;  %v20722_v34 = vmax.f32 %v17993_v53, 0.0  ;;  %v15230_v35 = vld [vmem:[%s20590_s18 + $0x234] ss:$8 sps:$4 sm:$0xff]  }
0x17b6   : > { %20957 = vst [vmem:[#allocation15_spill] sm:$0xff] %v18000_v55  ;;  %v20720_v27 = vmax.f32 %v18000_v55, 0.0  ;;  %14810 = vmatpush1.bf16.msra.mxu0 %v14809_v54  ;;  %7602 = vmatprep.subr.bf16.mxu1 %v15230_v35 }
0x17b7   : > { %20958 = vst [vmem:[#allocation16_spill] sm:$0xff] %v18003_v1  ;;  %v20719_v28 = vmax.f32 %v18003_v1, 0.0  ;;  %7603 = vmatpush1.bf16.msra.mxu1 %v15228_v62  ;;  %14847 = vmatprep.subr.bf16.mxu0 %v20959_v16 }
0x17b8   : > { %v6871_v41 = vpack.c.bf16 %v20720_v27, %v20721_v58  ;;  %14811 = vmatprep.subr.bf16.mxu1 %v20959_v16 }
0x17b9   : > { %v6872_v44 = vpack.c.bf16 %v20719_v28, %v20722_v34  ;;  %v6754_v23 = vpop.f32.mrb[252].mxu1 }
0x17ba   : > { %v6756_v14 = vpop.f32.mrb[253].mxu1  ;;  %v18037_v54 = vadd.f32 %v6754_v23, %v17561_v36 }
0x17bb   : > { %v18032_v50 = vadd.f32 %v6756_v14, %v17558_v3  ;;  %v6758_v0 = vpop.f32.mrb[254].mxu1  ;;  %13514 = vmatprep.mubr.msk.bf16.mxu0 %vm1976_vm6, %v6872_v44 }
0x17bc   : > { %20961 = vst [vmem:[#allocation18_spill] sm:$0xff] %v18037_v54  ;;  %v18040_v35 = vadd.f32 %v6758_v0, %v17561_v36  ;;  %v6760_v28 = vpop.f32.mrb[255].mxu1  ;;  %7238 = vmatmul.mubr.bf16.gmra.mrb[76].mxu0 %v6871_v41  ;;  %v20729_v44 = vmax.f32 %v18037_v54, 0.0 }
0x17bd   : > { %20960 = vst [vmem:[#allocation17_spill] sm:$0xff] %v18032_v50  ;;  %v18043_v62 = vadd.f32 %v6760_v28, %v17558_v3  ;;  %v20727_v14 = vmax.f32 %v18032_v50, 0.0 }
0x17be   : > { %20962 = vst [vmem:[#allocation19_spill] sm:$0xff] %v18040_v35  ;;  %v20728_v27 = vmax.f32 %v18040_v35, 0.0 }
0x17bf   : > { %20963 = vst [vmem:[#allocation20_spill] sm:$0xff] %v18043_v62  ;;  %v20726_v58 = vmax.f32 %v18043_v62, 0.0 }
0x17c0   : > { %v6873_v28 = vpack.c.bf16 %v20728_v27, %v20729_v44 }
0x17c1   : > { %v6874_v23 = vpack.c.bf16 %v20726_v58, %v20727_v14  ;;  %v6764_v0 = vpop.f32.mrb[0].mxu1 }
0x17c2   : > { %v6766_v41 = vpop.f32.mrb[1].mxu1  ;;  %v18062_v1 = vadd.f32 %v6764_v0, %v17561_v36 }
0x17c3   : > { %v18058_v34 = vadd.f32 %v6766_v41, %v17558_v3  ;;  %v6768_v55 = vpop.f32.mrb[2].mxu1  ;;  %13515 = vmatprep.mubr.msk.bf16.mxu0 %vm1976_vm6, %v6874_v23 }
0x17c4   : > { %20965 = vst [vmem:[#allocation22_spill] sm:$0xff] %v18062_v1  ;;  %v18065_v50 = vadd.f32 %v6768_v55, %v17561_v36  ;;  %v6770_v58 = vpop.f32.mrb[3].mxu1  ;;  %7248 = vmatmul.mubr.bf16.gmra.mrb[80].mxu0 %v6873_v28  ;;  %v20737_v35 = vmax.f32 %v18062_v1, 0.0  ;;  %v7838_v1 = vld [vmem:[%s20973_s0 + $0x8] sm:$0xff] }
0x17c5   : > { %20964 = vst [vmem:[#allocation21_spill] sm:$0xff] %v18058_v34  ;;  %v18068_v14 = vadd.f32 %v6770_v58, %v17558_v3  ;;  %v20735_v44 = vmax.f32 %v18058_v34, 0.0 }
0x17c6   : > { %20966 = vst [vmem:[#allocation23_spill] sm:$0xff] %v18065_v50  ;;  %v20736_v27 = vmax.f32 %v18065_v50, 0.0 }
0x17c7   : > { %20967 = vst [vmem:[#allocation24_spill] sm:$0xff] %v18068_v14  ;;  %v20734_v41 = vmax.f32 %v18068_v14, 0.0 }
0x17c8   : > { %v6875_v58 = vpack.c.bf16 %v20736_v27, %v20737_v35 }
0x17c9   : > { %v6876_v23 = vpack.c.bf16 %v20734_v41, %v20735_v44  ;;  %v6774_v55 = vpop.f32.mrb[4].mxu1 }
0x17ca   : > { %v6776_v0 = vpop.f32.mrb[5].mxu1  ;;  %v18087_v54 = vadd.f32 %v6774_v55, %v17561_v36 }
0x17cb   : > { %v18083_v28 = vadd.f32 %v6776_v0, %v17558_v3  ;;  %v6778_v62 = vpop.f32.mrb[6].mxu1  ;;  %13516 = vmatprep.mubr.msk.bf16.mxu0 %vm1976_vm6, %v6876_v23 }
0x17cc   : > { %20969 = vst [vmem:[#allocation26_spill] sm:$0xff] %v18087_v54  ;;  %v18090_v34 = vadd.f32 %v6778_v62, %v17561_v36  ;;  %v6780_v41 = vpop.f32.mrb[7].mxu1  ;;  %7258 = vmatmul.mubr.bf16.gmra.mrb[84].mxu0 %v6875_v58  ;;  %v20741_v50 = vmax.f32 %v18087_v54, 0.0 }
0x17cd   : > { %20968 = vst [vmem:[#allocation25_spill] sm:$0xff] %v18083_v28  ;;  %v18093_v44 = vadd.f32 %v6780_v41, %v17558_v3  ;;  %v20742_v35 = vmax.f32 %v18083_v28, 0.0  ;;  %v13477_v3 = vld [vmem:[%s20591_s19 + $0x2] sm:$0x3] }
0x17ce   : > { %20970 = vst [vmem:[#allocation27_spill] sm:$0xff] %v18090_v34  ;;  %v20740_v27 = vmax.f32 %v18090_v34, 0.0  ;;  %v18112_v62 = vrot.slane %v13477_v3, %v15856_v46  ;;  %v18115_v41 = vrot.slane %v13477_v3, %v20885_v13  ;;  %v7839_v13 = vld [vmem:[%s20973_s0 + $0x10] sm:$0xff]  ;;  %v7841_v46 = vld [vmem:[%s20973_s0 + $0x20] sm:$0xff] }
0x17cf   : > { %20971 = vst [vmem:[#allocation28_spill] sm:$0xff] %v18093_v44  ;;  %v20739_v0 = vmax.f32 %v18093_v44, 0.0 }
0x17d0   : > { %v6877_v36 = vpack.c.bf16 %v20740_v27, %v20741_v50  ;;  %v8527_v27 = vld [vmem:[%s20972_s24] sm:$0xff] }
0x17d1   : > { %v6878_v23 = vpack.c.bf16 %v20739_v0, %v20742_v35 }
0x17d3   : > { %13517 = vmatprep.mubr.msk.bf16.mxu0 %vm1976_vm6, %v6878_v23  ;;  %v8528_v23 = vld [vmem:[%s20972_s24 + $0x8] sm:$0xff] }
0x17d4   : > { %7268 = vmatmul.mubr.bf16.gmra.mrb[88].mxu0 %v6877_v36  ;;  %v14848_v54 = vpack.c.bf16 %v8528_v23, %v8527_v27 }
0x182f   : > { %v7119_v55 = vpop.f32.mrb[28].mxu0 }
0x1830   : > { %v7120_v58 = vadd.f32 %v7119_v55, %v18112_v62  ;;  %v7121_v0 = vpop.f32.mrb[29].mxu0  ;;  %v7837_v55 = vld [vmem:[%s20973_s0] sm:$0xff] }
0x1831   : > { %v7122_v36 = vadd.f32 %v7121_v0, %v18115_v41  ;;  %v7123_v50 = vpop.f32.mrb[30].mxu0  ;;  %v8529_v0 = vld [vmem:[%s20972_s24 + $0x10] sm:$0xff] }
0x1832   : > { %v7124_v35 = vadd.f32 %v7123_v50, %v18112_v62  ;;  %v7125_v34 = vpop.f32.mrb[31].mxu0  ;;  %v7278_v28 = vmax.f32 %v7120_v58, 0.0  ;;  %v8530_v50 = vld [vmem:[%s20972_s24 + $0x18] sm:$0xff] }
0x1833   : > { %v7279_v3 = vmax.f32 %v7122_v36, 0.0  ;;  %v7126_v44 = vadd.f32 %v7125_v34, %v18115_v41  ;;  %v14851_v23 = vpack.c.bf16 %v8530_v50, %v8529_v0 }
0x1834   : > { %v7280_v14 = vmax.f32 %v7124_v35, 0.0  ;;  %v14812_v35 = vpack.c.bf16 %v7838_v1, %v7837_v55  ;;  %v8531_v1 = vld [vmem:[%s20972_s24 + $0x20] sm:$0xff] }
0x1835   : > { %v7281_v34 = vmax.f32 %v7126_v44, 0.0  ;;  %13583 = vmatprep.mubr.msk.f32.mxu0 %vm1976_vm6, %v7279_v3  ;;  %v7840_v44 = vld [vmem:[%s20973_s0 + $0x18] sm:$0xff] }
0x1836   : > { %v7342_v36 = vpack.c.bf16 %v7280_v14, %v7278_v28  ;;  %8046 = vmatmul.mubr.f32.vlgmr.msra.gmra.mrb[92].mxu0 %v7278_v28 }
0x1837   : > { %v7343_v27 = vpack.c.bf16 %v7281_v34, %v7279_v3  ;;  %v7129_v58 = vpop.f32.mrb[32].mxu0  ;;  %13584 = vmatprep.mubr.msk.f32.mxu0 %vm1976_vm6, %v7281_v34  ;;  %14849 = vmatpush1.bf16.msra.mxu0 %v14848_v54  ;;  %v8532_v54 = vld [vmem:[%s20972_s24 + $0x28] sm:$0xff] }
0x1838   : > { %v7130_v6 = vadd.f32 %v7129_v58, %v18112_v62  ;;  %v7131_v53 = vpop.f32.mrb[33].mxu0  ;;  %14850 = vmatprep.subr.bf16.mxu0 %v20959_v16 }
0x1839   : > { %v7132_v28 = vadd.f32 %v7131_v53, %v18115_v41  ;;  %v7133_v3 = vpop.f32.mrb[34].mxu0  ;;  %13567 = vmatprep.mubr.msk.bf16.mxu1 %vm1976_vm6, %v7343_v27  ;;  %v14815_v53 = vpack.c.bf16 %v7840_v44, %v7839_v13  ;;  %v8533_v13 = vld [vmem:[%s20972_s24 + $0x30] sm:$0xff] }
0x183a   : > { %v7134_v55 = vadd.f32 %v7133_v3, %v18112_v62  ;;  %v7135_v0 = vpop.f32.mrb[35].mxu0  ;;  %7613 = vmatmul.mubr.bf16.vlgmr.msra.gmra.mrb[8].mxu1 %v7342_v36  ;;  %8051 = vmatmul.mubr.f32.gmra.mrb[94].mxu0 %v7280_v14  ;;  %v7282_v27 = vmax.f32 %v7130_v6, 0.0  ;;  %v7842_v3 = vld [vmem:[%s20973_s0 + $0x28] sm:$0xff]  ;;  %v14854_v14 = vpack.c.bf16 %v8532_v54, %v8531_v1  ;;  %v8534_v6 = vld [vmem:[%s20972_s24 + $0x38] sm:$0xff] }
0x183b   : > { %v7283_v50 = vmax.f32 %v7132_v28, 0.0  ;;  %v7136_v34 = vadd.f32 %v7135_v0, %v18115_v41  ;;  %14813 = vmatpush1.bf16.msra.mxu1 %v14812_v35  ;;  %14852 = vmatpush1.bf16.msra.mxu0 %v14851_v23  ;;  %v14818_v28 = vpack.c.bf16 %v7842_v3, %v7841_v46  ;;  %v7844_v0 = vld [vmem:[%s20973_s0 + $0x38] sm:$0xff] }
0x183c   : > { %v7284_v58 = vmax.f32 %v7134_v55, 0.0  ;;  %14814 = vmatprep.subr.bf16.mxu1 %v20959_v16  ;;  %14853 = vmatprep.subr.bf16.mxu0 %v20959_v16  ;;  %v7843_v55 = vld [vmem:[%s20973_s0 + $0x30] sm:$0xff] }
0x183d   : > { %v7285_v36 = vmax.f32 %v7136_v34, 0.0  ;;  %13585 = vmatprep.mubr.msk.f32.mxu0 %vm1976_vm6, %v7283_v50 }
0x183e   : > { %v7344_v35 = vpack.c.bf16 %v7284_v58, %v7282_v27  ;;  %8056 = vmatmul.mubr.f32.gmra.mrb[96].mxu0 %v7282_v27 }
0x183f   : > { %v7345_v23 = vpack.c.bf16 %v7285_v36, %v7283_v50  ;;  %v7139_v44 = vpop.f32.mrb[36].mxu0  ;;  %13586 = vmatprep.mubr.msk.f32.mxu0 %vm1976_vm6, %v7285_v36  ;;  %14816 = vmatpush1.bf16.msra.mxu1 %v14815_v53  ;;  %v14857_v50 = vpack.c.bf16 %v8534_v6, %v8533_v13  ;;  %v8536_v13 = vld [vmem:[%s20972_s24 + $0x48] sm:$0xff] }
0x1840   : > { %v7140_v1 = vadd.f32 %v7139_v44, %v18112_v62  ;;  %v7141_v54 = vpop.f32.mrb[37].mxu0  ;;  %14817 = vmatprep.subr.bf16.mxu1 %v20959_v16  ;;  %14855 = vmatpush1.bf16.msra.mxu0 %v14854_v14  ;;  %v14821_v44 = vpack.c.bf16 %v7844_v0, %v7843_v55  ;;  %v8535_v14 = vld [vmem:[%s20972_s24 + $0x40] sm:$0xff] }
0x1841   : > { %v7142_v34 = vadd.f32 %v7141_v54, %v18115_v41  ;;  %v7143_v27 = vpop.f32.mrb[38].mxu0  ;;  %13568 = vmatprep.mubr.msk.bf16.mxu1 %vm1976_vm6, %v7345_v23  ;;  %14856 = vmatprep.subr.bf16.mxu0 %v20959_v16 }
0x1842   : > { %v7144_v46 = vadd.f32 %v7143_v27, %v18112_v62  ;;  %v7145_v53 = vpop.f32.mrb[39].mxu0  ;;  %7623 = vmatmul.mubr.bf16.gmra.mrb[12].mxu1 %v7344_v35  ;;  %8061 = vmatmul.mubr.f32.gmra.mrb[98].mxu0 %v7284_v58  ;;  %v7286_v6 = vmax.f32 %v7140_v1, 0.0  ;;  %v7845_v58 = vld [vmem:[%s20973_s0 + $0x40] sm:$0xff]  ;;  %v7846_v35 = vld [vmem:[%s20973_s0 + $0x48] sm:$0xff] }
0x1843   : > { %v7287_v3 = vmax.f32 %v7142_v34, 0.0  ;;  %v7146_v36 = vadd.f32 %v7145_v53, %v18115_v41  ;;  %14819 = vmatpush1.bf16.msra.mxu1 %v14818_v28  ;;  %v14860_v28 = vpack.c.bf16 %v8536_v13, %v8535_v14  ;;  %v14824_v34 = vpack.c.bf16 %v7846_v35, %v7845_v58  ;;  %v7848_v53 = vld [vmem:[%s20973_s0 + $0x58] sm:$0xff] }
0x1844   : > { %v7288_v23 = vmax.f32 %v7144_v46, 0.0  ;;  %14820 = vmatprep.subr.bf16.mxu1 %v20959_v16  ;;  %14858 = vmatpush1.bf16.msra.mxu0 %v14857_v50  ;;  %v7847_v50 = vld [vmem:[%s20973_s0 + $0x50] sm:$0xff] }
0x1845   : > { %v7289_v54 = vmax.f32 %v7146_v36, 0.0  ;;  %13587 = vmatprep.mubr.msk.f32.mxu0 %vm1976_vm6, %v7287_v3  ;;  %14859 = vmatprep.subr.bf16.mxu0 %v20959_v16  ;;  %v14827_v58 = vpack.c.bf16 %v7848_v53, %v7847_v50  ;;  %v8538_v50 = vld [vmem:[%s20972_s24 + $0x58] sm:$0xff] }
0x1846   : > { %v7346_v55 = vpack.c.bf16 %v7288_v23, %v7286_v6  ;;  %8066 = vmatmul.mubr.f32.gmra.mrb[100].mxu0 %v7286_v6 }
0x1847   : > { %v7347_v1 = vpack.c.bf16 %v7289_v54, %v7287_v3  ;;  %v7149_v0 = vpop.f32.mrb[40].mxu0  ;;  %13588 = vmatprep.mubr.msk.f32.mxu0 %vm1976_vm6, %v7289_v54  ;;  %14822 = vmatpush1.bf16.msra.mxu1 %v14821_v44 }
0x1848   : > { %v7150_v27 = vadd.f32 %v7149_v0, %v18112_v62  ;;  %v7151_v46 = vpop.f32.mrb[41].mxu0  ;;  %14823 = vmatprep.subr.bf16.mxu1 %v20959_v16  ;;  %14861 = vmatpush1.bf16.msra.mxu0 %v14860_v28  ;;  %v7849_v28 = vld [vmem:[%s20973_s0 + $0x60] sm:$0xff] }
0x1849   : > { %v7152_v3 = vadd.f32 %v7151_v46, %v18115_v41  ;;  %v7153_v36 = vpop.f32.mrb[42].mxu0  ;;  %13569 = vmatprep.mubr.msk.bf16.mxu1 %vm1976_vm6, %v7347_v1  ;;  %14862 = vmatprep.subr.bf16.mxu0 %v20959_v16  ;;  %v7850_v1 = vld [vmem:[%s20973_s0 + $0x68] sm:$0xff]  ;;  %v8537_v46 = vld [vmem:[%s20972_s24 + $0x50] sm:$0xff] }
0x184a   : > { %v7154_v44 = vadd.f32 %v7153_v36, %v18112_v62  ;;  %v7155_v14 = vpop.f32.mrb[43].mxu0  ;;  %7633 = vmatmul.mubr.bf16.gmra.mrb[16].mxu1 %v7346_v55  ;;  %8071 = vmatmul.mubr.f32.gmra.mrb[102].mxu0 %v7288_v23  ;;  %v7290_v35 = vmax.f32 %v7150_v27, 0.0  ;;  %v14830_v27 = vpack.c.bf16 %v7850_v1, %v7849_v28  ;;  %v7851_v36 = vld [vmem:[%s20973_s0 + $0x70] sm:$0xff] }
0x184b   : > { %v7291_v13 = vmax.f32 %v7152_v3, 0.0  ;;  %v7156_v6 = vadd.f32 %v7155_v14, %v18115_v41  ;;  %14825 = vmatpush1.bf16.msra.mxu1 %v14824_v34  ;;  %v14863_v14 = vpack.c.bf16 %v8538_v50, %v8537_v46  ;;  %v7853_v46 = vld [vmem:[%s20973_s0 + $0x80] sm:$0xff] }
0x184c   : > { %v7292_v54 = vmax.f32 %v7154_v44, 0.0  ;;  %14826 = vmatprep.subr.bf16.mxu1 %v20959_v16  ;;  %v7852_v44 = vld [vmem:[%s20973_s0 + $0x78] sm:$0xff] }
0x184d   : > { %v7293_v0 = vmax.f32 %v7156_v6, 0.0  ;;  %13589 = vmatprep.mubr.msk.f32.mxu0 %vm1976_vm6, %v7291_v13  ;;  %14864 = vmatpush1.bf16.msra.mxu0 %v14863_v14 }
0x184e   : > { %v7348_v23 = vpack.c.bf16 %v7292_v54, %v7290_v35  ;;  %8076 = vmatmul.mubr.f32.gmra.mrb[104].mxu0 %v7290_v35  ;;  %14865 = vmatprep.subr.bf16.mxu0 %v20959_v16 }
0x184f   : > { %v7349_v55 = vpack.c.bf16 %v7293_v0, %v7291_v13  ;;  %v7159_v34 = vpop.f32.mrb[44].mxu0  ;;  %13590 = vmatprep.mubr.msk.f32.mxu0 %vm1976_vm6, %v7293_v0  ;;  %14828 = vmatpush1.bf16.msra.mxu1 %v14827_v58  ;;  %v14833_v0 = vpack.c.bf16 %v7852_v44, %v7851_v36  ;;  %v8540_v36 = vld [vmem:[%s20972_s24 + $0x68] sm:$0xff] }
0x1850   : > { %v7160_v53 = vadd.f32 %v7159_v34, %v18112_v62  ;;  %v7161_v3 = vpop.f32.mrb[45].mxu0  ;;  %14829 = vmatprep.subr.bf16.mxu1 %v20959_v16 }
0x1851   : > { %v7162_v13 = vadd.f32 %v7161_v3, %v18115_v41  ;;  %v7163_v6 = vpop.f32.mrb[46].mxu0  ;;  %13570 = vmatprep.mubr.msk.bf16.mxu1 %vm1976_vm6, %v7349_v55  ;;  %v7854_v55 = vld [vmem:[%s20973_s0 + $0x88] sm:$0xff]  ;;  %v8539_v3 = vld [vmem:[%s20972_s24 + $0x60] sm:$0xff] }
0x1852   : > { %v7164_v58 = vadd.f32 %v7163_v6, %v18112_v62  ;;  %v7165_v35 = vpop.f32.mrb[47].mxu0  ;;  %7643 = vmatmul.mubr.bf16.gmra.mrb[20].mxu1 %v7348_v23  ;;  %8081 = vmatmul.mubr.f32.gmra.mrb[106].mxu0 %v7292_v54  ;;  %v7294_v34 = vmax.f32 %v7160_v53, 0.0  ;;  %v14836_v53 = vpack.c.bf16 %v7854_v55, %v7853_v46  ;;  %v7856_v6 = vld [vmem:[%s20973_s0 + $0x98] sm:$0xff] }
0x1853   : > { %v7295_v28 = vmax.f32 %v7162_v13, 0.0  ;;  %v7166_v1 = vadd.f32 %v7165_v35, %v18115_v41  ;;  %14831 = vmatpush1.bf16.msra.mxu1 %v14830_v27  ;;  %v7855_v13 = vld [vmem:[%s20973_s0 + $0x90] sm:$0xff] }
0x1854   : > { %v7296_v60 = vmax.f32 %v7164_v58, 0.0  ;;  %14832 = vmatprep.subr.bf16.mxu1 %v20959_v16  ;;  %v14866_v58 = vpack.c.bf16 %v8540_v36, %v8539_v3  ;;  %v14839_v55 = vpack.c.bf16 %v7856_v6, %v7855_v13  ;;  %v7857_v3 = vld [vmem:[%s20973_s0 + $0xa0] sm:$0xff]  ;;  %v7859_v6 = vld [vmem:[%s20973_s0 + $0xb0] sm:$0xff] }
0x1855   : > { %v7297_v54 = vmax.f32 %v7166_v1, 0.0  ;;  %13591 = vmatprep.mubr.msk.f32.mxu0 %vm1976_vm6, %v7295_v28 }
0x1856   : > { %v7350_v23 = vpack.c.bf16 %v7296_v60, %v7294_v34  ;;  %8086 = vmatmul.mubr.f32.gmra.mrb[108].mxu0 %v7294_v34 }
0x1857   : > { %v7351_v27 = vpack.c.bf16 %v7297_v54, %v7295_v28  ;;  %v7169_v50 = vpop.f32.mrb[48].mxu0  ;;  %13592 = vmatprep.mubr.msk.f32.mxu0 %vm1976_vm6, %v7297_v54  ;;  %14834 = vmatpush1.bf16.msra.mxu1 %v14833_v0 }
0x1858   : > { %v7170_v44 = vadd.f32 %v7169_v50, %v18112_v62  ;;  %v7171_v14 = vpop.f32.mrb[49].mxu0  ;;  %14835 = vmatprep.subr.bf16.mxu1 %v20959_v16  ;;  %14867 = vmatpush1.bf16.msra.mxu0 %v14866_v58  ;;  %v7860_v58 = vld [vmem:[%s20973_s0 + $0xb8] sm:$0xff] }
0x1859   : > { %v7172_v35 = vadd.f32 %v7171_v14, %v18115_v41  ;;  %v7173_v28 = vpop.f32.mrb[50].mxu0  ;;  %13571 = vmatprep.mubr.msk.bf16.mxu1 %vm1976_vm6, %v7351_v27  ;;  %v7858_v27 = vld [vmem:[%s20973_s0 + $0xa8] sm:$0xff]  ;;  %14868 = vmatprep.subr.bf16.mxu0 %v20959_v16  ;;  %s14195_s0 = sshll.u32 %s21065_s25, 8 }
0x185a   : > { %v7174_v1 = vadd.f32 %v7173_v28, %v18112_v62  ;;  %v7175_v0 = vpop.f32.mrb[51].mxu0  ;;  %7653 = vmatmul.mubr.bf16.gmra.mrb[24].mxu1 %v7350_v23  ;;  %8091 = vmatmul.mubr.f32.gmra.mrb[110].mxu0 %v7296_v60  ;;  %v7298_v54 = vmax.f32 %v7170_v44, 0.0  ;;  %v14842_v44 = vpack.c.bf16 %v7858_v27, %v7857_v3  ;;  %v8542_v3 = vld [vmem:[%s20972_s24 + $0x78] sm:$0xff]  ;;  %s19837_s4 = scalar_lea.vmem %s21066_s3, %s14195_s0 }
0x185b   : > { %v7299_v34 = vmax.f32 %v7172_v35, 0.0  ;;  %v7176_v46 = vadd.f32 %v7175_v0, %v18115_v41  ;;  %14837 = vmatpush1.bf16.msra.mxu1 %v14836_v53 }
0x185c   : > { %v7300_v50 = vmax.f32 %v7174_v1, 0.0  ;;  %14838 = vmatprep.subr.bf16.mxu1 %v20959_v16 }
0x185d   : > { %v7301_v60 = vmax.f32 %v7176_v46, 0.0  ;;  %13593 = vmatprep.mubr.msk.f32.mxu0 %vm1976_vm6, %v7299_v34 }
0x185e   : > { %v7352_v23 = vpack.c.bf16 %v7300_v50, %v7298_v54  ;;  %8096 = vmatmul.mubr.f32.gmra.mrb[112].mxu0 %v7298_v54  ;;  %v8541_v54 = vld [vmem:[%s20972_s24 + $0x70] sm:$0xff] }
0x185f   : > { %v7353_v53 = vpack.c.bf16 %v7301_v60, %v7299_v34  ;;  %v7179_v36 = vpop.f32.mrb[52].mxu0  ;;  %13594 = vmatprep.mubr.msk.f32.mxu0 %vm1976_vm6, %v7301_v60  ;;  %14840 = vmatpush1.bf16.msra.mxu1 %v14839_v55  ;;  %v14845_v55 = vpack.c.bf16 %v7860_v58, %v7859_v6 }
0x1860   : > { %v7180_v14 = vadd.f32 %v7179_v36, %v18112_v62  ;;  %v7181_v13 = vpop.f32.mrb[53].mxu0  ;;  %14841 = vmatprep.subr.bf16.mxu1 %v20959_v16 }
0x1861   : > { %v7182_v35 = vadd.f32 %v7181_v13, %v18115_v41  ;;  %v7183_v28 = vpop.f32.mrb[54].mxu0  ;;  %13572 = vmatprep.mubr.msk.bf16.mxu1 %vm1976_vm6, %v7353_v53  ;;  %v14869_v53 = vpack.c.bf16 %v8542_v3, %v8541_v54 }
0x1862   : > { %v7184_v1 = vadd.f32 %v7183_v28, %v18112_v62  ;;  %v7185_v0 = vpop.f32.mrb[55].mxu0  ;;  %7663 = vmatmul.mubr.bf16.gmra.mrb[28].mxu1 %v7352_v23  ;;  %8101 = vmatmul.mubr.f32.gmra.mrb[114].mxu0 %v7300_v50  ;;  %v7302_v27 = vmax.f32 %v7180_v14, 0.0 }
0x1863   : > { %v7303_v34 = vmax.f32 %v7182_v35, 0.0  ;;  %v7186_v46 = vadd.f32 %v7185_v0, %v18115_v41  ;;  %14843 = vmatpush1.bf16.msra.mxu1 %v14842_v44  ;;  %14870 = vmatpush1.bf16.msra.mxu0 %v14869_v53  ;;  %v8543_v53 = vld [vmem:[%s20972_s24 + $0x80] sm:$0xff] }
0x1864   : > { %v7304_v60 = vmax.f32 %v7184_v1, 0.0  ;;  %14844 = vmatprep.subr.bf16.mxu1 %v20959_v16  ;;  %14871 = vmatprep.subr.bf16.mxu0 %v20959_v16 }
0x1865   : > { %v7305_v23 = vmax.f32 %v7186_v46, 0.0  ;;  %13595 = vmatprep.mubr.msk.f32.mxu0 %vm1976_vm6, %v7303_v34 }
0x1866   : > { %v7354_v50 = vpack.c.bf16 %v7304_v60, %v7302_v27  ;;  %8106 = vmatmul.mubr.f32.gmra.mrb[116].mxu0 %v7302_v27 }
0x1867   : > { %v7355_v36 = vpack.c.bf16 %v7305_v23, %v7303_v34  ;;  %v7189_v44 = vpop.f32.mrb[56].mxu0  ;;  %13596 = vmatprep.mubr.msk.f32.mxu0 %vm1976_vm6, %v7305_v23  ;;  %14846 = vmatpush1.bf16.msra.mxu1 %v14845_v55 }
0x1868   : > { %v7190_v13 = vadd.f32 %v7189_v44, %v18112_v62  ;;  %v7191_v6 = vpop.f32.mrb[57].mxu0 }
0x1869   : > { %v7192_v14 = vadd.f32 %v7191_v6, %v18115_v41  ;;  %v7193_v58 = vpop.f32.mrb[58].mxu0  ;;  %13573 = vmatprep.mubr.msk.bf16.mxu1 %vm1976_vm6, %v7355_v36 }
0x186a   : > { %v7194_v35 = vadd.f32 %v7193_v58, %v18112_v62  ;;  %v7195_v28 = vpop.f32.mrb[59].mxu0  ;;  %7673 = vmatmul.mubr.bf16.gmra.mrb[32].mxu1 %v7354_v50  ;;  %8111 = vmatmul.mubr.f32.gmra.mrb[118].mxu0 %v7304_v60  ;;  %v7306_v34 = vmax.f32 %v7190_v13, 0.0  ;;  %v8544_v60 = vld [vmem:[%s20972_s24 + $0x88] sm:$0xff] }
0x186b   : > { %v7307_v1 = vmax.f32 %v7192_v14, 0.0  ;;  %v7196_v0 = vadd.f32 %v7195_v28, %v18115_v41  ;;  %v14872_v36 = vpack.c.bf16 %v8544_v60, %v8543_v53 }
0x186c   : > { %v7308_v46 = vmax.f32 %v7194_v35, 0.0 }
0x186d   : > { %v7309_v55 = vmax.f32 %v7196_v0, 0.0  ;;  %13597 = vmatprep.mubr.msk.f32.mxu0 %vm1976_vm6, %v7307_v1  ;;  %14873 = vmatpush1.bf16.msra.mxu0 %v14872_v36 }
0x186e   : > { %v7356_v54 = vpack.c.bf16 %v7308_v46, %v7306_v34  ;;  %8116 = vmatmul.mubr.f32.gmra.mrb[120].mxu0 %v7306_v34  ;;  %14874 = vmatprep.subr.bf16.mxu0 %v20959_v16 }
0x186f   : > { %v7357_v3 = vpack.c.bf16 %v7309_v55, %v7307_v1  ;;  %v7199_v27 = vpop.f32.mrb[60].mxu0  ;;  %13598 = vmatprep.mubr.msk.f32.mxu0 %vm1976_vm6, %v7309_v55 }
0x1870   : > { %v7200_v23 = vadd.f32 %v7199_v27, %v18112_v62  ;;  %v7201_v50 = vpop.f32.mrb[61].mxu0 }
0x1871   : > { %v7202_v44 = vadd.f32 %v7201_v50, %v18115_v41  ;;  %v7203_v13 = vpop.f32.mrb[62].mxu0  ;;  %13574 = vmatprep.mubr.msk.bf16.mxu1 %vm1976_vm6, %v7357_v3 }
0x1872   : > { %v7204_v6 = vadd.f32 %v7203_v13, %v18112_v62  ;;  %v7205_v14 = vpop.f32.mrb[63].mxu0  ;;  %7683 = vmatmul.mubr.bf16.gmra.mrb[36].mxu1 %v7356_v54  ;;  %8121 = vmatmul.mubr.f32.gmra.mrb[122].mxu0 %v7308_v46  ;;  %v7310_v28 = vmax.f32 %v7200_v23, 0.0  ;;  %v8545_v46 = vld [vmem:[%s20972_s24 + $0x90] sm:$0xff]  ;;  %v8546_v54 = vld [vmem:[%s20972_s24 + $0x98] sm:$0xff] }
0x1873   : > { %v7311_v58 = vmax.f32 %v7202_v44, 0.0  ;;  %v7206_v35 = vadd.f32 %v7205_v14, %v18115_v41  ;;  %v14875_v60 = vpack.c.bf16 %v8546_v54, %v8545_v46 }
0x1874   : > { %v7312_v1 = vmax.f32 %v7204_v6, 0.0 }
0x1875   : > { %v7313_v0 = vmax.f32 %v7206_v35, 0.0  ;;  %13599 = vmatprep.mubr.msk.f32.mxu0 %vm1976_vm6, %v7311_v58  ;;  %14876 = vmatpush1.bf16.msra.mxu0 %v14875_v60 }
0x1876   : > { %v7358_v34 = vpack.c.bf16 %v7312_v1, %v7310_v28  ;;  %8126 = vmatmul.mubr.f32.gmra.mrb[124].mxu0 %v7310_v28  ;;  %14877 = vmatprep.subr.bf16.mxu0 %v20959_v16 }
0x1877   : > { %v7359_v55 = vpack.c.bf16 %v7313_v0, %v7311_v58  ;;  %v7209_v3 = vpop.f32.mrb[64].mxu0  ;;  %13600 = vmatprep.mubr.msk.f32.mxu0 %vm1976_vm6, %v7313_v0 }
0x1878   : > { %v7210_v27 = vadd.f32 %v7209_v3, %v18112_v62  ;;  %v7211_v53 = vpop.f32.mrb[65].mxu0 }
0x1879   : > { %v7212_v23 = vadd.f32 %v7211_v53, %v18115_v41  ;;  %v7213_v50 = vpop.f32.mrb[66].mxu0  ;;  %13575 = vmatprep.mubr.msk.bf16.mxu1 %vm1976_vm6, %v7359_v55 }
0x187a   : > { %v7214_v36 = vadd.f32 %v7213_v50, %v18112_v62  ;;  %v7215_v44 = vpop.f32.mrb[67].mxu0  ;;  %7693 = vmatmul.mubr.bf16.gmra.mrb[40].mxu1 %v7358_v34  ;;  %8131 = vmatmul.mubr.f32.gmra.mrb[126].mxu0 %v7312_v1  ;;  %v7314_v14 = vmax.f32 %v7210_v27, 0.0  ;;  %v8548_v50 = vld [vmem:[%s20972_s24 + $0xa8] sm:$0xff] }
0x187b   : > { %v7315_v13 = vmax.f32 %v7212_v23, 0.0  ;;  %v7216_v6 = vadd.f32 %v7215_v44, %v18115_v41  ;;  %v8547_v23 = vld [vmem:[%s20972_s24 + $0xa0] sm:$0xff] }
0x187c   : > { %v7316_v58 = vmax.f32 %v7214_v36, 0.0 }
0x187d   : > { %v7317_v35 = vmax.f32 %v7216_v6, 0.0  ;;  %13601 = vmatprep.mubr.msk.f32.mxu0 %vm1976_vm6, %v7315_v13 }
0x187e   : > { %v7360_v28 = vpack.c.bf16 %v7316_v58, %v7314_v14  ;;  %8136 = vmatmul.mubr.f32.gmra.mrb[128].mxu0 %v7314_v14 }
0x187f   : > { %v7361_v0 = vpack.c.bf16 %v7317_v35, %v7315_v13  ;;  %v7219_v55 = vpop.f32.mrb[68].mxu0  ;;  %13602 = vmatprep.mubr.msk.f32.mxu0 %vm1976_vm6, %v7317_v35  ;;  %v14878_v13 = vpack.c.bf16 %v8548_v50, %v8547_v23 }
0x1880   : > { %v7220_v34 = vadd.f32 %v7219_v55, %v18112_v62  ;;  %v7221_v1 = vpop.f32.mrb[69].mxu0 }
0x1881   : > { %v7222_v3 = vadd.f32 %v7221_v1, %v18115_v41  ;;  %v7223_v46 = vpop.f32.mrb[70].mxu0  ;;  %13576 = vmatprep.mubr.msk.bf16.mxu1 %vm1976_vm6, %v7361_v0  ;;  %14879 = vmatpush1.bf16.msra.mxu0 %v14878_v13 }
0x1882   : > { %v7224_v54 = vadd.f32 %v7223_v46, %v18112_v62  ;;  %v7225_v27 = vpop.f32.mrb[71].mxu0  ;;  %7703 = vmatmul.mubr.bf16.gmra.mrb[44].mxu1 %v7360_v28  ;;  %8141 = vmatmul.mubr.f32.gmra.mrb[130].mxu0 %v7316_v58  ;;  %v7318_v36 = vmax.f32 %v7220_v34, 0.0 }
0x1883   : > { %v7319_v53 = vmax.f32 %v7222_v3, 0.0  ;;  %v7226_v60 = vadd.f32 %v7225_v27, %v18115_v41  ;;  %14880 = vmatprep.subr.bf16.mxu0 %v20959_v16 }
0x1884   : > { %v7320_v44 = vmax.f32 %v7224_v54, 0.0 }
0x1885   : > { %v7321_v6 = vmax.f32 %v7226_v60, 0.0  ;;  %13603 = vmatprep.mubr.msk.f32.mxu0 %vm1976_vm6, %v7319_v53 }
0x1886   : > { %v7362_v14 = vpack.c.bf16 %v7320_v44, %v7318_v36  ;;  %8146 = vmatmul.mubr.f32.gmra.mrb[132].mxu0 %v7318_v36 }
0x1887   : > { %v7363_v58 = vpack.c.bf16 %v7321_v6, %v7319_v53  ;;  %v7229_v35 = vpop.f32.mrb[72].mxu0  ;;  %13604 = vmatprep.mubr.msk.f32.mxu0 %vm1976_vm6, %v7321_v6 }
0x1888   : > { %v7230_v28 = vadd.f32 %v7229_v35, %v18112_v62  ;;  %v7231_v0 = vpop.f32.mrb[73].mxu0  ;;  %v8549_v35 = vld [vmem:[%s20972_s24 + $0xb0] sm:$0xff] }
0x1889   : > { %v7232_v55 = vadd.f32 %v7231_v0, %v18115_v41  ;;  %v7233_v34 = vpop.f32.mrb[74].mxu0  ;;  %13577 = vmatprep.mubr.msk.bf16.mxu1 %vm1976_vm6, %v7363_v58 }
0x188a   : > { %v7234_v1 = vadd.f32 %v7233_v34, %v18112_v62  ;;  %v7235_v3 = vpop.f32.mrb[75].mxu0  ;;  %7713 = vmatmul.mubr.bf16.gmra.mrb[48].mxu1 %v7362_v14  ;;  %8151 = vmatmul.mubr.f32.gmra.mrb[134].mxu0 %v7320_v44  ;;  %v7322_v27 = vmax.f32 %v7230_v28, 0.0  ;;  %v8550_v28 = vld [vmem:[%s20972_s24 + $0xb8] sm:$0xff] }
0x188b   : > { %v7323_v46 = vmax.f32 %v7232_v55, 0.0  ;;  %v7236_v54 = vadd.f32 %v7235_v3, %v18115_v41  ;;  %v14881_v34 = vpack.c.bf16 %v8550_v28, %v8549_v35 }
0x188c   : > { %v7324_v53 = vmax.f32 %v7234_v1, 0.0 }
0x188d   : > { %v7325_v60 = vmax.f32 %v7236_v54, 0.0  ;;  %13605 = vmatprep.mubr.msk.f32.mxu0 %vm1976_vm6, %v7323_v46  ;;  %14882 = vmatpush1.bf16.msra.mxu0 %v14881_v34 }
0x188e   : > { %v7364_v23 = vpack.c.bf16 %v7324_v53, %v7322_v27  ;;  %8156 = vmatmul.mubr.f32.gmra.mrb[136].mxu0 %v7322_v27 }
0x188f   : > { %v7365_v16 = vpack.c.bf16 %v7325_v60, %v7323_v46  ;;  %v7239_v50 = vpop.f32.mrb[76].mxu0  ;;  %13606 = vmatprep.mubr.msk.f32.mxu0 %vm1976_vm6, %v7325_v60 }
0x1890   : > { %v7240_v36 = vadd.f32 %v7239_v50, %v18112_v62  ;;  %v7241_v13 = vpop.f32.mrb[77].mxu0 }
0x1891   : > { %v7242_v6 = vadd.f32 %v7241_v13, %v18115_v41  ;;  %v7243_v44 = vpop.f32.mrb[78].mxu0  ;;  %13578 = vmatprep.mubr.msk.bf16.mxu1 %vm1976_vm6, %v7365_v16 }
0x1892   : > { %v7244_v14 = vadd.f32 %v7243_v44, %v18112_v62  ;;  %v7245_v58 = vpop.f32.mrb[79].mxu0  ;;  %7723 = vmatmul.mubr.bf16.gmra.mrb[52].mxu1 %v7364_v23  ;;  %8161 = vmatmul.mubr.f32.gmra.mrb[138].mxu0 %v7324_v53  ;;  %v7326_v1 = vmax.f32 %v7240_v36, 0.0 }
0x1893   : > { %v7327_v0 = vmax.f32 %v7242_v6, 0.0  ;;  %v7246_v55 = vadd.f32 %v7245_v58, %v18115_v41 }
0x1894   : > { %v7328_v3 = vmax.f32 %v7244_v14, 0.0 }
0x1895   : > { %v7329_v46 = vmax.f32 %v7246_v55, 0.0  ;;  %13607 = vmatprep.mubr.msk.f32.mxu0 %vm1976_vm6, %v7327_v0 }
0x1896   : > { %v7366_v54 = vpack.c.bf16 %v7328_v3, %v7326_v1  ;;  %8166 = vmatmul.mubr.f32.gmra.mrb[140].mxu0 %v7326_v1 }
0x1897   : > { %v7367_v27 = vpack.c.bf16 %v7329_v46, %v7327_v0  ;;  %v7249_v53 = vpop.f32.mrb[80].mxu0  ;;  %13608 = vmatprep.mubr.msk.f32.mxu0 %vm1976_vm6, %v7329_v46 }
0x1898   : > { %v7250_v60 = vadd.f32 %v7249_v53, %v18112_v62  ;;  %v7251_v23 = vpop.f32.mrb[81].mxu0 }
0x1899   : > { %v7252_v16 = vadd.f32 %v7251_v23, %v18115_v41  ;;  %v7253_v50 = vpop.f32.mrb[82].mxu0  ;;  %13579 = vmatprep.mubr.msk.bf16.mxu1 %vm1976_vm6, %v7367_v27 }
0x189a   : > { %v7254_v36 = vadd.f32 %v7253_v50, %v18112_v62  ;;  %v7255_v13 = vpop.f32.mrb[83].mxu0  ;;  %7733 = vmatmul.mubr.bf16.gmra.mrb[56].mxu1 %v7366_v54  ;;  %8171 = vmatmul.mubr.f32.gmra.mrb[142].mxu0 %v7328_v3  ;;  %v7330_v14 = vmax.f32 %v7250_v60, 0.0 }
0x189b   : > { %v7331_v6 = vmax.f32 %v7252_v16, 0.0  ;;  %v7256_v44 = vadd.f32 %v7255_v13, %v18115_v41 }
0x189c   : > { %v7332_v58 = vmax.f32 %v7254_v36, 0.0 }
0x189d   : > { %v7333_v35 = vmax.f32 %v7256_v44, 0.0  ;;  %13609 = vmatprep.mubr.msk.f32.mxu0 %vm1976_vm6, %v7331_v6 }
0x189e   : > { %v7368_v28 = vpack.c.bf16 %v7332_v58, %v7330_v14  ;;  %8176 = vmatmul.mubr.f32.gmra.mrb[144].mxu0 %v7330_v14 }
0x189f   : > { %v7369_v0 = vpack.c.bf16 %v7333_v35, %v7331_v6  ;;  %v7259_v55 = vpop.f32.mrb[84].mxu0  ;;  %13610 = vmatprep.mubr.msk.f32.mxu0 %vm1976_vm6, %v7333_v35 }
0x18a0   : > { %v7260_v34 = vadd.f32 %v7259_v55, %v18112_v62  ;;  %v7261_v1 = vpop.f32.mrb[85].mxu0 }
0x18a1   : > { %v7262_v46 = vadd.f32 %v7261_v1, %v18115_v41  ;;  %v7263_v3 = vpop.f32.mrb[86].mxu0  ;;  %13580 = vmatprep.mubr.msk.bf16.mxu1 %vm1976_vm6, %v7369_v0 }
0x18a2   : > { %v7264_v54 = vadd.f32 %v7263_v3, %v18112_v62  ;;  %v7265_v27 = vpop.f32.mrb[87].mxu0  ;;  %7743 = vmatmul.mubr.bf16.gmra.mrb[60].mxu1 %v7368_v28  ;;  %8181 = vmatmul.mubr.f32.gmra.mrb[146].mxu0 %v7332_v58  ;;  %v7334_v23 = vmax.f32 %v7260_v34, 0.0 }
0x18a3   : > { %v7335_v53 = vmax.f32 %v7262_v46, 0.0  ;;  %v7266_v60 = vadd.f32 %v7265_v27, %v18115_v41 }
0x18a4   : > { %v7336_v16 = vmax.f32 %v7264_v54, 0.0 }
0x18a5   : > { %v7337_v50 = vmax.f32 %v7266_v60, 0.0  ;;  %13611 = vmatprep.mubr.msk.f32.mxu0 %vm1976_vm6, %v7335_v53  ;;  %v20977_v60 = vmax.f32 %v17570_v61, 0.0  ;;  %v20983_v61 = vmax.f32 %v17673_v31, 0.0  ;;  %v20989_v31 = vmax.f32 %v17727_v12, 0.0 }
0x18a6   : > { %v7370_v36 = vpack.c.bf16 %v7336_v16, %v7334_v23  ;;  %8186 = vmatmul.mubr.f32.gmra.mrb[148].mxu0 %v7334_v23  ;;  %v20978_v23 = vmax.f32 %v17615_v42, 0.0  ;;  %v20984_v42 = vmax.f32 %v17682_v18, 0.0  ;;  %v20990_v18 = vmax.f32 %v17768_v43, 0.0 }
0x18a7   : > { %v7371_v13 = vpack.c.bf16 %v7337_v50, %v7335_v53  ;;  %v7269_v6 = vpop.f32.mrb[88].mxu0  ;;  %13612 = vmatprep.mubr.msk.f32.mxu0 %vm1976_vm6, %v7337_v50  ;;  %v20976_v53 = vmax.f32 %v17579_v22, 0.0  ;;  %v20982_v22 = vmax.f32 %v17666_v19, 0.0  ;;  %v20988_v19 = vmax.f32 %v17733_v26, 0.0 }
0x18a8   : > { %v7270_v44 = vadd.f32 %v7269_v6, %v18112_v62  ;;  %v7271_v14 = vpop.f32.mrb[89].mxu0  ;;  %v20994_v26 = vmax.f32 %v17810_v29, 0.0  ;;  %v20995_v12 = vmax.f32 %v17814_v40, 0.0  ;;  %v20996_v43 = vmax.f32 %v17820_v37, 0.0  ;;  %v21018_v6 = vld [vmem:[#allocation9_spill] sm:$0xff] }
0x18a9   : > { %v7272_v35 = vadd.f32 %v7271_v14, %v18115_v41  ;;  %v7273_v58 = vpop.f32.mrb[90].mxu0  ;;  %13581 = vmatprep.mubr.msk.bf16.mxu1 %vm1976_vm6, %v7371_v13  ;;  %v21000_v29 = vmax.f32 %v17847_v33, 0.0  ;;  %v21001_v40 = vmax.f32 %v17844_v24, 0.0  ;;  %v21002_v37 = vmax.f32 %v17862_v7, 0.0 }
0x18aa   : > { %v7274_v28 = vadd.f32 %v7273_v58, %v18112_v62  ;;  %v7275_v0 = vpop.f32.mrb[91].mxu0  ;;  %7753 = vmatmul.mubr.bf16.gmra.mrb[64].mxu1 %v7370_v36  ;;  %8191 = vmatmul.mubr.f32.gmra.mrb[150].mxu0 %v7336_v16  ;;  %v7338_v1 = vmax.f32 %v7270_v44, 0.0  ;;  %v20974_v62 = vmax.f32 %v17564_v2, 0.0  ;;  %v20979_v16 = vmax.f32 %v17622_v59, 0.0 }
0x18ab   : > { %v7339_v55 = vmax.f32 %v7272_v35, 0.0  ;;  %v7276_v34 = vadd.f32 %v7275_v0, %v18115_v41  ;;  %v20975_v41 = vmax.f32 %v17567_v15, 0.0  ;;  %v20980_v2 = vmax.f32 %v17631_v11, 0.0 }
0x18ac   : > { %v7340_v46 = vmax.f32 %v7274_v28, 0.0  ;;  %v20981_v15 = vmax.f32 %v17625_v21, 0.0  ;;  %v20985_v59 = vmax.f32 %v17676_v51, 0.0  ;;  %v20986_v11 = vmax.f32 %v17717_v57, 0.0 }
0x18ad   : > { %v7341_v3 = vmax.f32 %v7276_v34, 0.0  ;;  %13613 = vmatprep.mubr.msk.f32.mxu0 %vm1976_vm6, %v7339_v55  ;;  %v20987_v21 = vmax.f32 %v17724_v5, 0.0  ;;  %v20991_v51 = vmax.f32 %v17775_v48, 0.0  ;;  %v20992_v57 = vmax.f32 %v17781_v20, 0.0 }
0x18ae   : > { %v7372_v54 = vpack.c.bf16 %v7340_v46, %v7338_v1  ;;  %8196 = vmatmul.mubr.f32.gmra.mrb[152].mxu0 %v7338_v1  ;;  %v20993_v5 = vmax.f32 %v17778_v52, 0.0  ;;  %v20997_v48 = vmax.f32 %v17817_v17, 0.0  ;;  %v20998_v20 = vmax.f32 %v17837_v49, 0.0 }
0x18af   : > { %v7373_v27 = vpack.c.bf16 %v7341_v3, %v7339_v55  ;;  %13614 = vmatprep.mubr.msk.f32.mxu0 %vm1976_vm6, %v7341_v3  ;;  %v20999_v52 = vmax.f32 %v17841_v47, 0.0  ;;  %v21003_v17 = vmax.f32 %v17866_v39, 0.0  ;;  %v21004_v49 = vmax.f32 %v17872_v63, 0.0  ;;  %v21021_v55 = vld [vmem:[#allocation4_spill] sm:$0xff]  ;;  %v21023_v3 = vld [vmem:[#allocation7_spill] sm:$0xff] }
0x18b0   : > { %v21005_v47 = vmax.f32 %v17869_v56, 0.0  ;;  %v21006_v33 = vmax.f32 %v17887_v10, 0.0  ;;  %v21007_v24 = vmax.f32 %v17891_v32, 0.0  ;;  %v21008_v7 = vmax.f32 %v17897_v9, 0.0 }
0x18b1   : > { %13582 = vmatprep.mubr.msk.bf16.mxu1 %vm1976_vm6, %v7373_v27  ;;  %v21009_v39 = vmax.f32 %v17894_v45, 0.0  ;;  %v21010_v63 = vmax.f32 %v17912_v38, 0.0  ;;  %v21011_v56 = vmax.f32 %v17916_v4, 0.0  ;;  %v21012_v10 = vmax.f32 %v17922_v8, 0.0  ;;  %v13542_v45 = vld [vmem:[%s20591_s19 + $0x4] sm:$0x3] }
0x18b2   : > { %7763 = vmatmul.mubr.bf16.gmra.mrb[68].mxu1 %v7372_v54  ;;  %8201 = vmatmul.mubr.f32.gmra.mrb[154].mxu0 %v7340_v46  ;;  %v21013_v32 = vmax.f32 %v17919_v25, 0.0  ;;  %v21014_v9 = vmax.f32 %v17937_v30, 0.0  ;;  %v21015_v4 = vld [vmem:[#allocation5_spill] sm:$0xff]  ;;  %v21017_v8 = vld [vmem:[#allocation10_spill] sm:$0xff]  ;;  %v21019_v25 = vmax.f32 %v21018_v6, 0.0  ;;  %v21020_v30 = vld [vmem:[#allocation11_spill] sm:$0xff] }
0x18b3   : > { %13615 = vmatprep.mubr.msk.f32.mxu1 %vm1976_vm6, %v20974_v62  ;;  %v21016_v36 = vmax.f32 %v21015_v4, 0.0  ;;  %v18506_v13 = vrot.slane %v13542_v45, %v21017_v8  ;;  %v18512_v44 = vrot.slane %v13542_v45, %v21020_v30  ;;  %v21022_v34 = vmax.f32 %v21021_v55, 0.0  ;;  %v21037_v45 = vld [vmem:[#allocation15_spill] sm:$0xff]  ;;  %v21039_v8 = vld [vmem:[#allocation17_spill] sm:$0xff] }
0x18b4   : > { %v21024_v54 = vmax.f32 %v21023_v3, 0.0  ;;  %v21040_v6 = vmax.f32 %v21039_v8, 0.0  ;;  %v21043_v3 = vld [vmem:[#allocation20_spill] sm:$0xff] }
0x18ba   : > { %8367 = vmatmul.mubr.f32.vlgmr.msra.gmra.mrb[72].mxu1 %v20975_v41 }
0x18bb   : > { %13616 = vmatprep.mubr.msk.f32.mxu1 %vm1976_vm6, %v20976_v53 }
0x18be   : > { %8372 = vmatmul.mubr.f32.gmra.mrb[74].mxu1 %v20977_v60 }
0x18bf   : > { %13617 = vmatprep.mubr.msk.f32.mxu1 %vm1976_vm6, %v20978_v23 }
0x18c2   : > { %8377 = vmatmul.mubr.f32.gmra.mrb[76].mxu1 %v20979_v16 }
0x18c3   : > { %13618 = vmatprep.mubr.msk.f32.mxu1 %vm1976_vm6, %v20980_v2  ;;  %v21025_v2 = vld [vmem:[#allocation8_spill] sm:$0xff] }
0x18c6   : > { %8382 = vmatmul.mubr.f32.gmra.mrb[78].mxu1 %v20981_v15  ;;  %v21026_v15 = vmax.f32 %v21025_v2, 0.0  ;;  %v21045_v2 = vld [vmem:[#allocation19_spill] sm:$0xff] }
0x18c7   : > { %13619 = vmatprep.mubr.msk.f32.mxu1 %vm1976_vm6, %v20982_v22 }
0x18ca   : > { %8387 = vmatmul.mubr.f32.gmra.mrb[80].mxu1 %v20983_v61  ;;  %v21027_v61 = vld [vmem:[#allocation12_spill] sm:$0xff] }
0x18cb   : > { %13620 = vmatprep.mubr.msk.f32.mxu1 %vm1976_vm6, %v20984_v42  ;;  %v21028_v42 = vmax.f32 %v21027_v61, 0.0 }
0x18ce   : > { %8392 = vmatmul.mubr.f32.gmra.mrb[82].mxu1 %v20985_v59 }
0x18cf   : > { %13621 = vmatprep.mubr.msk.f32.mxu1 %vm1976_vm6, %v20986_v11 }
0x18d2   : > { %8397 = vmatmul.mubr.f32.gmra.mrb[84].mxu1 %v20987_v21 }
0x18d3   : > { %13622 = vmatprep.mubr.msk.f32.mxu1 %vm1976_vm6, %v20988_v19 }
0x18d6   : > { %8402 = vmatmul.mubr.f32.gmra.mrb[86].mxu1 %v20989_v31 }
0x18d7   : > { %13623 = vmatprep.mubr.msk.f32.mxu1 %vm1976_vm6, %v20990_v18 }
0x18da   : > { %8407 = vmatmul.mubr.f32.gmra.mrb[88].mxu1 %v20991_v51  ;;  %v21029_v51 = vld [vmem:[#allocation6_spill] sm:$0xff] }
0x18db   : > { %13624 = vmatprep.mubr.msk.f32.mxu1 %vm1976_vm6, %v20992_v57  ;;  %v21030_v57 = vmax.f32 %v21029_v51, 0.0 }
0x18de   : > { %8412 = vmatmul.mubr.f32.gmra.mrb[90].mxu1 %v20993_v5 }
0x18df   : > { %13625 = vmatprep.mubr.msk.f32.mxu1 %vm1976_vm6, %v20994_v26 }
0x18e2   : > { %8417 = vmatmul.mubr.f32.gmra.mrb[92].mxu1 %v20995_v12  ;;  %v21031_v12 = vld [vmem:[#allocation13_spill] sm:$0xff] }
0x18e3   : > { %13626 = vmatprep.mubr.msk.f32.mxu1 %vm1976_vm6, %v20996_v43  ;;  %v21032_v43 = vmax.f32 %v21031_v12, 0.0 }
0x18e6   : > { %8422 = vmatmul.mubr.f32.gmra.mrb[94].mxu1 %v20997_v48 }
0x18e7   : > { %13627 = vmatprep.mubr.msk.f32.mxu1 %vm1976_vm6, %v20998_v20 }
0x18ea   : > { %8427 = vmatmul.mubr.f32.gmra.mrb[96].mxu1 %v20999_v52 }
0x18eb   : > { %13628 = vmatprep.mubr.msk.f32.mxu1 %vm1976_vm6, %v21000_v29 }
0x18ee   : > { %8432 = vmatmul.mubr.f32.gmra.mrb[98].mxu1 %v21001_v40 }
0x18ef   : > { %13629 = vmatprep.mubr.msk.f32.mxu1 %vm1976_vm6, %v21002_v37 }
0x18f2   : > { %8437 = vmatmul.mubr.f32.gmra.mrb[100].mxu1 %v21003_v17 }
0x18f3   : > { %13630 = vmatprep.mubr.msk.f32.mxu1 %vm1976_vm6, %v21004_v49  ;;  %v21033_v49 = vld [vmem:[#allocation14_spill] sm:$0xff] }
0x18f6   : > { %8442 = vmatmul.mubr.f32.gmra.mrb[102].mxu1 %v21005_v47  ;;  %v21034_v47 = vmax.f32 %v21033_v49, 0.0 }
0x18f7   : > { %13631 = vmatprep.mubr.msk.f32.mxu1 %vm1976_vm6, %v21006_v33 }
0x18fa   : > { %8447 = vmatmul.mubr.f32.gmra.mrb[104].mxu1 %v21007_v24  ;;  %v21035_v24 = vld [vmem:[#allocation16_spill] sm:$0xff] }
0x18fb   : > { %13632 = vmatprep.mubr.msk.f32.mxu1 %vm1976_vm6, %v21008_v7  ;;  %v21036_v7 = vmax.f32 %v21035_v24, 0.0 }
0x18fe   : > { %8452 = vmatmul.mubr.f32.gmra.mrb[106].mxu1 %v21009_v39 }
0x18ff   : > { %13633 = vmatprep.mubr.msk.f32.mxu1 %vm1976_vm6, %v21010_v63 }
0x1902   : > { %8457 = vmatmul.mubr.f32.gmra.mrb[108].mxu1 %v21011_v56 }
0x1903   : > { %13634 = vmatprep.mubr.msk.f32.mxu1 %vm1976_vm6, %v21012_v10 }
0x1906   : > { %8462 = vmatmul.mubr.f32.gmra.mrb[110].mxu1 %v21013_v32 }
0x1907   : > { %13635 = vmatprep.mubr.msk.f32.mxu1 %vm1976_vm6, %v21014_v9 }
0x1909   : > { %v18501_v38 = vpop.f32.mrb[92].mxu0 }
0x190a   : > { %v8049_v50 = vpop.f32.mrb[93].mxu0  ;;  %8467 = vmatmul.mubr.f32.gmra.mrb[112].mxu1 %v21016_v36 }
0x190b   : > { %13636 = vmatprep.mubr.msk.f32.mxu1 %vm1976_vm6, %v21019_v25  ;;  %v21038_v50 = vmax.f32 %v21037_v45, 0.0 }
0x190d   : > { %v7614_v14 = vpop.f32.mrb[8].mxu1  ;;  %v18514_v35 = vpop.f32.mrb[94].mxu0 }
0x190e   : > { %v7615_v58 = vadd.f32 %v7614_v14, %v18506_v13  ;;  %v7616_v28 = vpop.f32.mrb[9].mxu1  ;;  %v8054_v0 = vpop.f32.mrb[95].mxu0  ;;  %8472 = vmatmul.mubr.f32.gmra.mrb[114].mxu1 %v21022_v34  ;;  %v21041_v34 = vld [vmem:[#allocation18_spill] sm:$0xff] }
0x190f   : > { %v7617_v1 = vadd.f32 %v7616_v28, %v18512_v44  ;;  %v7618_v46 = vpop.f32.mrb[10].mxu1  ;;  %13637 = vmatprep.mubr.msk.f32.mxu1 %vm1976_vm6, %v21024_v54  ;;  %v21044_v54 = vmax.f32 %v21043_v3, 0.0 }
0x1910   : > { %v7620_v27 = vpop.f32.mrb[11].mxu1  ;;  %v7773_v60 = vmax.f32 %v7615_v58, 0.0  ;;  %v7619_v23 = vadd.f32 %v7618_v46, %v18506_v13 }
0x1911   : > { %v7774_v62 = vmax.f32 %v7617_v1, 0.0  ;;  %v7621_v41 = vadd.f32 %v7620_v27, %v18512_v44  ;;  %v18524_v53 = vpop.f32.mrb[96].mxu0  ;;  %v21042_v1 = vmax.f32 %v21041_v34, 0.0 }
0x1912   : > { %v8059_v16 = vpop.f32.mrb[97].mxu0  ;;  %8477 = vmatmul.mubr.f32.gmra.mrb[116].mxu1 %v21026_v15  ;;  %v7775_v21 = vmax.f32 %v7619_v23, 0.0  ;;  %v21046_v15 = vmax.f32 %v21045_v2, 0.0 }
0x1913   : > { %v7776_v22 = vmax.f32 %v7621_v41, 0.0  ;;  %13638 = vmatprep.mubr.msk.f32.mxu1 %vm1976_vm6, %v21028_v42  ;;  %13647 = vmatprep.mubr.msk.f32.mxu0 %vm1976_vm6, %v7774_v62  ;;  %v21047_v42 = vld [vmem:[#allocation21_spill] sm:$0xff] }
0x1914   : > { %8712 = vmatmul.mubr.f32.vlgmr.msra.gmra.mrb[156].mxu0 %v7773_v60 }
0x1915   : > { %v7624_v59 = vpop.f32.mrb[12].mxu1  ;;  %v18533_v11 = vpop.f32.mrb[98].mxu0  ;;  %13648 = vmatprep.mubr.msk.f32.mxu0 %vm1976_vm6, %v7776_v22 }
0x1916   : > { %v7625_v19 = vadd.f32 %v7624_v59, %v18506_v13  ;;  %v7626_v31 = vpop.f32.mrb[13].mxu1  ;;  %v8064_v18 = vpop.f32.mrb[99].mxu0  ;;  %8482 = vmatmul.mubr.f32.gmra.mrb[118].mxu1 %v21030_v57  ;;  %v21048_v59 = vmax.f32 %v21047_v42, 0.0 }
0x1917   : > { %v7627_v5 = vadd.f32 %v7626_v31, %v18512_v44  ;;  %v7628_v26 = vpop.f32.mrb[14].mxu1  ;;  %13639 = vmatprep.mubr.msk.f32.mxu1 %vm1976_vm6, %v21032_v43 }
0x1918   : > { %v7630_v48 = vpop.f32.mrb[15].mxu1  ;;  %8717 = vmatmul.mubr.f32.gmra.mrb[158].mxu0 %v7775_v21  ;;  %v7777_v40 = vmax.f32 %v7625_v19, 0.0  ;;  %v7629_v37 = vadd.f32 %v7628_v26, %v18506_v13  ;;  %v21049_v26 = vld [vmem:[#allocation22_spill] sm:$0xff] }
0x1919   : > { %v7778_v20 = vmax.f32 %v7627_v5, 0.0  ;;  %v7631_v52 = vadd.f32 %v7630_v48, %v18512_v44  ;;  %v18544_v29 = vpop.f32.mrb[100].mxu0  ;;  %v21050_v12 = vmax.f32 %v21049_v26, 0.0  ;;  %v21051_v48 = vld [vmem:[#allocation24_spill] sm:$0xff] }
0x191a   : > { %v8069_v17 = vpop.f32.mrb[101].mxu0  ;;  %8487 = vmatmul.mubr.f32.gmra.mrb[120].mxu1 %v21034_v47  ;;  %v7779_v56 = vmax.f32 %v7629_v37, 0.0 }
0x191b   : > { %v7780_v33 = vmax.f32 %v7631_v52, 0.0  ;;  %13640 = vmatprep.mubr.msk.f32.mxu1 %vm1976_vm6, %v21036_v7  ;;  %13649 = vmatprep.mubr.msk.f32.mxu0 %vm1976_vm6, %v7778_v20  ;;  %v21052_v20 = vmax.f32 %v21051_v48, 0.0 }
0x191c   : > { %8722 = vmatmul.mubr.f32.gmra.mrb[160].mxu0 %v7777_v40 }
0x191d   : > { %v7634_v39 = vpop.f32.mrb[16].mxu1  ;;  %v18553_v63 = vpop.f32.mrb[102].mxu0  ;;  %13650 = vmatprep.mubr.msk.f32.mxu0 %vm1976_vm6, %v7780_v33  ;;  %v21053_v33 = vld [vmem:[#allocation23_spill] sm:$0xff] }
0x191e   : > { %v7635_v10 = vadd.f32 %v7634_v39, %v18506_v13  ;;  %v7636_v32 = vpop.f32.mrb[17].mxu1  ;;  %v8074_v9 = vpop.f32.mrb[103].mxu0  ;;  %8492 = vmatmul.mubr.f32.gmra.mrb[122].mxu1 %v21038_v50  ;;  %v21054_v24 = vmax.f32 %v21053_v33, 0.0 }
0x191f   : > { %v7637_v4 = vadd.f32 %v7636_v32, %v18512_v44  ;;  %v7638_v36 = vpop.f32.mrb[18].mxu1  ;;  %13641 = vmatprep.mubr.msk.f32.mxu1 %vm1976_vm6, %v21040_v6  ;;  %v21057_v6 = vld [vmem:[#allocation26_spill] sm:$0xff] }
0x1920   : > { %v7640_v25 = vpop.f32.mrb[19].mxu1  ;;  %8727 = vmatmul.mubr.f32.gmra.mrb[162].mxu0 %v7779_v56  ;;  %v7781_v28 = vmax.f32 %v7635_v10, 0.0  ;;  %v7639_v0 = vadd.f32 %v7638_v36, %v18506_v13  ;;  %v21055_v56 = vld [vmem:[#allocation25_spill] sm:$0xff] }
0x1921   : > { %v7782_v30 = vmax.f32 %v7637_v4, 0.0  ;;  %v7641_v14 = vadd.f32 %v7640_v25, %v18512_v44  ;;  %v18564_v58 = vpop.f32.mrb[104].mxu0  ;;  %v21056_v10 = vmax.f32 %v21055_v56, 0.0  ;;  %v21058_v25 = vmax.f32 %v21057_v6, 0.0 }
0x1922   : > { %v8079_v55 = vpop.f32.mrb[105].mxu0  ;;  %8497 = vmatmul.mubr.f32.gmra.mrb[124].mxu1 %v21042_v1  ;;  %v7783_v41 = vmax.f32 %v7639_v0, 0.0 }
0x1923   : > { %v7784_v46 = vmax.f32 %v7641_v14, 0.0  ;;  %13642 = vmatprep.mubr.msk.f32.mxu1 %vm1976_vm6, %v21044_v54  ;;  %13651 = vmatprep.mubr.msk.f32.mxu0 %vm1976_vm6, %v7782_v30  ;;  %v21059_v14 = vld [vmem:[#allocation28_spill] sm:$0xff]  ;;  %v21061_v54 = vld [vmem:[#allocation27_spill] sm:$0xff] }
0x1924   : > { %8732 = vmatmul.mubr.f32.gmra.mrb[164].mxu0 %v7781_v28  ;;  %v21060_v28 = vmax.f32 %v21059_v14, 0.0 }
0x1925   : > { %v7644_v27 = vpop.f32.mrb[20].mxu1  ;;  %v18573_v62 = vpop.f32.mrb[106].mxu0  ;;  %13652 = vmatprep.mubr.msk.f32.mxu0 %vm1976_vm6, %v7784_v46 }
0x1926   : > { %v7645_v60 = vadd.f32 %v7644_v27, %v18506_v13  ;;  %v7646_v23 = vpop.f32.mrb[21].mxu1  ;;  %v8084_v16 = vpop.f32.mrb[107].mxu0  ;;  %8502 = vmatmul.mubr.f32.gmra.mrb[126].mxu1 %v21046_v15  ;;  %v21062_v27 = vmax.f32 %v21061_v54, 0.0 }
0x1927   : > { %v7647_v22 = vadd.f32 %v7646_v23, %v18512_v44  ;;  %v7648_v61 = vpop.f32.mrb[22].mxu1  ;;  %13643 = vmatprep.mubr.msk.f32.mxu1 %vm1976_vm6, %v21048_v59 }
0x1928   : > { %v7650_v21 = vpop.f32.mrb[23].mxu1  ;;  %8737 = vmatmul.mubr.f32.gmra.mrb[166].mxu0 %v7783_v41  ;;  %v7785_v51 = vmax.f32 %v7645_v60, 0.0  ;;  %v7649_v57 = vadd.f32 %v7648_v61, %v18506_v13 }
0x1929   : > { %v7786_v19 = vmax.f32 %v7647_v22, 0.0  ;;  %v7651_v31 = vadd.f32 %v7650_v21, %v18512_v44  ;;  %v18584_v18 = vpop.f32.mrb[108].mxu0 }
0x192a   : > { %v8089_v5 = vpop.f32.mrb[109].mxu0  ;;  %8507 = vmatmul.mubr.f32.gmra.mrb[128].mxu1 %v21050_v12  ;;  %v7787_v37 = vmax.f32 %v7649_v57, 0.0 }
0x192b   : > { %v7788_v43 = vmax.f32 %v7651_v31, 0.0  ;;  %13644 = vmatprep.mubr.msk.f32.mxu1 %vm1976_vm6, %v21052_v20  ;;  %13653 = vmatprep.mubr.msk.f32.mxu0 %vm1976_vm6, %v7786_v19 }
0x192c   : > { %8742 = vmatmul.mubr.f32.gmra.mrb[168].mxu0 %v7785_v51 }
0x192d   : > { %v7654_v52 = vpop.f32.mrb[24].mxu1  ;;  %v18593_v40 = vpop.f32.mrb[110].mxu0  ;;  %13654 = vmatprep.mubr.msk.f32.mxu0 %vm1976_vm6, %v7788_v43 }
0x192e   : > { %v7655_v17 = vadd.f32 %v7654_v52, %v18506_v13  ;;  %v7656_v49 = vpop.f32.mrb[25].mxu1  ;;  %v8094_v47 = vpop.f32.mrb[111].mxu0  ;;  %8512 = vmatmul.mubr.f32.gmra.mrb[130].mxu1 %v21054_v24 }
0x192f   : > { %v7657_v7 = vadd.f32 %v7656_v49, %v18512_v44  ;;  %v7658_v39 = vpop.f32.mrb[26].mxu1  ;;  %13645 = vmatprep.mubr.msk.f32.mxu1 %vm1976_vm6, %v21056_v10 }
0x1930   : > { %v7660_v32 = vpop.f32.mrb[27].mxu1  ;;  %8747 = vmatmul.mubr.f32.gmra.mrb[170].mxu0 %v7787_v37  ;;  %v7789_v4 = vmax.f32 %v7655_v17, 0.0  ;;  %v7659_v36 = vadd.f32 %v7658_v39, %v18506_v13 }
0x1931   : > { %v7790_v9 = vmax.f32 %v7657_v7, 0.0  ;;  %v7661_v45 = vadd.f32 %v7660_v32, %v18512_v44  ;;  %v18604_v50 = vpop.f32.mrb[112].mxu0 }
0x1932   : > { %v8099_v8 = vpop.f32.mrb[113].mxu0  ;;  %8517 = vmatmul.mubr.f32.gmra.mrb[132].mxu1 %v21058_v25  ;;  %v7791_v34 = vmax.f32 %v7659_v36, 0.0 }
0x1933   : > { %v7792_v30 = vmax.f32 %v7661_v45, 0.0  ;;  %13646 = vmatprep.mubr.msk.f32.mxu1 %vm1976_vm6, %v21060_v28  ;;  %13655 = vmatprep.mubr.msk.f32.mxu0 %vm1976_vm6, %v7790_v9 }
0x1934   : > { %8752 = vmatmul.mubr.f32.gmra.mrb[172].mxu0 %v7789_v4 }
0x1935   : > { %v7664_v0 = vpop.f32.mrb[28].mxu1  ;;  %v18613_v55 = vpop.f32.mrb[114].mxu0  ;;  %13656 = vmatprep.mubr.msk.f32.mxu0 %vm1976_vm6, %v7792_v30 }
0x1936   : > { %v7665_v1 = vadd.f32 %v7664_v0, %v18506_v13  ;;  %v7666_v46 = vpop.f32.mrb[29].mxu1  ;;  %v8104_v3 = vpop.f32.mrb[115].mxu0  ;;  %8522 = vmatmul.mubr.f32.gmra.mrb[134].mxu1 %v21062_v27 }
0x1937   : > { %v7667_v41 = vadd.f32 %v7666_v46, %v18512_v44  ;;  %v7668_v60 = vpop.f32.mrb[30].mxu1 }
0x1938   : > { %v7670_v23 = vpop.f32.mrb[31].mxu1  ;;  %8757 = vmatmul.mubr.f32.gmra.mrb[174].mxu0 %v7791_v34  ;;  %v7793_v22 = vmax.f32 %v7665_v1, 0.0  ;;  %v7669_v61 = vadd.f32 %v7668_v60, %v18506_v13 }
0x1939   : > { %v7794_v16 = vmax.f32 %v7667_v41, 0.0  ;;  %v7671_v2 = vadd.f32 %v7670_v23, %v18512_v44  ;;  %v18621_v15 = vpop.f32.mrb[116].mxu0 }
0x193a   : > { %v8109_v42 = vpop.f32.mrb[117].mxu0  ;;  %v7795_v31 = vmax.f32 %v7669_v61, 0.0 }
0x193b   : > { %v7796_v59 = vmax.f32 %v7671_v2, 0.0  ;;  %13657 = vmatprep.mubr.msk.f32.mxu0 %vm1976_vm6, %v7794_v16 }
0x193c   : > { %8762 = vmatmul.mubr.f32.gmra.mrb[176].mxu0 %v7793_v22 }
0x193d   : > { %v7674_v21 = vpop.f32.mrb[32].mxu1  ;;  %v18625_v19 = vpop.f32.mrb[118].mxu0  ;;  %13658 = vmatprep.mubr.msk.f32.mxu0 %vm1976_vm6, %v7796_v59 }
0x193e   : > { %v7675_v51 = vadd.f32 %v7674_v21, %v18506_v13  ;;  %v7676_v57 = vpop.f32.mrb[33].mxu1  ;;  %v8114_v5 = vpop.f32.mrb[119].mxu0 }
0x193f   : > { %v7677_v26 = vadd.f32 %v7676_v57, %v18512_v44  ;;  %v7678_v12 = vpop.f32.mrb[34].mxu1 }
0x1940   : > { %v7680_v43 = vpop.f32.mrb[35].mxu1  ;;  %8767 = vmatmul.mubr.f32.gmra.mrb[178].mxu0 %v7795_v31  ;;  %v7797_v37 = vmax.f32 %v7675_v51, 0.0  ;;  %v7679_v17 = vadd.f32 %v7678_v12, %v18506_v13 }
0x1941   : > { %v7798_v48 = vmax.f32 %v7677_v26, 0.0  ;;  %v7681_v20 = vadd.f32 %v7680_v43, %v18512_v44  ;;  %v18631_v52 = vpop.f32.mrb[120].mxu0 }
0x1942   : > { %v8119_v49 = vpop.f32.mrb[121].mxu0  ;;  %v7799_v7 = vmax.f32 %v7679_v17, 0.0 }
0x1943   : > { %v7800_v47 = vmax.f32 %v7681_v20, 0.0  ;;  %13659 = vmatprep.mubr.msk.f32.mxu0 %vm1976_vm6, %v7798_v48 }
0x1944   : > { %8772 = vmatmul.mubr.f32.gmra.mrb[180].mxu0 %v7797_v37 }
0x1945   : > { %v7684_v33 = vpop.f32.mrb[36].mxu1  ;;  %v18635_v24 = vpop.f32.mrb[122].mxu0  ;;  %13660 = vmatprep.mubr.msk.f32.mxu0 %vm1976_vm6, %v7800_v47 }
0x1946   : > { %v7685_v39 = vadd.f32 %v7684_v33, %v18506_v13  ;;  %v7686_v56 = vpop.f32.mrb[37].mxu1  ;;  %v8124_v10 = vpop.f32.mrb[123].mxu0 }
0x1947   : > { %v7687_v32 = vadd.f32 %v7686_v56, %v18512_v44  ;;  %v7688_v9 = vpop.f32.mrb[38].mxu1 }
0x1948   : > { %v7690_v45 = vpop.f32.mrb[39].mxu1  ;;  %8777 = vmatmul.mubr.f32.gmra.mrb[182].mxu0 %v7799_v7  ;;  %v7801_v6 = vmax.f32 %v7685_v39, 0.0  ;;  %v7689_v25 = vadd.f32 %v7688_v9, %v18506_v13 }
0x1949   : > { %v7802_v4 = vmax.f32 %v7687_v32, 0.0  ;;  %v7691_v36 = vadd.f32 %v7690_v45, %v18512_v44  ;;  %v18641_v8 = vpop.f32.mrb[124].mxu0 }
0x194a   : > { %v8129_v30 = vpop.f32.mrb[125].mxu0  ;;  %v7803_v34 = vmax.f32 %v7689_v25, 0.0 }
0x194b   : > { %v7804_v14 = vmax.f32 %v7691_v36, 0.0  ;;  %13661 = vmatprep.mubr.msk.f32.mxu0 %vm1976_vm6, %v7802_v4 }
0x194c   : > { %8782 = vmatmul.mubr.f32.gmra.mrb[184].mxu0 %v7801_v6 }
0x194d   : > { %v7694_v28 = vpop.f32.mrb[40].mxu1  ;;  %v18645_v0 = vpop.f32.mrb[126].mxu0  ;;  %13662 = vmatprep.mubr.msk.f32.mxu0 %vm1976_vm6, %v7804_v14 }
0x194e   : > { %v7695_v1 = vadd.f32 %v7694_v28, %v18506_v13  ;;  %v7696_v46 = vpop.f32.mrb[41].mxu1  ;;  %v8134_v3 = vpop.f32.mrb[127].mxu0 }
0x194f   : > { %v7697_v54 = vadd.f32 %v7696_v46, %v18512_v44  ;;  %v7698_v27 = vpop.f32.mrb[42].mxu1 }
0x1950   : > { %v7700_v41 = vpop.f32.mrb[43].mxu1  ;;  %8787 = vmatmul.mubr.f32.gmra.mrb[186].mxu0 %v7803_v34  ;;  %v7805_v2 = vmax.f32 %v7695_v1, 0.0  ;;  %v7699_v22 = vadd.f32 %v7698_v27, %v18506_v13 }
0x1951   : > { %v7806_v60 = vmax.f32 %v7697_v54, 0.0  ;;  %v7701_v23 = vadd.f32 %v7700_v41, %v18512_v44  ;;  %v18651_v16 = vpop.f32.mrb[128].mxu0 }
0x1952   : > { %v8139_v61 = vpop.f32.mrb[129].mxu0  ;;  %v7807_v31 = vmax.f32 %v7699_v22, 0.0 }
0x1953   : > { %v7808_v42 = vmax.f32 %v7701_v23, 0.0  ;;  %13663 = vmatprep.mubr.msk.f32.mxu0 %vm1976_vm6, %v7806_v60 }
0x1954   : > { %8792 = vmatmul.mubr.f32.gmra.mrb[188].mxu0 %v7805_v2 }
0x1955   : > { %v7704_v59 = vpop.f32.mrb[44].mxu1  ;;  %v18655_v21 = vpop.f32.mrb[130].mxu0  ;;  %13664 = vmatprep.mubr.msk.f32.mxu0 %vm1976_vm6, %v7808_v42 }
0x1956   : > { %v7705_v51 = vadd.f32 %v7704_v59, %v18506_v13  ;;  %v7706_v57 = vpop.f32.mrb[45].mxu1  ;;  %v8144_v5 = vpop.f32.mrb[131].mxu0 }
0x1957   : > { %v7707_v26 = vadd.f32 %v7706_v57, %v18512_v44  ;;  %v7708_v12 = vpop.f32.mrb[46].mxu1 }
0x1958   : > { %v7710_v43 = vpop.f32.mrb[47].mxu1  ;;  %8797 = vmatmul.mubr.f32.gmra.mrb[190].mxu0 %v7807_v31  ;;  %v7809_v17 = vmax.f32 %v7705_v51, 0.0  ;;  %v7709_v49 = vadd.f32 %v7708_v12, %v18506_v13 }
0x1959   : > { %v7810_v48 = vmax.f32 %v7707_v26, 0.0  ;;  %v7711_v20 = vadd.f32 %v7710_v43, %v18512_v44  ;;  %v18661_v37 = vpop.f32.mrb[132].mxu0 }
0x195a   : > { %v8149_v47 = vpop.f32.mrb[133].mxu0  ;;  %v7811_v56 = vmax.f32 %v7709_v49, 0.0 }
0x195b   : > { %v7812_v33 = vmax.f32 %v7711_v20, 0.0  ;;  %13665 = vmatprep.mubr.msk.f32.mxu0 %vm1976_vm6, %v7810_v48 }
0x195c   : > { %8802 = vmatmul.mubr.f32.gmra.mrb[192].mxu0 %v7809_v17 }
0x195d   : > { %v7714_v7 = vpop.f32.mrb[48].mxu1  ;;  %v18665_v39 = vpop.f32.mrb[134].mxu0  ;;  %13666 = vmatprep.mubr.msk.f32.mxu0 %vm1976_vm6, %v7812_v33 }
0x195e   : > { %v7715_v10 = vadd.f32 %v7714_v7, %v18506_v13  ;;  %v7716_v32 = vpop.f32.mrb[49].mxu1  ;;  %v8154_v9 = vpop.f32.mrb[135].mxu0 }
0x195f   : > { %v7717_v45 = vadd.f32 %v7716_v32, %v18512_v44  ;;  %v7718_v4 = vpop.f32.mrb[50].mxu1 }
0x1960   : > { %v7720_v36 = vpop.f32.mrb[51].mxu1  ;;  %8807 = vmatmul.mubr.f32.gmra.mrb[194].mxu0 %v7811_v56  ;;  %v7813_v14 = vmax.f32 %v7715_v10, 0.0  ;;  %v7719_v28 = vadd.f32 %v7718_v4, %v18506_v13 }
0x1961   : > { %v7814_v6 = vmax.f32 %v7717_v45, 0.0  ;;  %v7721_v25 = vadd.f32 %v7720_v36, %v18512_v44  ;;  %v18671_v30 = vpop.f32.mrb[136].mxu0 }
0x1962   : > { %v8159_v34 = vpop.f32.mrb[137].mxu0  ;;  %v7815_v54 = vmax.f32 %v7719_v28, 0.0 }
0x1963   : > { %v7816_v1 = vmax.f32 %v7721_v25, 0.0  ;;  %13667 = vmatprep.mubr.msk.f32.mxu0 %vm1976_vm6, %v7814_v6 }
0x1964   : > { %8812 = vmatmul.mubr.f32.gmra.mrb[196].mxu0 %v7813_v14 }
0x1965   : > { %v7724_v46 = vpop.f32.mrb[52].mxu1  ;;  %v18675_v3 = vpop.f32.mrb[138].mxu0  ;;  %13668 = vmatprep.mubr.msk.f32.mxu0 %vm1976_vm6, %v7816_v1 }
0x1966   : > { %v7725_v27 = vadd.f32 %v7724_v46, %v18506_v13  ;;  %v7726_v41 = vpop.f32.mrb[53].mxu1  ;;  %v8164_v60 = vpop.f32.mrb[139].mxu0 }
0x1967   : > { %v7727_v23 = vadd.f32 %v7726_v41, %v18512_v44  ;;  %v7728_v2 = vpop.f32.mrb[54].mxu1 }
0x1968   : > { %v7730_v22 = vpop.f32.mrb[55].mxu1  ;;  %8817 = vmatmul.mubr.f32.gmra.mrb[198].mxu0 %v7815_v54  ;;  %v7817_v31 = vmax.f32 %v7725_v27, 0.0  ;;  %v7729_v51 = vadd.f32 %v7728_v2, %v18506_v13 }
0x1969   : > { %v7818_v61 = vmax.f32 %v7727_v23, 0.0  ;;  %v7731_v42 = vadd.f32 %v7730_v22, %v18512_v44  ;;  %v18681_v59 = vpop.f32.mrb[140].mxu0 }
0x196a   : > { %v8169_v57 = vpop.f32.mrb[141].mxu0  ;;  %v7819_v43 = vmax.f32 %v7729_v51, 0.0 }
0x196b   : > { %v7820_v5 = vmax.f32 %v7731_v42, 0.0  ;;  %13669 = vmatprep.mubr.msk.f32.mxu0 %vm1976_vm6, %v7818_v61 }
0x196c   : > { %8822 = vmatmul.mubr.f32.gmra.mrb[200].mxu0 %v7817_v31 }
0x196d   : > { %v7734_v26 = vpop.f32.mrb[56].mxu1  ;;  %v18685_v12 = vpop.f32.mrb[142].mxu0  ;;  %13670 = vmatprep.mubr.msk.f32.mxu0 %vm1976_vm6, %v7820_v5 }
0x196e   : > { %v7735_v48 = vadd.f32 %v7734_v26, %v18506_v13  ;;  %v7736_v20 = vpop.f32.mrb[57].mxu1  ;;  %v8174_v17 = vpop.f32.mrb[143].mxu0 }
0x196f   : > { %v7737_v49 = vadd.f32 %v7736_v20, %v18512_v44  ;;  %v7738_v47 = vpop.f32.mrb[58].mxu1 }
0x1970   : > { %v7740_v33 = vpop.f32.mrb[59].mxu1  ;;  %8827 = vmatmul.mubr.f32.gmra.mrb[202].mxu0 %v7819_v43  ;;  %v7821_v32 = vmax.f32 %v7735_v48, 0.0  ;;  %v7739_v9 = vadd.f32 %v7738_v47, %v18506_v13 }
0x1971   : > { %v7822_v7 = vmax.f32 %v7737_v49, 0.0  ;;  %v7741_v56 = vadd.f32 %v7740_v33, %v18512_v44  ;;  %v18691_v10 = vpop.f32.mrb[144].mxu0 }
0x1972   : > { %v8179_v45 = vpop.f32.mrb[145].mxu0  ;;  %v7823_v25 = vmax.f32 %v7739_v9, 0.0 }
0x1973   : > { %v7824_v4 = vmax.f32 %v7741_v56, 0.0  ;;  %13671 = vmatprep.mubr.msk.f32.mxu0 %vm1976_vm6, %v7822_v7 }
0x1974   : > { %8832 = vmatmul.mubr.f32.gmra.mrb[204].mxu0 %v7821_v32 }
0x1975   : > { %v7744_v36 = vpop.f32.mrb[60].mxu1  ;;  %v18695_v6 = vpop.f32.mrb[146].mxu0  ;;  %13672 = vmatprep.mubr.msk.f32.mxu0 %vm1976_vm6, %v7824_v4 }
0x1976   : > { %v7745_v14 = vadd.f32 %v7744_v36, %v18506_v13  ;;  %v7746_v28 = vpop.f32.mrb[61].mxu1  ;;  %v8184_v34 = vpop.f32.mrb[147].mxu0 }
0x1977   : > { %v7747_v1 = vadd.f32 %v7746_v28, %v18512_v44  ;;  %v7748_v46 = vpop.f32.mrb[62].mxu1 }
0x1978   : > { %v7750_v54 = vpop.f32.mrb[63].mxu1  ;;  %8837 = vmatmul.mubr.f32.gmra.mrb[206].mxu0 %v7823_v25  ;;  %v7825_v23 = vmax.f32 %v7745_v14, 0.0  ;;  %v7749_v2 = vadd.f32 %v7748_v46, %v18506_v13 }
0x1979   : > { %v7826_v27 = vmax.f32 %v7747_v1, 0.0  ;;  %v7751_v41 = vadd.f32 %v7750_v54, %v18512_v44  ;;  %v18701_v60 = vpop.f32.mrb[148].mxu0 }
0x197a   : > { %v8189_v22 = vpop.f32.mrb[149].mxu0  ;;  %v7827_v51 = vmax.f32 %v7749_v2, 0.0 }
0x197b   : > { %v7828_v61 = vmax.f32 %v7751_v41, 0.0  ;;  %13673 = vmatprep.mubr.msk.f32.mxu0 %vm1976_vm6, %v7826_v27 }
0x197c   : > { %8842 = vmatmul.mubr.f32.gmra.mrb[208].mxu0 %v7825_v23 }
0x197d   : > { %v7754_v42 = vpop.f32.mrb[64].mxu1  ;;  %v18705_v31 = vpop.f32.mrb[150].mxu0  ;;  %13674 = vmatprep.mubr.msk.f32.mxu0 %vm1976_vm6, %v7828_v61 }
0x197e   : > { %v7755_v57 = vadd.f32 %v7754_v42, %v18506_v13  ;;  %v7756_v5 = vpop.f32.mrb[65].mxu1  ;;  %v8194_v26 = vpop.f32.mrb[151].mxu0 }
0x197f   : > { %v7757_v43 = vadd.f32 %v7756_v5, %v18512_v44  ;;  %v7758_v48 = vpop.f32.mrb[66].mxu1 }
0x1980   : > { %v7760_v20 = vpop.f32.mrb[67].mxu1  ;;  %8847 = vmatmul.mubr.f32.gmra.mrb[210].mxu0 %v7827_v51  ;;  %v7829_v33 = vmax.f32 %v7755_v57, 0.0  ;;  %v7759_v7 = vadd.f32 %v7758_v48, %v18506_v13 }
0x1981   : > { %v7830_v17 = vmax.f32 %v7757_v43, 0.0  ;;  %v7761_v49 = vadd.f32 %v7760_v20, %v18512_v44  ;;  %v18711_v47 = vpop.f32.mrb[152].mxu0 }
0x1982   : > { %v8199_v56 = vpop.f32.mrb[153].mxu0  ;;  %v7831_v4 = vmax.f32 %v7759_v7, 0.0 }
0x1983   : > { %v7832_v32 = vmax.f32 %v7761_v49, 0.0  ;;  %13675 = vmatprep.mubr.msk.f32.mxu0 %vm1976_vm6, %v7830_v17 }
0x1984   : > { %8852 = vmatmul.mubr.f32.gmra.mrb[212].mxu0 %v7829_v33 }
0x1985   : > { %v7764_v9 = vpop.f32.mrb[68].mxu1  ;;  %v18715_v45 = vpop.f32.mrb[154].mxu0  ;;  %13676 = vmatprep.mubr.msk.f32.mxu0 %vm1976_vm6, %v7832_v32 }
0x1986   : > { %v7765_v36 = vadd.f32 %v7764_v9, %v18506_v13  ;;  %v7766_v25 = vpop.f32.mrb[69].mxu1  ;;  %v8204_v14 = vpop.f32.mrb[155].mxu0 }
0x1987   : > { %v7767_v28 = vadd.f32 %v7766_v25, %v18512_v44  ;;  %v7768_v34 = vpop.f32.mrb[70].mxu1 }
0x1988   : > { %v7770_v1 = vpop.f32.mrb[71].mxu1  ;;  %8857 = vmatmul.mubr.f32.gmra.mrb[214].mxu0 %v7831_v4  ;;  %v7833_v27 = vmax.f32 %v7765_v36, 0.0  ;;  %v7769_v41 = vadd.f32 %v7768_v34, %v18506_v13 }
0x1989   : > { %v7834_v46 = vmax.f32 %v7767_v28, 0.0  ;;  %v7771_v54 = vadd.f32 %v7770_v1, %v18512_v44 }
0x198a   : > { %v7835_v22 = vmax.f32 %v7769_v41, 0.0 }
0x198b   : > { %v7836_v23 = vmax.f32 %v7771_v54, 0.0  ;;  %13677 = vmatprep.mubr.msk.f32.mxu0 %vm1976_vm6, %v7834_v46 }
0x198c   : > { %8862 = vmatmul.mubr.f32.gmra.mrb[216].mxu0 %v7833_v27 }
0x198d   : > { %v8368_v2 = vpop.f32.mrb[72].mxu1  ;;  %13678 = vmatprep.mubr.msk.f32.mxu0 %vm1976_vm6, %v7836_v23 }
0x198e   : > { %v18725_v61 = vadd.f32 %v8368_v2, %v18501_v38  ;;  %v8370_v42 = vpop.f32.mrb[73].mxu1 }
0x1990   : > { %8867 = vmatmul.mubr.f32.gmra.mrb[218].mxu0 %v7835_v22 }
0x1991   : > { %v8373_v51 = vpop.f32.mrb[74].mxu1 }
0x1992   : > { %v18728_v57 = vadd.f32 %v8373_v51, %v18514_v35  ;;  %v8375_v44 = vpop.f32.mrb[75].mxu1  ;;  %v9041_v51 = vld [vmem:[%s21063_s2 + $0x100] sm:$0xff] }
0x1993   : > { %v9057_v44 = vld [vmem:[%s21063_s2 + $0x180] sm:$0xff] }
0x1995   : > { %v8378_v5 = vpop.f32.mrb[76].mxu1 }
0x1996   : > { %v18731_v13 = vadd.f32 %v8378_v5, %v18524_v53  ;;  %v8380_v26 = vpop.f32.mrb[77].mxu1  ;;  %v13712_v5 = vcombine.low %v9041_v51, %v9057_v44 }
0x1997   : > { %v13713_v26 = vcombine.high %v9041_v51, %v9057_v44 }
0x1999   : > { %v8383_v43 = vpop.f32.mrb[78].mxu1 }
0x199a   : > { %v18734_v48 = vadd.f32 %v8383_v43, %v18533_v11  ;;  %v8385_v20 = vpop.f32.mrb[79].mxu1 }
0x199d   : > { %v8388_v17 = vpop.f32.mrb[80].mxu1 }
0x199e   : > { %v18737_v38 = vadd.f32 %v8388_v17, %v18544_v29  ;;  %v8390_v49 = vpop.f32.mrb[81].mxu1 }
0x19a1   : > { %v8393_v33 = vpop.f32.mrb[82].mxu1 }
0x19a2   : > { %v18740_v35 = vadd.f32 %v8393_v33, %v18553_v63  ;;  %v8395_v7 = vpop.f32.mrb[83].mxu1  ;;  %v9073_v33 = vld [vmem:[%s21063_s2 + $0x200] sm:$0xff] }
0x19a3   : > { %v9089_v7 = vld [vmem:[%s21063_s2 + $0x280] sm:$0xff] }
0x19a5   : > { %v8398_v56 = vpop.f32.mrb[84].mxu1 }
0x19a6   : > { %v18743_v53 = vadd.f32 %v8398_v56, %v18564_v58  ;;  %v8400_v32 = vpop.f32.mrb[85].mxu1  ;;  %v13744_v56 = vcombine.low %v9073_v33, %v9089_v7 }
0x19a7   : > { %v13745_v32 = vcombine.high %v9073_v33, %v9089_v7  ;;  %v9217_v33 = vld [vmem:[%s21063_s2 + $0x680] sm:$0xff] }
0x19a9   : > { %v8403_v9 = vpop.f32.mrb[86].mxu1 }
0x19aa   : > { %v18746_v11 = vadd.f32 %v8403_v9, %v18573_v62  ;;  %v8405_v4 = vpop.f32.mrb[87].mxu1 }
0x19ad   : > { %v8408_v36 = vpop.f32.mrb[88].mxu1 }
0x19ae   : > { %v18749_v29 = vadd.f32 %v8408_v36, %v18584_v18  ;;  %v8410_v25 = vpop.f32.mrb[89].mxu1  ;;  %v9009_v18 = vld [vmem:[%s21063_s2] sm:$0xff] }
0x19b1   : > { %v8413_v14 = vpop.f32.mrb[90].mxu1 }
0x19b2   : > { %v18752_v63 = vadd.f32 %v8413_v14, %v18593_v40  ;;  %v8415_v28 = vpop.f32.mrb[91].mxu1  ;;  %v9025_v40 = vld [vmem:[%s21063_s2 + $0x80] sm:$0xff] }
0x19b3   : > { %v13680_v27 = vcombine.low %v9009_v18, %v9025_v40  ;;  %v13681_v41 = vcombine.high %v9009_v18, %v9025_v40  ;;  %v9105_v14 = vld [vmem:[%s21063_s2 + $0x300] sm:$0xff] }
0x19b4   : > { %v9121_v28 = vld [vmem:[%s21063_s2 + $0x380] sm:$0xff] }
0x19b5   : > { %v8418_v34 = vpop.f32.mrb[92].mxu1  ;;  %12081 = vmatprep.subr.bf16.mxu1 %v13681_v41  ;;  %v9153_v41 = vld [vmem:[%s21063_s2 + $0x480] sm:$0xff] }
0x19b6   : > { %v18755_v58 = vadd.f32 %v8418_v34, %v18604_v50  ;;  %v8420_v1 = vpop.f32.mrb[93].mxu1  ;;  %12082 = vmatpush1.bf16.msra.mxu1 %v13680_v27  ;;  %v13776_v34 = vcombine.low %v9105_v14, %v9121_v28  ;;  %v9137_v27 = vld [vmem:[%s21063_s2 + $0x400] sm:$0xff] }
0x19b7   : > { %12083 = vmatprep.subr.bf16.mxu1 %v13713_v26  ;;  %v13777_v1 = vcombine.high %v9105_v14, %v9121_v28  ;;  %v9185_v26 = vld [vmem:[%s21063_s2 + $0x580] sm:$0xff] }
0x19b8   : > { %v9233_v14 = vld [vmem:[%s21063_s2 + $0x700] sm:$0xff] }
0x19b9   : > { %v8423_v46 = vpop.f32.mrb[94].mxu1  ;;  %v9249_v28 = vld [vmem:[%s21063_s2 + $0x780] sm:$0xff] }
0x19ba   : > { %v18758_v62 = vadd.f32 %v8423_v46, %v18613_v55  ;;  %v8425_v54 = vpop.f32.mrb[95].mxu1  ;;  %12084 = vmatpush1.bf16.msra.mxu1 %v13712_v5  ;;  %v9169_v5 = vld [vmem:[%s21063_s2 + $0x500] sm:$0xff] }
0x19bb   : > { %12085 = vmatprep.subr.bf16.mxu1 %v13745_v32 }
0x19bd   : > { %v8428_v23 = vpop.f32.mrb[96].mxu1 }
0x19be   : > { %v18767_v50 = vadd.f32 %v8428_v23, %v18621_v15  ;;  %v8430_v2 = vpop.f32.mrb[97].mxu1  ;;  %12086 = vmatpush1.bf16.msra.mxu1 %v13744_v56  ;;  %v13808_v23 = vcombine.low %v9137_v27, %v9153_v41 }
0x19bf   : > { %12087 = vmatprep.subr.bf16.mxu1 %v13777_v1  ;;  %v13809_v2 = vcombine.high %v9137_v27, %v9153_v41  ;;  %v13904_v1 = vcombine.low %v9233_v14, %v9249_v28 }
0x19c1   : > { %v8433_v55 = vpop.f32.mrb[98].mxu1 }
0x19c2   : > { %v18770_v22 = vadd.f32 %v8433_v55, %v18625_v19  ;;  %v8435_v42 = vpop.f32.mrb[99].mxu1  ;;  %12088 = vmatpush1.bf16.msra.mxu1 %v13776_v34 }
0x19c3   : > { %12089 = vmatprep.subr.bf16.mxu1 %v13809_v2  ;;  %v9265_v2 = vld [vmem:[%s21063_s2 + $0x800] sm:$0xff] }
0x19c5   : > { %v8438_v43 = vpop.f32.mrb[100].mxu1 }
0x19c6   : > { %v18779_v15 = vadd.f32 %v8438_v43, %v18631_v52  ;;  %v8440_v20 = vpop.f32.mrb[101].mxu1  ;;  %12090 = vmatpush1.bf16.msra.mxu1 %v13808_v23  ;;  %v13840_v43 = vcombine.low %v9169_v5, %v9185_v26 }
0x19c7   : > { %v13841_v20 = vcombine.high %v9169_v5, %v9185_v26  ;;  %v9091_v5 = vld [vmem:[%s21063_s2 + $0x290] sm:$0xff] }
0x19c9   : > { %v8443_v19 = vpop.f32.mrb[102].mxu1  ;;  %12091 = vmatprep.subr.bf16.mxu1 %v13841_v20 }
0x19ca   : > { %v18782_v17 = vadd.f32 %v8443_v19, %v18635_v24  ;;  %v8445_v49 = vpop.f32.mrb[103].mxu1  ;;  %12092 = vmatpush1.bf16.msra.mxu1 %v13840_v43 }
0x19cd   : > { %v8448_v9 = vpop.f32.mrb[104].mxu1 }
0x19ce   : > { %v18791_v52 = vadd.f32 %v8448_v9, %v18641_v8  ;;  %v8450_v4 = vpop.f32.mrb[105].mxu1 }
0x19d1   : > { %v8453_v24 = vpop.f32.mrb[106].mxu1 }
0x19d2   : > { %v18794_v36 = vadd.f32 %v8453_v24, %v18645_v0  ;;  %v8455_v25 = vpop.f32.mrb[107].mxu1 }
0x19d5   : > { %v8458_v46 = vpop.f32.mrb[108].mxu1 }
0x19d6   : > { %v18803_v8 = vadd.f32 %v8458_v46, %v18651_v16  ;;  %v8460_v54 = vpop.f32.mrb[109].mxu1  ;;  %v13905_v46 = vcombine.high %v9233_v14, %v9249_v28  ;;  %v9107_v14 = vld [vmem:[%s21063_s2 + $0x310] sm:$0xff] }
0x19d7   : > { %v9043_v54 = vld [vmem:[%s21063_s2 + $0x110] sm:$0xff] }
0x19d9   : > { %v8463_v0 = vpop.f32.mrb[110].mxu1 }
0x19da   : > { %v18806_v18 = vadd.f32 %v8463_v0, %v18655_v21  ;;  %v8465_v40 = vpop.f32.mrb[111].mxu1  ;;  %v9059_v0 = vld [vmem:[%s21063_s2 + $0x190] sm:$0xff] }
0x19dd   : > { %v8468_v55 = vpop.f32.mrb[112].mxu1 }
0x19de   : > { %v18815_v16 = vadd.f32 %v8468_v55, %v18661_v37  ;;  %v8470_v42 = vpop.f32.mrb[113].mxu1  ;;  %v9281_v55 = vld [vmem:[%s21063_s2 + $0x880] sm:$0xff] }
0x19df   : > { %v13936_v20 = vcombine.low %v9265_v2, %v9281_v55 }
0x19e1   : > { %v8473_v21 = vpop.f32.mrb[114].mxu1 }
0x19e2   : > { %v18818_v51 = vadd.f32 %v8473_v21, %v18665_v39  ;;  %v8475_v44 = vpop.f32.mrb[115].mxu1  ;;  %v9201_v39 = vld [vmem:[%s21063_s2 + $0x600] sm:$0xff]  ;;  %v13717_v21 = vcombine.high %v9043_v54, %v9059_v0 }
0x19e3   : > { %v13872_v56 = vcombine.low %v9201_v39, %v9217_v33  ;;  %v13873_v32 = vcombine.high %v9201_v39, %v9217_v33  ;;  %v13937_v44 = vcombine.high %v9265_v2, %v9281_v55  ;;  %v13716_v33 = vcombine.low %v9043_v54, %v9059_v0  ;;  %v9139_v2 = vld [vmem:[%s21063_s2 + $0x410] sm:$0xff] }
0x19e5   : > { %v8478_v19 = vpop.f32.mrb[116].mxu1  ;;  %12093 = vmatprep.subr.bf16.mxu1 %v13873_v32 }
0x19e6   : > { %v18827_v37 = vadd.f32 %v8478_v19, %v18671_v30  ;;  %v8480_v49 = vpop.f32.mrb[117].mxu1  ;;  %12094 = vmatpush1.bf16.msra.mxu1 %v13872_v56  ;;  %v9297_v19 = vld [vmem:[%s21063_s2 + $0x900] sm:$0xff] }
0x19e7   : > { %v8713_v7 = vpop.f32.mrb[156].mxu0  ;;  %12095 = vmatprep.subr.bf16.mxu1 %v13905_v46  ;;  %v9313_v49 = vld [vmem:[%s21063_s2 + $0x980] sm:$0xff] }
0x19e8   : > { %v18836_v9 = vadd.f32 %v8713_v7, %v18725_v61  ;;  %v8715_v4 = vpop.f32.mrb[157].mxu0  ;;  %v9011_v61 = vld [vmem:[%s21063_s2 + $0x10] sm:$0xff]  ;;  %v13969_v32 = vcombine.high %v9297_v19, %v9313_v49 }
0x19e9   : > { %v8483_v24 = vpop.f32.mrb[118].mxu1  ;;  %v9329_v4 = vld [vmem:[%s21063_s2 + $0xa00] sm:$0xff] }
0x19ea   : > { %v18839_v30 = vadd.f32 %v8483_v24, %v18675_v3  ;;  %v8485_v25 = vpop.f32.mrb[119].mxu1  ;;  %v9027_v3 = vld [vmem:[%s21063_s2 + $0x90] sm:$0xff]  ;;  %12096 = vmatpush1.bf16.msra.mxu1 %v13904_v1  ;;  %v9345_v24 = vld [vmem:[%s21063_s2 + $0xa80] sm:$0xff] }
0x19eb   : > { %v8718_v34 = vpop.f32.mrb[158].mxu0  ;;  %v13684_v41 = vcombine.low %v9011_v61, %v9027_v3  ;;  %v13685_v23 = vcombine.high %v9011_v61, %v9027_v3  ;;  %12097 = vmatprep.subr.bf16.mxu1 %v13937_v44  ;;  %v14001_v3 = vcombine.high %v9329_v4, %v9345_v24 }
0x19ec   : > { %v18860_v40 = vadd.f32 %v8718_v34, %v18728_v57  ;;  %v8720_v27 = vpop.f32.mrb[159].mxu0  ;;  %v9075_v57 = vld [vmem:[%s21063_s2 + $0x210] sm:$0xff]  ;;  %v13968_v34 = vcombine.low %v9297_v19, %v9313_v49  ;;  %v9393_v49 = vld [vmem:[%s21063_s2 + $0xc00] sm:$0xff] }
0x19ed   : > { %v8488_v42 = vpop.f32.mrb[120].mxu1  ;;  %12163 = vmatprep.subr.bf16.mxu0 %v13685_v23  ;;  %v13749_v56 = vcombine.high %v9075_v57, %v9091_v5  ;;  %v13748_v46 = vcombine.low %v9075_v57, %v9091_v5 }
0x19ee   : > { %v18875_v26 = vadd.f32 %v8488_v42, %v18681_v59  ;;  %v8490_v43 = vpop.f32.mrb[121].mxu1  ;;  %12164 = vmatpush1.bf16.msra.mxu0 %v13684_v41  ;;  %12098 = vmatpush1.bf16.msra.mxu1 %v13936_v20  ;;  %v9361_v41 = vld [vmem:[%s21063_s2 + $0xb00] sm:$0xff] }
0x19ef   : > { %v8723_v39 = vpop.f32.mrb[160].mxu0  ;;  %12165 = vmatprep.subr.bf16.mxu0 %v13717_v21  ;;  %12099 = vmatprep.subr.bf16.mxu1 %v13969_v32  ;;  %v14000_v21 = vcombine.low %v9329_v4, %v9345_v24 }
0x19f0   : > { %v18884_v7 = vadd.f32 %v8723_v39, %v18731_v13  ;;  %v8725_v59 = vpop.f32.mrb[161].mxu0  ;;  %v9123_v13 = vld [vmem:[%s21063_s2 + $0x390] sm:$0xff] }
0x19f1   : > { %v8493_v25 = vpop.f32.mrb[122].mxu1  ;;  %v13781_v27 = vcombine.high %v9107_v14, %v9123_v13  ;;  %v13780_v57 = vcombine.low %v9107_v14, %v9123_v13 }
0x19f2   : > { %v18899_v28 = vadd.f32 %v8493_v25, %v18685_v12  ;;  %v8495_v61 = vpop.f32.mrb[123].mxu1  ;;  %12166 = vmatpush1.bf16.msra.mxu0 %v13716_v33  ;;  %v9377_v12 = vld [vmem:[%s21063_s2 + $0xb80] sm:$0xff]  ;;  %12100 = vmatpush1.bf16.msra.mxu1 %v13968_v34  ;;  %v9171_v33 = vld [vmem:[%s21063_s2 + $0x510] sm:$0xff] }
0x19f3   : > { %v8728_v1 = vpop.f32.mrb[162].mxu0  ;;  %12167 = vmatprep.subr.bf16.mxu0 %v13749_v56  ;;  %12101 = vmatprep.subr.bf16.mxu1 %v14001_v3  ;;  %v14033_v5 = vcombine.high %v9361_v41, %v9377_v12  ;;  %v14032_v32 = vcombine.low %v9361_v41, %v9377_v12  ;;  %v9425_v34 = vld [vmem:[%s21063_s2 + $0xd00] sm:$0xff] }
0x19f4   : > { %v18902_v54 = vadd.f32 %v8728_v1, %v18734_v48  ;;  %v8730_v0 = vpop.f32.mrb[163].mxu0  ;;  %v9155_v48 = vld [vmem:[%s21063_s2 + $0x490] sm:$0xff] }
0x19f5   : > { %v8498_v23 = vpop.f32.mrb[124].mxu1  ;;  %v13813_v19 = vcombine.high %v9139_v2, %v9155_v48  ;;  %v13812_v24 = vcombine.low %v9139_v2, %v9155_v48 }
0x19f6   : > { %v18917_v55 = vadd.f32 %v8498_v23, %v18691_v10  ;;  %v8500_v42 = vpop.f32.mrb[125].mxu1  ;;  %12168 = vmatpush1.bf16.msra.mxu0 %v13748_v46  ;;  %v9409_v10 = vld [vmem:[%s21063_s2 + $0xc80] sm:$0xff]  ;;  %12102 = vmatpush1.bf16.msra.mxu1 %v14000_v21  ;;  %v9203_v46 = vld [vmem:[%s21063_s2 + $0x610] sm:$0xff] }
0x19f7   : > { %v8733_v44 = vpop.f32.mrb[164].mxu0  ;;  %12169 = vmatprep.subr.bf16.mxu0 %v13781_v27  ;;  %12103 = vmatprep.subr.bf16.mxu1 %v14033_v5  ;;  %v14065_v25 = vcombine.high %v9393_v49, %v9409_v10  ;;  %v14064_v27 = vcombine.low %v9393_v49, %v9409_v10  ;;  %v9457_v21 = vld [vmem:[%s21063_s2 + $0xe00] sm:$0xff] }
0x19f8   : > { %v18920_v43 = vadd.f32 %v8733_v44, %v18737_v38  ;;  %v8735_v20 = vpop.f32.mrb[165].mxu0  ;;  %v9187_v38 = vld [vmem:[%s21063_s2 + $0x590] sm:$0xff] }
0x19f9   : > { %v8503_v39 = vpop.f32.mrb[126].mxu1  ;;  %v13845_v61 = vcombine.high %v9171_v33, %v9187_v38  ;;  %v13844_v12 = vcombine.low %v9171_v33, %v9187_v38 }
0x19fa   : > { %v18935_v59 = vadd.f32 %v8503_v39, %v18695_v6  ;;  %v8505_v56 = vpop.f32.mrb[127].mxu1  ;;  %12170 = vmatpush1.bf16.msra.mxu0 %v13780_v57  ;;  %v9441_v6 = vld [vmem:[%s21063_s2 + $0xd80] sm:$0xff]  ;;  %12104 = vmatpush1.bf16.msra.mxu1 %v14032_v32  ;;  %v9235_v57 = vld [vmem:[%s21063_s2 + $0x710] sm:$0xff] }
0x19fb   : > { %v8738_v4 = vpop.f32.mrb[166].mxu0  ;;  %12171 = vmatprep.subr.bf16.mxu0 %v13813_v19  ;;  %12105 = vmatprep.subr.bf16.mxu1 %v14065_v25  ;;  %v14097_v23 = vcombine.high %v9425_v34, %v9441_v6  ;;  %v14096_v19 = vcombine.low %v9425_v34, %v9441_v6 }
0x19fc   : > { %v18938_v14 = vadd.f32 %v8738_v4, %v18740_v35  ;;  %v8740_v13 = vpop.f32.mrb[167].mxu0  ;;  %v9219_v35 = vld [vmem:[%s21063_s2 + $0x690] sm:$0xff] }
0x19fd   : > { %v8508_v1 = vpop.f32.mrb[128].mxu1  ;;  %v13877_v42 = vcombine.high %v9203_v46, %v9219_v35  ;;  %v13876_v10 = vcombine.low %v9203_v46, %v9219_v35  ;;  %v9283_v4 = vld [vmem:[%s21063_s2 + $0x890] sm:$0xff] }
0x19fe   : > { %v18953_v3 = vadd.f32 %v8508_v1, %v18701_v60  ;;  %v8510_v0 = vpop.f32.mrb[129].mxu1  ;;  %12172 = vmatpush1.bf16.msra.mxu0 %v13812_v24  ;;  %v9473_v60 = vld [vmem:[%s21063_s2 + $0xe80] sm:$0xff]  ;;  %12106 = vmatpush1.bf16.msra.mxu1 %v14064_v27  ;;  %v9299_v35 = vld [vmem:[%s21063_s2 + $0x910] sm:$0xff] }
0x19ff   : > { %v8743_v41 = vpop.f32.mrb[168].mxu0  ;;  %12173 = vmatprep.subr.bf16.mxu0 %v13845_v61  ;;  %12107 = vmatprep.subr.bf16.mxu1 %v14097_v23  ;;  %v14129_v39 = vcombine.high %v9457_v21, %v9473_v60  ;;  %v14128_v13 = vcombine.low %v9457_v21, %v9473_v60 }
0x1a00   : > { %v18956_v2 = vadd.f32 %v8743_v41, %v18743_v53  ;;  %v8745_v48 = vpop.f32.mrb[169].mxu0  ;;  %v9251_v53 = vld [vmem:[%s21063_s2 + $0x790] sm:$0xff] }
0x1a01   : > { %v8513_v44 = vpop.f32.mrb[130].mxu1  ;;  %v13909_v56 = vcombine.high %v9235_v57, %v9251_v53  ;;  %v13908_v61 = vcombine.low %v9235_v57, %v9251_v53  ;;  %v9363_v53 = vld [vmem:[%s21063_s2 + $0xb10] sm:$0xff] }
0x1a02   : > { %v18971_v5 = vadd.f32 %v8513_v44, %v18705_v31  ;;  %v8515_v20 = vpop.f32.mrb[131].mxu1  ;;  %12174 = vmatpush1.bf16.msra.mxu0 %v13844_v12  ;;  %v9267_v31 = vld [vmem:[%s21063_s2 + $0x810] sm:$0xff]  ;;  %12108 = vmatpush1.bf16.msra.mxu1 %v14096_v19 }
0x1a03   : > { %v8748_v49 = vpop.f32.mrb[170].mxu0  ;;  %12175 = vmatprep.subr.bf16.mxu0 %v13877_v42  ;;  %12109 = vmatprep.subr.bf16.mxu1 %v14129_v39  ;;  %v13941_v1 = vcombine.high %v9267_v31, %v9283_v4  ;;  %v9331_v42 = vld [vmem:[%s21063_s2 + $0xa10] sm:$0xff] }
0x1a04   : > { %v18974_v33 = vadd.f32 %v8748_v49, %v18746_v11  ;;  %v8750_v38 = vpop.f32.mrb[171].mxu0  ;;  %v9379_v20 = vld [vmem:[%s21063_s2 + $0xb90] sm:$0xff] }
0x1a05   : > { %v8518_v32 = vpop.f32.mrb[132].mxu1  ;;  %v9395_v38 = vld [vmem:[%s21063_s2 + $0xc10] sm:$0xff] }
0x1a06   : > { %v18983_v24 = vadd.f32 %v8518_v32, %v18711_v47  ;;  %v8520_v25 = vpop.f32.mrb[133].mxu1  ;;  %12176 = vmatpush1.bf16.msra.mxu0 %v13876_v10  ;;  %v9315_v47 = vld [vmem:[%s21063_s2 + $0x990] sm:$0xff]  ;;  %12110 = vmatpush1.bf16.msra.mxu1 %v14128_v13 }
0x1a07   : > { %v8753_v11 = vpop.f32.mrb[172].mxu0  ;;  %12177 = vmatprep.subr.bf16.mxu0 %v13909_v56  ;;  %v13973_v48 = vcombine.high %v9299_v35, %v9315_v47  ;;  %v13972_v60 = vcombine.low %v9299_v35, %v9315_v47  ;;  %v9411_v56 = vld [vmem:[%s21063_s2 + $0xc90] sm:$0xff] }
0x1a08   : > { %v18986_v34 = vadd.f32 %v8753_v11, %v18749_v29  ;;  %v8755_v6 = vpop.f32.mrb[173].mxu0  ;;  %v13940_v29 = vcombine.low %v9267_v31, %v9283_v4  ;;  %v14036_v31 = vcombine.low %v9363_v53, %v9379_v20  ;;  %v9427_v13 = vld [vmem:[%s21063_s2 + $0xd10] sm:$0xff] }
0x1a09   : > { %v8523_v46 = vpop.f32.mrb[134].mxu1  ;;  %v9443_v11 = vld [vmem:[%s21063_s2 + $0xd90] sm:$0xff]  ;;  %v14068_v6 = vcombine.low %v9395_v38, %v9411_v56 }
0x1a0a   : > { %v18995_v0 = vadd.f32 %v8523_v46, %v18715_v45  ;;  %v8525_v27 = vpop.f32.mrb[135].mxu1  ;;  %12178 = vmatpush1.bf16.msra.mxu0 %v13908_v61  ;;  %v9347_v45 = vld [vmem:[%s21063_s2 + $0xa90] sm:$0xff] }
0x1a0b   : > { %v8758_v41 = vpop.f32.mrb[174].mxu0  ;;  %12179 = vmatprep.subr.bf16.mxu0 %v13941_v1  ;;  %v14004_v49 = vcombine.low %v9331_v42, %v9347_v45  ;;  %v9459_v35 = vld [vmem:[%s21063_s2 + $0xe10] sm:$0xff] }
0x1a0c   : > { %v18998_v12 = vadd.f32 %v8758_v41, %v18752_v63  ;;  %v8760_v23 = vpop.f32.mrb[175].mxu0  ;;  %v14005_v63 = vcombine.high %v9331_v42, %v9347_v45  ;;  %v9475_v47 = vld [vmem:[%s21063_s2 + $0xe90] sm:$0xff]  ;;  %v14100_v41 = vcombine.low %v9427_v13, %v9443_v11 }
0x1a0d   : > { %v14132_v42 = vcombine.low %v9459_v35, %v9475_v47 }
0x1a0e   : > { %12180 = vmatpush1.bf16.msra.mxu0 %v13940_v29 }
0x1a0f   : > { %v8763_v21 = vpop.f32.mrb[176].mxu0  ;;  %12181 = vmatprep.subr.bf16.mxu0 %v13973_v48 }
0x1a10   : > { %v19007_v44 = vadd.f32 %v8763_v21, %v18755_v58  ;;  %v8765_v57 = vpop.f32.mrb[177].mxu0  ;;  %v14037_v58 = vcombine.high %v9363_v53, %v9379_v20 }
0x1a12   : > { %12182 = vmatpush1.bf16.msra.mxu0 %v13972_v60  ;;  %v19051_v60 = vld [vmem:[%s21064_s22] ss:$0 sm:$0xff] }
0x1a13   : > { %v8768_v19 = vpop.f32.mrb[178].mxu0  ;;  %12183 = vmatprep.subr.bf16.mxu0 %v14005_v63  ;;  %v8911_v53 = vadd.f32 %v19051_v60, %v18836_v9  ;;  %v9489_v9 = vld [vmem:[%s21063_s2 + $0xf00] sm:$0xff] }
0x1a14   : > { %v19016_v10 = vadd.f32 %v8768_v19, %v18758_v62  ;;  %v8770_v39 = vpop.f32.mrb[179].mxu0  ;;  %v14069_v62 = vcombine.high %v9395_v38, %v9411_v56 }
0x1a16   : > { %12184 = vmatpush1.bf16.msra.mxu0 %v14004_v49 }
0x1a17   : > { %v8773_v32 = vpop.f32.mrb[180].mxu0  ;;  %12185 = vmatprep.subr.bf16.mxu0 %v14037_v58  ;;  %v8912_v58 = vadd.f32 %v19051_v60, %v18860_v40  ;;  %v9491_v40 = vld [vmem:[%s21063_s2 + $0xf10] sm:$0xff] }
0x1a18   : > { %v19025_v4 = vadd.f32 %v8773_v32, %v18767_v50  ;;  %v8775_v25 = vpop.f32.mrb[181].mxu0  ;;  %v14101_v50 = vcombine.high %v9427_v13, %v9443_v11  ;;  %v9507_v11 = vld [vmem:[%s21063_s2 + $0xf90] sm:$0xff] }
0x1a19   : > { %v8913_v25 = vadd.f32 %v19051_v60, %v18884_v7  ;;  %v19085_v7 = vld [vmem:[%s21063_s2 + $0x88] sm:$0xff] }
0x1a1a   : > { %12186 = vmatpush1.bf16.msra.mxu0 %v14036_v31 }
0x1a1b   : > { %v8778_v61 = vpop.f32.mrb[182].mxu0  ;;  %12187 = vmatprep.subr.bf16.mxu0 %v14069_v62 }
0x1a1c   : > { %v19034_v1 = vadd.f32 %v8778_v61, %v18770_v22  ;;  %v8780_v46 = vpop.f32.mrb[183].mxu0  ;;  %v14133_v22 = vcombine.high %v9459_v35, %v9475_v47  ;;  %v19090_v35 = vld [vmem:[%s21063_s2 + $0x20] sm:$0xff] }
0x1a1d   : > { %v14165_v46 = vcombine.high %v9491_v40, %v9507_v11 }
0x1a1e   : > { %12188 = vmatpush1.bf16.msra.mxu0 %v14068_v6  ;;  %v14164_v6 = vcombine.low %v9491_v40, %v9507_v11 }
0x1a1f   : > { %v8783_v27 = vpop.f32.mrb[184].mxu0  ;;  %12189 = vmatprep.subr.bf16.mxu0 %v14101_v50  ;;  %v19080_v50 = vld [vmem:[%s21063_s2 + $0x8] sm:$0xff] }
0x1a20   : > { %v19043_v29 = vadd.f32 %v8783_v27, %v18779_v15  ;;  %v8785_v23 = vpop.f32.mrb[185].mxu0 }
0x1a21   : > { %v13682_v23 = vcombine.low %v19080_v50, %v19085_v7 }
0x1a22   : > { %12190 = vmatpush1.bf16.msra.mxu0 %v14100_v41 }
0x1a23   : > { %v8788_v48 = vpop.f32.mrb[186].mxu0  ;;  %12191 = vmatprep.subr.bf16.mxu0 %v14133_v22  ;;  %v13683_v22 = vcombine.high %v19080_v50, %v19085_v7  ;;  %v9122_v50 = vld [vmem:[%s21063_s2 + $0x388] sm:$0xff]  ;;  %v9109_v7 = vld [vmem:[%s21063_s2 + $0x320] sm:$0xff] }
0x1a24   : > { %v19046_v45 = vadd.f32 %v8788_v48, %v18782_v17  ;;  %v8790_v21 = vpop.f32.mrb[187].mxu0  ;;  %v19100_v48 = vld [vmem:[%s21063_s2 + $0xa0] sm:$0xff] }
0x1a25   : > { %v8914_v21 = vadd.f32 %v19051_v60, %v18902_v54 }
0x1a26   : > { %12192 = vmatpush1.bf16.msra.mxu0 %v14132_v42  ;;  %v13688_v42 = vcombine.low %v19090_v35, %v19100_v48 }
0x1a27   : > { %v8793_v57 = vpop.f32.mrb[188].mxu0  ;;  %12193 = vmatprep.subr.bf16.mxu0 %v14165_v46 }
0x1a28   : > { %v8888_v15 = vadd.f32 %v8793_v57, %v18791_v52  ;;  %v8795_v63 = vpop.f32.mrb[189].mxu0 }
0x1a2a   : > { %v8927_v20 = vadd.f32 %v19051_v60, %v8888_v15  ;;  %12194 = vmatpush1.bf16.msra.mxu0 %v14164_v6 }
0x1a2b   : > { %v8798_v19 = vpop.f32.mrb[190].mxu0 }
0x1a2c   : > { %v8889_v17 = vadd.f32 %v8798_v19, %v18794_v36  ;;  %v8800_v49 = vpop.f32.mrb[191].mxu0  ;;  %v14897_v39 = vpack.i.bf16 %v8911_v53, %v8927_v20  ;;  %v9505_v36 = vld [vmem:[%s21063_s2 + $0xf80] sm:$0xff]  ;;  %v8915_v19 = vadd.f32 %v19051_v60, %v18920_v43  ;;  %v8917_v43 = vadd.f32 %v19051_v60, %v18956_v2 }
0x1a2d   : > { %v14161_v13 = vcombine.high %v9489_v9, %v9505_v36  ;;  %v8919_v2 = vadd.f32 %v19051_v60, %v18986_v34  ;;  %v8921_v34 = vadd.f32 %v19051_v60, %v19007_v44  ;;  %v8923_v44 = vadd.f32 %v19051_v60, %v19025_v4 }
0x1a2e   : > { %v8928_v38 = vadd.f32 %v19051_v60, %v8889_v17  ;;  %14898 = vxpose.xlu0.b32.start [1/16] (narrow) %v14897_v39, 8  ;;  %v8925_v4 = vadd.f32 %v19051_v60, %v19043_v29  ;;  %v9042_v29 = vld [vmem:[%s21063_s2 + $0x108] sm:$0xff] }
0x1a2f   : > { %v8803_v56 = vpop.f32.mrb[192].mxu0  ;;  %12111 = vmatprep.subr.bf16.mxu1 %v14161_v13 }
0x1a30   : > { %v8890_v52 = vadd.f32 %v8803_v56, %v18803_v8  ;;  %v8805_v32 = vpop.f32.mrb[193].mxu0  ;;  %v14899_v31 = vpack.i.bf16 %v8912_v58, %v8928_v38  ;;  %v14160_v8 = vcombine.low %v9489_v9, %v9505_v36  ;;  %v8916_v38 = vadd.f32 %v19051_v60, %v18938_v14 }
0x1a31   : > { %v8918_v14 = vadd.f32 %v19051_v60, %v18974_v33  ;;  %v8920_v33 = vadd.f32 %v19051_v60, %v18998_v12  ;;  %v8922_v12 = vadd.f32 %v19051_v60, %v19016_v10  ;;  %v8924_v10 = vadd.f32 %v19051_v60, %v19034_v1 }
0x1a32   : > { %v8929_v62 = vadd.f32 %v19051_v60, %v8890_v52  ;;  %14900 = vxpose.xlu0.b32.cont [2/16] (narrow) %v14899_v31, 8  ;;  %12112 = vmatpush1.bf16.msra.mxu1 %v14160_v8  ;;  %v8926_v1 = vadd.f32 %v19051_v60, %v19046_v45  ;;  %v9045_v45 = vld [vmem:[%s21063_s2 + $0x120] sm:$0xff] }
0x1a33   : > { %v8808_v61 = vpop.f32.mrb[194].mxu0  ;;  %12122 = vmatprep.subr.bf16.mxu1 %v13683_v22 }
0x1a34   : > { %v8891_v47 = vadd.f32 %v8808_v61, %v18806_v18  ;;  %v8810_v27 = vpop.f32.mrb[195].mxu0  ;;  %v14901_v41 = vpack.i.bf16 %v8913_v25, %v8929_v62  ;;  %v13689_v18 = vcombine.high %v19090_v35, %v19100_v48  ;;  %v9125_v35 = vld [vmem:[%s21063_s2 + $0x3a0] sm:$0xff] }
0x1a36   : > { %v8930_v57 = vadd.f32 %v19051_v60, %v8891_v47  ;;  %14902 = vxpose.xlu0.b32.cont [3/16] (narrow) %v14901_v41, 8  ;;  %12245 = vmatprep.subr.bf16.mxu0 %v13689_v18 }
0x1a37   : > { %v8813_v15 = vpop.f32.mrb[196].mxu0 }
0x1a38   : > { %v8892_v63 = vadd.f32 %v8813_v15, %v18815_v16  ;;  %v8815_v53 = vpop.f32.mrb[197].mxu0  ;;  %v14903_v20 = vpack.i.bf16 %v8914_v21, %v8930_v57 }
0x1a3a   : > { %v8931_v17 = vadd.f32 %v19051_v60, %v8892_v63  ;;  %14904 = vxpose.xlu0.b32.cont [4/16] (narrow) %v14903_v20, 8 }
0x1a3b   : > { %v8818_v49 = vpop.f32.mrb[198].mxu0 }
0x1a3c   : > { %v8893_v54 = vadd.f32 %v8818_v49, %v18818_v51  ;;  %v8820_v39 = vpop.f32.mrb[199].mxu0  ;;  %v14905_v58 = vpack.i.bf16 %v8915_v19, %v8931_v17 }
0x1a3e   : > { %v8932_v56 = vadd.f32 %v19051_v60, %v8893_v54  ;;  %14906 = vxpose.xlu0.b32.cont [5/16] (narrow) %v14905_v58, 8 }
0x1a3f   : > { %v8823_v16 = vpop.f32.mrb[200].mxu0 }
0x1a40   : > { %v8894_v52 = vadd.f32 %v8823_v16, %v18827_v37  ;;  %v8825_v32 = vpop.f32.mrb[201].mxu0  ;;  %v14907_v31 = vpack.i.bf16 %v8916_v38, %v8932_v56 }
0x1a42   : > { %v8933_v9 = vadd.f32 %v19051_v60, %v8894_v52  ;;  %14908 = vxpose.xlu0.b32.cont [6/16] (narrow) %v14907_v31, 8 }
0x1a43   : > { %v8828_v51 = vpop.f32.mrb[202].mxu0 }
0x1a44   : > { %v8895_v36 = vadd.f32 %v8828_v51, %v18839_v30  ;;  %v8830_v40 = vpop.f32.mrb[203].mxu0  ;;  %v14909_v25 = vpack.i.bf16 %v8917_v43, %v8933_v9 }
0x1a46   : > { %v8934_v62 = vadd.f32 %v19051_v60, %v8895_v36  ;;  %14910 = vxpose.xlu0.b32.cont [7/16] (narrow) %v14909_v25, 8 }
0x1a47   : > { %v8833_v37 = vpop.f32.mrb[204].mxu0 }
0x1a48   : > { %v8896_v8 = vadd.f32 %v8833_v37, %v18875_v26  ;;  %v8835_v13 = vpop.f32.mrb[205].mxu0  ;;  %v14911_v11 = vpack.i.bf16 %v8918_v14, %v8934_v62 }
0x1a49   : > { %v9074_v13 = vld [vmem:[%s21063_s2 + $0x208] sm:$0xff] }
0x1a4a   : > { %v8935_v61 = vadd.f32 %v19051_v60, %v8896_v8  ;;  %14912 = vxpose.xlu0.b32.cont [8/16] (narrow) %v14911_v11, 8  ;;  %v9090_v11 = vld [vmem:[%s21063_s2 + $0x288] sm:$0xff] }
0x1a4b   : > { %v8838_v30 = vpop.f32.mrb[206].mxu0 }
0x1a4c   : > { %v8897_v6 = vadd.f32 %v8838_v30, %v18899_v28  ;;  %v8840_v46 = vpop.f32.mrb[207].mxu0  ;;  %v14913_v47 = vpack.i.bf16 %v8919_v2, %v8935_v61  ;;  %v9077_v2 = vld [vmem:[%s21063_s2 + $0x220] sm:$0xff] }
0x1a4d   : > { %v9093_v61 = vld [vmem:[%s21063_s2 + $0x2a0] sm:$0xff]  ;;  %v13747_v46 = vcombine.high %v9074_v13, %v9090_v11 }
0x1a4e   : > { %v8936_v27 = vadd.f32 %v19051_v60, %v8897_v6  ;;  %14914 = vxpose.xlu0.b32.cont [9/16] (narrow) %v14913_v47, 8  ;;  %v13753_v47 = vcombine.high %v9077_v2, %v9093_v61  ;;  %v13752_v48 = vcombine.low %v9077_v2, %v9093_v61  ;;  %v9330_v2 = vld [vmem:[%s21063_s2 + $0xa08] sm:$0xff] }
0x1a4f   : > { %v8843_v26 = vpop.f32.mrb[208].mxu0  ;;  %v9346_v61 = vld [vmem:[%s21063_s2 + $0xa88] sm:$0xff] }
0x1a50   : > { %v8898_v41 = vadd.f32 %v8843_v26, %v18917_v55  ;;  %v8845_v22 = vpop.f32.mrb[209].mxu0  ;;  %v14915_v18 = vpack.i.bf16 %v8920_v33, %v8936_v27  ;;  %v9106_v33 = vld [vmem:[%s21063_s2 + $0x308] sm:$0xff]  ;;  %v13785_v27 = vcombine.high %v9109_v7, %v9125_v35 }
0x1a51   : > { %v9138_v26 = vld [vmem:[%s21063_s2 + $0x408] sm:$0xff]  ;;  %v9141_v22 = vld [vmem:[%s21063_s2 + $0x420] sm:$0xff] }
0x1a52   : > { %v8937_v21 = vadd.f32 %v19051_v60, %v8898_v41  ;;  %14916 = vxpose.xlu0.b32.cont [10/16] (narrow) %v14915_v18, 8  ;;  %v9154_v41 = vld [vmem:[%s21063_s2 + $0x488] sm:$0xff]  ;;  %v9157_v18 = vld [vmem:[%s21063_s2 + $0x4a0] sm:$0xff] }
0x1a53   : > { %v8848_v28 = vpop.f32.mrb[210].mxu0 }
0x1a54   : > { %v8899_v57 = vadd.f32 %v8848_v28, %v18935_v59  ;;  %v8850_v15 = vpop.f32.mrb[211].mxu0  ;;  %v14917_v63 = vpack.i.bf16 %v8921_v34, %v8937_v21  ;;  %v13778_v34 = vcombine.low %v9106_v33, %v9122_v50  ;;  %v13784_v21 = vcombine.low %v9109_v7, %v9125_v35  ;;  %v9362_v7 = vld [vmem:[%s21063_s2 + $0xb08] sm:$0xff] }
0x1a55   : > { %v13811_v28 = vcombine.high %v9138_v26, %v9154_v41  ;;  %v9170_v15 = vld [vmem:[%s21063_s2 + $0x508] sm:$0xff] }
0x1a56   : > { %v8938_v53 = vadd.f32 %v19051_v60, %v8899_v57  ;;  %14918 = vxpose.xlu0.b32.cont [11/16] (narrow) %v14917_v63, 8  ;;  %v13817_v57 = vcombine.high %v9141_v22, %v9157_v18  ;;  %v9186_v63 = vld [vmem:[%s21063_s2 + $0x588] sm:$0xff] }
0x1a57   : > { %v8853_v55 = vpop.f32.mrb[212].mxu0  ;;  %v9378_v35 = vld [vmem:[%s21063_s2 + $0xb88] sm:$0xff] }
0x1a58   : > { %v8900_v20 = vadd.f32 %v8853_v55, %v18953_v3  ;;  %v8855_v19 = vpop.f32.mrb[213].mxu0  ;;  %v14919_v17 = vpack.i.bf16 %v8922_v12, %v8938_v53  ;;  %v9173_v12 = vld [vmem:[%s21063_s2 + $0x520] sm:$0xff]  ;;  %v13810_v55 = vcombine.low %v9138_v26, %v9154_v41  ;;  %v14035_v26 = vcombine.high %v9362_v7, %v9378_v35 }
0x1a59   : > { %v9189_v53 = vld [vmem:[%s21063_s2 + $0x5a0] sm:$0xff]  ;;  %v13843_v19 = vcombine.high %v9170_v15, %v9186_v63 }
0x1a5a   : > { %v8939_v49 = vadd.f32 %v19051_v60, %v8900_v20  ;;  %14920 = vxpose.xlu0.b32.cont [12/16] (narrow) %v14919_v17, 8  ;;  %v13816_v20 = vcombine.low %v9141_v22, %v9157_v18  ;;  %v13849_v17 = vcombine.high %v9173_v12, %v9189_v53  ;;  %v9394_v22 = vld [vmem:[%s21063_s2 + $0xc08] sm:$0xff] }
0x1a5b   : > { %v8858_v59 = vpop.f32.mrb[214].mxu0  ;;  %v9410_v18 = vld [vmem:[%s21063_s2 + $0xc88] sm:$0xff] }
0x1a5c   : > { %v8901_v54 = vadd.f32 %v8858_v59, %v18971_v5  ;;  %v8860_v39 = vpop.f32.mrb[215].mxu0  ;;  %v14921_v58 = vpack.i.bf16 %v8923_v44, %v8939_v49  ;;  %v9202_v44 = vld [vmem:[%s21063_s2 + $0x608] sm:$0xff]  ;;  %v9205_v59 = vld [vmem:[%s21063_s2 + $0x620] sm:$0xff] }
0x1a5d   : > { %v9218_v49 = vld [vmem:[%s21063_s2 + $0x688] sm:$0xff]  ;;  %v13842_v39 = vcombine.low %v9170_v15, %v9186_v63  ;;  %v14067_v15 = vcombine.high %v9394_v22, %v9410_v18 }
0x1a5e   : > { %v8940_v38 = vadd.f32 %v19051_v60, %v8901_v54  ;;  %14922 = vxpose.xlu0.b32.cont [13/16] (narrow) %v14921_v58, 8  ;;  %v9221_v54 = vld [vmem:[%s21063_s2 + $0x6a0] sm:$0xff]  ;;  %v13848_v58 = vcombine.low %v9173_v12, %v9189_v53  ;;  %v9426_v12 = vld [vmem:[%s21063_s2 + $0xd08] sm:$0xff] }
0x1a5f   : > { %v8863_v3 = vpop.f32.mrb[216].mxu0  ;;  %v9442_v53 = vld [vmem:[%s21063_s2 + $0xd88] sm:$0xff] }
0x1a60   : > { %v8902_v56 = vadd.f32 %v8863_v3, %v18983_v24  ;;  %v8865_v16 = vpop.f32.mrb[217].mxu0  ;;  %v14923_v52 = vpack.i.bf16 %v8924_v10, %v8940_v38  ;;  %v13875_v10 = vcombine.high %v9202_v44, %v9218_v49  ;;  %v13881_v38 = vcombine.high %v9205_v59, %v9221_v54  ;;  %v9234_v3 = vld [vmem:[%s21063_s2 + $0x708] sm:$0xff] }
0x1a61   : > { %v9237_v16 = vld [vmem:[%s21063_s2 + $0x720] sm:$0xff] }
0x1a62   : > { %v8941_v32 = vadd.f32 %v19051_v60, %v8902_v56  ;;  %14924 = vxpose.xlu0.b32.cont [14/16] (narrow) %v14923_v52, 8  ;;  %v9250_v56 = vld [vmem:[%s21063_s2 + $0x788] sm:$0xff]  ;;  %v9253_v52 = vld [vmem:[%s21063_s2 + $0x7a0] sm:$0xff] }
0x1a63   : > { %v8868_v5 = vpop.f32.mrb[218].mxu0 }
0x1a64   : > { %v8903_v31 = vadd.f32 %v8868_v5, %v18995_v0  ;;  %v8870_v43 = vpop.f32.mrb[219].mxu0  ;;  %v14925_v9 = vpack.i.bf16 %v8925_v4, %v8941_v32  ;;  %v9058_v0 = vld [vmem:[%s21063_s2 + $0x188] sm:$0xff]  ;;  %v13874_v4 = vcombine.low %v9202_v44, %v9218_v49  ;;  %v13880_v32 = vcombine.low %v9205_v59, %v9221_v54 }
0x1a65   : > { %v13715_v37 = vcombine.high %v9042_v29, %v9058_v0  ;;  %v13714_v30 = vcombine.low %v9042_v29, %v9058_v0  ;;  %v13907_v5 = vcombine.high %v9234_v3, %v9250_v56  ;;  %v9266_v43 = vld [vmem:[%s21063_s2 + $0x808] sm:$0xff]  ;;  %v14099_v44 = vcombine.high %v9426_v12, %v9442_v53 }
0x1a66   : > { %v8942_v51 = vadd.f32 %v19051_v60, %v8903_v31  ;;  %14926 = vxpose.xlu0.b32.cont [15/16] (narrow) %v14925_v9, 8  ;;  %v9061_v60 = vld [vmem:[%s21063_s2 + $0x1a0] sm:$0xff]  ;;  %v13913_v31 = vcombine.high %v9237_v16, %v9253_v52  ;;  %v9282_v9 = vld [vmem:[%s21063_s2 + $0x888] sm:$0xff] }
0x1a67   : > { %v13721_v8 = vcombine.high %v9045_v45, %v9061_v60  ;;  %v13720_v6 = vcombine.low %v9045_v45, %v9061_v60  ;;  %v13939_v29 = vcombine.high %v9266_v43, %v9282_v9  ;;  %v9314_v0 = vld [vmem:[%s21063_s2 + $0x988] sm:$0xff]  ;;  %v9301_v45 = vld [vmem:[%s21063_s2 + $0x920] sm:$0xff] }
0x1a68   : > { %v14927_v24 = vpack.i.bf16 %v8926_v1, %v8942_v51  ;;  %v9269_v1 = vld [vmem:[%s21063_s2 + $0x820] sm:$0xff]  ;;  %v9458_v59 = vld [vmem:[%s21063_s2 + $0xe08] sm:$0xff] }
0x1a69   : > { %v9285_v51 = vld [vmem:[%s21063_s2 + $0x8a0] sm:$0xff]  ;;  %v9474_v54 = vld [vmem:[%s21063_s2 + $0xe88] sm:$0xff] }
0x1a6a   : > { %14928 = vxpose.xlu0.b32.end [16/16] (narrow) %v14927_v24, 8  ;;  %v13906_v24 = vcombine.low %v9234_v3, %v9250_v56  ;;  %v9317_v60 = vld [vmem:[%s21063_s2 + $0x9a0] sm:$0xff]  ;;  %v14131_v3 = vcombine.high %v9458_v59, %v9474_v54 }
0x1aae   : > { %v14929_v36 = vpop.trf.xlu0 }
0x1aaf   : > { %v14933_v40 = vunpack.i.h.bf16 %v14929_v36  ;;  %v14930_v25 = vunpack.i.l.bf16 %v14929_v36  ;;  %v13912_v36 = vcombine.low %v9237_v16, %v9253_v52  ;;  %v9490_v16 = vld [vmem:[%s21063_s2 + $0xf08] sm:$0xff] }
0x1ab0   : > { %v9506_v52 = vld [vmem:[%s21063_s2 + $0xf88] sm:$0xff] }
0x1ab1   : > { %v19169_v14 = vpack.c.bf16 %v14933_v40, %v14933_v40  ;;  %v19171_v62 = vpack.c.bf16 %v14930_v25, %v14930_v25  ;;  %v13945_v40 = vcombine.high %v9269_v1, %v9285_v51  ;;  %v9298_v25 = vld [vmem:[%s21063_s2 + $0x908] sm:$0xff] }
0x1ab3   : > { %12113 = vmatprep.mubr.bf16.mxu1 %v19171_v62  ;;  %12195 = vmatprep.mubr.bf16.mxu0 %v19171_v62 }
0x1ab4   : > { %12114 = vmatmul.mubr.bf16.vlgmr.msra.gmra.mrb[136].mxu1 %v19169_v14  ;;  %12196 = vmatmul.mubr.bf16.vlgmr.msra.gmra.mrb[220].mxu0 %v19169_v14 }
0x1ab5   : > { %12123 = vmatpush1.bf16.msra.mxu1 %v13682_v23  ;;  %12246 = vmatpush1.bf16.msra.mxu0 %v13688_v42  ;;  %v13746_v23 = vcombine.low %v9074_v13, %v9090_v11  ;;  %v13779_v42 = vcombine.high %v9106_v33, %v9122_v50  ;;  %v13971_v13 = vcombine.high %v9298_v25, %v9314_v0 }
0x1ab6   : > { %12124 = vmatprep.subr.bf16.mxu1 %v13715_v37  ;;  %12247 = vmatprep.subr.bf16.mxu0 %v13721_v8  ;;  %v13938_v37 = vcombine.low %v9266_v43, %v9282_v9  ;;  %v13944_v8 = vcombine.low %v9269_v1, %v9285_v51  ;;  %v13977_v11 = vcombine.high %v9301_v45, %v9317_v60  ;;  %v9012_v1 = vld [vmem:[%s21063_s2 + $0x18] sm:$0xff] }
0x1ab7   : > { %12154 = vmatprep.mubr.bf16.mxu1 %v19171_v62  ;;  %12277 = vmatprep.mubr.bf16.mxu0 %v19171_v62  ;;  %v14003_v33 = vcombine.high %v9330_v2, %v9346_v61  ;;  %v14163_v43 = vcombine.high %v9490_v16, %v9506_v52  ;;  %v9028_v51 = vld [vmem:[%s21063_s2 + $0x98] sm:$0xff] }
0x1ab9   : > { %12125 = vmatpush1.bf16.msra.mxu1 %v13714_v30  ;;  %12248 = vmatpush1.bf16.msra.mxu0 %v13720_v6  ;;  %v9333_v30 = vld [vmem:[%s21063_s2 + $0xa20] sm:$0xff] }
0x1aba   : > { %12126 = vmatprep.subr.bf16.mxu1 %v13747_v46  ;;  %12249 = vmatprep.subr.bf16.mxu0 %v13753_v47  ;;  %v9349_v6 = vld [vmem:[%s21063_s2 + $0xaa0] sm:$0xff]  ;;  %v13970_v46 = vcombine.low %v9298_v25, %v9314_v0  ;;  %v13976_v47 = vcombine.low %v9301_v45, %v9317_v60  ;;  %v13687_v25 = vcombine.high %v9012_v1, %v9028_v51  ;;  %v9044_v45 = vld [vmem:[%s21063_s2 + $0x118] sm:$0xff] }
0x1abb   : > { %v14009_v50 = vcombine.high %v9333_v30, %v9349_v6  ;;  %v9060_v60 = vld [vmem:[%s21063_s2 + $0x198] sm:$0xff] }
0x1abd   : > { %12127 = vmatpush1.bf16.msra.mxu1 %v13746_v23  ;;  %12250 = vmatpush1.bf16.msra.mxu0 %v13752_v48  ;;  %v9365_v23 = vld [vmem:[%s21063_s2 + $0xb20] sm:$0xff] }
0x1abe   : > { %12128 = vmatprep.subr.bf16.mxu1 %v13779_v42  ;;  %12251 = vmatprep.subr.bf16.mxu0 %v13785_v27  ;;  %v9381_v48 = vld [vmem:[%s21063_s2 + $0xba0] sm:$0xff]  ;;  %v14002_v42 = vcombine.low %v9330_v2, %v9346_v61  ;;  %v14008_v27 = vcombine.low %v9333_v30, %v9349_v6  ;;  %v13719_v2 = vcombine.high %v9044_v45, %v9060_v60  ;;  %v9076_v30 = vld [vmem:[%s21063_s2 + $0x218] sm:$0xff] }
0x1abf   : > { %v14041_v41 = vcombine.high %v9365_v23, %v9381_v48  ;;  %v9092_v6 = vld [vmem:[%s21063_s2 + $0x298] sm:$0xff] }
0x1ac1   : > { %12129 = vmatpush1.bf16.msra.mxu1 %v13778_v34  ;;  %12252 = vmatpush1.bf16.msra.mxu0 %v13784_v21  ;;  %v9397_v34 = vld [vmem:[%s21063_s2 + $0xc20] sm:$0xff] }
0x1ac2   : > { %12130 = vmatprep.subr.bf16.mxu1 %v13811_v28  ;;  %12253 = vmatprep.subr.bf16.mxu0 %v13817_v57  ;;  %v9413_v21 = vld [vmem:[%s21063_s2 + $0xca0] sm:$0xff]  ;;  %v14034_v28 = vcombine.low %v9362_v7, %v9378_v35  ;;  %v14040_v57 = vcombine.low %v9365_v23, %v9381_v48  ;;  %v13751_v7 = vcombine.high %v9076_v30, %v9092_v6  ;;  %v9108_v23 = vld [vmem:[%s21063_s2 + $0x318] sm:$0xff] }
0x1ac3   : > { %v14073_v63 = vcombine.high %v9397_v34, %v9413_v21  ;;  %v9124_v48 = vld [vmem:[%s21063_s2 + $0x398] sm:$0xff] }
0x1ac5   : > { %12131 = vmatpush1.bf16.msra.mxu1 %v13810_v55  ;;  %12254 = vmatpush1.bf16.msra.mxu0 %v13816_v20  ;;  %v9429_v55 = vld [vmem:[%s21063_s2 + $0xd20] sm:$0xff] }
0x1ac6   : > { %12132 = vmatprep.subr.bf16.mxu1 %v13843_v19  ;;  %12255 = vmatprep.subr.bf16.mxu0 %v13849_v17  ;;  %v9445_v20 = vld [vmem:[%s21063_s2 + $0xda0] sm:$0xff]  ;;  %v14066_v19 = vcombine.low %v9394_v22, %v9410_v18  ;;  %v14072_v17 = vcombine.low %v9397_v34, %v9413_v21  ;;  %v13783_v22 = vcombine.high %v9108_v23, %v9124_v48  ;;  %v9140_v34 = vld [vmem:[%s21063_s2 + $0x418] sm:$0xff] }
0x1ac7   : > { %v14105_v49 = vcombine.high %v9429_v55, %v9445_v20  ;;  %v9156_v21 = vld [vmem:[%s21063_s2 + $0x498] sm:$0xff] }
0x1ac9   : > { %12133 = vmatpush1.bf16.msra.mxu1 %v13842_v39  ;;  %12256 = vmatpush1.bf16.msra.mxu0 %v13848_v58  ;;  %v9461_v39 = vld [vmem:[%s21063_s2 + $0xe20] sm:$0xff] }
0x1aca   : > { %12134 = vmatprep.subr.bf16.mxu1 %v13875_v10  ;;  %12257 = vmatprep.subr.bf16.mxu0 %v13881_v38  ;;  %v9477_v58 = vld [vmem:[%s21063_s2 + $0xea0] sm:$0xff]  ;;  %v14098_v10 = vcombine.low %v9426_v12, %v9442_v53  ;;  %v14104_v38 = vcombine.low %v9429_v55, %v9445_v20  ;;  %v13815_v12 = vcombine.high %v9140_v34, %v9156_v21  ;;  %v9172_v55 = vld [vmem:[%s21063_s2 + $0x518] sm:$0xff] }
0x1acb   : > { %v14137_v56 = vcombine.high %v9461_v39, %v9477_v58  ;;  %v9188_v20 = vld [vmem:[%s21063_s2 + $0x598] sm:$0xff] }
0x1acd   : > { %12135 = vmatpush1.bf16.msra.mxu1 %v13874_v4  ;;  %12258 = vmatpush1.bf16.msra.mxu0 %v13880_v32  ;;  %v9493_v4 = vld [vmem:[%s21063_s2 + $0xf20] sm:$0xff] }
0x1ace   : > { %12136 = vmatprep.subr.bf16.mxu1 %v13907_v5  ;;  %12259 = vmatprep.subr.bf16.mxu0 %v13913_v31  ;;  %v9509_v32 = vld [vmem:[%s21063_s2 + $0xfa0] sm:$0xff]  ;;  %v14130_v5 = vcombine.low %v9458_v59, %v9474_v54  ;;  %v14136_v31 = vcombine.low %v9461_v39, %v9477_v58  ;;  %v13847_v59 = vcombine.high %v9172_v55, %v9188_v20  ;;  %v9204_v39 = vld [vmem:[%s21063_s2 + $0x618] sm:$0xff] }
0x1acf   : > { %v14169_v9 = vcombine.high %v9493_v4, %v9509_v32  ;;  %v9220_v58 = vld [vmem:[%s21063_s2 + $0x698] sm:$0xff] }
0x1ad1   : > { %12137 = vmatpush1.bf16.msra.mxu1 %v13906_v24  ;;  %12260 = vmatpush1.bf16.msra.mxu0 %v13912_v36  ;;  %v9015_v24 = vld [vmem:[%s21063_s2 + $0x30] sm:$0xff] }
0x1ad2   : > { %12138 = vmatprep.subr.bf16.mxu1 %v13939_v29  ;;  %12261 = vmatprep.subr.bf16.mxu0 %v13945_v40  ;;  %v9031_v36 = vld [vmem:[%s21063_s2 + $0xb0] sm:$0xff]  ;;  %v14162_v29 = vcombine.low %v9490_v16, %v9506_v52  ;;  %v14168_v40 = vcombine.low %v9493_v4, %v9509_v32  ;;  %v13879_v16 = vcombine.high %v9204_v39, %v9220_v58  ;;  %v9236_v4 = vld [vmem:[%s21063_s2 + $0x718] sm:$0xff] }
0x1ad3   : > { %v13693_v0 = vcombine.high %v9015_v24, %v9031_v36  ;;  %v9252_v32 = vld [vmem:[%s21063_s2 + $0x798] sm:$0xff] }
0x1ad5   : > { %12139 = vmatpush1.bf16.msra.mxu1 %v13938_v37  ;;  %12262 = vmatpush1.bf16.msra.mxu0 %v13944_v8  ;;  %v9047_v37 = vld [vmem:[%s21063_s2 + $0x130] sm:$0xff] }
0x1ad6   : > { %12140 = vmatprep.subr.bf16.mxu1 %v13971_v13  ;;  %12263 = vmatprep.subr.bf16.mxu0 %v13977_v11  ;;  %v9063_v8 = vld [vmem:[%s21063_s2 + $0x1b0] sm:$0xff]  ;;  %v13686_v13 = vcombine.low %v9012_v1, %v9028_v51  ;;  %v13692_v11 = vcombine.low %v9015_v24, %v9031_v36  ;;  %v13911_v1 = vcombine.high %v9236_v4, %v9252_v32  ;;  %v9268_v24 = vld [vmem:[%s21063_s2 + $0x818] sm:$0xff] }
0x1ad7   : > { %v13725_v61 = vcombine.high %v9047_v37, %v9063_v8  ;;  %v9284_v36 = vld [vmem:[%s21063_s2 + $0x898] sm:$0xff] }
0x1ad9   : > { %12141 = vmatpush1.bf16.msra.mxu1 %v13970_v46  ;;  %12264 = vmatpush1.bf16.msra.mxu0 %v13976_v47  ;;  %v9079_v46 = vld [vmem:[%s21063_s2 + $0x230] sm:$0xff] }
0x1ada   : > { %12142 = vmatprep.subr.bf16.mxu1 %v14003_v33  ;;  %12265 = vmatprep.subr.bf16.mxu0 %v14009_v50  ;;  %v9095_v47 = vld [vmem:[%s21063_s2 + $0x2b0] sm:$0xff]  ;;  %v13718_v33 = vcombine.low %v9044_v45, %v9060_v60  ;;  %v13724_v50 = vcombine.low %v9047_v37, %v9063_v8  ;;  %v13943_v45 = vcombine.high %v9268_v24, %v9284_v36  ;;  %v9300_v37 = vld [vmem:[%s21063_s2 + $0x918] sm:$0xff] }
0x1adb   : > { %v13757_v35 = vcombine.high %v9079_v46, %v9095_v47  ;;  %v9316_v8 = vld [vmem:[%s21063_s2 + $0x998] sm:$0xff] }
0x1add   : > { %12143 = vmatpush1.bf16.msra.mxu1 %v14002_v42  ;;  %12266 = vmatpush1.bf16.msra.mxu0 %v14008_v27  ;;  %v9111_v42 = vld [vmem:[%s21063_s2 + $0x330] sm:$0xff] }
0x1ade   : > { %12144 = vmatprep.subr.bf16.mxu1 %v14035_v26  ;;  %12267 = vmatprep.subr.bf16.mxu0 %v14041_v41  ;;  %v9127_v27 = vld [vmem:[%s21063_s2 + $0x3b0] sm:$0xff]  ;;  %v13750_v26 = vcombine.low %v9076_v30, %v9092_v6  ;;  %v13756_v41 = vcombine.low %v9079_v46, %v9095_v47  ;;  %v13975_v30 = vcombine.high %v9300_v37, %v9316_v8  ;;  %v9332_v46 = vld [vmem:[%s21063_s2 + $0xa18] sm:$0xff] }
0x1adf   : > { %v13789_v18 = vcombine.high %v9111_v42, %v9127_v27  ;;  %v9348_v47 = vld [vmem:[%s21063_s2 + $0xa98] sm:$0xff] }
0x1ae1   : > { %12145 = vmatpush1.bf16.msra.mxu1 %v14034_v28  ;;  %12268 = vmatpush1.bf16.msra.mxu0 %v14040_v57  ;;  %v9143_v28 = vld [vmem:[%s21063_s2 + $0x430] sm:$0xff] }
0x1ae2   : > { %12146 = vmatprep.subr.bf16.mxu1 %v14067_v15  ;;  %12269 = vmatprep.subr.bf16.mxu0 %v14073_v63  ;;  %v9159_v57 = vld [vmem:[%s21063_s2 + $0x4b0] sm:$0xff]  ;;  %v13782_v15 = vcombine.low %v9108_v23, %v9124_v48  ;;  %v13788_v63 = vcombine.low %v9111_v42, %v9127_v27  ;;  %v14007_v23 = vcombine.high %v9332_v46, %v9348_v47  ;;  %v9364_v42 = vld [vmem:[%s21063_s2 + $0xb18] sm:$0xff] }
0x1ae3   : > { %v13821_v53 = vcombine.high %v9143_v28, %v9159_v57  ;;  %v9380_v27 = vld [vmem:[%s21063_s2 + $0xb98] sm:$0xff] }
0x1ae5   : > { %12147 = vmatpush1.bf16.msra.mxu1 %v14066_v19  ;;  %12270 = vmatpush1.bf16.msra.mxu0 %v14072_v17  ;;  %v9175_v19 = vld [vmem:[%s21063_s2 + $0x530] sm:$0xff] }
0x1ae6   : > { %12148 = vmatprep.subr.bf16.mxu1 %v14099_v44  ;;  %12271 = vmatprep.subr.bf16.mxu0 %v14105_v49  ;;  %v9191_v17 = vld [vmem:[%s21063_s2 + $0x5b0] sm:$0xff]  ;;  %v13814_v44 = vcombine.low %v9140_v34, %v9156_v21  ;;  %v13820_v49 = vcombine.low %v9143_v28, %v9159_v57  ;;  %v14039_v34 = vcombine.high %v9364_v42, %v9380_v27  ;;  %v9396_v28 = vld [vmem:[%s21063_s2 + $0xc18] sm:$0xff] }
0x1ae7   : > { %v13853_v54 = vcombine.high %v9175_v19, %v9191_v17  ;;  %v9412_v57 = vld [vmem:[%s21063_s2 + $0xc98] sm:$0xff] }
0x1ae9   : > { %12149 = vmatpush1.bf16.msra.mxu1 %v14098_v10  ;;  %12272 = vmatpush1.bf16.msra.mxu0 %v14104_v38  ;;  %v9207_v10 = vld [vmem:[%s21063_s2 + $0x630] sm:$0xff] }
0x1aea   : > { %12150 = vmatprep.subr.bf16.mxu1 %v14131_v3  ;;  %12273 = vmatprep.subr.bf16.mxu0 %v14137_v56  ;;  %v9223_v38 = vld [vmem:[%s21063_s2 + $0x6b0] sm:$0xff]  ;;  %v13846_v3 = vcombine.low %v9172_v55, %v9188_v20  ;;  %v13852_v56 = vcombine.low %v9175_v19, %v9191_v17  ;;  %v14071_v55 = vcombine.high %v9396_v28, %v9412_v57  ;;  %v9428_v19 = vld [vmem:[%s21063_s2 + $0xd18] sm:$0xff] }
0x1aeb   : > { %v13885_v52 = vcombine.high %v9207_v10, %v9223_v38  ;;  %v9444_v17 = vld [vmem:[%s21063_s2 + $0xd98] sm:$0xff] }
0x1aed   : > { %12151 = vmatpush1.bf16.msra.mxu1 %v14130_v5  ;;  %12274 = vmatpush1.bf16.msra.mxu0 %v14136_v31  ;;  %v9239_v5 = vld [vmem:[%s21063_s2 + $0x730] sm:$0xff] }
0x1aee   : > { %12152 = vmatprep.subr.bf16.mxu1 %v14163_v43  ;;  %12275 = vmatprep.subr.bf16.mxu0 %v14169_v9  ;;  %v9255_v31 = vld [vmem:[%s21063_s2 + $0x7b0] sm:$0xff]  ;;  %v13878_v43 = vcombine.low %v9204_v39, %v9220_v58  ;;  %v13884_v9 = vcombine.low %v9207_v10, %v9223_v38  ;;  %v14103_v39 = vcombine.high %v9428_v19, %v9444_v17  ;;  %v9460_v10 = vld [vmem:[%s21063_s2 + $0xe18] sm:$0xff] }
0x1aef   : > { %v13917_v51 = vcombine.high %v9239_v5, %v9255_v31  ;;  %v9476_v38 = vld [vmem:[%s21063_s2 + $0xe98] sm:$0xff] }
0x1af1   : > { %12153 = vmatpush1.bf16.msra.mxu1 %v14162_v29  ;;  %12276 = vmatpush1.bf16.msra.mxu0 %v14168_v40  ;;  %v9271_v29 = vld [vmem:[%s21063_s2 + $0x830] sm:$0xff] }
0x1af2   : > { %12204 = vmatprep.subr.bf16.mxu1 %v13687_v25  ;;  %12327 = vmatprep.subr.bf16.mxu0 %v13693_v0  ;;  %v9287_v40 = vld [vmem:[%s21063_s2 + $0x8b0] sm:$0xff]  ;;  %v13910_v25 = vcombine.low %v9236_v4, %v9252_v32  ;;  %v13916_v0 = vcombine.low %v9239_v5, %v9255_v31  ;;  %v14135_v4 = vcombine.high %v9460_v10, %v9476_v38  ;;  %v9492_v5 = vld [vmem:[%s21063_s2 + $0xf18] sm:$0xff] }
0x1af3   : > { %v13949_v60 = vcombine.high %v9271_v29, %v9287_v40  ;;  %v9508_v31 = vld [vmem:[%s21063_s2 + $0xf98] sm:$0xff] }
0x1af4   : > { %12155 = vmatmul.mubr.bf16.vlgmr.msra.gmra.mrb[140].mxu1 %v19169_v14  ;;  %12278 = vmatmul.mubr.bf16.vlgmr.msra.gmra.mrb[224].mxu0 %v19169_v14 }
0x1af5   : > { %12205 = vmatpush1.bf16.msra.mxu1 %v13686_v13  ;;  %12236 = vmatprep.mubr.bf16.mxu1 %v19171_v62  ;;  %v9303_v13 = vld [vmem:[%s21063_s2 + $0x930] sm:$0xff] }
0x1af6   : > { %12328 = vmatpush1.bf16.msra.mxu0 %v13692_v11  ;;  %12359 = vmatprep.mubr.bf16.mxu0 %v19171_v62  ;;  %v9319_v11 = vld [vmem:[%s21063_s2 + $0x9b0] sm:$0xff] }
0x1af7   : > { %12206 = vmatprep.subr.bf16.mxu1 %v13719_v2  ;;  %12329 = vmatprep.subr.bf16.mxu0 %v13725_v61  ;;  %v13942_v2 = vcombine.low %v9268_v24, %v9284_v36  ;;  %v13948_v61 = vcombine.low %v9271_v29, %v9287_v40  ;;  %v13981_v6 = vcombine.high %v9303_v13, %v9319_v11  ;;  %v9014_v29 = vld [vmem:[%s21063_s2 + $0x28] sm:$0xff] }
0x1af8   : > { %v14167_v24 = vcombine.high %v9492_v5, %v9508_v31  ;;  %v9030_v40 = vld [vmem:[%s21063_s2 + $0xa8] sm:$0xff] }
0x1af9   : > { %12207 = vmatpush1.bf16.msra.mxu1 %v13718_v33  ;;  %v9335_v33 = vld [vmem:[%s21063_s2 + $0xa30] sm:$0xff] }
0x1afa   : > { %12330 = vmatpush1.bf16.msra.mxu0 %v13724_v50  ;;  %12208 = vmatprep.subr.bf16.mxu1 %v13751_v7  ;;  %v9351_v50 = vld [vmem:[%s21063_s2 + $0xab0] sm:$0xff]  ;;  %v13974_v7 = vcombine.low %v9300_v37, %v9316_v8  ;;  %v13691_v37 = vcombine.high %v9014_v29, %v9030_v40 }
0x1afb   : > { %12331 = vmatprep.subr.bf16.mxu0 %v13757_v35  ;;  %v13980_v35 = vcombine.low %v9303_v13, %v9319_v11  ;;  %v14013_v48 = vcombine.high %v9335_v33, %v9351_v50  ;;  %v9046_v13 = vld [vmem:[%s21063_s2 + $0x128] sm:$0xff] }
0x1afc   : > { %v9062_v11 = vld [vmem:[%s21063_s2 + $0x1a8] sm:$0xff] }
0x1afd   : > { %12209 = vmatpush1.bf16.msra.mxu1 %v13750_v26  ;;  %v9367_v26 = vld [vmem:[%s21063_s2 + $0xb30] sm:$0xff] }
0x1afe   : > { %12332 = vmatpush1.bf16.msra.mxu0 %v13756_v41  ;;  %12210 = vmatprep.subr.bf16.mxu1 %v13783_v22  ;;  %v9383_v41 = vld [vmem:[%s21063_s2 + $0xbb0] sm:$0xff]  ;;  %v14006_v22 = vcombine.low %v9332_v46, %v9348_v47  ;;  %v13723_v46 = vcombine.high %v9046_v13, %v9062_v11  ;;  %v9078_v47 = vld [vmem:[%s21063_s2 + $0x228] sm:$0xff] }
0x1aff   : > { %12333 = vmatprep.subr.bf16.mxu0 %v13789_v18  ;;  %v14012_v18 = vcombine.low %v9335_v33, %v9351_v50  ;;  %v14045_v21 = vcombine.high %v9367_v26, %v9383_v41  ;;  %v9094_v33 = vld [vmem:[%s21063_s2 + $0x2a8] sm:$0xff] }
0x1b01   : > { %12211 = vmatpush1.bf16.msra.mxu1 %v13782_v15  ;;  %v9399_v15 = vld [vmem:[%s21063_s2 + $0xc30] sm:$0xff] }
0x1b02   : > { %12334 = vmatpush1.bf16.msra.mxu0 %v13788_v63  ;;  %12212 = vmatprep.subr.bf16.mxu1 %v13815_v12  ;;  %v9415_v63 = vld [vmem:[%s21063_s2 + $0xcb0] sm:$0xff]  ;;  %v14038_v12 = vcombine.low %v9364_v42, %v9380_v27  ;;  %v13755_v42 = vcombine.high %v9078_v47, %v9094_v33 }
0x1b03   : > { %12335 = vmatprep.subr.bf16.mxu0 %v13821_v53  ;;  %v14044_v53 = vcombine.low %v9367_v26, %v9383_v41  ;;  %v14077_v20 = vcombine.high %v9399_v15, %v9415_v63  ;;  %v9110_v26 = vld [vmem:[%s21063_s2 + $0x328] sm:$0xff] }
0x1b04   : > { %v9126_v41 = vld [vmem:[%s21063_s2 + $0x3a8] sm:$0xff] }
0x1b05   : > { %12213 = vmatpush1.bf16.msra.mxu1 %v13814_v44  ;;  %v9431_v44 = vld [vmem:[%s21063_s2 + $0xd30] sm:$0xff] }
0x1b06   : > { %12336 = vmatpush1.bf16.msra.mxu0 %v13820_v49  ;;  %12214 = vmatprep.subr.bf16.mxu1 %v13847_v59  ;;  %v9447_v49 = vld [vmem:[%s21063_s2 + $0xdb0] sm:$0xff]  ;;  %v14070_v59 = vcombine.low %v9396_v28, %v9412_v57  ;;  %v13787_v28 = vcombine.high %v9110_v26, %v9126_v41 }
0x1b07   : > { %12337 = vmatprep.subr.bf16.mxu0 %v13853_v54  ;;  %v14076_v54 = vcombine.low %v9399_v15, %v9415_v63  ;;  %v14109_v58 = vcombine.high %v9431_v44, %v9447_v49  ;;  %v9142_v15 = vld [vmem:[%s21063_s2 + $0x428] sm:$0xff] }
0x1b08   : > { %v9158_v63 = vld [vmem:[%s21063_s2 + $0x4a8] sm:$0xff] }
0x1b09   : > { %12215 = vmatpush1.bf16.msra.mxu1 %v13846_v3  ;;  %v9463_v3 = vld [vmem:[%s21063_s2 + $0xe30] sm:$0xff] }
0x1b0a   : > { %12338 = vmatpush1.bf16.msra.mxu0 %v13852_v56  ;;  %12216 = vmatprep.subr.bf16.mxu1 %v13879_v16  ;;  %v9479_v56 = vld [vmem:[%s21063_s2 + $0xeb0] sm:$0xff]  ;;  %v14102_v16 = vcombine.low %v9428_v19, %v9444_v17  ;;  %v13819_v19 = vcombine.high %v9142_v15, %v9158_v63 }
0x1b0b   : > { %12339 = vmatprep.subr.bf16.mxu0 %v13885_v52  ;;  %v14108_v52 = vcombine.low %v9431_v44, %v9447_v49  ;;  %v14141_v32 = vcombine.high %v9463_v3, %v9479_v56  ;;  %v9174_v44 = vld [vmem:[%s21063_s2 + $0x528] sm:$0xff] }
0x1b0c   : > { %v9190_v49 = vld [vmem:[%s21063_s2 + $0x5a8] sm:$0xff] }
0x1b0d   : > { %12217 = vmatpush1.bf16.msra.mxu1 %v13878_v43  ;;  %v9495_v43 = vld [vmem:[%s21063_s2 + $0xf30] sm:$0xff] }
0x1b0e   : > { %12340 = vmatpush1.bf16.msra.mxu0 %v13884_v9  ;;  %12218 = vmatprep.subr.bf16.mxu1 %v13911_v1  ;;  %v9511_v9 = vld [vmem:[%s21063_s2 + $0xfb0] sm:$0xff]  ;;  %v14134_v1 = vcombine.low %v9460_v10, %v9476_v38  ;;  %v13851_v10 = vcombine.high %v9174_v44, %v9190_v49 }
0x1b0f   : > { %12341 = vmatprep.subr.bf16.mxu0 %v13917_v51  ;;  %v14140_v51 = vcombine.low %v9463_v3, %v9479_v56  ;;  %v14173_v36 = vcombine.high %v9495_v43, %v9511_v9  ;;  %v9206_v3 = vld [vmem:[%s21063_s2 + $0x628] sm:$0xff] }
0x1b10   : > { %v9222_v56 = vld [vmem:[%s21063_s2 + $0x6a8] sm:$0xff] }
0x1b11   : > { %12219 = vmatpush1.bf16.msra.mxu1 %v13910_v25  ;;  %v9017_v25 = vld [vmem:[%s21063_s2 + $0x40] sm:$0xff] }
0x1b12   : > { %12342 = vmatpush1.bf16.msra.mxu0 %v13916_v0  ;;  %12220 = vmatprep.subr.bf16.mxu1 %v13943_v45  ;;  %v9033_v0 = vld [vmem:[%s21063_s2 + $0xc0] sm:$0xff]  ;;  %v14166_v45 = vcombine.low %v9492_v5, %v9508_v31  ;;  %v13883_v5 = vcombine.high %v9206_v3, %v9222_v56 }
0x1b13   : > { %12343 = vmatprep.subr.bf16.mxu0 %v13949_v60  ;;  %v14172_v60 = vcombine.low %v9495_v43, %v9511_v9  ;;  %v13697_v8 = vcombine.high %v9017_v25, %v9033_v0  ;;  %v9238_v43 = vld [vmem:[%s21063_s2 + $0x728] sm:$0xff] }
0x1b14   : > { %v9254_v9 = vld [vmem:[%s21063_s2 + $0x7a8] sm:$0xff] }
0x1b15   : > { %12221 = vmatpush1.bf16.msra.mxu1 %v13942_v2  ;;  %v13690_v2 = vcombine.low %v9014_v29, %v9030_v40  ;;  %v13915_v29 = vcombine.high %v9238_v43, %v9254_v9 }
0x1b16   : > { %12344 = vmatpush1.bf16.msra.mxu0 %v13948_v61  ;;  %12222 = vmatprep.subr.bf16.mxu1 %v13975_v30  ;;  %v9049_v61 = vld [vmem:[%s21063_s2 + $0x140] sm:$0xff] }
0x1b17   : > { %12345 = vmatprep.subr.bf16.mxu0 %v13981_v6  ;;  %v9065_v30 = vld [vmem:[%s21063_s2 + $0x1c0] sm:$0xff]  ;;  %v13696_v6 = vcombine.low %v9017_v25, %v9033_v0  ;;  %v9270_v25 = vld [vmem:[%s21063_s2 + $0x828] sm:$0xff] }
0x1b18   : > { %v13729_v50 = vcombine.high %v9049_v61, %v9065_v30  ;;  %v9286_v0 = vld [vmem:[%s21063_s2 + $0x8a8] sm:$0xff] }
0x1b19   : > { %12223 = vmatpush1.bf16.msra.mxu1 %v13974_v7  ;;  %v9081_v7 = vld [vmem:[%s21063_s2 + $0x240] sm:$0xff] }
0x1b1a   : > { %12346 = vmatpush1.bf16.msra.mxu0 %v13980_v35  ;;  %12224 = vmatprep.subr.bf16.mxu1 %v14007_v23  ;;  %v9097_v35 = vld [vmem:[%s21063_s2 + $0x2c0] sm:$0xff]  ;;  %v13722_v23 = vcombine.low %v9046_v13, %v9062_v11  ;;  %v13947_v13 = vcombine.high %v9270_v25, %v9286_v0 }
0x1b1b   : > { %12347 = vmatprep.subr.bf16.mxu0 %v14013_v48  ;;  %v13728_v48 = vcombine.low %v9049_v61, %v9065_v30  ;;  %v13761_v27 = vcombine.high %v9081_v7, %v9097_v35  ;;  %v9318_v61 = vld [vmem:[%s21063_s2 + $0x9a8] sm:$0xff]  ;;  %v9305_v30 = vld [vmem:[%s21063_s2 + $0x940] sm:$0xff] }
0x1b1d   : > { %12225 = vmatpush1.bf16.msra.mxu1 %v14006_v22  ;;  %v9113_v22 = vld [vmem:[%s21063_s2 + $0x340] sm:$0xff] }
0x1b1e   : > { %12348 = vmatpush1.bf16.msra.mxu0 %v14012_v18  ;;  %12226 = vmatprep.subr.bf16.mxu1 %v14039_v34  ;;  %v9129_v18 = vld [vmem:[%s21063_s2 + $0x3c0] sm:$0xff]  ;;  %v13754_v34 = vcombine.low %v9078_v47, %v9094_v33 }
0x1b1f   : > { %12349 = vmatprep.subr.bf16.mxu0 %v14045_v21  ;;  %v13760_v21 = vcombine.low %v9081_v7, %v9097_v35  ;;  %v13793_v57 = vcombine.high %v9113_v22, %v9129_v18  ;;  %v9334_v7 = vld [vmem:[%s21063_s2 + $0xa28] sm:$0xff] }
0x1b20   : > { %v9350_v35 = vld [vmem:[%s21063_s2 + $0xaa8] sm:$0xff] }
0x1b21   : > { %12227 = vmatpush1.bf16.msra.mxu1 %v14038_v12  ;;  %v9145_v12 = vld [vmem:[%s21063_s2 + $0x440] sm:$0xff] }
0x1b22   : > { %12350 = vmatpush1.bf16.msra.mxu0 %v14044_v53  ;;  %12228 = vmatprep.subr.bf16.mxu1 %v14071_v55  ;;  %v9161_v53 = vld [vmem:[%s21063_s2 + $0x4c0] sm:$0xff]  ;;  %v13786_v55 = vcombine.low %v9110_v26, %v9126_v41  ;;  %v14011_v26 = vcombine.high %v9334_v7, %v9350_v35 }
0x1b23   : > { %12351 = vmatprep.subr.bf16.mxu0 %v14077_v20  ;;  %v13792_v20 = vcombine.low %v9113_v22, %v9129_v18  ;;  %v13825_v17 = vcombine.high %v9145_v12, %v9161_v53  ;;  %v9366_v22 = vld [vmem:[%s21063_s2 + $0xb28] sm:$0xff] }
0x1b24   : > { %v9382_v18 = vld [vmem:[%s21063_s2 + $0xba8] sm:$0xff] }
0x1b25   : > { %12229 = vmatpush1.bf16.msra.mxu1 %v14070_v59  ;;  %v9177_v59 = vld [vmem:[%s21063_s2 + $0x540] sm:$0xff] }
0x1b26   : > { %12352 = vmatpush1.bf16.msra.mxu0 %v14076_v54  ;;  %12230 = vmatprep.subr.bf16.mxu1 %v14103_v39  ;;  %v9193_v54 = vld [vmem:[%s21063_s2 + $0x5c0] sm:$0xff]  ;;  %v13818_v39 = vcombine.low %v9142_v15, %v9158_v63  ;;  %v14043_v15 = vcombine.high %v9366_v22, %v9382_v18 }
0x1b27   : > { %12353 = vmatprep.subr.bf16.mxu0 %v14109_v58  ;;  %v13824_v58 = vcombine.low %v9145_v12, %v9161_v53  ;;  %v13857_v38 = vcombine.high %v9177_v59, %v9193_v54  ;;  %v9398_v12 = vld [vmem:[%s21063_s2 + $0xc28] sm:$0xff] }
0x1b28   : > { %v9414_v53 = vld [vmem:[%s21063_s2 + $0xca8] sm:$0xff] }
0x1b29   : > { %12231 = vmatpush1.bf16.msra.mxu1 %v14102_v16  ;;  %v9209_v16 = vld [vmem:[%s21063_s2 + $0x640] sm:$0xff] }
0x1b2a   : > { %12354 = vmatpush1.bf16.msra.mxu0 %v14108_v52  ;;  %12232 = vmatprep.subr.bf16.mxu1 %v14135_v4  ;;  %v9225_v52 = vld [vmem:[%s21063_s2 + $0x6c0] sm:$0xff]  ;;  %v13850_v4 = vcombine.low %v9174_v44, %v9190_v49  ;;  %v14075_v44 = vcombine.high %v9398_v12, %v9414_v53 }
0x1b2b   : > { %12355 = vmatprep.subr.bf16.mxu0 %v14141_v32  ;;  %v13856_v32 = vcombine.low %v9177_v59, %v9193_v54  ;;  %v13889_v31 = vcombine.high %v9209_v16, %v9225_v52  ;;  %v9430_v59 = vld [vmem:[%s21063_s2 + $0xd28] sm:$0xff] }
0x1b2c   : > { %v9446_v54 = vld [vmem:[%s21063_s2 + $0xda8] sm:$0xff] }
0x1b2d   : > { %12233 = vmatpush1.bf16.msra.mxu1 %v14134_v1  ;;  %v9241_v1 = vld [vmem:[%s21063_s2 + $0x740] sm:$0xff] }
0x1b2e   : > { %12356 = vmatpush1.bf16.msra.mxu0 %v14140_v51  ;;  %12234 = vmatprep.subr.bf16.mxu1 %v14167_v24  ;;  %v9257_v51 = vld [vmem:[%s21063_s2 + $0x7c0] sm:$0xff]  ;;  %v13882_v24 = vcombine.low %v9206_v3, %v9222_v56  ;;  %v14107_v3 = vcombine.high %v9430_v59, %v9446_v54 }
0x1b2f   : > { %12357 = vmatprep.subr.bf16.mxu0 %v14173_v36  ;;  %v13888_v36 = vcombine.low %v9209_v16, %v9225_v52  ;;  %v13921_v40 = vcombine.high %v9241_v1, %v9257_v51  ;;  %v9462_v16 = vld [vmem:[%s21063_s2 + $0xe28] sm:$0xff] }
0x1b30   : > { %v9478_v52 = vld [vmem:[%s21063_s2 + $0xea8] sm:$0xff] }
0x1b31   : > { %12235 = vmatpush1.bf16.msra.mxu1 %v14166_v45  ;;  %v9273_v45 = vld [vmem:[%s21063_s2 + $0x840] sm:$0xff] }
0x1b32   : > { %12358 = vmatpush1.bf16.msra.mxu0 %v14172_v60  ;;  %12286 = vmatprep.subr.bf16.mxu1 %v13691_v37  ;;  %v9289_v60 = vld [vmem:[%s21063_s2 + $0x8c0] sm:$0xff]  ;;  %v13914_v37 = vcombine.low %v9238_v43, %v9254_v9  ;;  %v14139_v43 = vcombine.high %v9462_v16, %v9478_v52 }
0x1b33   : > { %12409 = vmatprep.subr.bf16.mxu0 %v13697_v8  ;;  %v13920_v8 = vcombine.low %v9241_v1, %v9257_v51  ;;  %v13953_v11 = vcombine.high %v9273_v45, %v9289_v60  ;;  %v13952_v47 = vcombine.low %v9273_v45, %v9289_v60  ;;  %v9494_v1 = vld [vmem:[%s21063_s2 + $0xf28] sm:$0xff]  ;;  %v9016_v45 = vld [vmem:[%s21063_s2 + $0x38] sm:$0xff] }
0x1b34   : > { %12237 = vmatmul.mubr.bf16.vlgmr.msra.gmra.mrb[144].mxu1 %v19169_v14  ;;  %v9510_v51 = vld [vmem:[%s21063_s2 + $0xfa8] sm:$0xff]  ;;  %v9032_v60 = vld [vmem:[%s21063_s2 + $0xb8] sm:$0xff] }
0x1b35   : > { %12360 = vmatmul.mubr.bf16.vlgmr.msra.gmra.mrb[228].mxu0 %v19169_v14  ;;  %12287 = vmatpush1.bf16.msra.mxu1 %v13690_v2  ;;  %v9302_v2 = vld [vmem:[%s21063_s2 + $0x928] sm:$0xff] }
0x1b36   : > { %12318 = vmatprep.mubr.bf16.mxu1 %v19171_v62  ;;  %12410 = vmatpush1.bf16.msra.mxu0 %v13696_v6  ;;  %v9321_v6 = vld [vmem:[%s21063_s2 + $0x9c0] sm:$0xff]  ;;  %v13979_v33 = vcombine.high %v9302_v2, %v9318_v61 }
0x1b37   : > { %12441 = vmatprep.mubr.bf16.mxu0 %v19171_v62  ;;  %12288 = vmatprep.subr.bf16.mxu1 %v13723_v46  ;;  %v13946_v46 = vcombine.low %v9270_v25, %v9286_v0  ;;  %v14171_v25 = vcombine.high %v9494_v1, %v9510_v51 }
0x1b38   : > { %12411 = vmatprep.subr.bf16.mxu0 %v13729_v50  ;;  %v13985_v50 = vcombine.high %v9305_v30, %v9321_v6 }
0x1b39   : > { %12289 = vmatpush1.bf16.msra.mxu1 %v13722_v23  ;;  %v9337_v23 = vld [vmem:[%s21063_s2 + $0xa40] sm:$0xff] }
0x1b3a   : > { %12412 = vmatpush1.bf16.msra.mxu0 %v13728_v48  ;;  %12290 = vmatprep.subr.bf16.mxu1 %v13755_v42  ;;  %v9353_v48 = vld [vmem:[%s21063_s2 + $0xac0] sm:$0xff]  ;;  %v13978_v42 = vcombine.low %v9302_v2, %v9318_v61  ;;  %v13695_v2 = vcombine.high %v9016_v45, %v9032_v60 }
0x1b3b   : > { %12413 = vmatprep.subr.bf16.mxu0 %v13761_v27  ;;  %v13984_v27 = vcombine.low %v9305_v30, %v9321_v6  ;;  %v14017_v41 = vcombine.high %v9337_v23, %v9353_v48  ;;  %v9048_v30 = vld [vmem:[%s21063_s2 + $0x138] sm:$0xff] }
0x1b3c   : > { %v9064_v6 = vld [vmem:[%s21063_s2 + $0x1b8] sm:$0xff] }
0x1b3d   : > { %12291 = vmatpush1.bf16.msra.mxu1 %v13754_v34  ;;  %v9369_v34 = vld [vmem:[%s21063_s2 + $0xb40] sm:$0xff] }
0x1b3e   : > { %12414 = vmatpush1.bf16.msra.mxu0 %v13760_v21  ;;  %12292 = vmatprep.subr.bf16.mxu1 %v13787_v28  ;;  %v9385_v21 = vld [vmem:[%s21063_s2 + $0xbc0] sm:$0xff]  ;;  %v14010_v28 = vcombine.low %v9334_v7, %v9350_v35  ;;  %v13727_v7 = vcombine.high %v9048_v30, %v9064_v6  ;;  %v9080_v35 = vld [vmem:[%s21063_s2 + $0x238] sm:$0xff] }
0x1b3f   : > { %12415 = vmatprep.subr.bf16.mxu0 %v13793_v57  ;;  %v14016_v57 = vcombine.low %v9337_v23, %v9353_v48  ;;  %v14049_v63 = vcombine.high %v9369_v34, %v9385_v21  ;;  %v9096_v23 = vld [vmem:[%s21063_s2 + $0x2b8] sm:$0xff] }
0x1b41   : > { %12293 = vmatpush1.bf16.msra.mxu1 %v13786_v55  ;;  %v9401_v55 = vld [vmem:[%s21063_s2 + $0xc40] sm:$0xff] }
0x1b42   : > { %12416 = vmatpush1.bf16.msra.mxu0 %v13792_v20  ;;  %12294 = vmatprep.subr.bf16.mxu1 %v13819_v19  ;;  %v9417_v20 = vld [vmem:[%s21063_s2 + $0xcc0] sm:$0xff]  ;;  %v14042_v19 = vcombine.low %v9366_v22, %v9382_v18  ;;  %v13759_v22 = vcombine.high %v9080_v35, %v9096_v23 }
0x1b43   : > { %12417 = vmatprep.subr.bf16.mxu0 %v13825_v17  ;;  %v14048_v17 = vcombine.low %v9369_v34, %v9385_v21  ;;  %v14081_v49 = vcombine.high %v9401_v55, %v9417_v20  ;;  %v9112_v34 = vld [vmem:[%s21063_s2 + $0x338] sm:$0xff] }
0x1b44   : > { %v9128_v21 = vld [vmem:[%s21063_s2 + $0x3b8] sm:$0xff] }
0x1b45   : > { %12295 = vmatpush1.bf16.msra.mxu1 %v13818_v39  ;;  %v9433_v39 = vld [vmem:[%s21063_s2 + $0xd40] sm:$0xff] }
0x1b46   : > { %12418 = vmatpush1.bf16.msra.mxu0 %v13824_v58  ;;  %12296 = vmatprep.subr.bf16.mxu1 %v13851_v10  ;;  %v9449_v58 = vld [vmem:[%s21063_s2 + $0xdc0] sm:$0xff]  ;;  %v14074_v10 = vcombine.low %v9398_v12, %v9414_v53  ;;  %v13791_v12 = vcombine.high %v9112_v34, %v9128_v21 }
0x1b47   : > { %12419 = vmatprep.subr.bf16.mxu0 %v13857_v38  ;;  %v14080_v38 = vcombine.low %v9401_v55, %v9417_v20  ;;  %v14113_v56 = vcombine.high %v9433_v39, %v9449_v58  ;;  %v9144_v55 = vld [vmem:[%s21063_s2 + $0x438] sm:$0xff] }
0x1b48   : > { %v9160_v20 = vld [vmem:[%s21063_s2 + $0x4b8] sm:$0xff] }
0x1b49   : > { %12297 = vmatpush1.bf16.msra.mxu1 %v13850_v4  ;;  %v9465_v4 = vld [vmem:[%s21063_s2 + $0xe40] sm:$0xff] }
0x1b4a   : > { %12420 = vmatpush1.bf16.msra.mxu0 %v13856_v32  ;;  %12298 = vmatprep.subr.bf16.mxu1 %v13883_v5  ;;  %v9481_v32 = vld [vmem:[%s21063_s2 + $0xec0] sm:$0xff]  ;;  %v14106_v5 = vcombine.low %v9430_v59, %v9446_v54  ;;  %v13823_v59 = vcombine.high %v9144_v55, %v9160_v20 }
0x1b4b   : > { %12421 = vmatprep.subr.bf16.mxu0 %v13889_v31  ;;  %v14112_v31 = vcombine.low %v9433_v39, %v9449_v58  ;;  %v14145_v9 = vcombine.high %v9465_v4, %v9481_v32  ;;  %v9176_v39 = vld [vmem:[%s21063_s2 + $0x538] sm:$0xff] }
0x1b4c   : > { %v9192_v58 = vld [vmem:[%s21063_s2 + $0x5b8] sm:$0xff] }
0x1b4d   : > { %12299 = vmatpush1.bf16.msra.mxu1 %v13882_v24  ;;  %v9497_v24 = vld [vmem:[%s21063_s2 + $0xf40] sm:$0xff] }
0x1b4e   : > { %12422 = vmatpush1.bf16.msra.mxu0 %v13888_v36  ;;  %12300 = vmatprep.subr.bf16.mxu1 %v13915_v29  ;;  %v9513_v36 = vld [vmem:[%s21063_s2 + $0xfc0] sm:$0xff]  ;;  %v14138_v29 = vcombine.low %v9462_v16, %v9478_v52  ;;  %v13855_v16 = vcombine.high %v9176_v39, %v9192_v58 }
0x1b4f   : > { %12423 = vmatprep.subr.bf16.mxu0 %v13921_v40  ;;  %v14144_v40 = vcombine.low %v9465_v4, %v9481_v32  ;;  %v14177_v0 = vcombine.high %v9497_v24, %v9513_v36  ;;  %v9208_v4 = vld [vmem:[%s21063_s2 + $0x638] sm:$0xff] }
0x1b50   : > { %v9224_v32 = vld [vmem:[%s21063_s2 + $0x6b8] sm:$0xff] }
0x1b51   : > { %12301 = vmatpush1.bf16.msra.mxu1 %v13914_v37  ;;  %v9019_v37 = vld [vmem:[%s21063_s2 + $0x50] sm:$0xff] }
0x1b52   : > { %12424 = vmatpush1.bf16.msra.mxu0 %v13920_v8  ;;  %12302 = vmatprep.subr.bf16.mxu1 %v13947_v13  ;;  %v9035_v8 = vld [vmem:[%s21063_s2 + $0xd0] sm:$0xff]  ;;  %v14170_v13 = vcombine.low %v9494_v1, %v9510_v51  ;;  %v13887_v1 = vcombine.high %v9208_v4, %v9224_v32 }
0x1b53   : > { %12425 = vmatprep.subr.bf16.mxu0 %v13953_v11  ;;  %v14176_v11 = vcombine.low %v9497_v24, %v9513_v36  ;;  %v13701_v61 = vcombine.high %v9019_v37, %v9035_v8 }
0x1b55   : > { %12303 = vmatpush1.bf16.msra.mxu1 %v13946_v46  ;;  %v13694_v46 = vcombine.low %v9016_v45, %v9032_v60  ;;  %v9243_v45 = vld [vmem:[%s21063_s2 + $0x750] sm:$0xff] }
0x1b56   : > { %12426 = vmatpush1.bf16.msra.mxu0 %v13952_v47  ;;  %12304 = vmatprep.subr.bf16.mxu1 %v13979_v33  ;;  %v9051_v47 = vld [vmem:[%s21063_s2 + $0x150] sm:$0xff] }
0x1b57   : > { %12427 = vmatprep.subr.bf16.mxu0 %v13985_v50  ;;  %v9067_v33 = vld [vmem:[%s21063_s2 + $0x1d0] sm:$0xff]  ;;  %v13700_v50 = vcombine.low %v9019_v37, %v9035_v8 }
0x1b58   : > { %v13733_v48 = vcombine.high %v9051_v47, %v9067_v33  ;;  %v9259_v60 = vld [vmem:[%s21063_s2 + $0x7d0] sm:$0xff] }
0x1b59   : > { %12305 = vmatpush1.bf16.msra.mxu1 %v13978_v42  ;;  %v9083_v42 = vld [vmem:[%s21063_s2 + $0x250] sm:$0xff] }
0x1b5a   : > { %12428 = vmatpush1.bf16.msra.mxu0 %v13984_v27  ;;  %12306 = vmatprep.subr.bf16.mxu1 %v14011_v26  ;;  %v9099_v27 = vld [vmem:[%s21063_s2 + $0x2d0] sm:$0xff]  ;;  %v13726_v26 = vcombine.low %v9048_v30, %v9064_v6  ;;  %v13925_v6 = vcombine.high %v9243_v45, %v9259_v60 }
0x1b5b   : > { %12429 = vmatprep.subr.bf16.mxu0 %v14017_v41  ;;  %v13732_v41 = vcombine.low %v9051_v47, %v9067_v33  ;;  %v13765_v18 = vcombine.high %v9083_v42, %v9099_v27  ;;  %v9288_v47 = vld [vmem:[%s21063_s2 + $0x8b8] sm:$0xff]  ;;  %v9275_v33 = vld [vmem:[%s21063_s2 + $0x850] sm:$0xff] }
0x1b5d   : > { %12307 = vmatpush1.bf16.msra.mxu1 %v14010_v28  ;;  %v9115_v28 = vld [vmem:[%s21063_s2 + $0x350] sm:$0xff] }
0x1b5e   : > { %12430 = vmatpush1.bf16.msra.mxu0 %v14016_v57  ;;  %12308 = vmatprep.subr.bf16.mxu1 %v14043_v15  ;;  %v9131_v57 = vld [vmem:[%s21063_s2 + $0x3d0] sm:$0xff]  ;;  %v13758_v15 = vcombine.low %v9080_v35, %v9096_v23  ;;  %v13924_v35 = vcombine.low %v9243_v45, %v9259_v60 }
0x1b5f   : > { %12431 = vmatprep.subr.bf16.mxu0 %v14049_v63  ;;  %v13764_v63 = vcombine.low %v9083_v42, %v9099_v27  ;;  %v13797_v53 = vcombine.high %v9115_v28, %v9131_v57  ;;  %v9304_v42 = vld [vmem:[%s21063_s2 + $0x938] sm:$0xff] }
0x1b60   : > { %v9320_v27 = vld [vmem:[%s21063_s2 + $0x9b8] sm:$0xff] }
0x1b61   : > { %12309 = vmatpush1.bf16.msra.mxu1 %v14042_v19  ;;  %v9147_v19 = vld [vmem:[%s21063_s2 + $0x450] sm:$0xff] }
0x1b62   : > { %12432 = vmatpush1.bf16.msra.mxu0 %v14048_v17  ;;  %12310 = vmatprep.subr.bf16.mxu1 %v14075_v44  ;;  %v9163_v17 = vld [vmem:[%s21063_s2 + $0x4d0] sm:$0xff]  ;;  %v13790_v44 = vcombine.low %v9112_v34, %v9128_v21  ;;  %v13983_v34 = vcombine.high %v9304_v42, %v9320_v27 }
0x1b63   : > { %12433 = vmatprep.subr.bf16.mxu0 %v14081_v49  ;;  %v13796_v49 = vcombine.low %v9115_v28, %v9131_v57  ;;  %v13829_v54 = vcombine.high %v9147_v19, %v9163_v17  ;;  %v9336_v28 = vld [vmem:[%s21063_s2 + $0xa38] sm:$0xff] }
0x1b64   : > { %v9352_v57 = vld [vmem:[%s21063_s2 + $0xab8] sm:$0xff] }
0x1b65   : > { %12311 = vmatpush1.bf16.msra.mxu1 %v14074_v10  ;;  %v9179_v10 = vld [vmem:[%s21063_s2 + $0x550] sm:$0xff] }
0x1b66   : > { %12434 = vmatpush1.bf16.msra.mxu0 %v14080_v38  ;;  %12312 = vmatprep.subr.bf16.mxu1 %v14107_v3  ;;  %v9195_v38 = vld [vmem:[%s21063_s2 + $0x5d0] sm:$0xff]  ;;  %v13822_v3 = vcombine.low %v9144_v55, %v9160_v20  ;;  %v14015_v55 = vcombine.high %v9336_v28, %v9352_v57 }
0x1b67   : > { %12435 = vmatprep.subr.bf16.mxu0 %v14113_v56  ;;  %v13828_v56 = vcombine.low %v9147_v19, %v9163_v17  ;;  %v13861_v52 = vcombine.high %v9179_v10, %v9195_v38  ;;  %v9368_v19 = vld [vmem:[%s21063_s2 + $0xb38] sm:$0xff] }
0x1b68   : > { %v9384_v17 = vld [vmem:[%s21063_s2 + $0xbb8] sm:$0xff] }
0x1b69   : > { %12313 = vmatpush1.bf16.msra.mxu1 %v14106_v5  ;;  %v9211_v5 = vld [vmem:[%s21063_s2 + $0x650] sm:$0xff] }
0x1b6a   : > { %12436 = vmatpush1.bf16.msra.mxu0 %v14112_v31  ;;  %12314 = vmatprep.subr.bf16.mxu1 %v14139_v43  ;;  %v9227_v31 = vld [vmem:[%s21063_s2 + $0x6d0] sm:$0xff]  ;;  %v13854_v43 = vcombine.low %v9176_v39, %v9192_v58  ;;  %v14047_v39 = vcombine.high %v9368_v19, %v9384_v17 }
0x1b6b   : > { %12437 = vmatprep.subr.bf16.mxu0 %v14145_v9  ;;  %v13860_v9 = vcombine.low %v9179_v10, %v9195_v38  ;;  %v13893_v36 = vcombine.high %v9211_v5, %v9227_v31  ;;  %v9400_v10 = vld [vmem:[%s21063_s2 + $0xc38] sm:$0xff] }
0x1b6c   : > { %v9416_v38 = vld [vmem:[%s21063_s2 + $0xcb8] sm:$0xff] }
0x1b6d   : > { %12315 = vmatpush1.bf16.msra.mxu1 %v14138_v29  ;;  %v9240_v29 = vld [vmem:[%s21063_s2 + $0x738] sm:$0xff] }
0x1b6e   : > { %12438 = vmatpush1.bf16.msra.mxu0 %v14144_v40  ;;  %12316 = vmatprep.subr.bf16.mxu1 %v14171_v25  ;;  %v9256_v40 = vld [vmem:[%s21063_s2 + $0x7b8] sm:$0xff] }
0x1b6f   : > { %12439 = vmatprep.subr.bf16.mxu0 %v14177_v0  ;;  %v13919_v30 = vcombine.high %v9240_v29, %v9256_v40 }
0x1b71   : > { %12317 = vmatpush1.bf16.msra.mxu1 %v14170_v13  ;;  %v13886_v13 = vcombine.low %v9208_v4, %v9224_v32  ;;  %v14079_v4 = vcombine.high %v9400_v10, %v9416_v38 }
0x1b72   : > { %12440 = vmatpush1.bf16.msra.mxu0 %v14176_v11  ;;  %12368 = vmatprep.subr.bf16.mxu1 %v13695_v2 }
0x1b73   : > { %12491 = vmatprep.subr.bf16.mxu0 %v13701_v61  ;;  %v13892_v61 = vcombine.low %v9211_v5, %v9227_v31  ;;  %v9432_v5 = vld [vmem:[%s21063_s2 + $0xd38] sm:$0xff] }
0x1b74   : > { %12319 = vmatmul.mubr.bf16.vlgmr.msra.gmra.mrb[148].mxu1 %v19169_v14  ;;  %v9448_v31 = vld [vmem:[%s21063_s2 + $0xdb8] sm:$0xff] }
0x1b75   : > { %12442 = vmatmul.mubr.bf16.vlgmr.msra.gmra.mrb[232].mxu0 %v19169_v14  ;;  %12369 = vmatpush1.bf16.msra.mxu1 %v13694_v46  ;;  %v9272_v46 = vld [vmem:[%s21063_s2 + $0x838] sm:$0xff]  ;;  %v14110_v45 = vcombine.low %v9432_v5, %v9448_v31 }
0x1b76   : > { %12400 = vmatprep.mubr.bf16.mxu1 %v19171_v62  ;;  %12492 = vmatpush1.bf16.msra.mxu0 %v13700_v50  ;;  %v9291_v50 = vld [vmem:[%s21063_s2 + $0x8d0] sm:$0xff]  ;;  %v13951_v23 = vcombine.high %v9272_v46, %v9288_v47 }
0x1b77   : > { %12523 = vmatprep.mubr.bf16.mxu0 %v19171_v62  ;;  %12370 = vmatprep.subr.bf16.mxu1 %v13727_v7  ;;  %v13918_v7 = vcombine.low %v9240_v29, %v9256_v40  ;;  %v9464_v29 = vld [vmem:[%s21063_s2 + $0xe38] sm:$0xff] }
0x1b78   : > { %12493 = vmatprep.subr.bf16.mxu0 %v13733_v48  ;;  %v13957_v48 = vcombine.high %v9275_v33, %v9291_v50  ;;  %v9480_v40 = vld [vmem:[%s21063_s2 + $0xeb8] sm:$0xff] }
0x1b79   : > { %12371 = vmatpush1.bf16.msra.mxu1 %v13726_v26  ;;  %v9307_v26 = vld [vmem:[%s21063_s2 + $0x950] sm:$0xff] }
0x1b7a   : > { %12494 = vmatpush1.bf16.msra.mxu0 %v13732_v41  ;;  %12372 = vmatprep.subr.bf16.mxu1 %v13759_v22  ;;  %v9323_v41 = vld [vmem:[%s21063_s2 + $0x9d0] sm:$0xff]  ;;  %v13950_v22 = vcombine.low %v9272_v46, %v9288_v47 }
0x1b7b   : > { %12495 = vmatprep.subr.bf16.mxu0 %v13765_v18  ;;  %v13956_v18 = vcombine.low %v9275_v33, %v9291_v50  ;;  %v13989_v21 = vcombine.high %v9307_v26, %v9323_v41  ;;  %v9018_v33 = vld [vmem:[%s21063_s2 + $0x48] sm:$0xff] }
0x1b7c   : > { %v9034_v50 = vld [vmem:[%s21063_s2 + $0xc8] sm:$0xff] }
0x1b7d   : > { %12373 = vmatpush1.bf16.msra.mxu1 %v13758_v15  ;;  %v9339_v15 = vld [vmem:[%s21063_s2 + $0xa50] sm:$0xff] }
0x1b7e   : > { %12496 = vmatpush1.bf16.msra.mxu0 %v13764_v63  ;;  %12374 = vmatprep.subr.bf16.mxu1 %v13791_v12  ;;  %v9355_v63 = vld [vmem:[%s21063_s2 + $0xad0] sm:$0xff]  ;;  %v13982_v12 = vcombine.low %v9304_v42, %v9320_v27  ;;  %v13699_v42 = vcombine.high %v9018_v33, %v9034_v50 }
0x1b7f   : > { %12497 = vmatprep.subr.bf16.mxu0 %v13797_v53  ;;  %v13988_v53 = vcombine.low %v9307_v26, %v9323_v41  ;;  %v14021_v20 = vcombine.high %v9339_v15, %v9355_v63  ;;  %v9050_v26 = vld [vmem:[%s21063_s2 + $0x148] sm:$0xff] }
0x1b80   : > { %v9066_v41 = vld [vmem:[%s21063_s2 + $0x1c8] sm:$0xff] }
0x1b81   : > { %12375 = vmatpush1.bf16.msra.mxu1 %v13790_v44  ;;  %v9371_v44 = vld [vmem:[%s21063_s2 + $0xb50] sm:$0xff] }
0x1b82   : > { %12498 = vmatpush1.bf16.msra.mxu0 %v13796_v49  ;;  %12376 = vmatprep.subr.bf16.mxu1 %v13823_v59  ;;  %v9387_v49 = vld [vmem:[%s21063_s2 + $0xbd0] sm:$0xff]  ;;  %v14014_v59 = vcombine.low %v9336_v28, %v9352_v57  ;;  %v13731_v28 = vcombine.high %v9050_v26, %v9066_v41  ;;  %v9082_v57 = vld [vmem:[%s21063_s2 + $0x248] sm:$0xff] }
0x1b83   : > { %12499 = vmatprep.subr.bf16.mxu0 %v13829_v54  ;;  %v14020_v54 = vcombine.low %v9339_v15, %v9355_v63  ;;  %v14053_v58 = vcombine.high %v9371_v44, %v9387_v49  ;;  %v9098_v15 = vld [vmem:[%s21063_s2 + $0x2c8] sm:$0xff] }
0x1b85   : > { %12377 = vmatpush1.bf16.msra.mxu1 %v13822_v3  ;;  %v9403_v3 = vld [vmem:[%s21063_s2 + $0xc50] sm:$0xff] }
0x1b86   : > { %12500 = vmatpush1.bf16.msra.mxu0 %v13828_v56  ;;  %12378 = vmatprep.subr.bf16.mxu1 %v13855_v16  ;;  %v9419_v56 = vld [vmem:[%s21063_s2 + $0xcd0] sm:$0xff]  ;;  %v14046_v16 = vcombine.low %v9368_v19, %v9384_v17  ;;  %v13763_v19 = vcombine.high %v9082_v57, %v9098_v15 }
0x1b87   : > { %12501 = vmatprep.subr.bf16.mxu0 %v13861_v52  ;;  %v12115_v51 = vpop.f32.mrb[136].mxu1  ;;  %v12197_v24 = vpop.f32.mrb[220].mxu0  ;;  %v14052_v52 = vcombine.low %v9371_v44, %v9387_v49  ;;  %v14085_v32 = vcombine.high %v9403_v3, %v9419_v56  ;;  %v9114_v44 = vld [vmem:[%s21063_s2 + $0x348] sm:$0xff] }
0x1b88   : > { %12737 = vst [vmem:[%s19837_s4] sm:$0xff] %v12115_v51  ;;  %12741 = vst [vmem:[%s19837_s4 + $0x20] sm:$0xff] %v12197_v24  ;;  %v12117_v25 = vpop.f32.mrb[137].mxu1  ;;  %v12199_v0 = vpop.f32.mrb[221].mxu0  ;;  %v14084_v51 = vcombine.low %v9403_v3, %v9419_v56  ;;  %v14111_v24 = vcombine.high %v9432_v5, %v9448_v31  ;;  %v9130_v49 = vld [vmem:[%s21063_s2 + $0x3c8] sm:$0xff] }
0x1b89   : > { %12379 = vmatpush1.bf16.msra.mxu1 %v13854_v43  ;;  %12738 = vst [vmem:[%s19837_s4 + $0x8] sm:$0xff] %v12117_v25  ;;  %12742 = vst [vmem:[%s19837_s4 + $0x28] sm:$0xff] %v12199_v0  ;;  %v12119_v37 = vpop.f32.mrb[138].mxu1  ;;  %v12201_v8 = vpop.f32.mrb[222].mxu0  ;;  %v9435_v43 = vld [vmem:[%s21063_s2 + $0xd50] sm:$0xff]  ;;  %v9146_v3 = vld [vmem:[%s21063_s2 + $0x448] sm:$0xff] }
0x1b8a   : > { %12502 = vmatpush1.bf16.msra.mxu0 %v13860_v9  ;;  %v12120_v11 = vpop.f32.mrb[139].mxu1  ;;  %v12202_v2 = vpop.f32.mrb[223].mxu0  ;;  %12380 = vmatprep.subr.bf16.mxu1 %v13887_v1  ;;  %v9451_v9 = vld [vmem:[%s21063_s2 + $0xdd0] sm:$0xff]  ;;  %v14078_v1 = vcombine.low %v9400_v10, %v9416_v38  ;;  %v14143_v37 = vcombine.high %v9464_v29, %v9480_v40  ;;  %v13795_v10 = vcombine.high %v9114_v44, %v9130_v49  ;;  %v9162_v56 = vld [vmem:[%s21063_s2 + $0x4c8] sm:$0xff] }
0x1b8b   : > { %12503 = vmatprep.subr.bf16.mxu0 %v13893_v36  ;;  %v14117_v36 = vcombine.high %v9435_v43, %v9451_v9  ;;  %v9467_v25 = vld [vmem:[%s21063_s2 + $0xe50] sm:$0xff]  ;;  %v14116_v60 = vcombine.low %v9435_v43, %v9451_v9  ;;  %v9512_v11 = vld [vmem:[%s21063_s2 + $0xfb8] sm:$0xff]  ;;  %v13827_v5 = vcombine.high %v9146_v3, %v9162_v56  ;;  %v9178_v43 = vld [vmem:[%s21063_s2 + $0x548] sm:$0xff] }
0x1b8c   : > { %v9483_v0 = vld [vmem:[%s21063_s2 + $0xed0] sm:$0xff]  ;;  %v9194_v9 = vld [vmem:[%s21063_s2 + $0x5c8] sm:$0xff] }
0x1b8d   : > { %12381 = vmatpush1.bf16.msra.mxu1 %v13886_v13  ;;  %v14149_v8 = vcombine.high %v9467_v25, %v9483_v0  ;;  %v9496_v13 = vld [vmem:[%s21063_s2 + $0xf38] sm:$0xff]  ;;  %v9499_v2 = vld [vmem:[%s21063_s2 + $0xf50] sm:$0xff] }
0x1b8e   : > { %12504 = vmatpush1.bf16.msra.mxu0 %v13892_v61  ;;  %12382 = vmatprep.subr.bf16.mxu1 %v13919_v30  ;;  %v9515_v61 = vld [vmem:[%s21063_s2 + $0xfd0] sm:$0xff]  ;;  %v14142_v30 = vcombine.low %v9464_v29, %v9480_v40  ;;  %v14175_v46 = vcombine.high %v9496_v13, %v9512_v11  ;;  %v13859_v29 = vcombine.high %v9178_v43, %v9194_v9 }
0x1b8f   : > { %12505 = vmatprep.subr.bf16.mxu0 %v13925_v6  ;;  %v14148_v6 = vcombine.low %v9467_v25, %v9483_v0  ;;  %v14181_v47 = vcombine.high %v9499_v2, %v9515_v61  ;;  %v9210_v25 = vld [vmem:[%s21063_s2 + $0x648] sm:$0xff] }
0x1b90   : > { %v9226_v0 = vld [vmem:[%s21063_s2 + $0x6c8] sm:$0xff] }
0x1b91   : > { %12383 = vmatpush1.bf16.msra.mxu1 %v13918_v7  ;;  %v9021_v7 = vld [vmem:[%s21063_s2 + $0x60] sm:$0xff] }
0x1b92   : > { %12506 = vmatpush1.bf16.msra.mxu0 %v13924_v35  ;;  %12384 = vmatprep.subr.bf16.mxu1 %v13951_v23  ;;  %v9037_v35 = vld [vmem:[%s21063_s2 + $0xe0] sm:$0xff]  ;;  %v14174_v23 = vcombine.low %v9496_v13, %v9512_v11  ;;  %v13891_v13 = vcombine.high %v9210_v25, %v9226_v0 }
0x1b93   : > { %12507 = vmatprep.subr.bf16.mxu0 %v13957_v48  ;;  %v14180_v48 = vcombine.low %v9499_v2, %v9515_v61  ;;  %v13705_v27 = vcombine.high %v9021_v7, %v9037_v35 }
0x1b95   : > { %12385 = vmatpush1.bf16.msra.mxu1 %v13950_v22  ;;  %v13698_v22 = vcombine.low %v9018_v33, %v9034_v50  ;;  %v9245_v33 = vld [vmem:[%s21063_s2 + $0x760] sm:$0xff] }
0x1b96   : > { %12508 = vmatpush1.bf16.msra.mxu0 %v13956_v18  ;;  %12386 = vmatprep.subr.bf16.mxu1 %v13983_v34  ;;  %v9053_v18 = vld [vmem:[%s21063_s2 + $0x160] sm:$0xff] }
0x1b97   : > { %12509 = vmatprep.subr.bf16.mxu0 %v13989_v21  ;;  %v9069_v34 = vld [vmem:[%s21063_s2 + $0x1e0] sm:$0xff]  ;;  %v13704_v21 = vcombine.low %v9021_v7, %v9037_v35 }
0x1b98   : > { %v13737_v63 = vcombine.high %v9053_v18, %v9069_v34  ;;  %v9261_v50 = vld [vmem:[%s21063_s2 + $0x7e0] sm:$0xff] }
0x1b99   : > { %12387 = vmatpush1.bf16.msra.mxu1 %v13982_v12  ;;  %v9085_v12 = vld [vmem:[%s21063_s2 + $0x260] sm:$0xff] }
0x1b9a   : > { %12510 = vmatpush1.bf16.msra.mxu0 %v13988_v53  ;;  %12388 = vmatprep.subr.bf16.mxu1 %v14015_v55  ;;  %v9101_v53 = vld [vmem:[%s21063_s2 + $0x2e0] sm:$0xff]  ;;  %v13730_v55 = vcombine.low %v9050_v26, %v9066_v41  ;;  %v13929_v41 = vcombine.high %v9245_v33, %v9261_v50 }
0x1b9b   : > { %12511 = vmatprep.subr.bf16.mxu0 %v14021_v20  ;;  %v13736_v20 = vcombine.low %v9053_v18, %v9069_v34  ;;  %v13769_v17 = vcombine.high %v9085_v12, %v9101_v53  ;;  %v9290_v18 = vld [vmem:[%s21063_s2 + $0x8c8] sm:$0xff]  ;;  %v9277_v34 = vld [vmem:[%s21063_s2 + $0x860] sm:$0xff] }
0x1b9d   : > { %12389 = vmatpush1.bf16.msra.mxu1 %v14014_v59  ;;  %v9117_v59 = vld [vmem:[%s21063_s2 + $0x360] sm:$0xff] }
0x1b9e   : > { %12512 = vmatpush1.bf16.msra.mxu0 %v14020_v54  ;;  %12390 = vmatprep.subr.bf16.mxu1 %v14047_v39  ;;  %v9133_v54 = vld [vmem:[%s21063_s2 + $0x3e0] sm:$0xff]  ;;  %v13762_v39 = vcombine.low %v9082_v57, %v9098_v15  ;;  %v13928_v57 = vcombine.low %v9245_v33, %v9261_v50 }
0x1b9f   : > { %12513 = vmatprep.subr.bf16.mxu0 %v14053_v58  ;;  %v13768_v58 = vcombine.low %v9085_v12, %v9101_v53  ;;  %v13801_v38 = vcombine.high %v9117_v59, %v9133_v54  ;;  %v9306_v12 = vld [vmem:[%s21063_s2 + $0x948] sm:$0xff] }
0x1ba0   : > { %v9322_v53 = vld [vmem:[%s21063_s2 + $0x9c8] sm:$0xff] }
0x1ba1   : > { %12391 = vmatpush1.bf16.msra.mxu1 %v14046_v16  ;;  %v9149_v16 = vld [vmem:[%s21063_s2 + $0x460] sm:$0xff] }
0x1ba2   : > { %12514 = vmatpush1.bf16.msra.mxu0 %v14052_v52  ;;  %12392 = vmatprep.subr.bf16.mxu1 %v14079_v4  ;;  %v9165_v52 = vld [vmem:[%s21063_s2 + $0x4e0] sm:$0xff]  ;;  %v13794_v4 = vcombine.low %v9114_v44, %v9130_v49  ;;  %v13987_v44 = vcombine.high %v9306_v12, %v9322_v53 }
0x1ba3   : > { %12515 = vmatprep.subr.bf16.mxu0 %v14085_v32  ;;  %v13800_v32 = vcombine.low %v9117_v59, %v9133_v54  ;;  %v13833_v31 = vcombine.high %v9149_v16, %v9165_v52  ;;  %v9338_v59 = vld [vmem:[%s21063_s2 + $0xa48] sm:$0xff] }
0x1ba4   : > { %v9354_v54 = vld [vmem:[%s21063_s2 + $0xac8] sm:$0xff] }
0x1ba5   : > { %12393 = vmatpush1.bf16.msra.mxu1 %v14078_v1  ;;  %v9181_v1 = vld [vmem:[%s21063_s2 + $0x560] sm:$0xff] }
0x1ba6   : > { %12516 = vmatpush1.bf16.msra.mxu0 %v14084_v51  ;;  %12394 = vmatprep.subr.bf16.mxu1 %v14111_v24  ;;  %v9197_v51 = vld [vmem:[%s21063_s2 + $0x5e0] sm:$0xff]  ;;  %v13826_v24 = vcombine.low %v9146_v3, %v9162_v56  ;;  %v14019_v3 = vcombine.high %v9338_v59, %v9354_v54 }
0x1ba7   : > { %12517 = vmatprep.subr.bf16.mxu0 %v14117_v36  ;;  %v13832_v36 = vcombine.low %v9149_v16, %v9165_v52  ;;  %v13865_v40 = vcombine.high %v9181_v1, %v9197_v51  ;;  %v9370_v16 = vld [vmem:[%s21063_s2 + $0xb48] sm:$0xff] }
0x1ba8   : > { %v9386_v52 = vld [vmem:[%s21063_s2 + $0xbc8] sm:$0xff] }
0x1ba9   : > { %12395 = vmatpush1.bf16.msra.mxu1 %v14110_v45  ;;  %v9213_v45 = vld [vmem:[%s21063_s2 + $0x660] sm:$0xff] }
0x1baa   : > { %12518 = vmatpush1.bf16.msra.mxu0 %v14116_v60  ;;  %12396 = vmatprep.subr.bf16.mxu1 %v14143_v37  ;;  %v9229_v60 = vld [vmem:[%s21063_s2 + $0x6e0] sm:$0xff]  ;;  %v13858_v37 = vcombine.low %v9178_v43, %v9194_v9  ;;  %v14051_v43 = vcombine.high %v9370_v16, %v9386_v52 }
0x1bab   : > { %12519 = vmatprep.subr.bf16.mxu0 %v14149_v8  ;;  %v13864_v8 = vcombine.low %v9181_v1, %v9197_v51  ;;  %v13897_v61 = vcombine.high %v9213_v45, %v9229_v60  ;;  %v9402_v1 = vld [vmem:[%s21063_s2 + $0xc48] sm:$0xff] }
0x1bac   : > { %v9418_v51 = vld [vmem:[%s21063_s2 + $0xcc8] sm:$0xff] }
0x1bad   : > { %12397 = vmatpush1.bf16.msra.mxu1 %v14142_v30  ;;  %v9242_v30 = vld [vmem:[%s21063_s2 + $0x748] sm:$0xff] }
0x1bae   : > { %12520 = vmatpush1.bf16.msra.mxu0 %v14148_v6  ;;  %12398 = vmatprep.subr.bf16.mxu1 %v14175_v46  ;;  %v9258_v6 = vld [vmem:[%s21063_s2 + $0x7c8] sm:$0xff] }
0x1baf   : > { %12521 = vmatprep.subr.bf16.mxu0 %v14181_v47  ;;  %v13923_v26 = vcombine.high %v9242_v30, %v9258_v6 }
0x1bb1   : > { %12399 = vmatpush1.bf16.msra.mxu1 %v14174_v23  ;;  %v13890_v23 = vcombine.low %v9210_v25, %v9226_v0  ;;  %v14083_v25 = vcombine.high %v9402_v1, %v9418_v51 }
0x1bb2   : > { %12522 = vmatpush1.bf16.msra.mxu0 %v14180_v48  ;;  %12450 = vmatprep.subr.bf16.mxu1 %v13699_v42 }
0x1bb3   : > { %12573 = vmatprep.subr.bf16.mxu0 %v13705_v27  ;;  %v13896_v27 = vcombine.low %v9213_v45, %v9229_v60  ;;  %v9434_v45 = vld [vmem:[%s21063_s2 + $0xd48] sm:$0xff] }
0x1bb4   : > { %12401 = vmatmul.mubr.bf16.vlgmr.msra.gmra.mrb[152].mxu1 %v19169_v14  ;;  %v9450_v60 = vld [vmem:[%s21063_s2 + $0xdc8] sm:$0xff] }
0x1bb5   : > { %12524 = vmatmul.mubr.bf16.vlgmr.msra.gmra.mrb[236].mxu0 %v19169_v14  ;;  %12451 = vmatpush1.bf16.msra.mxu1 %v13698_v22  ;;  %v9274_v22 = vld [vmem:[%s21063_s2 + $0x848] sm:$0xff]  ;;  %v14114_v33 = vcombine.low %v9434_v45, %v9450_v60 }
0x1bb6   : > { %12482 = vmatprep.mubr.bf16.mxu1 %v19171_v62  ;;  %12574 = vmatpush1.bf16.msra.mxu0 %v13704_v21  ;;  %v9293_v21 = vld [vmem:[%s21063_s2 + $0x8e0] sm:$0xff]  ;;  %v13955_v15 = vcombine.high %v9274_v22, %v9290_v18 }
0x1bb7   : > { %12605 = vmatprep.mubr.bf16.mxu0 %v19171_v62  ;;  %12452 = vmatprep.subr.bf16.mxu1 %v13731_v28  ;;  %v13922_v28 = vcombine.low %v9242_v30, %v9258_v6  ;;  %v9466_v30 = vld [vmem:[%s21063_s2 + $0xe48] sm:$0xff] }
0x1bb8   : > { %12575 = vmatprep.subr.bf16.mxu0 %v13737_v63  ;;  %v13961_v63 = vcombine.high %v9277_v34, %v9293_v21  ;;  %v9482_v6 = vld [vmem:[%s21063_s2 + $0xec8] sm:$0xff] }
0x1bb9   : > { %12453 = vmatpush1.bf16.msra.mxu1 %v13730_v55  ;;  %v9309_v55 = vld [vmem:[%s21063_s2 + $0x960] sm:$0xff] }
0x1bba   : > { %12576 = vmatpush1.bf16.msra.mxu0 %v13736_v20  ;;  %12454 = vmatprep.subr.bf16.mxu1 %v13763_v19  ;;  %v9325_v20 = vld [vmem:[%s21063_s2 + $0x9e0] sm:$0xff]  ;;  %v13954_v19 = vcombine.low %v9274_v22, %v9290_v18 }
0x1bbb   : > { %12577 = vmatprep.subr.bf16.mxu0 %v13769_v17  ;;  %v13960_v17 = vcombine.low %v9277_v34, %v9293_v21  ;;  %v13993_v49 = vcombine.high %v9309_v55, %v9325_v20  ;;  %v9020_v34 = vld [vmem:[%s21063_s2 + $0x58] sm:$0xff] }
0x1bbc   : > { %v9036_v21 = vld [vmem:[%s21063_s2 + $0xd8] sm:$0xff] }
0x1bbd   : > { %12455 = vmatpush1.bf16.msra.mxu1 %v13762_v39  ;;  %v9341_v39 = vld [vmem:[%s21063_s2 + $0xa60] sm:$0xff] }
0x1bbe   : > { %12578 = vmatpush1.bf16.msra.mxu0 %v13768_v58  ;;  %12456 = vmatprep.subr.bf16.mxu1 %v13795_v10  ;;  %v9357_v58 = vld [vmem:[%s21063_s2 + $0xae0] sm:$0xff]  ;;  %v13986_v10 = vcombine.low %v9306_v12, %v9322_v53  ;;  %v13703_v12 = vcombine.high %v9020_v34, %v9036_v21 }
0x1bbf   : > { %12579 = vmatprep.subr.bf16.mxu0 %v13801_v38  ;;  %v13992_v38 = vcombine.low %v9309_v55, %v9325_v20  ;;  %v14025_v56 = vcombine.high %v9341_v39, %v9357_v58  ;;  %v9052_v55 = vld [vmem:[%s21063_s2 + $0x158] sm:$0xff] }
0x1bc0   : > { %v9068_v20 = vld [vmem:[%s21063_s2 + $0x1d8] sm:$0xff] }
0x1bc1   : > { %12457 = vmatpush1.bf16.msra.mxu1 %v13794_v4  ;;  %v9373_v4 = vld [vmem:[%s21063_s2 + $0xb60] sm:$0xff] }
0x1bc2   : > { %12580 = vmatpush1.bf16.msra.mxu0 %v13800_v32  ;;  %12458 = vmatprep.subr.bf16.mxu1 %v13827_v5  ;;  %v9389_v32 = vld [vmem:[%s21063_s2 + $0xbe0] sm:$0xff]  ;;  %v14018_v5 = vcombine.low %v9338_v59, %v9354_v54  ;;  %v13735_v59 = vcombine.high %v9052_v55, %v9068_v20  ;;  %v9084_v54 = vld [vmem:[%s21063_s2 + $0x258] sm:$0xff] }
0x1bc3   : > { %12581 = vmatprep.subr.bf16.mxu0 %v13833_v31  ;;  %v14024_v31 = vcombine.low %v9341_v39, %v9357_v58  ;;  %v14057_v9 = vcombine.high %v9373_v4, %v9389_v32  ;;  %v9100_v39 = vld [vmem:[%s21063_s2 + $0x2d8] sm:$0xff] }
0x1bc5   : > { %12459 = vmatpush1.bf16.msra.mxu1 %v13826_v24  ;;  %v9405_v24 = vld [vmem:[%s21063_s2 + $0xc60] sm:$0xff] }
0x1bc6   : > { %12582 = vmatpush1.bf16.msra.mxu0 %v13832_v36  ;;  %12460 = vmatprep.subr.bf16.mxu1 %v13859_v29  ;;  %v9421_v36 = vld [vmem:[%s21063_s2 + $0xce0] sm:$0xff]  ;;  %v14050_v29 = vcombine.low %v9370_v16, %v9386_v52  ;;  %v13767_v16 = vcombine.high %v9084_v54, %v9100_v39 }
0x1bc7   : > { %v12156_v11 = vpop.f32.mrb[140].mxu1  ;;  %v12279_v2 = vpop.f32.mrb[224].mxu0  ;;  %12583 = vmatprep.subr.bf16.mxu0 %v13865_v40  ;;  %v14056_v40 = vcombine.low %v9373_v4, %v9389_v32  ;;  %v14089_v0 = vcombine.high %v9405_v24, %v9421_v36  ;;  %v9116_v4 = vld [vmem:[%s21063_s2 + $0x358] sm:$0xff] }
0x1bc8   : > { %12739 = vst [vmem:[%s19837_s4 + $0x10] sm:$0xff] %v12156_v11  ;;  %12745 = vst [vmem:[%s19837_s4 + $0x40] sm:$0xff] %v12279_v2  ;;  %v12158_v46 = vpop.f32.mrb[141].mxu1  ;;  %v12281_v47 = vpop.f32.mrb[225].mxu0  ;;  %v14088_v11 = vcombine.low %v9405_v24, %v9421_v36  ;;  %v14115_v2 = vcombine.high %v9434_v45, %v9450_v60  ;;  %v9132_v32 = vld [vmem:[%s21063_s2 + $0x3d8] sm:$0xff] }
0x1bc9   : > { %12740 = vst [vmem:[%s19837_s4 + $0x18] sm:$0xff] %v12158_v46  ;;  %12746 = vst [vmem:[%s19837_s4 + $0x48] sm:$0xff] %v12281_v47  ;;  %v12160_v7 = vpop.f32.mrb[142].mxu1  ;;  %v12283_v35 = vpop.f32.mrb[226].mxu0  ;;  %12461 = vmatpush1.bf16.msra.mxu1 %v13858_v37  ;;  %v9437_v37 = vld [vmem:[%s21063_s2 + $0xd60] sm:$0xff]  ;;  %v9148_v24 = vld [vmem:[%s21063_s2 + $0x458] sm:$0xff] }
0x1bca   : > { %12584 = vmatpush1.bf16.msra.mxu0 %v13864_v8  ;;  %v12161_v48 = vpop.f32.mrb[143].mxu1  ;;  %v12284_v42 = vpop.f32.mrb[227].mxu0  ;;  %12462 = vmatprep.subr.bf16.mxu1 %v13891_v13  ;;  %v9453_v8 = vld [vmem:[%s21063_s2 + $0xde0] sm:$0xff]  ;;  %v14082_v13 = vcombine.low %v9402_v1, %v9418_v51  ;;  %v14147_v7 = vcombine.high %v9466_v30, %v9482_v6  ;;  %v13799_v1 = vcombine.high %v9116_v4, %v9132_v32  ;;  %v9164_v36 = vld [vmem:[%s21063_s2 + $0x4d8] sm:$0xff] }
0x1bcb   : > { %12585 = vmatprep.subr.bf16.mxu0 %v13897_v61  ;;  %v14121_v61 = vcombine.high %v9437_v37, %v9453_v8  ;;  %v9469_v46 = vld [vmem:[%s21063_s2 + $0xe60] sm:$0xff]  ;;  %v14120_v50 = vcombine.low %v9437_v37, %v9453_v8  ;;  %v9514_v48 = vld [vmem:[%s21063_s2 + $0xfc8] sm:$0xff]  ;;  %v13831_v45 = vcombine.high %v9148_v24, %v9164_v36  ;;  %v9180_v37 = vld [vmem:[%s21063_s2 + $0x558] sm:$0xff] }
0x1bcc   : > { %v9485_v47 = vld [vmem:[%s21063_s2 + $0xee0] sm:$0xff]  ;;  %v9196_v8 = vld [vmem:[%s21063_s2 + $0x5d8] sm:$0xff] }
0x1bcd   : > { %12463 = vmatpush1.bf16.msra.mxu1 %v13890_v23  ;;  %v14153_v35 = vcombine.high %v9469_v46, %v9485_v47  ;;  %v9498_v23 = vld [vmem:[%s21063_s2 + $0xf48] sm:$0xff]  ;;  %v9501_v42 = vld [vmem:[%s21063_s2 + $0xf60] sm:$0xff] }
0x1bce   : > { %12586 = vmatpush1.bf16.msra.mxu0 %v13896_v27  ;;  %12464 = vmatprep.subr.bf16.mxu1 %v13923_v26  ;;  %v9517_v27 = vld [vmem:[%s21063_s2 + $0xfe0] sm:$0xff]  ;;  %v14146_v26 = vcombine.low %v9466_v30, %v9482_v6  ;;  %v14179_v22 = vcombine.high %v9498_v23, %v9514_v48  ;;  %v13863_v30 = vcombine.high %v9180_v37, %v9196_v8 }
0x1bcf   : > { %12587 = vmatprep.subr.bf16.mxu0 %v13929_v41  ;;  %v14152_v41 = vcombine.low %v9469_v46, %v9485_v47  ;;  %v14185_v18 = vcombine.high %v9501_v42, %v9517_v27  ;;  %v9212_v46 = vld [vmem:[%s21063_s2 + $0x658] sm:$0xff] }
0x1bd0   : > { %v9228_v47 = vld [vmem:[%s21063_s2 + $0x6d8] sm:$0xff] }
0x1bd1   : > { %12465 = vmatpush1.bf16.msra.mxu1 %v13922_v28  ;;  %v9023_v28 = vld [vmem:[%s21063_s2 + $0x70] sm:$0xff] }
0x1bd2   : > { %12588 = vmatpush1.bf16.msra.mxu0 %v13928_v57  ;;  %12466 = vmatprep.subr.bf16.mxu1 %v13955_v15  ;;  %v9039_v57 = vld [vmem:[%s21063_s2 + $0xf0] sm:$0xff]  ;;  %v14178_v15 = vcombine.low %v9498_v23, %v9514_v48  ;;  %v13895_v23 = vcombine.high %v9212_v46, %v9228_v47 }
0x1bd3   : > { %12589 = vmatprep.subr.bf16.mxu0 %v13961_v63  ;;  %v14184_v63 = vcombine.low %v9501_v42, %v9517_v27  ;;  %v13709_v53 = vcombine.high %v9023_v28, %v9039_v57  ;;  %v9244_v27 = vld [vmem:[%s21063_s2 + $0x758] sm:$0xff] }
0x1bd5   : > { %12467 = vmatpush1.bf16.msra.mxu1 %v13954_v19  ;;  %v13702_v19 = vcombine.low %v9020_v34, %v9036_v21  ;;  %v9263_v34 = vld [vmem:[%s21063_s2 + $0x7f0] sm:$0xff] }
0x1bd6   : > { %12590 = vmatpush1.bf16.msra.mxu0 %v13960_v17  ;;  %12468 = vmatprep.subr.bf16.mxu1 %v13987_v44  ;;  %v9055_v17 = vld [vmem:[%s21063_s2 + $0x170] sm:$0xff] }
0x1bd7   : > { %12591 = vmatprep.subr.bf16.mxu0 %v13993_v49  ;;  %v9071_v44 = vld [vmem:[%s21063_s2 + $0x1f0] sm:$0xff]  ;;  %v13708_v49 = vcombine.low %v9023_v28, %v9039_v57  ;;  %v13894_v57 = vcombine.low %v9212_v46, %v9228_v47 }
0x1bd8   : > { %v13741_v58 = vcombine.high %v9055_v17, %v9071_v44 }
0x1bd9   : > { %12469 = vmatpush1.bf16.msra.mxu1 %v13986_v10  ;;  %v9087_v10 = vld [vmem:[%s21063_s2 + $0x270] sm:$0xff] }
0x1bda   : > { %12592 = vmatpush1.bf16.msra.mxu0 %v13992_v38  ;;  %12470 = vmatprep.subr.bf16.mxu1 %v14019_v3  ;;  %v9103_v38 = vld [vmem:[%s21063_s2 + $0x2f0] sm:$0xff]  ;;  %v13734_v3 = vcombine.low %v9052_v55, %v9068_v20 }
0x1bdb   : > { %12593 = vmatprep.subr.bf16.mxu0 %v14025_v56  ;;  %v13740_v56 = vcombine.low %v9055_v17, %v9071_v44  ;;  %v13773_v52 = vcombine.high %v9087_v10, %v9103_v38  ;;  %v9292_v17 = vld [vmem:[%s21063_s2 + $0x8d8] sm:$0xff]  ;;  %v9279_v44 = vld [vmem:[%s21063_s2 + $0x870] sm:$0xff] }
0x1bdd   : > { %12471 = vmatpush1.bf16.msra.mxu1 %v14018_v5  ;;  %v9119_v5 = vld [vmem:[%s21063_s2 + $0x370] sm:$0xff] }
0x1bde   : > { %12594 = vmatpush1.bf16.msra.mxu0 %v14024_v31  ;;  %12472 = vmatprep.subr.bf16.mxu1 %v14051_v43  ;;  %v9135_v31 = vld [vmem:[%s21063_s2 + $0x3f0] sm:$0xff]  ;;  %v13766_v43 = vcombine.low %v9084_v54, %v9100_v39 }
0x1bdf   : > { %12595 = vmatprep.subr.bf16.mxu0 %v14057_v9  ;;  %v13772_v9 = vcombine.low %v9087_v10, %v9103_v38  ;;  %v13805_v51 = vcombine.high %v9119_v5, %v9135_v31  ;;  %v9308_v10 = vld [vmem:[%s21063_s2 + $0x958] sm:$0xff] }
0x1be0   : > { %v9324_v38 = vld [vmem:[%s21063_s2 + $0x9d8] sm:$0xff] }
0x1be1   : > { %12473 = vmatpush1.bf16.msra.mxu1 %v14050_v29  ;;  %v9151_v29 = vld [vmem:[%s21063_s2 + $0x470] sm:$0xff] }
0x1be2   : > { %12596 = vmatpush1.bf16.msra.mxu0 %v14056_v40  ;;  %12474 = vmatprep.subr.bf16.mxu1 %v14083_v25  ;;  %v9167_v40 = vld [vmem:[%s21063_s2 + $0x4f0] sm:$0xff]  ;;  %v13798_v25 = vcombine.low %v9116_v4, %v9132_v32  ;;  %v13991_v4 = vcombine.high %v9308_v10, %v9324_v38 }
0x1be3   : > { %12597 = vmatprep.subr.bf16.mxu0 %v14089_v0  ;;  %v13804_v0 = vcombine.low %v9119_v5, %v9135_v31  ;;  %v13837_v60 = vcombine.high %v9151_v29, %v9167_v40  ;;  %v9340_v5 = vld [vmem:[%s21063_s2 + $0xa58] sm:$0xff] }
0x1be4   : > { %v9356_v31 = vld [vmem:[%s21063_s2 + $0xad8] sm:$0xff] }
0x1be5   : > { %12475 = vmatpush1.bf16.msra.mxu1 %v14082_v13  ;;  %v9183_v13 = vld [vmem:[%s21063_s2 + $0x570] sm:$0xff] }
0x1be6   : > { %12598 = vmatpush1.bf16.msra.mxu0 %v14088_v11  ;;  %12476 = vmatprep.subr.bf16.mxu1 %v14115_v2  ;;  %v9199_v11 = vld [vmem:[%s21063_s2 + $0x5f0] sm:$0xff]  ;;  %v13830_v2 = vcombine.low %v9148_v24, %v9164_v36  ;;  %v14023_v24 = vcombine.high %v9340_v5, %v9356_v31 }
0x1be7   : > { %12599 = vmatprep.subr.bf16.mxu0 %v14121_v61  ;;  %v13836_v61 = vcombine.low %v9151_v29, %v9167_v40  ;;  %v13869_v6 = vcombine.high %v9183_v13, %v9199_v11  ;;  %v9372_v29 = vld [vmem:[%s21063_s2 + $0xb58] sm:$0xff] }
0x1be8   : > { %v9388_v40 = vld [vmem:[%s21063_s2 + $0xbd8] sm:$0xff] }
0x1be9   : > { %12477 = vmatpush1.bf16.msra.mxu1 %v14114_v33  ;;  %v9215_v33 = vld [vmem:[%s21063_s2 + $0x670] sm:$0xff] }
0x1bea   : > { %12600 = vmatpush1.bf16.msra.mxu0 %v14120_v50  ;;  %12478 = vmatprep.subr.bf16.mxu1 %v14147_v7  ;;  %v9231_v50 = vld [vmem:[%s21063_s2 + $0x6f0] sm:$0xff]  ;;  %v13862_v7 = vcombine.low %v9180_v37, %v9196_v8  ;;  %v14055_v37 = vcombine.high %v9372_v29, %v9388_v40 }
0x1beb   : > { %12601 = vmatprep.subr.bf16.mxu0 %v14153_v35  ;;  %v13868_v35 = vcombine.low %v9183_v13, %v9199_v11  ;;  %v13901_v42 = vcombine.high %v9215_v33, %v9231_v50  ;;  %v9404_v13 = vld [vmem:[%s21063_s2 + $0xc58] sm:$0xff] }
0x1bec   : > { %v9420_v11 = vld [vmem:[%s21063_s2 + $0xcd8] sm:$0xff] }
0x1bed   : > { %12479 = vmatpush1.bf16.msra.mxu1 %v14146_v26  ;;  %v9260_v26 = vld [vmem:[%s21063_s2 + $0x7d8] sm:$0xff]  ;;  %v14087_v46 = vcombine.high %v9404_v13, %v9420_v11 }
0x1bee   : > { %12602 = vmatpush1.bf16.msra.mxu0 %v14152_v41  ;;  %12480 = vmatprep.subr.bf16.mxu1 %v14179_v22 }
0x1bef   : > { %12603 = vmatprep.subr.bf16.mxu0 %v14185_v18  ;;  %v9247_v18 = vld [vmem:[%s21063_s2 + $0x770] sm:$0xff] }
0x1bf0   : > { %v13933_v20 = vcombine.high %v9247_v18, %v9263_v34  ;;  %v13932_v54 = vcombine.low %v9247_v18, %v9263_v34  ;;  %v9487_v18 = vld [vmem:[%s21063_s2 + $0xef0] sm:$0xff] }
0x1bf1   : > { %12481 = vmatpush1.bf16.msra.mxu1 %v14178_v15 }
0x1bf2   : > { %12604 = vmatpush1.bf16.msra.mxu0 %v14184_v63  ;;  %12532 = vmatprep.subr.bf16.mxu1 %v13703_v12  ;;  %v13900_v12 = vcombine.low %v9215_v33, %v9231_v50  ;;  %v9436_v33 = vld [vmem:[%s21063_s2 + $0xd58] sm:$0xff] }
0x1bf3   : > { %12655 = vmatprep.subr.bf16.mxu0 %v13709_v53  ;;  %v13927_v53 = vcombine.high %v9244_v27, %v9260_v26  ;;  %v9452_v50 = vld [vmem:[%s21063_s2 + $0xdd8] sm:$0xff] }
0x1bf4   : > { %12483 = vmatmul.mubr.bf16.vlgmr.msra.gmra.mrb[160].mxu1 %v19169_v14  ;;  %v14118_v34 = vcombine.low %v9436_v33, %v9452_v50 }
0x1bf5   : > { %12606 = vmatmul.mubr.bf16.vlgmr.msra.gmra.mrb[240].mxu0 %v19169_v14  ;;  %12533 = vmatpush1.bf16.msra.mxu1 %v13702_v19  ;;  %v9276_v19 = vld [vmem:[%s21063_s2 + $0x858] sm:$0xff] }
0x1bf6   : > { %12564 = vmatprep.mubr.bf16.mxu1 %v19171_v62  ;;  %12656 = vmatpush1.bf16.msra.mxu0 %v13708_v49  ;;  %v9295_v49 = vld [vmem:[%s21063_s2 + $0x8f0] sm:$0xff]  ;;  %v13959_v39 = vcombine.high %v9276_v19, %v9292_v17 }
0x1bf7   : > { %12687 = vmatprep.mubr.bf16.mxu0 %v19171_v62  ;;  %12534 = vmatprep.subr.bf16.mxu1 %v13735_v59  ;;  %v13926_v59 = vcombine.low %v9244_v27, %v9260_v26  ;;  %v9468_v26 = vld [vmem:[%s21063_s2 + $0xe58] sm:$0xff] }
0x1bf8   : > { %12657 = vmatprep.subr.bf16.mxu0 %v13741_v58  ;;  %v13965_v58 = vcombine.high %v9279_v44, %v9295_v49 }
0x1bf9   : > { %12535 = vmatpush1.bf16.msra.mxu1 %v13734_v3  ;;  %v9311_v3 = vld [vmem:[%s21063_s2 + $0x970] sm:$0xff] }
0x1bfa   : > { %12658 = vmatpush1.bf16.msra.mxu0 %v13740_v56  ;;  %12536 = vmatprep.subr.bf16.mxu1 %v13767_v16  ;;  %v9327_v56 = vld [vmem:[%s21063_s2 + $0x9f0] sm:$0xff]  ;;  %v13958_v16 = vcombine.low %v9276_v19, %v9292_v17 }
0x1bfb   : > { %12659 = vmatprep.subr.bf16.mxu0 %v13773_v52  ;;  %v13964_v52 = vcombine.low %v9279_v44, %v9295_v49  ;;  %v13997_v32 = vcombine.high %v9311_v3, %v9327_v56  ;;  %v9022_v44 = vld [vmem:[%s21063_s2 + $0x68] sm:$0xff] }
0x1bfc   : > { %v9038_v49 = vld [vmem:[%s21063_s2 + $0xe8] sm:$0xff] }
0x1bfd   : > { %12537 = vmatpush1.bf16.msra.mxu1 %v13766_v43  ;;  %v9343_v43 = vld [vmem:[%s21063_s2 + $0xa70] sm:$0xff] }
0x1bfe   : > { %12660 = vmatpush1.bf16.msra.mxu0 %v13772_v9  ;;  %12538 = vmatprep.subr.bf16.mxu1 %v13799_v1  ;;  %v9359_v9 = vld [vmem:[%s21063_s2 + $0xaf0] sm:$0xff]  ;;  %v13990_v1 = vcombine.low %v9308_v10, %v9324_v38  ;;  %v9070_v10 = vld [vmem:[%s21063_s2 + $0x1e8] sm:$0xff]  ;;  %v13706_v38 = vcombine.low %v9022_v44, %v9038_v49 }
0x1bff   : > { %12661 = vmatprep.subr.bf16.mxu0 %v13805_v51  ;;  %v13996_v51 = vcombine.low %v9311_v3, %v9327_v56  ;;  %v14029_v36 = vcombine.high %v9343_v43, %v9359_v9  ;;  %v9086_v56 = vld [vmem:[%s21063_s2 + $0x268] sm:$0xff] }
0x1c01   : > { %12539 = vmatpush1.bf16.msra.mxu1 %v13798_v25  ;;  %v9375_v25 = vld [vmem:[%s21063_s2 + $0xb70] sm:$0xff] }
0x1c02   : > { %12662 = vmatpush1.bf16.msra.mxu0 %v13804_v0  ;;  %12540 = vmatprep.subr.bf16.mxu1 %v13831_v45  ;;  %v9391_v0 = vld [vmem:[%s21063_s2 + $0xbf0] sm:$0xff]  ;;  %v14022_v45 = vcombine.low %v9340_v5, %v9356_v31  ;;  %v9134_v5 = vld [vmem:[%s21063_s2 + $0x3e8] sm:$0xff] }
0x1c03   : > { %12663 = vmatprep.subr.bf16.mxu0 %v13837_v60  ;;  %v14028_v60 = vcombine.low %v9343_v43, %v9359_v9  ;;  %v14061_v8 = vcombine.high %v9375_v25, %v9391_v0  ;;  %v9150_v9 = vld [vmem:[%s21063_s2 + $0x468] sm:$0xff] }
0x1c05   : > { %12541 = vmatpush1.bf16.msra.mxu1 %v13830_v2  ;;  %v9407_v2 = vld [vmem:[%s21063_s2 + $0xc70] sm:$0xff] }
0x1c06   : > { %12664 = vmatpush1.bf16.msra.mxu0 %v13836_v61  ;;  %12542 = vmatprep.subr.bf16.mxu1 %v13863_v30  ;;  %v9423_v61 = vld [vmem:[%s21063_s2 + $0xcf0] sm:$0xff]  ;;  %v14054_v30 = vcombine.low %v9372_v29, %v9388_v40  ;;  %v9198_v29 = vld [vmem:[%s21063_s2 + $0x5e8] sm:$0xff] }
0x1c07   : > { %v12238_v48 = vpop.f32.mrb[144].mxu1  ;;  %12665 = vmatprep.subr.bf16.mxu0 %v13869_v6  ;;  %v14060_v6 = vcombine.low %v9375_v25, %v9391_v0  ;;  %v14093_v47 = vcombine.high %v9407_v2, %v9423_v61  ;;  %v9214_v0 = vld [vmem:[%s21063_s2 + $0x668] sm:$0xff] }
0x1c08   : > { %12743 = vst [vmem:[%s19837_s4 + $0x30] sm:$0xff] %v12238_v48  ;;  %v12361_v41 = vpop.f32.mrb[228].mxu0  ;;  %v12240_v22 = vpop.f32.mrb[145].mxu1  ;;  %v14092_v48 = vcombine.low %v9407_v2, %v9423_v61 }
0x1c09   : > { %12749 = vst [vmem:[%s19837_s4 + $0x60] sm:$0xff] %v12361_v41  ;;  %12744 = vst [vmem:[%s19837_s4 + $0x38] sm:$0xff] %v12240_v22  ;;  %v12363_v21 = vpop.f32.mrb[229].mxu0  ;;  %v12242_v28 = vpop.f32.mrb[146].mxu1  ;;  %12543 = vmatpush1.bf16.msra.mxu1 %v13862_v7  ;;  %v9439_v7 = vld [vmem:[%s21063_s2 + $0xd70] sm:$0xff]  ;;  %v9484_v41 = vld [vmem:[%s21063_s2 + $0xed8] sm:$0xff] }
0x1c0a   : > { %12750 = vst [vmem:[%s19837_s4 + $0x68] sm:$0xff] %v12363_v21  ;;  %v12365_v15 = vpop.f32.mrb[230].mxu0  ;;  %12666 = vmatpush1.bf16.msra.mxu0 %v13868_v35  ;;  %v12243_v63 = vpop.f32.mrb[147].mxu1  ;;  %12544 = vmatprep.subr.bf16.mxu1 %v13895_v23  ;;  %v9455_v35 = vld [vmem:[%s21063_s2 + $0xdf0] sm:$0xff]  ;;  %v14086_v23 = vcombine.low %v9404_v13, %v9420_v11  ;;  %v14151_v28 = vcombine.high %v9468_v26, %v9484_v41  ;;  %v9246_v13 = vld [vmem:[%s21063_s2 + $0x768] sm:$0xff] }
0x1c0b   : > { %v12366_v55 = vpop.f32.mrb[231].mxu0  ;;  %12667 = vmatprep.subr.bf16.mxu0 %v13901_v42  ;;  %v14119_v42 = vcombine.high %v9436_v33, %v9452_v50  ;;  %v14125_v27 = vcombine.high %v9439_v7, %v9455_v35  ;;  %v9471_v22 = vld [vmem:[%s21063_s2 + $0xe70] sm:$0xff]  ;;  %v14124_v21 = vcombine.low %v9439_v7, %v9455_v35  ;;  %v9500_v15 = vld [vmem:[%s21063_s2 + $0xf58] sm:$0xff]  ;;  %v9262_v11 = vld [vmem:[%s21063_s2 + $0x7e8] sm:$0xff] }
0x1c0c   : > { %v9516_v63 = vld [vmem:[%s21063_s2 + $0xfd8] sm:$0xff]  ;;  %v14150_v55 = vcombine.low %v9468_v26, %v9484_v41  ;;  %v13931_v50 = vcombine.high %v9246_v13, %v9262_v11  ;;  %v9278_v35 = vld [vmem:[%s21063_s2 + $0x868] sm:$0xff] }
0x1c0d   : > { %12545 = vmatpush1.bf16.msra.mxu1 %v13894_v57  ;;  %v14157_v57 = vcombine.high %v9471_v22, %v9487_v18  ;;  %v14183_v19 = vcombine.high %v9500_v15, %v9516_v63  ;;  %v9326_v26 = vld [vmem:[%s21063_s2 + $0x9e8] sm:$0xff] }
0x1c0e   : > { %12668 = vmatpush1.bf16.msra.mxu0 %v13900_v12  ;;  %12546 = vmatprep.subr.bf16.mxu1 %v13927_v53  ;;  %v9503_v12 = vld [vmem:[%s21063_s2 + $0xf70] sm:$0xff] }
0x1c0f   : > { %12669 = vmatprep.subr.bf16.mxu0 %v13933_v20  ;;  %v9519_v53 = vld [vmem:[%s21063_s2 + $0xff0] sm:$0xff]  ;;  %v14156_v20 = vcombine.low %v9471_v22, %v9487_v18  ;;  %v9342_v18 = vld [vmem:[%s21063_s2 + $0xa68] sm:$0xff] }
0x1c10   : > { %v14189_v17 = vcombine.high %v9503_v12, %v9519_v53 }
0x1c11   : > { %12547 = vmatpush1.bf16.msra.mxu1 %v13926_v59  ;;  %v14182_v59 = vcombine.low %v9500_v15, %v9516_v63  ;;  %v9390_v15 = vld [vmem:[%s21063_s2 + $0xbe8] sm:$0xff] }
0x1c12   : > { %12670 = vmatpush1.bf16.msra.mxu0 %v13932_v54  ;;  %12548 = vmatprep.subr.bf16.mxu1 %v13959_v39  ;;  %v14188_v54 = vcombine.low %v9503_v12, %v9519_v53  ;;  %v13707_v39 = vcombine.high %v9022_v44, %v9038_v49  ;;  %v9406_v53 = vld [vmem:[%s21063_s2 + $0xc68] sm:$0xff] }
0x1c13   : > { %12671 = vmatprep.subr.bf16.mxu0 %v13965_v58  ;;  %v9054_v58 = vld [vmem:[%s21063_s2 + $0x168] sm:$0xff] }
0x1c14   : > { %v13739_v3 = vcombine.high %v9054_v58, %v9070_v10  ;;  %v9454_v44 = vld [vmem:[%s21063_s2 + $0xde8] sm:$0xff] }
0x1c15   : > { %12549 = vmatpush1.bf16.msra.mxu1 %v13958_v16  ;;  %v9102_v16 = vld [vmem:[%s21063_s2 + $0x2e8] sm:$0xff] }
0x1c16   : > { %12672 = vmatpush1.bf16.msra.mxu0 %v13964_v52  ;;  %12550 = vmatprep.subr.bf16.mxu1 %v13991_v4  ;;  %v13738_v52 = vcombine.low %v9054_v58, %v9070_v10  ;;  %v13771_v4 = vcombine.high %v9086_v56, %v9102_v16  ;;  %v13770_v31 = vcombine.low %v9086_v56, %v9102_v16 }
0x1c17   : > { %12673 = vmatprep.subr.bf16.mxu0 %v13997_v32  ;;  %v9118_v32 = vld [vmem:[%s21063_s2 + $0x368] sm:$0xff] }
0x1c18   : > { %v13803_v43 = vcombine.high %v9118_v32, %v9134_v5 }
0x1c19   : > { %12551 = vmatpush1.bf16.msra.mxu1 %v13990_v1  ;;  %v9166_v1 = vld [vmem:[%s21063_s2 + $0x4e8] sm:$0xff] }
0x1c1a   : > { %12674 = vmatpush1.bf16.msra.mxu0 %v13996_v51  ;;  %12552 = vmatprep.subr.bf16.mxu1 %v14023_v24  ;;  %v13802_v51 = vcombine.low %v9118_v32, %v9134_v5  ;;  %v13835_v24 = vcombine.high %v9150_v9, %v9166_v1  ;;  %v13834_v40 = vcombine.low %v9150_v9, %v9166_v1 }
0x1c1b   : > { %12675 = vmatprep.subr.bf16.mxu0 %v14029_v36  ;;  %v9182_v36 = vld [vmem:[%s21063_s2 + $0x568] sm:$0xff] }
0x1c1c   : > { %v13867_v25 = vcombine.high %v9182_v36, %v9198_v29 }
0x1c1d   : > { %12553 = vmatpush1.bf16.msra.mxu1 %v14022_v45  ;;  %v9230_v45 = vld [vmem:[%s21063_s2 + $0x6e8] sm:$0xff] }
0x1c1e   : > { %12676 = vmatpush1.bf16.msra.mxu0 %v14028_v60  ;;  %12554 = vmatprep.subr.bf16.mxu1 %v14055_v37  ;;  %v13866_v60 = vcombine.low %v9182_v36, %v9198_v29  ;;  %v13899_v37 = vcombine.high %v9214_v0, %v9230_v45 }
0x1c1f   : > { %12677 = vmatprep.subr.bf16.mxu0 %v14061_v8 }
0x1c21   : > { %12555 = vmatpush1.bf16.msra.mxu1 %v14054_v30 }
0x1c22   : > { %12678 = vmatpush1.bf16.msra.mxu0 %v14060_v6  ;;  %12556 = vmatprep.subr.bf16.mxu1 %v14087_v46  ;;  %v13898_v46 = vcombine.low %v9214_v0, %v9230_v45 }
0x1c23   : > { %12679 = vmatprep.subr.bf16.mxu0 %v14093_v47 }
0x1c25   : > { %12557 = vmatpush1.bf16.msra.mxu1 %v14086_v23  ;;  %v9294_v23 = vld [vmem:[%s21063_s2 + $0x8e8] sm:$0xff] }
0x1c26   : > { %12680 = vmatpush1.bf16.msra.mxu0 %v14092_v48  ;;  %12558 = vmatprep.subr.bf16.mxu1 %v14119_v42  ;;  %v13930_v48 = vcombine.low %v9246_v13, %v9262_v11  ;;  %v13963_v42 = vcombine.high %v9278_v35, %v9294_v23  ;;  %v13962_v41 = vcombine.low %v9278_v35, %v9294_v23  ;;  %v9184_v13 = vld [vmem:[%s21063_s2 + $0x578] sm:$0xff] }
0x1c27   : > { %12681 = vmatprep.subr.bf16.mxu0 %v14125_v27  ;;  %v9310_v27 = vld [vmem:[%s21063_s2 + $0x968] sm:$0xff]  ;;  %v9200_v11 = vld [vmem:[%s21063_s2 + $0x5f8] sm:$0xff] }
0x1c28   : > { %v13995_v22 = vcombine.high %v9310_v27, %v9326_v26 }
0x1c29   : > { %12559 = vmatpush1.bf16.msra.mxu1 %v14118_v34  ;;  %v9358_v34 = vld [vmem:[%s21063_s2 + $0xae8] sm:$0xff] }
0x1c2a   : > { %12682 = vmatpush1.bf16.msra.mxu0 %v14124_v21  ;;  %12560 = vmatprep.subr.bf16.mxu1 %v14151_v28  ;;  %v13994_v21 = vcombine.low %v9310_v27, %v9326_v26  ;;  %v14027_v28 = vcombine.high %v9342_v18, %v9358_v34  ;;  %v14026_v63 = vcombine.low %v9342_v18, %v9358_v34  ;;  %v9280_v34 = vld [vmem:[%s21063_s2 + $0x878] sm:$0xff] }
0x1c2b   : > { %12683 = vmatprep.subr.bf16.mxu0 %v14157_v57  ;;  %v9374_v57 = vld [vmem:[%s21063_s2 + $0xb68] sm:$0xff] }
0x1c2c   : > { %v14059_v12 = vcombine.high %v9374_v57, %v9390_v15 }
0x1c2d   : > { %12561 = vmatpush1.bf16.msra.mxu1 %v14150_v55  ;;  %v9422_v55 = vld [vmem:[%s21063_s2 + $0xce8] sm:$0xff] }
0x1c2e   : > { %12684 = vmatpush1.bf16.msra.mxu0 %v14156_v20  ;;  %12562 = vmatprep.subr.bf16.mxu1 %v14183_v19  ;;  %v14058_v20 = vcombine.low %v9374_v57, %v9390_v15  ;;  %v14091_v19 = vcombine.high %v9406_v53, %v9422_v55  ;;  %v14090_v49 = vcombine.low %v9406_v53, %v9422_v55  ;;  %v9312_v15 = vld [vmem:[%s21063_s2 + $0x978] sm:$0xff] }
0x1c2f   : > { %12685 = vmatprep.subr.bf16.mxu0 %v14189_v17  ;;  %v9438_v17 = vld [vmem:[%s21063_s2 + $0xd68] sm:$0xff]  ;;  %v9344_v55 = vld [vmem:[%s21063_s2 + $0xa78] sm:$0xff] }
0x1c30   : > { %v14122_v58 = vcombine.low %v9438_v17, %v9454_v44 }
0x1c31   : > { %12563 = vmatpush1.bf16.msra.mxu1 %v14182_v59  ;;  %v14123_v59 = vcombine.high %v9438_v17, %v9454_v44  ;;  %v9376_v44 = vld [vmem:[%s21063_s2 + $0xb78] sm:$0xff] }
0x1c32   : > { %12686 = vmatpush1.bf16.msra.mxu0 %v14188_v54  ;;  %12614 = vmatprep.subr.bf16.mxu1 %v13707_v39  ;;  %v9470_v54 = vld [vmem:[%s21063_s2 + $0xe68] sm:$0xff] }
0x1c33   : > { %v9486_v39 = vld [vmem:[%s21063_s2 + $0xee8] sm:$0xff] }
0x1c34   : > { %12565 = vmatmul.mubr.bf16.vlgmr.msra.gmra.mrb[164].mxu1 %v19169_v14  ;;  %v14155_v10 = vcombine.high %v9470_v54, %v9486_v39  ;;  %v14154_v56 = vcombine.low %v9470_v54, %v9486_v39  ;;  %v9408_v39 = vld [vmem:[%s21063_s2 + $0xc78] sm:$0xff] }
0x1c35   : > { %12688 = vmatmul.mubr.bf16.vlgmr.msra.gmra.mrb[244].mxu0 %v19169_v14  ;;  %12615 = vmatpush1.bf16.msra.mxu1 %v13706_v38  ;;  %v9502_v38 = vld [vmem:[%s21063_s2 + $0xf68] sm:$0xff] }
0x1c36   : > { %12646 = vmatprep.mubr.bf16.mxu1 %v19171_v62  ;;  %12616 = vmatprep.subr.bf16.mxu1 %v13739_v3  ;;  %v9518_v3 = vld [vmem:[%s21063_s2 + $0xfe8] sm:$0xff] }
0x1c37   : > { %v14187_v16 = vcombine.high %v9502_v38, %v9518_v3  ;;  %v14186_v32 = vcombine.low %v9502_v38, %v9518_v3  ;;  %v9440_v3 = vld [vmem:[%s21063_s2 + $0xd78] sm:$0xff] }
0x1c39   : > { %12617 = vmatpush1.bf16.msra.mxu1 %v13738_v52  ;;  %v9024_v52 = vld [vmem:[%s21063_s2 + $0x78] sm:$0xff] }
0x1c3a   : > { %12618 = vmatprep.subr.bf16.mxu1 %v13771_v4  ;;  %v9040_v4 = vld [vmem:[%s21063_s2 + $0xf8] sm:$0xff] }
0x1c3b   : > { %v13711_v5 = vcombine.high %v9024_v52, %v9040_v4  ;;  %v13710_v9 = vcombine.low %v9024_v52, %v9040_v4  ;;  %v9472_v4 = vld [vmem:[%s21063_s2 + $0xe78] sm:$0xff] }
0x1c3d   : > { %12619 = vmatpush1.bf16.msra.mxu1 %v13770_v31  ;;  %v9056_v31 = vld [vmem:[%s21063_s2 + $0x178] sm:$0xff] }
0x1c3e   : > { %12620 = vmatprep.subr.bf16.mxu1 %v13803_v43  ;;  %v9072_v43 = vld [vmem:[%s21063_s2 + $0x1f8] sm:$0xff] }
0x1c3f   : > { %v13743_v1 = vcombine.high %v9056_v31, %v9072_v43  ;;  %v13742_v36 = vcombine.low %v9056_v31, %v9072_v43  ;;  %v9504_v43 = vld [vmem:[%s21063_s2 + $0xf78] sm:$0xff] }
0x1c41   : > { %12621 = vmatpush1.bf16.msra.mxu1 %v13802_v51  ;;  %v9088_v51 = vld [vmem:[%s21063_s2 + $0x278] sm:$0xff] }
0x1c42   : > { %12622 = vmatprep.subr.bf16.mxu1 %v13835_v24  ;;  %v9104_v24 = vld [vmem:[%s21063_s2 + $0x2f8] sm:$0xff] }
0x1c43   : > { %v13775_v29 = vcombine.high %v9088_v51, %v9104_v24  ;;  %v13774_v0 = vcombine.low %v9088_v51, %v9104_v24 }
0x1c45   : > { %12623 = vmatpush1.bf16.msra.mxu1 %v13834_v40  ;;  %v9120_v40 = vld [vmem:[%s21063_s2 + $0x378] sm:$0xff] }
0x1c46   : > { %12624 = vmatprep.subr.bf16.mxu1 %v13867_v25  ;;  %v9136_v25 = vld [vmem:[%s21063_s2 + $0x3f8] sm:$0xff] }
0x1c47   : > { %v12320_v8 = vpop.f32.mrb[148].mxu1  ;;  %v13807_v45 = vcombine.high %v9120_v40, %v9136_v25 }
0x1c48   : > { %12747 = vst [vmem:[%s19837_s4 + $0x50] sm:$0xff] %v12320_v8  ;;  %v12443_v2 = vpop.f32.mrb[232].mxu0  ;;  %v12322_v61 = vpop.f32.mrb[149].mxu1 }
0x1c49   : > { %12753 = vst [vmem:[%s19837_s4 + $0x80] sm:$0xff] %v12443_v2  ;;  %12748 = vst [vmem:[%s19837_s4 + $0x58] sm:$0xff] %v12322_v61  ;;  %v12445_v30 = vpop.f32.mrb[233].mxu0  ;;  %v12324_v6 = vpop.f32.mrb[150].mxu1  ;;  %12625 = vmatpush1.bf16.msra.mxu1 %v13866_v60  ;;  %v9152_v60 = vld [vmem:[%s21063_s2 + $0x478] sm:$0xff]  ;;  %v13871_v61 = vcombine.high %v9184_v13, %v9200_v11 }
0x1c4a   : > { %12754 = vst [vmem:[%s19837_s4 + $0x88] sm:$0xff] %v12445_v30  ;;  %v12447_v47 = vpop.f32.mrb[234].mxu0  ;;  %v12325_v33 = vpop.f32.mrb[151].mxu1  ;;  %12626 = vmatprep.subr.bf16.mxu1 %v13899_v37  ;;  %v13806_v37 = vcombine.low %v9120_v40, %v9136_v25  ;;  %v9216_v30 = vld [vmem:[%s21063_s2 + $0x678] sm:$0xff] }
0x1c4b   : > { %v12448_v7 = vpop.f32.mrb[235].mxu0  ;;  %v9232_v6 = vld [vmem:[%s21063_s2 + $0x6f8] sm:$0xff] }
0x1c4c   : > { %v13903_v47 = vcombine.high %v9216_v30, %v9232_v6  ;;  %v9264_v7 = vld [vmem:[%s21063_s2 + $0x7f8] sm:$0xff]  ;;  %v13902_v27 = vcombine.low %v9216_v30, %v9232_v6 }
0x1c4d   : > { %12627 = vmatpush1.bf16.msra.mxu1 %v13898_v46  ;;  %v13870_v46 = vcombine.low %v9184_v13, %v9200_v11 }
0x1c4e   : > { %12628 = vmatprep.subr.bf16.mxu1 %v13931_v50  ;;  %v9248_v50 = vld [vmem:[%s21063_s2 + $0x778] sm:$0xff] }
0x1c51   : > { %12629 = vmatpush1.bf16.msra.mxu1 %v13930_v48 }
0x1c52   : > { %12630 = vmatprep.subr.bf16.mxu1 %v13963_v42 }
0x1c55   : > { %12631 = vmatpush1.bf16.msra.mxu1 %v13962_v41 }
0x1c56   : > { %12632 = vmatprep.subr.bf16.mxu1 %v13995_v22  ;;  %v13935_v22 = vcombine.high %v9248_v50, %v9264_v7 }
0x1c59   : > { %12633 = vmatpush1.bf16.msra.mxu1 %v13994_v21  ;;  %v9296_v21 = vld [vmem:[%s21063_s2 + $0x8f8] sm:$0xff] }
0x1c5a   : > { %12634 = vmatprep.subr.bf16.mxu1 %v14027_v28  ;;  %v13934_v28 = vcombine.low %v9248_v50, %v9264_v7  ;;  %v13967_v57 = vcombine.high %v9280_v34, %v9296_v21 }
0x1c5d   : > { %12635 = vmatpush1.bf16.msra.mxu1 %v14026_v63  ;;  %v9328_v63 = vld [vmem:[%s21063_s2 + $0x9f8] sm:$0xff] }
0x1c5e   : > { %12636 = vmatprep.subr.bf16.mxu1 %v14059_v12  ;;  %v13966_v12 = vcombine.low %v9280_v34, %v9296_v21  ;;  %v13999_v53 = vcombine.high %v9312_v15, %v9328_v63 }
0x1c61   : > { %12637 = vmatpush1.bf16.msra.mxu1 %v14058_v20  ;;  %v9360_v20 = vld [vmem:[%s21063_s2 + $0xaf8] sm:$0xff] }
0x1c62   : > { %12638 = vmatprep.subr.bf16.mxu1 %v14091_v19  ;;  %v13998_v19 = vcombine.low %v9312_v15, %v9328_v63  ;;  %v14031_v17 = vcombine.high %v9344_v55, %v9360_v20 }
0x1c65   : > { %12639 = vmatpush1.bf16.msra.mxu1 %v14090_v49  ;;  %v9392_v49 = vld [vmem:[%s21063_s2 + $0xbf8] sm:$0xff] }
0x1c66   : > { %12640 = vmatprep.subr.bf16.mxu1 %v14123_v59  ;;  %v14030_v59 = vcombine.low %v9344_v55, %v9360_v20  ;;  %v14063_v54 = vcombine.high %v9376_v44, %v9392_v49 }
0x1c69   : > { %12641 = vmatpush1.bf16.msra.mxu1 %v14122_v58  ;;  %v9424_v58 = vld [vmem:[%s21063_s2 + $0xcf8] sm:$0xff] }
0x1c6a   : > { %12642 = vmatprep.subr.bf16.mxu1 %v14155_v10  ;;  %v14062_v10 = vcombine.low %v9376_v44, %v9392_v49  ;;  %v14095_v38 = vcombine.high %v9408_v39, %v9424_v58 }
0x1c6d   : > { %12643 = vmatpush1.bf16.msra.mxu1 %v14154_v56  ;;  %v9456_v56 = vld [vmem:[%s21063_s2 + $0xdf8] sm:$0xff] }
0x1c6e   : > { %12644 = vmatprep.subr.bf16.mxu1 %v14187_v16  ;;  %v14094_v16 = vcombine.low %v9408_v39, %v9424_v58  ;;  %v14127_v52 = vcombine.high %v9440_v3, %v9456_v56 }
0x1c71   : > { %12645 = vmatpush1.bf16.msra.mxu1 %v14186_v32  ;;  %v9488_v32 = vld [vmem:[%s21063_s2 + $0xef8] sm:$0xff] }
0x1c72   : > { %12696 = vmatprep.subr.bf16.mxu1 %v13711_v5  ;;  %v14126_v5 = vcombine.low %v9440_v3, %v9456_v56  ;;  %v14159_v31 = vcombine.high %v9472_v4, %v9488_v32 }
0x1c74   : > { %12647 = vmatmul.mubr.bf16.vlgmr.msra.gmra.mrb[168].mxu1 %v19169_v14 }
0x1c75   : > { %12697 = vmatpush1.bf16.msra.mxu1 %v13710_v9  ;;  %12728 = vmatprep.mubr.bf16.mxu1 %v19171_v62  ;;  %v9168_v62 = vld [vmem:[%s21063_s2 + $0x4f8] sm:$0xff] }
0x1c76   : > { %12698 = vmatprep.subr.bf16.mxu1 %v13743_v1  ;;  %v13839_v8 = vcombine.high %v9152_v60, %v9168_v62  ;;  %v13838_v2 = vcombine.low %v9152_v60, %v9168_v62  ;;  %v9520_v9 = vld [vmem:[%s21063_s2 + $0xff8] sm:$0xff]  ;;  %v14158_v1 = vcombine.low %v9472_v4, %v9488_v32 }
0x1c77   : > { %v14191_v51 = vcombine.high %v9504_v43, %v9520_v9  ;;  %v14190_v24 = vcombine.low %v9504_v43, %v9520_v9 }
0x1c79   : > { %12699 = vmatpush1.bf16.msra.mxu1 %v13742_v36 }
0x1c7a   : > { %12700 = vmatprep.subr.bf16.mxu1 %v13775_v29 }
0x1c7d   : > { %12701 = vmatpush1.bf16.msra.mxu1 %v13774_v0 }
0x1c7e   : > { %12702 = vmatprep.subr.bf16.mxu1 %v13807_v45 }
0x1c81   : > { %12703 = vmatpush1.bf16.msra.mxu1 %v13806_v37 }
0x1c82   : > { %12704 = vmatprep.subr.bf16.mxu1 %v13839_v8 }
0x1c85   : > { %12705 = vmatpush1.bf16.msra.mxu1 %v13838_v2 }
0x1c86   : > { %12706 = vmatprep.subr.bf16.mxu1 %v13871_v61 }
0x1c87   : > { %v12402_v33 = vpop.f32.mrb[152].mxu1 }
0x1c88   : > { %12751 = vst [vmem:[%s19837_s4 + $0x70] sm:$0xff] %v12402_v33  ;;  %v12525_v35 = vpop.f32.mrb[236].mxu0  ;;  %v12404_v23 = vpop.f32.mrb[153].mxu1 }
0x1c89   : > { %12757 = vst [vmem:[%s19837_s4 + $0xa0] sm:$0xff] %v12525_v35  ;;  %12752 = vst [vmem:[%s19837_s4 + $0x78] sm:$0xff] %v12404_v23  ;;  %v12527_v48 = vpop.f32.mrb[237].mxu0  ;;  %v12406_v42 = vpop.f32.mrb[154].mxu1  ;;  %12707 = vmatpush1.bf16.msra.mxu1 %v13870_v46 }
0x1c8a   : > { %12758 = vst [vmem:[%s19837_s4 + $0xa8] sm:$0xff] %v12527_v48  ;;  %v12529_v26 = vpop.f32.mrb[238].mxu0  ;;  %v12407_v41 = vpop.f32.mrb[155].mxu1  ;;  %12708 = vmatprep.subr.bf16.mxu1 %v13903_v47 }
0x1c8b   : > { %v12530_v18 = vpop.f32.mrb[239].mxu0 }
0x1c8d   : > { %12709 = vmatpush1.bf16.msra.mxu1 %v13902_v27 }
0x1c8e   : > { %12710 = vmatprep.subr.bf16.mxu1 %v13935_v22 }
0x1c91   : > { %12711 = vmatpush1.bf16.msra.mxu1 %v13934_v28 }
0x1c92   : > { %12712 = vmatprep.subr.bf16.mxu1 %v13967_v57 }
0x1c95   : > { %12713 = vmatpush1.bf16.msra.mxu1 %v13966_v12 }
0x1c96   : > { %12714 = vmatprep.subr.bf16.mxu1 %v13999_v53 }
0x1c99   : > { %12715 = vmatpush1.bf16.msra.mxu1 %v13998_v19 }
0x1c9a   : > { %12716 = vmatprep.subr.bf16.mxu1 %v14031_v17 }
0x1c9d   : > { %12717 = vmatpush1.bf16.msra.mxu1 %v14030_v59 }
0x1c9e   : > { %12718 = vmatprep.subr.bf16.mxu1 %v14063_v54 }
0x1ca1   : > { %12719 = vmatpush1.bf16.msra.mxu1 %v14062_v10 }
0x1ca2   : > { %12720 = vmatprep.subr.bf16.mxu1 %v14095_v38 }
0x1ca5   : > { %12721 = vmatpush1.bf16.msra.mxu1 %v14094_v16 }
0x1ca6   : > { %12722 = vmatprep.subr.bf16.mxu1 %v14127_v52 }
0x1ca9   : > { %12723 = vmatpush1.bf16.msra.mxu1 %v14126_v5 }
0x1caa   : > { %12724 = vmatprep.subr.bf16.mxu1 %v14159_v31 }
0x1cad   : > { %12725 = vmatpush1.bf16.msra.mxu1 %v14158_v1 }
0x1cae   : > { %12726 = vmatprep.subr.bf16.mxu1 %v14191_v51 }
0x1cb1   : > { %12727 = vmatpush1.bf16.msra.mxu1 %v14190_v24 }
0x1cb4   : > { %12729 = vmatmul.mubr.bf16.vlgmr.msra.gmra.mrb[172].mxu1 %v19169_v14 }
0x1cc7   : > { %v12484_v36 = vpop.f32.mrb[160].mxu1 }
0x1cc8   : > { %12755 = vst [vmem:[%s19837_s4 + $0x90] sm:$0xff] %v12484_v36  ;;  %v12607_v29 = vpop.f32.mrb[240].mxu0  ;;  %v12486_v40 = vpop.f32.mrb[161].mxu1 }
0x1cc9   : > { %12761 = vst [vmem:[%s19837_s4 + $0xc0] sm:$0xff] %v12607_v29  ;;  %12756 = vst [vmem:[%s19837_s4 + $0x98] sm:$0xff] %v12486_v40  ;;  %v12609_v25 = vpop.f32.mrb[241].mxu0  ;;  %v12488_v0 = vpop.f32.mrb[162].mxu1 }
0x1cca   : > { %12762 = vst [vmem:[%s19837_s4 + $0xc8] sm:$0xff] %v12609_v25  ;;  %v12611_v45 = vpop.f32.mrb[242].mxu0  ;;  %v12489_v60 = vpop.f32.mrb[163].mxu1 }
0x1ccb   : > { %v12612_v62 = vpop.f32.mrb[243].mxu0 }
0x1d07   : > { %v12566_v37 = vpop.f32.mrb[164].mxu1 }
0x1d08   : > { %12759 = vst [vmem:[%s19837_s4 + $0xb0] sm:$0xff] %v12566_v37  ;;  %v12689_v14 = vpop.f32.mrb[244].mxu0  ;;  %v12568_v8 = vpop.f32.mrb[165].mxu1 }
0x1d09   : > { %12765 = vst [vmem:[%s19837_s4 + $0xe0] sm:$0xff] %v12689_v14  ;;  %12760 = vst [vmem:[%s19837_s4 + $0xb8] sm:$0xff] %v12568_v8  ;;  %v12691_v13 = vpop.f32.mrb[245].mxu0  ;;  %v12570_v11 = vpop.f32.mrb[166].mxu1 }
0x1d0a   : > { %12766 = vst [vmem:[%s19837_s4 + $0xe8] sm:$0xff] %v12691_v13  ;;  %v12693_v2 = vpop.f32.mrb[246].mxu0  ;;  %v12571_v61 = vpop.f32.mrb[167].mxu1 }
0x1d0b   : > { %v12694_v30 = vpop.f32.mrb[247].mxu0 }
0x1d47   : > { %v12648_v6 = vpop.f32.mrb[168].mxu1 }
0x1d48   : > { %12763 = vst [vmem:[%s19837_s4 + $0xd0] sm:$0xff] %v12648_v6  ;;  %v12650_v46 = vpop.f32.mrb[169].mxu1 }
0x1d49   : > { %12764 = vst [vmem:[%s19837_s4 + $0xd8] sm:$0xff] %v12650_v46  ;;  %v12652_v47 = vpop.f32.mrb[170].mxu1 }
0x1d4a   : > { %v12653_v33 = vpop.f32.mrb[171].mxu1 }
0x1d87   : > { %v12730_v50 = vpop.f32.mrb[172].mxu1 }
0x1d88   : > { %12767 = vst [vmem:[%s19837_s4 + $0xf0] sm:$0xff] %v12730_v50  ;;  %v12732_v7 = vpop.f32.mrb[173].mxu1 }
0x1d89   : > { %12768 = vst [vmem:[%s19837_s4 + $0xf8] sm:$0xff] %v12732_v7  ;;  %v12734_v35 = vpop.f32.mrb[174].mxu1 }
0x1d8a   : > { %v12735_v23 = vpop.f32.mrb[175].mxu1 }
0x1d8b PF: > { %s21067_s6 = sld [smem:[#allocation2_spill]] }
0x1d91   : > { %s35_s29 = sadd.s32 1, %s21067_s6  }
0x1d92   : > { %p32_p4 = scmp.ge.s32.totalorder %s35_s29, 4  }
0x1d94   :  { %34 = sbr.rel (!%p32_p4) target bundleno = 16 (0x10), region = 199 }

</bundles_post_ra>
